<compile_context>
chip_gen: v5e
topology: v5e:2x2
jax: 0.10.0
libtpu: 0.0.40
codegen_flags: <defaults>
</compile_context>

<pallas_src>
import functools

import jax
import jax.numpy as jnp
from jax import lax
from jax.experimental import pallas as pl
from jax.experimental.pallas import tpu as pltpu


def _attention_kernel(heads, x_ref, w_in_ref, w_out_ref, b_ref, o_ref):
    """Whole (tiny) problem in one invocation, everything channels-first.

    x_ref    : (B, C, L)   input, channels-first (free reshape of NCHW)
    w_in_ref : (3E, C)     fused qkv projection weight (q rows pre-scaled)
    w_out_ref: (C, E)      output projection weight
    b_ref    : (C, 1)      output projection bias
    o_ref    : (B, C, L)   result, channels-first
    """
    w_in = w_in_ref[...]                                  # (3E, C)
    w_out = w_out_ref[...]                                # (C, E)
    bias = b_ref[...]                                     # (C, 1)
    B, C, L = x_ref.shape
    E = w_out.shape[1]
    d = E // heads

    # Hoisted once: the ones row that turns the epilogue matmul into a fused
    # (head output, softmax denominator) MXU op.
    ones_row = jnp.ones((1, L), jnp.float32)

    # B and heads are tiny & static -> static unroll; per-head (L, L)
    # temporaries live in VMEM so vreg pressure is bounded per matmul/exp.
    # TODO(synk): if bundle dumps ever show spill vld/vst from interleaved
    # heads, switch the head loop to lax.fori_loop (working set = one head).
    for b in range(B):
        x = x_ref[b]                                      # (C, L)
        # Channels-first fused qkv projection: one (3E, C) @ (C, L) matmul,
        # lane-dense (3E, L) result, heads sliced as rows.
        qkv = jnp.dot(w_in, x, preferred_element_type=jnp.float32)   # (3E, L)

        acc = jnp.zeros((C, L), jnp.float32)
        for h in range(heads):
            q_h = qkv[h * d:(h + 1) * d, :]                     # (d, L) scale pre-folded
            k_h = qkv[E + h * d:E + (h + 1) * d, :]             # (d, L)
            v_h = qkv[2 * E + h * d:2 * E + (h + 1) * d, :]     # (d, L)

            # Scores transposed so the *key* axis sits on sublanes:
            # s_t[a, i] = sum_k k[k, a] * q[k, i].  bf16 operands keep the
            # largest MXU op single-pass; K = d = 2 so accumulation error is
            # negligible (and further attenuated by the 1e-6-scaled conv_out).
            s_t = lax.dot_general(
                k_h.astype(jnp.bfloat16), q_h.astype(jnp.bfloat16),
                (((0,), (0,)), ((), ())),
                preferred_element_type=jnp.float32)              # (L, L)

            # Softmax stats are lane-dense (1, L) rows; max runs down
            # sublanes (mostly VPU tree + one XLU fold).  exp stays f32.
            m_row = jnp.max(s_t, axis=0, keepdims=True)          # (1, L)
            p_t = jnp.exp(s_t - m_row)                           # (L, L) f32

            # Reassociated epilogue: fold conv_out into the value side first,
            # append a ones row so one canonical (C+1, L) @ (L, L) MXU matmul
            # emits the head output (rows 0..C-1) and the softmax denominator
            # (row C) together — no XLU row-sum, no lane-sparse (L, d) tile.
            wv = jnp.dot(w_out[:, h * d:(h + 1) * d], v_h,
                         preferred_element_type=jnp.float32)     # (C, L)
            wv_aug = jnp.concatenate([wv, ones_row], axis=0)     # (C+1, L)
            res = jnp.dot(wv_aug, p_t,
                          preferred_element_type=jnp.float32)    # (C+1, L)

            # Deferred normalization; approx reciprocal rides the EUP slot.
            acc = acc + res[:C, :] * pl.reciprocal(res[C:C + 1, :], approx=True)

        # Bias (broadcast over lanes) + residual; lane-dense unmasked store.
        o_ref[b] = (acc + bias + x).astype(o_ref.dtype)


def attention_forward(x, w_in, w_out, b_out, heads):
    """x: (B, C, H, W) NCHW.  w_in: (3E, C).  w_out: (C, E).  b_out: (C,)."""
    B, C, H, W = x.shape
    L = H * W
    E = w_in.shape[0] // 3
    assert E % heads == 0 and w_in.shape == (3 * E, C) and w_out.shape == (C, E)

    # torch: attn * attn.shape[1]**-0.5 -> shape[1] is the *heads* axis.
    # Fold the scale into the q rows of the projection weight (exact for
    # power-of-two scale, otherwise epsilon-level difference).
    scale = heads ** (-0.5)
    w_in_f = w_in.astype(jnp.float32)
    w_in_scaled = jnp.concatenate([w_in_f[:E] * scale, w_in_f[E:]], axis=0)

    x_cf = x.reshape(B, C, L).astype(jnp.float32)        # free reshape of NCHW
    w_out_f = w_out.astype(jnp.float32)
    bias = b_out.reshape(C, 1).astype(jnp.float32)

    d = E // heads
    flops_per_b = (2 * (3 * E) * C * L                   # qkv projection
                   + heads * (2 * d * L * L              # scores
                              + 2 * C * d * L            # w_out_h @ v_h
                              + 2 * (C + 1) * L * L))    # fused epilogue + row-sum
    cost = pl.CostEstimate(
        flops=B * flops_per_b,
        transcendentals=B * heads * (L * L + L),          # exp + reciprocal
        bytes_accessed=4 * (2 * B * C * L + 3 * E * C + C * E + C))

    kernel = functools.partial(_attention_kernel, heads)
    out_cf = pl.pallas_call(
        kernel,
        out_shape=jax.ShapeDtypeStruct((B, C, L), jnp.float32),
        grid=(1,),                                        # single step: B merged in-kernel
        in_specs=[
            pl.BlockSpec((B, C, L), lambda i: (0, 0, 0)),   # x, channels-first
            pl.BlockSpec((3 * E, C), lambda i: (0, 0)),     # w_in (q rows pre-scaled)
            pl.BlockSpec((C, E), lambda i: (0, 0)),         # w_out
            pl.BlockSpec((C, 1), lambda i: (0, 0)),         # bias
        ],
        out_specs=pl.BlockSpec((B, C, L), lambda i: (0, 0, 0)),
        compiler_params=pltpu.CompilerParams(
            dimension_semantics=("arbitrary",),
            vmem_limit_bytes=32 * 1024 * 1024),
        cost_estimate=cost,
    )(x_cf, w_in_scaled, w_out_f, bias)

    return out_cf.reshape(B, C, H, W)


def attention_reference(x, w_in, w_out, b_out, heads):
    """Pure-JAX transcription of the PyTorch forward, for validation."""
    B, C, H, W = x.shape
    L = H * W
    E = w_in.shape[0] // 3
    d = E // heads
    xf = x.reshape(B, C, L)
    qkv = jnp.einsum('oc,bcl->bol', w_in, xf)             # conv_in (1x1, no bias)
    qkv = qkv.reshape(B, 3, heads, d, L)
    q, k, v = qkv[:, 0], qkv[:, 1], qkv[:, 2]
    attn = jnp.einsum('bhki,bhka->bhia', q, k) * (heads ** (-0.5))
    attn = jax.nn.softmax(attn, axis=-1)
    o = jnp.einsum('bhia,bhda->bhdi', attn, v).reshape(B, E, L)
    y = jnp.einsum('ce,bel->bcl', w_out, o) + b_out[None, :, None]   # conv_out
    return y.reshape(B, C, H, W) + x


if __name__ == "__main__":
    # Module config: Attention(in_channels=8, heads=4) -> E = 8, head_dim = 2.
    B, C, H, W = 2, 8, 16, 16
    heads = 4
    E = C  # embedding_channels defaults to in_channels

    key = jax.random.PRNGKey(0)
    k1, k2, k3, k4 = jax.random.split(key, 4)
    x = jax.random.normal(k1, (B, C, H, W), jnp.float32)

    # conv_in: Conv1d(C, 3E, kernel=1, bias=False) -> weight (3E, C, 1); keep
    # the squeezed (3E, C) matrix.  Deterministic synthetic init.
    w_in = 0.1 * jax.random.normal(k2, (3 * E, C), jnp.float32)
    # conv_out: Conv1d(E, C, kernel=1) run through factor_weights(factor=1e-6),
    # which scales both weight and bias by 1e-6.
    w_out = 1e-6 * (0.1 * jax.random.normal(k3, (C, E), jnp.float32))
    b_out = 1e-6 * (0.1 * jax.random.normal(k4, (C,), jnp.float32))

    out = attention_forward(x, w_in, w_out, b_out, heads)
    out = jax.block_until_ready(out)

    ref = attention_reference(x, w_in, w_out, b_out, heads)
    assert out.shape == x.shape
    assert jnp.allclose(out, ref, atol=1e-5, rtol=1e-5), \
        float(jnp.max(jnp.abs(out - ref)))

    print("KERNEL_OK")
</pallas_src>

<mosaic_0001>
module attributes {stable_mosaic.version = 11 : i64} {
  func.func @_attention_kernel(%arg0: i32, %arg1: memref<2x8x256xf32, #tpu.memory_space<vmem>>, %arg2: memref<24x8xf32, #tpu.memory_space<vmem>>, %arg3: memref<8x8xf32, #tpu.memory_space<vmem>>, %arg4: memref<8x1xf32, #tpu.memory_space<vmem>>, %arg5: memref<2x8x256xf32, #tpu.memory_space<vmem>>) attributes {dimension_semantics = [#tpu.dimension_semantics<arbitrary>], iteration_bounds = array<i64: 1>, scalar_prefetch = 0 : i64, scratch_operands = 0 : i64, tpu.core_type = #tpu.core_type<tc>, window_params = [{pipeline_mode = #tpu.pipeline_mode<synchronous>, transform_indices = @transform_0, window_bounds = array<i64: 2, 8, 256>}, {pipeline_mode = #tpu.pipeline_mode<synchronous>, transform_indices = @transform_1, window_bounds = array<i64: 24, 8>}, {pipeline_mode = #tpu.pipeline_mode<synchronous>, transform_indices = @transform_2, window_bounds = array<i64: 8, 8>}, {pipeline_mode = #tpu.pipeline_mode<synchronous>, transform_indices = @transform_3, window_bounds = array<i64: 8, 1>}, {pipeline_mode = #tpu.pipeline_mode<synchronous>, transform_indices = @transform_4, window_bounds = array<i64: 2, 8, 256>}]} {
    %c0 = arith.constant 0 : index
    %c0_0 = arith.constant 0 : index
    %0 = vector.load %arg2[%c0, %c0_0] : memref<24x8xf32, #tpu.memory_space<vmem>>, vector<24x8xf32>
    %c0_1 = arith.constant 0 : index
    %c0_2 = arith.constant 0 : index
    %1 = vector.load %arg3[%c0_1, %c0_2] : memref<8x8xf32, #tpu.memory_space<vmem>>, vector<8x8xf32>
    %c0_3 = arith.constant 0 : index
    %c0_4 = arith.constant 0 : index
    %2 = vector.load %arg4[%c0_3, %c0_4] : memref<8x1xf32, #tpu.memory_space<vmem>>, vector<8x1xf32>
    %cst = arith.constant 1.000000e+00 : f32
    %3 = vector.broadcast %cst : f32 to vector<1x256xf32>
    %c0_5 = arith.constant 0 : index
    %c0_6 = arith.constant 0 : index
    %c0_7 = arith.constant 0 : index
    %4 = vector.load %arg1[%c0_5, %c0_6, %c0_7] : memref<2x8x256xf32, #tpu.memory_space<vmem>>, vector<1x8x256xf32>
    %5 = vector.shape_cast %4 : vector<1x8x256xf32> to vector<8x256xf32>
    %cst_8 = arith.constant dense<0.000000e+00> : vector<24x256xf32>
    %6 = tpu.matmul %0, %5, %cst_8 {dimension_numbers = #tpu.dot_dimension_numbers<[1], [0], [0], [1], [0, 0, 1, 1], [], []>} : vector<24x8xf32>, vector<8x256xf32>, vector<24x256xf32> -> vector<24x256xf32>
    %cst_9 = arith.constant 0.000000e+00 : f32
    %7 = vector.broadcast %cst_9 : f32 to vector<8x256xf32>
    %8 = vector.extract_strided_slice %6 {offsets = [0, 0], sizes = [2, 256], strides = [1, 1]} : vector<24x256xf32> to vector<2x256xf32>
    %9 = vector.extract_strided_slice %6 {offsets = [8, 0], sizes = [2, 256], strides = [1, 1]} : vector<24x256xf32> to vector<2x256xf32>
    %10 = vector.extract_strided_slice %6 {offsets = [16, 0], sizes = [2, 256], strides = [1, 1]} : vector<24x256xf32> to vector<2x256xf32>
    %11 = arith.truncf %9 : vector<2x256xf32> to vector<2x256xbf16>
    %12 = arith.truncf %8 : vector<2x256xf32> to vector<2x256xbf16>
    %cst_10 = arith.constant dense<0.000000e+00> : vector<256x256xf32>
    %13 = tpu.matmul %11, %12, %cst_10 {dimension_numbers = #tpu.dot_dimension_numbers<[0], [0], [1], [1], [0, 1, 1, 1], [], []>} : vector<2x256xbf16>, vector<2x256xbf16>, vector<256x256xf32> -> vector<256x256xf32>
    %cst_11 = arith.constant dense<0xFF800000> : vector<256xf32>
    %14 = vector.multi_reduction <maximumf>, %13, %cst_11 [0] : vector<256x256xf32> to vector<256xf32>
    %15 = vector.shape_cast %14 : vector<256xf32> to vector<1x256xf32>
    %16 = vector.broadcast %15 : vector<1x256xf32> to vector<256x256xf32>
    %17 = arith.subf %13, %16 : vector<256x256xf32>
    %18 = math.exp %17 : vector<256x256xf32>
    %19 = vector.extract_strided_slice %1 {offsets = [0, 0], sizes = [8, 2], strides = [1, 1]} : vector<8x8xf32> to vector<8x2xf32>
    %cst_12 = arith.constant dense<0.000000e+00> : vector<8x256xf32>
    %20 = tpu.matmul %19, %10, %cst_12 {dimension_numbers = #tpu.dot_dimension_numbers<[1], [0], [0], [1], [0, 0, 1, 1], [], []>} : vector<8x2xf32>, vector<2x256xf32>, vector<8x256xf32> -> vector<8x256xf32>
    %21 = tpu.concatenate %20, %3 in 0 : vector<8x256xf32>, vector<1x256xf32> -> vector<9x256xf32>
    %cst_13 = arith.constant dense<0.000000e+00> : vector<9x256xf32>
    %22 = tpu.matmul %21, %18, %cst_13 {dimension_numbers = #tpu.dot_dimension_numbers<[1], [0], [0], [1], [0, 0, 1, 1], [], []>} : vector<9x256xf32>, vector<256x256xf32>, vector<9x256xf32> -> vector<9x256xf32>
    %23 = vector.extract_strided_slice %22 {offsets = [0, 0], sizes = [8, 256], strides = [1, 1]} : vector<9x256xf32> to vector<8x256xf32>
    %24 = vector.extract_strided_slice %22 {offsets = [8, 0], sizes = [1, 256], strides = [1, 1]} : vector<9x256xf32> to vector<1x256xf32>
    %25 = tpu.reciprocal %24 {approx = true} : vector<1x256xf32> -> vector<1x256xf32>
    %26 = vector.broadcast %25 : vector<1x256xf32> to vector<8x256xf32>
    %27 = arith.mulf %23, %26 : vector<8x256xf32>
    %28 = arith.addf %7, %27 : vector<8x256xf32>
    %29 = vector.extract_strided_slice %6 {offsets = [2, 0], sizes = [2, 256], strides = [1, 1]} : vector<24x256xf32> to vector<2x256xf32>
    %30 = vector.extract_strided_slice %6 {offsets = [10, 0], sizes = [2, 256], strides = [1, 1]} : vector<24x256xf32> to vector<2x256xf32>
    %31 = vector.extract_strided_slice %6 {offsets = [18, 0], sizes = [2, 256], strides = [1, 1]} : vector<24x256xf32> to vector<2x256xf32>
    %32 = arith.truncf %30 : vector<2x256xf32> to vector<2x256xbf16>
    %33 = arith.truncf %29 : vector<2x256xf32> to vector<2x256xbf16>
    %cst_14 = arith.constant dense<0.000000e+00> : vector<256x256xf32>
    %34 = tpu.matmul %32, %33, %cst_14 {dimension_numbers = #tpu.dot_dimension_numbers<[0], [0], [1], [1], [0, 1, 1, 1], [], []>} : vector<2x256xbf16>, vector<2x256xbf16>, vector<256x256xf32> -> vector<256x256xf32>
    %cst_15 = arith.constant dense<0xFF800000> : vector<256xf32>
    %35 = vector.multi_reduction <maximumf>, %34, %cst_15 [0] : vector<256x256xf32> to vector<256xf32>
    %36 = vector.shape_cast %35 : vector<256xf32> to vector<1x256xf32>
    %37 = vector.broadcast %36 : vector<1x256xf32> to vector<256x256xf32>
    %38 = arith.subf %34, %37 : vector<256x256xf32>
    %39 = math.exp %38 : vector<256x256xf32>
    %40 = vector.extract_strided_slice %1 {offsets = [0, 2], sizes = [8, 2], strides = [1, 1]} : vector<8x8xf32> to vector<8x2xf32>
    %cst_16 = arith.constant dense<0.000000e+00> : vector<8x256xf32>
    %41 = tpu.matmul %40, %31, %cst_16 {dimension_numbers = #tpu.dot_dimension_numbers<[1], [0], [0], [1], [0, 0, 1, 1], [], []>} : vector<8x2xf32>, vector<2x256xf32>, vector<8x256xf32> -> vector<8x256xf32>
    %42 = tpu.concatenate %41, %3 in 0 : vector<8x256xf32>, vector<1x256xf32> -> vector<9x256xf32>
    %cst_17 = arith.constant dense<0.000000e+00> : vector<9x256xf32>
    %43 = tpu.matmul %42, %39, %cst_17 {dimension_numbers = #tpu.dot_dimension_numbers<[1], [0], [0], [1], [0, 0, 1, 1], [], []>} : vector<9x256xf32>, vector<256x256xf32>, vector<9x256xf32> -> vector<9x256xf32>
    %44 = vector.extract_strided_slice %43 {offsets = [0, 0], sizes = [8, 256], strides = [1, 1]} : vector<9x256xf32> to vector<8x256xf32>
    %45 = vector.extract_strided_slice %43 {offsets = [8, 0], sizes = [1, 256], strides = [1, 1]} : vector<9x256xf32> to vector<1x256xf32>
    %46 = tpu.reciprocal %45 {approx = true} : vector<1x256xf32> -> vector<1x256xf32>
    %47 = vector.broadcast %46 : vector<1x256xf32> to vector<8x256xf32>
    %48 = arith.mulf %44, %47 : vector<8x256xf32>
    %49 = arith.addf %28, %48 : vector<8x256xf32>
    %50 = vector.extract_strided_slice %6 {offsets = [4, 0], sizes = [2, 256], strides = [1, 1]} : vector<24x256xf32> to vector<2x256xf32>
    %51 = vector.extract_strided_slice %6 {offsets = [12, 0], sizes = [2, 256], strides = [1, 1]} : vector<24x256xf32> to vector<2x256xf32>
    %52 = vector.extract_strided_slice %6 {offsets = [20, 0], sizes = [2, 256], strides = [1, 1]} : vector<24x256xf32> to vector<2x256xf32>
    %53 = arith.truncf %51 : vector<2x256xf32> to vector<2x256xbf16>
    %54 = arith.truncf %50 : vector<2x256xf32> to vector<2x256xbf16>
    %cst_18 = arith.constant dense<0.000000e+00> : vector<256x256xf32>
    %55 = tpu.matmul %53, %54, %cst_18 {dimension_numbers = #tpu.dot_dimension_numbers<[0], [0], [1], [1], [0, 1, 1, 1], [], []>} : vector<2x256xbf16>, vector<2x256xbf16>, vector<256x256xf32> -> vector<256x256xf32>
    %cst_19 = arith.constant dense<0xFF800000> : vector<256xf32>
    %56 = vector.multi_reduction <maximumf>, %55, %cst_19 [0] : vector<256x256xf32> to vector<256xf32>
    %57 = vector.shape_cast %56 : vector<256xf32> to vector<1x256xf32>
    %58 = vector.broadcast %57 : vector<1x256xf32> to vector<256x256xf32>
    %59 = arith.subf %55, %58 : vector<256x256xf32>
    %60 = math.exp %59 : vector<256x256xf32>
    %61 = vector.extract_strided_slice %1 {offsets = [0, 4], sizes = [8, 2], strides = [1, 1]} : vector<8x8xf32> to vector<8x2xf32>
    %cst_20 = arith.constant dense<0.000000e+00> : vector<8x256xf32>
    %62 = tpu.matmul %61, %52, %cst_20 {dimension_numbers = #tpu.dot_dimension_numbers<[1], [0], [0], [1], [0, 0, 1, 1], [], []>} : vector<8x2xf32>, vector<2x256xf32>, vector<8x256xf32> -> vector<8x256xf32>
    %63 = tpu.concatenate %62, %3 in 0 : vector<8x256xf32>, vector<1x256xf32> -> vector<9x256xf32>
    %cst_21 = arith.constant dense<0.000000e+00> : vector<9x256xf32>
    %64 = tpu.matmul %63, %60, %cst_21 {dimension_numbers = #tpu.dot_dimension_numbers<[1], [0], [0], [1], [0, 0, 1, 1], [], []>} : vector<9x256xf32>, vector<256x256xf32>, vector<9x256xf32> -> vector<9x256xf32>
    %65 = vector.extract_strided_slice %64 {offsets = [0, 0], sizes = [8, 256], strides = [1, 1]} : vector<9x256xf32> to vector<8x256xf32>
    %66 = vector.extract_strided_slice %64 {offsets = [8, 0], sizes = [1, 256], strides = [1, 1]} : vector<9x256xf32> to vector<1x256xf32>
    %67 = tpu.reciprocal %66 {approx = true} : vector<1x256xf32> -> vector<1x256xf32>
    %68 = vector.broadcast %67 : vector<1x256xf32> to vector<8x256xf32>
    %69 = arith.mulf %65, %68 : vector<8x256xf32>
    %70 = arith.addf %49, %69 : vector<8x256xf32>
    %71 = vector.extract_strided_slice %6 {offsets = [6, 0], sizes = [2, 256], strides = [1, 1]} : vector<24x256xf32> to vector<2x256xf32>
    %72 = vector.extract_strided_slice %6 {offsets = [14, 0], sizes = [2, 256], strides = [1, 1]} : vector<24x256xf32> to vector<2x256xf32>
    %73 = vector.extract_strided_slice %6 {offsets = [22, 0], sizes = [2, 256], strides = [1, 1]} : vector<24x256xf32> to vector<2x256xf32>
    %74 = arith.truncf %72 : vector<2x256xf32> to vector<2x256xbf16>
    %75 = arith.truncf %71 : vector<2x256xf32> to vector<2x256xbf16>
    %cst_22 = arith.constant dense<0.000000e+00> : vector<256x256xf32>
    %76 = tpu.matmul %74, %75, %cst_22 {dimension_numbers = #tpu.dot_dimension_numbers<[0], [0], [1], [1], [0, 1, 1, 1], [], []>} : vector<2x256xbf16>, vector<2x256xbf16>, vector<256x256xf32> -> vector<256x256xf32>
    %cst_23 = arith.constant dense<0xFF800000> : vector<256xf32>
    %77 = vector.multi_reduction <maximumf>, %76, %cst_23 [0] : vector<256x256xf32> to vector<256xf32>
    %78 = vector.shape_cast %77 : vector<256xf32> to vector<1x256xf32>
    %79 = vector.broadcast %78 : vector<1x256xf32> to vector<256x256xf32>
    %80 = arith.subf %76, %79 : vector<256x256xf32>
    %81 = math.exp %80 : vector<256x256xf32>
    %82 = vector.extract_strided_slice %1 {offsets = [0, 6], sizes = [8, 2], strides = [1, 1]} : vector<8x8xf32> to vector<8x2xf32>
    %cst_24 = arith.constant dense<0.000000e+00> : vector<8x256xf32>
    %83 = tpu.matmul %82, %73, %cst_24 {dimension_numbers = #tpu.dot_dimension_numbers<[1], [0], [0], [1], [0, 0, 1, 1], [], []>} : vector<8x2xf32>, vector<2x256xf32>, vector<8x256xf32> -> vector<8x256xf32>
    %84 = tpu.concatenate %83, %3 in 0 : vector<8x256xf32>, vector<1x256xf32> -> vector<9x256xf32>
    %cst_25 = arith.constant dense<0.000000e+00> : vector<9x256xf32>
    %85 = tpu.matmul %84, %81, %cst_25 {dimension_numbers = #tpu.dot_dimension_numbers<[1], [0], [0], [1], [0, 0, 1, 1], [], []>} : vector<9x256xf32>, vector<256x256xf32>, vector<9x256xf32> -> vector<9x256xf32>
    %86 = vector.extract_strided_slice %85 {offsets = [0, 0], sizes = [8, 256], strides = [1, 1]} : vector<9x256xf32> to vector<8x256xf32>
    %87 = vector.extract_strided_slice %85 {offsets = [8, 0], sizes = [1, 256], strides = [1, 1]} : vector<9x256xf32> to vector<1x256xf32>
    %88 = tpu.reciprocal %87 {approx = true} : vector<1x256xf32> -> vector<1x256xf32>
    %89 = vector.broadcast %88 : vector<1x256xf32> to vector<8x256xf32>
    %90 = arith.mulf %86, %89 : vector<8x256xf32>
    %91 = arith.addf %70, %90 : vector<8x256xf32>
    %92 = vector.broadcast %2 : vector<8x1xf32> to vector<8x256xf32>
    %93 = arith.addf %91, %92 : vector<8x256xf32>
    %94 = arith.addf %93, %5 : vector<8x256xf32>
    %c0_26 = arith.constant 0 : index
    %c0_27 = arith.constant 0 : index
    %c0_28 = arith.constant 0 : index
    %95 = vector.load %arg5[%c0_26, %c0_27, %c0_28] : memref<2x8x256xf32, #tpu.memory_space<vmem>>, vector<1x8x256xf32>
    %96 = vector.shape_cast %95 : vector<1x8x256xf32> to vector<8x256xf32>
    %97 = vector.shape_cast %94 : vector<8x256xf32> to vector<1x8x256xf32>
    tpu.vector_store %arg5[%c0_26, %c0_27, %c0_28], %97 {strides = array<i32>} : memref<2x8x256xf32, #tpu.memory_space<vmem>>, vector<1x8x256xf32>,
    %c1 = arith.constant 1 : index
    %c0_29 = arith.constant 0 : index
    %c0_30 = arith.constant 0 : index
    %98 = vector.load %arg1[%c1, %c0_29, %c0_30] : memref<2x8x256xf32, #tpu.memory_space<vmem>>, vector<1x8x256xf32>
    %99 = vector.shape_cast %98 : vector<1x8x256xf32> to vector<8x256xf32>
    %cst_31 = arith.constant dense<0.000000e+00> : vector<24x256xf32>
    %100 = tpu.matmul %0, %99, %cst_31 {dimension_numbers = #tpu.dot_dimension_numbers<[1], [0], [0], [1], [0, 0, 1, 1], [], []>} : vector<24x8xf32>, vector<8x256xf32>, vector<24x256xf32> -> vector<24x256xf32>
    %cst_32 = arith.constant 0.000000e+00 : f32
    %101 = vector.broadcast %cst_32 : f32 to vector<8x256xf32>
    %102 = vector.extract_strided_slice %100 {offsets = [0, 0], sizes = [2, 256], strides = [1, 1]} : vector<24x256xf32> to vector<2x256xf32>
    %103 = vector.extract_strided_slice %100 {offsets = [8, 0], sizes = [2, 256], strides = [1, 1]} : vector<24x256xf32> to vector<2x256xf32>
    %104 = vector.extract_strided_slice %100 {offsets = [16, 0], sizes = [2, 256], strides = [1, 1]} : vector<24x256xf32> to vector<2x256xf32>
    %105 = arith.truncf %103 : vector<2x256xf32> to vector<2x256xbf16>
    %106 = arith.truncf %102 : vector<2x256xf32> to vector<2x256xbf16>
    %cst_33 = arith.constant dense<0.000000e+00> : vector<256x256xf32>
    %107 = tpu.matmul %105, %106, %cst_33 {dimension_numbers = #tpu.dot_dimension_numbers<[0], [0], [1], [1], [0, 1, 1, 1], [], []>} : vector<2x256xbf16>, vector<2x256xbf16>, vector<256x256xf32> -> vector<256x256xf32>
    %cst_34 = arith.constant dense<0xFF800000> : vector<256xf32>
    %108 = vector.multi_reduction <maximumf>, %107, %cst_34 [0] : vector<256x256xf32> to vector<256xf32>
    %109 = vector.shape_cast %108 : vector<256xf32> to vector<1x256xf32>
    %110 = vector.broadcast %109 : vector<1x256xf32> to vector<256x256xf32>
    %111 = arith.subf %107, %110 : vector<256x256xf32>
    %112 = math.exp %111 : vector<256x256xf32>
    %113 = vector.extract_strided_slice %1 {offsets = [0, 0], sizes = [8, 2], strides = [1, 1]} : vector<8x8xf32> to vector<8x2xf32>
    %cst_35 = arith.constant dense<0.000000e+00> : vector<8x256xf32>
    %114 = tpu.matmul %113, %104, %cst_35 {dimension_numbers = #tpu.dot_dimension_numbers<[1], [0], [0], [1], [0, 0, 1, 1], [], []>} : vector<8x2xf32>, vector<2x256xf32>, vector<8x256xf32> -> vector<8x256xf32>
    %115 = tpu.concatenate %114, %3 in 0 : vector<8x256xf32>, vector<1x256xf32> -> vector<9x256xf32>
    %cst_36 = arith.constant dense<0.000000e+00> : vector<9x256xf32>
    %116 = tpu.matmul %115, %112, %cst_36 {dimension_numbers = #tpu.dot_dimension_numbers<[1], [0], [0], [1], [0, 0, 1, 1], [], []>} : vector<9x256xf32>, vector<256x256xf32>, vector<9x256xf32> -> vector<9x256xf32>
    %117 = vector.extract_strided_slice %116 {offsets = [0, 0], sizes = [8, 256], strides = [1, 1]} : vector<9x256xf32> to vector<8x256xf32>
    %118 = vector.extract_strided_slice %116 {offsets = [8, 0], sizes = [1, 256], strides = [1, 1]} : vector<9x256xf32> to vector<1x256xf32>
    %119 = tpu.reciprocal %118 {approx = true} : vector<1x256xf32> -> vector<1x256xf32>
    %120 = vector.broadcast %119 : vector<1x256xf32> to vector<8x256xf32>
    %121 = arith.mulf %117, %120 : vector<8x256xf32>
    %122 = arith.addf %101, %121 : vector<8x256xf32>
    %123 = vector.extract_strided_slice %100 {offsets = [2, 0], sizes = [2, 256], strides = [1, 1]} : vector<24x256xf32> to vector<2x256xf32>
    %124 = vector.extract_strided_slice %100 {offsets = [10, 0], sizes = [2, 256], strides = [1, 1]} : vector<24x256xf32> to vector<2x256xf32>
    %125 = vector.extract_strided_slice %100 {offsets = [18, 0], sizes = [2, 256], strides = [1, 1]} : vector<24x256xf32> to vector<2x256xf32>
    %126 = arith.truncf %124 : vector<2x256xf32> to vector<2x256xbf16>
    %127 = arith.truncf %123 : vector<2x256xf32> to vector<2x256xbf16>
    %cst_37 = arith.constant dense<0.000000e+00> : vector<256x256xf32>
    %128 = tpu.matmul %126, %127, %cst_37 {dimension_numbers = #tpu.dot_dimension_numbers<[0], [0], [1], [1], [0, 1, 1, 1], [], []>} : vector<2x256xbf16>, vector<2x256xbf16>, vector<256x256xf32> -> vector<256x256xf32>
    %cst_38 = arith.constant dense<0xFF800000> : vector<256xf32>
    %129 = vector.multi_reduction <maximumf>, %128, %cst_38 [0] : vector<256x256xf32> to vector<256xf32>
    %130 = vector.shape_cast %129 : vector<256xf32> to vector<1x256xf32>
    %131 = vector.broadcast %130 : vector<1x256xf32> to vector<256x256xf32>
    %132 = arith.subf %128, %131 : vector<256x256xf32>
    %133 = math.exp %132 : vector<256x256xf32>
    %134 = vector.extract_strided_slice %1 {offsets = [0, 2], sizes = [8, 2], strides = [1, 1]} : vector<8x8xf32> to vector<8x2xf32>
    %cst_39 = arith.constant dense<0.000000e+00> : vector<8x256xf32>
    %135 = tpu.matmul %134, %125, %cst_39 {dimension_numbers = #tpu.dot_dimension_numbers<[1], [0], [0], [1], [0, 0, 1, 1], [], []>} : vector<8x2xf32>, vector<2x256xf32>, vector<8x256xf32> -> vector<8x256xf32>
    %136 = tpu.concatenate %135, %3 in 0 : vector<8x256xf32>, vector<1x256xf32> -> vector<9x256xf32>
    %cst_40 = arith.constant dense<0.000000e+00> : vector<9x256xf32>
    %137 = tpu.matmul %136, %133, %cst_40 {dimension_numbers = #tpu.dot_dimension_numbers<[1], [0], [0], [1], [0, 0, 1, 1], [], []>} : vector<9x256xf32>, vector<256x256xf32>, vector<9x256xf32> -> vector<9x256xf32>
    %138 = vector.extract_strided_slice %137 {offsets = [0, 0], sizes = [8, 256], strides = [1, 1]} : vector<9x256xf32> to vector<8x256xf32>
    %139 = vector.extract_strided_slice %137 {offsets = [8, 0], sizes = [1, 256], strides = [1, 1]} : vector<9x256xf32> to vector<1x256xf32>
    %140 = tpu.reciprocal %139 {approx = true} : vector<1x256xf32> -> vector<1x256xf32>
    %141 = vector.broadcast %140 : vector<1x256xf32> to vector<8x256xf32>
    %142 = arith.mulf %138, %141 : vector<8x256xf32>
    %143 = arith.addf %122, %142 : vector<8x256xf32>
    %144 = vector.extract_strided_slice %100 {offsets = [4, 0], sizes = [2, 256], strides = [1, 1]} : vector<24x256xf32> to vector<2x256xf32>
    %145 = vector.extract_strided_slice %100 {offsets = [12, 0], sizes = [2, 256], strides = [1, 1]} : vector<24x256xf32> to vector<2x256xf32>
    %146 = vector.extract_strided_slice %100 {offsets = [20, 0], sizes = [2, 256], strides = [1, 1]} : vector<24x256xf32> to vector<2x256xf32>
    %147 = arith.truncf %145 : vector<2x256xf32> to vector<2x256xbf16>
    %148 = arith.truncf %144 : vector<2x256xf32> to vector<2x256xbf16>
    %cst_41 = arith.constant dense<0.000000e+00> : vector<256x256xf32>
    %149 = tpu.matmul %147, %148, %cst_41 {dimension_numbers = #tpu.dot_dimension_numbers<[0], [0], [1], [1], [0, 1, 1, 1], [], []>} : vector<2x256xbf16>, vector<2x256xbf16>, vector<256x256xf32> -> vector<256x256xf32>
    %cst_42 = arith.constant dense<0xFF800000> : vector<256xf32>
    %150 = vector.multi_reduction <maximumf>, %149, %cst_42 [0] : vector<256x256xf32> to vector<256xf32>
    %151 = vector.shape_cast %150 : vector<256xf32> to vector<1x256xf32>
    %152 = vector.broadcast %151 : vector<1x256xf32> to vector<256x256xf32>
    %153 = arith.subf %149, %152 : vector<256x256xf32>
    %154 = math.exp %153 : vector<256x256xf32>
    %155 = vector.extract_strided_slice %1 {offsets = [0, 4], sizes = [8, 2], strides = [1, 1]} : vector<8x8xf32> to vector<8x2xf32>
    %cst_43 = arith.constant dense<0.000000e+00> : vector<8x256xf32>
    %156 = tpu.matmul %155, %146, %cst_43 {dimension_numbers = #tpu.dot_dimension_numbers<[1], [0], [0], [1], [0, 0, 1, 1], [], []>} : vector<8x2xf32>, vector<2x256xf32>, vector<8x256xf32> -> vector<8x256xf32>
    %157 = tpu.concatenate %156, %3 in 0 : vector<8x256xf32>, vector<1x256xf32> -> vector<9x256xf32>
    %cst_44 = arith.constant dense<0.000000e+00> : vector<9x256xf32>
    %158 = tpu.matmul %157, %154, %cst_44 {dimension_numbers = #tpu.dot_dimension_numbers<[1], [0], [0], [1], [0, 0, 1, 1], [], []>} : vector<9x256xf32>, vector<256x256xf32>, vector<9x256xf32> -> vector<9x256xf32>
    %159 = vector.extract_strided_slice %158 {offsets = [0, 0], sizes = [8, 256], strides = [1, 1]} : vector<9x256xf32> to vector<8x256xf32>
    %160 = vector.extract_strided_slice %158 {offsets = [8, 0], sizes = [1, 256], strides = [1, 1]} : vector<9x256xf32> to vector<1x256xf32>
    %161 = tpu.reciprocal %160 {approx = true} : vector<1x256xf32> -> vector<1x256xf32>
    %162 = vector.broadcast %161 : vector<1x256xf32> to vector<8x256xf32>
    %163 = arith.mulf %159, %162 : vector<8x256xf32>
    %164 = arith.addf %143, %163 : vector<8x256xf32>
    %165 = vector.extract_strided_slice %100 {offsets = [6, 0], sizes = [2, 256], strides = [1, 1]} : vector<24x256xf32> to vector<2x256xf32>
    %166 = vector.extract_strided_slice %100 {offsets = [14, 0], sizes = [2, 256], strides = [1, 1]} : vector<24x256xf32> to vector<2x256xf32>
    %167 = vector.extract_strided_slice %100 {offsets = [22, 0], sizes = [2, 256], strides = [1, 1]} : vector<24x256xf32> to vector<2x256xf32>
    %168 = arith.truncf %166 : vector<2x256xf32> to vector<2x256xbf16>
    %169 = arith.truncf %165 : vector<2x256xf32> to vector<2x256xbf16>
    %cst_45 = arith.constant dense<0.000000e+00> : vector<256x256xf32>
    %170 = tpu.matmul %168, %169, %cst_45 {dimension_numbers = #tpu.dot_dimension_numbers<[0], [0], [1], [1], [0, 1, 1, 1], [], []>} : vector<2x256xbf16>, vector<2x256xbf16>, vector<256x256xf32> -> vector<256x256xf32>
    %cst_46 = arith.constant dense<0xFF800000> : vector<256xf32>
    %171 = vector.multi_reduction <maximumf>, %170, %cst_46 [0] : vector<256x256xf32> to vector<256xf32>
    %172 = vector.shape_cast %171 : vector<256xf32> to vector<1x256xf32>
    %173 = vector.broadcast %172 : vector<1x256xf32> to vector<256x256xf32>
    %174 = arith.subf %170, %173 : vector<256x256xf32>
    %175 = math.exp %174 : vector<256x256xf32>
    %176 = vector.extract_strided_slice %1 {offsets = [0, 6], sizes = [8, 2], strides = [1, 1]} : vector<8x8xf32> to vector<8x2xf32>
    %cst_47 = arith.constant dense<0.000000e+00> : vector<8x256xf32>
    %177 = tpu.matmul %176, %167, %cst_47 {dimension_numbers = #tpu.dot_dimension_numbers<[1], [0], [0], [1], [0, 0, 1, 1], [], []>} : vector<8x2xf32>, vector<2x256xf32>, vector<8x256xf32> -> vector<8x256xf32>
    %178 = tpu.concatenate %177, %3 in 0 : vector<8x256xf32>, vector<1x256xf32> -> vector<9x256xf32>
    %cst_48 = arith.constant dense<0.000000e+00> : vector<9x256xf32>
    %179 = tpu.matmul %178, %175, %cst_48 {dimension_numbers = #tpu.dot_dimension_numbers<[1], [0], [0], [1], [0, 0, 1, 1], [], []>} : vector<9x256xf32>, vector<256x256xf32>, vector<9x256xf32> -> vector<9x256xf32>
    %180 = vector.extract_strided_slice %179 {offsets = [0, 0], sizes = [8, 256], strides = [1, 1]} : vector<9x256xf32> to vector<8x256xf32>
    %181 = vector.extract_strided_slice %179 {offsets = [8, 0], sizes = [1, 256], strides = [1, 1]} : vector<9x256xf32> to vector<1x256xf32>
    %182 = tpu.reciprocal %181 {approx = true} : vector<1x256xf32> -> vector<1x256xf32>
    %183 = vector.broadcast %182 : vector<1x256xf32> to vector<8x256xf32>
    %184 = arith.mulf %180, %183 : vector<8x256xf32>
    %185 = arith.addf %164, %184 : vector<8x256xf32>
    %186 = vector.broadcast %2 : vector<8x1xf32> to vector<8x256xf32>
    %187 = arith.addf %185, %186 : vector<8x256xf32>
    %188 = arith.addf %187, %99 : vector<8x256xf32>
    %c1_49 = arith.constant 1 : index
    %c0_50 = arith.constant 0 : index
    %c0_51 = arith.constant 0 : index
    %189 = vector.load %arg5[%c1_49, %c0_50, %c0_51] : memref<2x8x256xf32, #tpu.memory_space<vmem>>, vector<1x8x256xf32>
    %190 = vector.shape_cast %189 : vector<1x8x256xf32> to vector<8x256xf32>
    %191 = vector.shape_cast %188 : vector<8x256xf32> to vector<1x8x256xf32>
    tpu.vector_store %arg5[%c1_49, %c0_50, %c0_51], %191 {strides = array<i32>} : memref<2x8x256xf32, #tpu.memory_space<vmem>>, vector<1x8x256xf32>,
    return
  }
  func.func @transform_0(%arg0: i32) -> (i32, i32, i32) {
    %c0_i32 = arith.constant 0 : i32
    %c0_i32_0 = arith.constant 0 : i32
    %c0_i32_1 = arith.constant 0 : i32
    %c0_i32_2 = arith.constant 0 : i32
    return %c0_i32, %c0_i32_0, %c0_i32_1 : i32, i32, i32
  }
  func.func @transform_1(%arg0: i32) -> (i32, i32) {
    %c0_i32 = arith.constant 0 : i32
    %c0_i32_0 = arith.constant 0 : i32
    %c0_i32_1 = arith.constant 0 : i32
    return %c0_i32, %c0_i32_0 : i32, i32
  }
  func.func @transform_2(%arg0: i32) -> (i32, i32) {
    %c0_i32 = arith.constant 0 : i32
    %c0_i32_0 = arith.constant 0 : i32
    %c0_i32_1 = arith.constant 0 : i32
    return %c0_i32, %c0_i32_0 : i32, i32
  }
  func.func @transform_3(%arg0: i32) -> (i32, i32) {
    %c0_i32 = arith.constant 0 : i32
    %c0_i32_0 = arith.constant 0 : i32
    %c0_i32_1 = arith.constant 0 : i32
    return %c0_i32, %c0_i32_0 : i32, i32
  }
  func.func @transform_4(%arg0: i32) -> (i32, i32, i32) {
    %c0_i32 = arith.constant 0 : i32
    %c0_i32_0 = arith.constant 0 : i32
    %c0_i32_1 = arith.constant 0 : i32
    %c0_i32_2 = arith.constant 0 : i32
    return %c0_i32, %c0_i32_0, %c0_i32_1 : i32, i32, i32
  }
}

</mosaic_0001>

<bundles_post_ra>
// kernel: tpu_custom_call.1
= control target key start
LH: loop header
LB: loop body
LE: loop exit
PB: predicated region body
PF: predicated region fallthrough
CT: control target
= control target key end

     0   :  { %9 = vsyncpa [#allocation3], 0  ;;  %s10408_s0 = inlined_call_operand.vmem [shape: f32[2,8,256], index: 0, kind: input, shape index: {}]   ;;  %s10409_s1 = inlined_call_operand.vmem [shape: f32[24,8], index: 1, kind: input, shape index: {}]   ;;  %s10410_s2 = inlined_call_operand.hbm [shape: f32[8,8], index: 2, kind: input, shape index: {}]   ;;  %s10411_s3 = inlined_call_operand.vmem [shape: f32[8,1], index: 3, kind: input, shape index: {}]   ;;  %s10412_s4 = inlined_call_operand.hbm [shape: f32[2,8,256], index: 4, kind: output, shape index: {}]  }
   0x1   :  { %10 = vsyncpa [#allocation4], 0  ;;  %s20_s17 = sshll.u32 %s10410_s2, 4  ;;  %s7037_s18 = smov [#allocation2]   ;;  %s21_s17 = int_to_ptr.hbm [resolvable:$true] %s20_s17 }
   0x2   :  { %s22_s19 = sshll.u32 %s7037_s18, 4  ;;  %s23_s19 = int_to_ptr.vmem [resolvable:$true] %s22_s19 }
   0x3   :  { %25 = dma.hbm_to_vmem [thread:$0]  %s21_s17, 128, %s23_s19, [#allocation3]  }
   0x4   :  { %7033 = dma.done.wait [#allocation3], 128  }
   0x5   :  { %7034 = vsyncadd [#allocation3], 4294967168  ;;  %vm40_vm0 = vcmask 64512   ;;  %v38_v0 = vld [vmem:[%s10408_s0] sm:$0xff]  ;;  %v39_v1 = vld [vmem:[%s10408_s0 + $0x8] sm:$0xff]  ;;  %s7038_s2 = smov 126  }
   0x6   :  { %v33_v2 = vld [vmem:[%s10409_s1] sm:$0xff]  ;;  %65 = vmatpush.msra.mxu0 %v38_v0  ;;  %91 = vmatpush.msra.mxu1 %v39_v1  ;;  %s7039_s26 = smov 124   ;;  %v34_v4 = vld [vmem:[%s10409_s1 + $0x8] sm:$0xff]  ;;  %vm179_vm1 = vcmask 1040384   ;;  %vm130_vm2 = vcmask 15360   ;;  %v35_v42 = vld [vmem:[%s10409_s1 + $0x10] sm:$0xff] }
   0x7   :  { %v7083_v3 = vld [vmem:[#allocation2] sm:$0xff]  ;;  %5608 = vmatmul.msk.f32.vlgmr.msra.gmra.mxu0 %vm40_vm0, %v33_v2  ;;  %5611 = vmatmul.msk.f32.vlgmr.msra.gmra.mxu1 %vm40_vm0, %v33_v2  ;;  %vm633_vm3 = vcmask 1041408   ;;  %s7041_s5 = smov 122   ;;  %s7043_s22 = smov [#allocation5]  }
   0x8   :  { %1312 = vrot.lane.b32.xlu1 %v7083_v3, %s7038_s2  ;;  %1990 = vrot.lane.b32.xlu2 %v7083_v3, %s7039_s26  ;;  %s5593_s23 = sshll.u32 %s7043_s22, 4  ;;  %s5595_s2 = sshll.u32 %s10412_s4, 4  ;;  %s5594_s23 = int_to_ptr.vmem [resolvable:$true] %s5593_s23  ;;  %s5596_s2 = int_to_ptr.hbm [resolvable:$true] %s5595_s2 }
   0x9   :  { %s7044_s28 = smov 256   ;;  %s7045_s29 = smov 16  }
   0xf   :  { %5609 = vmatmul.msk.f32.gmra.mxu0 %vm40_vm0, %v34_v4  ;;  %5612 = vmatmul.msk.f32.gmra.mxu1 %vm40_vm0, %v34_v4 }
  0x17   :  { %5610 = vmatmul.msk.f32.gmra.mxu0 %vm40_vm0, %v35_v42  ;;  %5613 = vmatmul.msk.f32.gmra.mxu1 %vm40_vm0, %v35_v42 }
  0x84   :  { %v67_v5 = vpop.f32.mrf.mxu0  ;;  %v93_v6 = vpop.f32.mrf.mxu1 }
  0x85   :  { %v7094_v7 = vpack.c.bf16 %v67_v5, %v67_v5  ;;  %v7096_v8 = vpack.c.bf16 %v93_v6, %v93_v6 }
  0x87   :  { %10561 = vst [vmem:[#allocation8_spill] sm:$0xff] %v7094_v7  ;;  %v181_v9 = vsel %vm179_vm1, %v7094_v7, 0  ;;  %v184_v10 = vsel %vm179_vm1, %v7096_v8, 0 }
  0x88   :  { %10562 = vst [vmem:[#allocation9_spill] sm:$0xff] %v7096_v8  ;;  %193 = vmatpush.bf16.msra.mxu2 %v181_v9  ;;  %282 = vmatpush.bf16.msra.mxu3 %v184_v10 }
  0x8c   :  { %v70_v11 = vpop.f32.mrf.mxu0  ;;  %v96_v12 = vpop.f32.mrf.mxu1 }
  0x8d   :  { %v102_v13 = vpack.c.bf16 %v70_v11, %v70_v11  ;;  %v103_v14 = vpack.c.bf16 %v96_v12, %v96_v12 }
  0x8f   :  { %106 = vxpose.binary.xlu0.c.b16.start.end [1/2] (short) %v103_v14, %v102_v13, 128  ;;  %v2140_v15 = vrot.slane %v102_v13, 3  ;;  %v2141_v16 = vrot.slane %v103_v14, 3  ;;  %v1462_v17 = vrot.slane %v102_v13, 2  ;;  %v1463_v18 = vrot.slane %v103_v14, 2 }
  0x90   :  { %v782_v19 = vrot.slane %v102_v13, 1  ;;  %v783_v20 = vrot.slane %v103_v14, 1 }
  0x91   :  { %2144 = vxpose.binary.xlu2.c.b16.start.end [1/2] (short) %v2141_v16, %v2140_v15, 128 }
  0x92   :  { %1466 = vxpose.binary.xlu1.c.b16.start.end [1/2] (short) %v1463_v18, %v1462_v17, 128 }
  0x94   :  { %v7211_v13 = vpop.f32.mrf.mxu0  ;;  %v7213_v14 = vpop.f32.mrf.mxu1 }
  0x95   :  { %10571 = vst [vmem:[#allocation18_spill] sm:$0xff] %v7211_v13  ;;  %5646 = vmatpush.msk.msrb.mxu0 %vm633_vm3, %v7211_v13  ;;  %5648 = vmatpush.msk.msrb.mxu1 %vm633_vm3, %v7213_v14 }
  0x96   :  { %10572 = vst [vmem:[#allocation19_spill] sm:$0xff] %v7213_v14  ;;  %5647 = vmatmul.msk.f32.vlgmr.msrb.gmra.mxu0 %vm130_vm2, %v7083_v3  ;;  %5649 = vmatmul.msk.f32.vlgmr.msrb.gmra.mxu1 %vm130_vm2, %v7083_v3 }
 0x10f   :  { %786 = vxpose.binary.xlu0.c.b16.start.end [1/2] (short) %v783_v20, %v782_v19, 128  ;;  %v1314_v19 = vrot.slane %v7211_v13, 2 }
 0x111   :  { %5682 = vmatpush.msk.msrb.mxu2 %vm633_vm3, %v1314_v19 }
 0x13b   :  { %v114_v21 = vpop.trf.xlu0 }
 0x13c   :  { %5614 = vmatmul.msk.bf16.vlgmr.msra.gmra.mxu2 %vm130_vm2, %v114_v21  ;;  %5630 = vmatmul.msk.bf16.vlgmr.msra.gmra.mxu3 %vm130_vm2, %v114_v21 }
 0x143   :  { %v115_v22 = vpop.trf.xlu0 }
 0x14b   :  { %v116_v23 = vpop.trf.xlu0 }
 0x14c   :  { %5615 = vmatmul.msk.bf16.gmra.mxu2 %vm130_vm2, %v116_v23  ;;  %5631 = vmatmul.msk.bf16.gmra.mxu3 %vm130_vm2, %v116_v23 }
 0x153   :  { %v117_v24 = vpop.trf.xlu0 }
 0x15b   :  { %v118_v25 = vpop.trf.xlu0 }
 0x15c   :  { %5616 = vmatmul.msk.bf16.gmra.mxu2 %vm130_vm2, %v118_v25  ;;  %5632 = vmatmul.msk.bf16.gmra.mxu3 %vm130_vm2, %v118_v25 }
 0x163   :  { %v119_v26 = vpop.trf.xlu0 }
 0x16b   :  { %v120_v27 = vpop.trf.xlu0 }
 0x16c   :  { %5617 = vmatmul.msk.bf16.gmra.mxu2 %vm130_vm2, %v120_v27  ;;  %5633 = vmatmul.msk.bf16.gmra.mxu3 %vm130_vm2, %v120_v27 }
 0x173   :  { %v121_v28 = vpop.trf.xlu0 }
 0x17b   :  { %v122_v29 = vpop.trf.xlu0 }
 0x17c   :  { %5618 = vmatmul.msk.bf16.gmra.mxu2 %vm130_vm2, %v122_v29  ;;  %5634 = vmatmul.msk.bf16.gmra.mxu3 %vm130_vm2, %v122_v29 }
 0x183   :  { %v123_v30 = vpop.trf.xlu0 }
 0x18b   :  { %v124_v31 = vpop.trf.xlu0 }
 0x18c   :  { %5619 = vmatmul.msk.bf16.gmra.mxu2 %vm130_vm2, %v124_v31  ;;  %5635 = vmatmul.msk.bf16.gmra.mxu3 %vm130_vm2, %v124_v31 }
 0x193   :  { %v125_v32 = vpop.trf.xlu0 }
 0x19b   :  { %v126_v33 = vpop.trf.xlu0 }
 0x19c   :  { %5620 = vmatmul.msk.bf16.gmra.mxu2 %vm130_vm2, %v126_v33  ;;  %5636 = vmatmul.msk.bf16.gmra.mxu3 %vm130_vm2, %v126_v33 }
 0x1a3   :  { %v127_v34 = vpop.trf.xlu0 }
 0x1ab   :  { %v128_v35 = vpop.trf.xlu0 }
 0x1ac   :  { %5621 = vmatmul.msk.bf16.gmra.mxu2 %vm130_vm2, %v128_v35  ;;  %5637 = vmatmul.msk.bf16.gmra.mxu3 %vm130_vm2, %v128_v35 }
 0x1b3   :  { %v129_v0 = vpop.trf.xlu0 }
 0x1bc   :  { %5622 = vmatmul.msk.bf16.gmra.mxu2 %vm130_vm2, %v115_v22  ;;  %5638 = vmatmul.msk.bf16.gmra.mxu3 %vm130_vm2, %v115_v22 }
 0x1bf   :  { %v7120_v36 = vpop.f32.mrf.mxu2  ;;  %v7122_v37 = vpop.f32.mrf.mxu3 }
 0x1c0   :  { %10563 = vst [vmem:[#allocation10_spill] sm:$0xff] %v7120_v36 }
 0x1c7   :  { %v7124_v38 = vpop.f32.mrf.mxu2  ;;  %v7126_v39 = vpop.f32.mrf.mxu3 }
 0x1c8   :  { %10564 = vst [vmem:[#allocation11_spill] sm:$0xff] %v7124_v38 }
 0x1cc   :  { %5623 = vmatmul.msk.bf16.gmra.mxu2 %vm130_vm2, %v117_v24  ;;  %5639 = vmatmul.msk.bf16.gmra.mxu3 %vm130_vm2, %v117_v24 }
 0x1cf   :  { %v7130_v40 = vpop.f32.mrf.mxu2  ;;  %v7132_v41 = vpop.f32.mrf.mxu3 }
 0x1d0   :  { %10565 = vst [vmem:[#allocation12_spill] sm:$0xff] %v7130_v40  ;;  %v364_v33 = vmax.f32 %v7120_v36, %v7130_v40 }
 0x1d7   :  { %v7139_v43 = vpop.f32.mrf.mxu2  ;;  %v7141_v44 = vpop.f32.mrf.mxu3 }
 0x1d8   :  { %10566 = vst [vmem:[#allocation13_spill] sm:$0xff] %v7139_v43 }
 0x1dc   :  { %5624 = vmatmul.msk.bf16.gmra.mxu2 %vm130_vm2, %v119_v26  ;;  %5640 = vmatmul.msk.bf16.gmra.mxu3 %vm130_vm2, %v119_v26  ;;  %v1315_v26 = vrot.slane %v7213_v14, 2 }
 0x1de   :  { %5684 = vmatpush.msk.msrb.mxu3 %vm633_vm3, %v1315_v26 }
 0x1df   :  { %v7145_v45 = vpop.f32.mrf.mxu2  ;;  %v7147_v46 = vpop.f32.mrf.mxu3 }
 0x1e0   :  { %v366_v35 = vmax.f32 %v364_v33, %v7145_v45 }
 0x1e7   :  { %v7149_v47 = vpop.f32.mrf.mxu2  ;;  %v7151_v48 = vpop.f32.mrf.mxu3 }
 0x1ec   :  { %5625 = vmatmul.msk.bf16.gmra.mxu2 %vm130_vm2, %v121_v28  ;;  %5641 = vmatmul.msk.bf16.gmra.mxu3 %vm130_vm2, %v121_v28 }
 0x1ef   :  { %v7155_v49 = vpop.f32.mrf.mxu2  ;;  %v7157_v50 = vpop.f32.mrf.mxu3 }
 0x1f0   :  { %v368_v19 = vmax.f32 %v366_v35, %v7155_v49 }
 0x1f7   :  { %v7159_v51 = vpop.f32.mrf.mxu2  ;;  %v7161_v52 = vpop.f32.mrf.mxu3 }
 0x1fc   :  { %5626 = vmatmul.msk.bf16.gmra.mxu2 %vm130_vm2, %v123_v30  ;;  %5642 = vmatmul.msk.bf16.gmra.mxu3 %vm130_vm2, %v123_v30 }
 0x1ff   :  { %v7165_v53 = vpop.f32.mrf.mxu2  ;;  %v7167_v54 = vpop.f32.mrf.mxu3 }
 0x200   :  { %v370_v14 = vmax.f32 %v368_v19, %v7165_v53 }
 0x207   :  { %v7169_v55 = vpop.f32.mrf.mxu2  ;;  %v7171_v56 = vpop.f32.mrf.mxu3 }
 0x20c   :  { %5627 = vmatmul.msk.bf16.gmra.mxu2 %vm130_vm2, %v125_v32  ;;  %5643 = vmatmul.msk.bf16.gmra.mxu3 %vm130_vm2, %v125_v32 }
 0x20f   :  { %v7175_v57 = vpop.f32.mrf.mxu2  ;;  %v7177_v58 = vpop.f32.mrf.mxu3 }
 0x210   :  { %v372_v7 = vmax.f32 %v370_v14, %v7175_v57 }
 0x217   :  { %v7179_v59 = vpop.f32.mrf.mxu2  ;;  %v7181_v60 = vpop.f32.mrf.mxu3 }
 0x21c   :  { %5628 = vmatmul.msk.bf16.gmra.mxu2 %vm130_vm2, %v127_v34  ;;  %5644 = vmatmul.msk.bf16.gmra.mxu3 %vm130_vm2, %v127_v34  ;;  %v365_v34 = vmax.f32 %v7124_v38, %v7139_v43 }
 0x21e   :  { %v367_v42 = vmax.f32 %v365_v34, %v7149_v47 }
 0x21f   :  { %v7185_v61 = vpop.f32.mrf.mxu2  ;;  %v7187_v62 = vpop.f32.mrf.mxu3 }
 0x220   :  { %v369_v26 = vmax.f32 %v367_v42, %v7159_v51  ;;  %v374_v33 = vmax.f32 %v372_v7, %v7185_v61 }
 0x222   :  { %v371_v8 = vmax.f32 %v369_v26, %v7169_v55 }
 0x224   :  { %v373_v36 = vmax.f32 %v371_v8, %v7179_v59 }
 0x227   :  { %v7189_v63 = vpop.f32.mrf.mxu2  ;;  %v7191_v1 = vpop.f32.mrf.mxu3 }
 0x228   :  { %v375_v34 = vmax.f32 %v373_v36, %v7189_v63 }
 0x22c   :  { %5629 = vmatmul.msk.bf16.gmra.mxu2 %vm130_vm2, %v129_v0  ;;  %5645 = vmatmul.msk.bf16.gmra.mxu3 %vm130_vm2, %v129_v0 }
 0x22f   :  { %v7195_v2 = vpop.f32.mrf.mxu2  ;;  %v7197_v4 = vpop.f32.mrf.mxu3 }
 0x230   :  { %v376_v35 = vmax.f32 %v374_v33, %v7195_v2 }
 0x237   :  { %v7199_v5 = vpop.f32.mrf.mxu2  ;;  %v7201_v6 = vpop.f32.mrf.mxu3 }
 0x238   :  { %v377_v42 = vmax.f32 %v375_v34, %v7199_v5 }
 0x23f   :  { %v7203_v9 = vpop.f32.mrf.mxu2  ;;  %v7207_v11 = vpop.f32.mrf.mxu3 }
 0x240   :  { %10567 = vst [vmem:[#allocation14_spill] sm:$0xff] %v7203_v9  ;;  %v378_v19 = vmax.f32 %v376_v35, %v7203_v9 }
 0x241   :  { %10569 = vst [vmem:[#allocation16_spill] sm:$0xff] %v7207_v11 }
 0x247   :  { %v7205_v10 = vpop.f32.mrf.mxu2  ;;  %v7219_v15 = vpop.f32.mrf.mxu3 }
 0x248   :  { %10568 = vst [vmem:[#allocation15_spill] sm:$0xff] %v7205_v10  ;;  %v379_v26 = vmax.f32 %v377_v42, %v7205_v10 }
 0x24f   :  { %v7209_v12 = vpop.f32.mrf.mxu2  ;;  %v7227_v17 = vpop.f32.mrf.mxu3 }
 0x250   :  { %10570 = vst [vmem:[#allocation17_spill] sm:$0xff] %v7209_v12  ;;  %v380_v40 = vmax.f32 %v378_v19, %v7209_v12 }
 0x257   :  { %v7225_v16 = vpop.f32.mrf.mxu2  ;;  %v7233_v20 = vpop.f32.mrf.mxu3 }
 0x258   :  { %10573 = vst [vmem:[#allocation20_spill] sm:$0xff] %v7225_v16  ;;  %v381_v14 = vmax.f32 %v379_v26, %v7225_v16 }
 0x25f   :  { %v7229_v18 = vpop.f32.mrf.mxu2  ;;  %v7239_v23 = vpop.f32.mrf.mxu3 }
 0x260   :  { %10574 = vst [vmem:[#allocation21_spill] sm:$0xff] %v7229_v18  ;;  %v382_v7 = vmax.f32 %v380_v40, %v7229_v18 }
 0x267   :  { %v7235_v21 = vpop.f32.mrf.mxu2  ;;  %v7243_v3 = vpop.f32.mrf.mxu3 }
 0x268   :  { %10575 = vst [vmem:[#allocation22_spill] sm:$0xff] %v7235_v21  ;;  %v383_v8 = vmax.f32 %v381_v14, %v7235_v21 }
 0x26f   :  { %v7237_v22 = vpop.f32.mrf.mxu2  ;;  %v7249_v27 = vpop.f32.mrf.mxu3 }
 0x270   :  { %10576 = vst [vmem:[#allocation23_spill] sm:$0xff] %v7237_v22  ;;  %v384_v33 = vmax.f32 %v382_v7, %v7237_v22 }
 0x277   :  { %v7241_v24 = vpop.f32.mrf.mxu2  ;;  %v7253_v29 = vpop.f32.mrf.mxu3 }
 0x278   :  { %v385_v34 = vmax.f32 %v383_v8, %v7241_v24 }
 0x27f   :  { %v7245_v25 = vpop.f32.mrf.mxu2  ;;  %v7259_v32 = vpop.f32.mrf.mxu3 }
 0x280   :  { %v386_v35 = vmax.f32 %v384_v33, %v7245_v25 }
 0x287   :  { %v7251_v28 = vpop.f32.mrf.mxu2  ;;  %v7273_v13 = vpop.f32.mrf.mxu3 }
 0x288   :  { %v387_v42 = vmax.f32 %v385_v34, %v7251_v28 }
 0x28f   :  { %v7255_v30 = vpop.f32.mrf.mxu2  ;;  %v7287_v43 = vpop.f32.mrf.mxu3 }
 0x290   :  { %v388_v19 = vmax.f32 %v386_v35, %v7255_v30 }
 0x297   :  { %v7257_v31 = vpop.f32.mrf.mxu2  ;;  %v7299_v9 = vpop.f32.mrf.mxu3 }
 0x298   :  { %v389_v26 = vmax.f32 %v387_v42, %v7257_v31  ;;  %v402_v42 = vmax.f32 %v7126_v39, %v7141_v44 }
 0x29f   :  { %v7267_v0 = vpop.f32.mrf.mxu2  ;;  %v7304_v33 = vpop.f32.mrf.mxu3 }
 0x2a0   :  { %v390_v40 = vmax.f32 %v388_v19, %v7267_v0  ;;  %v401_v19 = vmax.f32 %v7122_v37, %v7132_v41 }
 0x2a7   :  { %v7279_v38 = vpop.f32.mrf.mxu2 }
 0x2a8   :  { %v391_v14 = vmax.f32 %v389_v26, %v7279_v38  ;;  %v404_v26 = vmax.f32 %v402_v42, %v7151_v48 }
 0x2af   :  { %v7291_v36 = vpop.f32.mrf.mxu2 }
 0x2b0   :  { %v392_v12 = vmax.f32 %v390_v40, %v7291_v36 }
 0x2b7   :  { %v272_v10 = vpop.f32.mrf.mxu2 }
 0x2b8   :  { %v393_v7 = vmax.f32 %v391_v14, %v272_v10  ;;  %v7316_v14 = vpop.f32.mrf.mxu3 }
 0x2ba   :  { %v394_v16 = vmax.f32 %v392_v12, %v393_v7  ;;  %v403_v12 = vmax.f32 %v401_v19, %v7147_v46 }
 0x2bc   :  { %v395_v8 = vrot.slane %v394_v16, 4  ;;  %v405_v7 = vmax.f32 %v403_v12, %v7157_v50 }
 0x2be   :  { %v396_v18 = vmax.f32 %v394_v16, %v395_v8  ;;  %v406_v16 = vmax.f32 %v404_v26, %v7161_v52 }
 0x2c0   :  { %v397_v34 = vrot.slane %v396_v18, 2  ;;  %v408_v8 = vmax.f32 %v406_v16, %v7171_v56  ;;  %v7328_v16 = vpop.f32.mrf.mxu3 }
 0x2c2   :  { %v398_v21 = vmax.f32 %v396_v18, %v397_v34  ;;  %v410_v34 = vmax.f32 %v408_v8, %v7181_v60 }
 0x2c4   :  { %v399_v35 = vrot.slane %v398_v21, 1 }
 0x2c6   :  { %v7308_v22 = vmax.f32 %v398_v21, %v399_v35  ;;  %v407_v21 = vmax.f32 %v405_v7, %v7167_v54 }
 0x2c8   :  { %v500_v40 = vsub.f32 %v272_v10, %v7308_v22  ;;  %v409_v35 = vmax.f32 %v407_v21, %v7177_v58  ;;  %v412_v10 = vmax.f32 %v410_v34, %v7191_v1 }
 0x2ca   :  { %v626_v18 = vmul.f32 1.442695, %v500_v40  ;;  %v411_v42 = vmax.f32 %v409_v35, %v7187_v62  ;;  %v414_v19 = vmax.f32 %v412_v10, %v7201_v6  ;;  %v468_v10 = vsub.f32 %v7199_v5, %v7308_v22 }
 0x2cc   :  { %5920 = vpow2.f32 %v626_v18  ;;  %v413_v40 = vmax.f32 %v411_v42, %v7197_v4  ;;  %v416_v12 = vmax.f32 %v414_v19, %v7219_v15 }
 0x2ce   :  { %v415_v18 = vmax.f32 %v413_v40, %v7207_v11  ;;  %v418_v7 = vmax.f32 %v416_v12, %v7233_v20  ;;  %v7342_v12 = vpop.f32.mrf.mxu3 }
 0x2d0   :  { %v417_v8 = vmax.f32 %v415_v18, %v7227_v17  ;;  %v420_v21 = vmax.f32 %v418_v7, %v7243_v3  ;;  %v562_v18 = vmul.f32 1.442695, %v468_v10  ;;  %v462_v10 = vsub.f32 %v7185_v61, %v7308_v22 }
 0x2d1   :  { %v454_v61 = vsub.f32 %v7165_v53, %v7308_v22  ;;  %v496_v53 = vsub.f32 %v7279_v38, %v7308_v22  ;;  %v492_v38 = vsub.f32 %v7257_v31, %v7308_v22 }
 0x2d2   :  { %v5921_v26 = vpop.eup %5920  ;;  %v419_v34 = vmax.f32 %v417_v8, %v7239_v23  ;;  %v422_v35 = vmax.f32 %v420_v21, %v7253_v29  ;;  %5922 = vpow2.f32 %v562_v18 }
 0x2d3   :  { %703 = vmatpush.msra.mxu1 %v5921_v26 }
 0x2d4   :  { %v421_v42 = vmax.f32 %v419_v34, %v7249_v27  ;;  %v424_v19 = vmax.f32 %v422_v35, %v7273_v13  ;;  %v466_v34 = vsub.f32 %v7195_v2, %v7308_v22  ;;  %v458_v2 = vsub.f32 %v7175_v57, %v7308_v22 }
 0x2d5   :  { %v498_v57 = vsub.f32 %v7291_v36, %v7308_v22  ;;  %v494_v36 = vsub.f32 %v7267_v0, %v7308_v22  ;;  %v490_v0 = vsub.f32 %v7255_v30, %v7308_v22 }
 0x2d6   :  { %v423_v26 = vmax.f32 %v421_v42, %v7259_v32  ;;  %v426_v40 = vmax.f32 %v424_v19, %v7299_v9  ;;  %v464_v42 = vsub.f32 %v7189_v63, %v7308_v22  ;;  %v456_v63 = vsub.f32 %v7169_v55, %v7308_v22 }
 0x2d8   :  { %v425_v7 = vmax.f32 %v423_v26, %v7287_v43  ;;  %v428_v8 = vmax.f32 %v426_v40, %v7316_v14  ;;  %v5923_v11 = vpop.eup %5922  ;;  %v558_v26 = vmul.f32 1.442695, %v466_v34  ;;  %v460_v40 = vsub.f32 %v7179_v59, %v7308_v22 }
 0x2d9   :  { %680 = vmatpush.msra.mxu0 %v5923_v11  ;;  %v554_v18 = vmul.f32 1.442695, %v464_v42  ;;  %v542_v11 = vmul.f32 1.442695, %v458_v2  ;;  %v452_v59 = vsub.f32 %v7159_v51, %v7308_v22  ;;  %v448_v51 = vsub.f32 %v7149_v47, %v7308_v22 }
 0x2da   :  { %v427_v21 = vmax.f32 %v425_v7, %v7304_v33  ;;  %v430_v5 = vmax.f32 %v428_v8, %v7342_v12  ;;  %v550_v8 = vmul.f32 1.442695, %v462_v10  ;;  %5924 = vpow2.f32 %v558_v26 }
 0x2db   :  { %5926 = vpow2.f32 %v554_v18  ;;  %v534_v10 = vmul.f32 1.442695, %v454_v61 }
 0x2dc   :  { %v429_v35 = vmax.f32 %v427_v21, %v7328_v16  ;;  %v546_v21 = vmul.f32 1.442695, %v460_v40  ;;  %5928 = vpow2.f32 %v550_v8  ;;  %v530_v40 = vmul.f32 1.442695, %v452_v59  ;;  %v10578_v59 = vld [vmem:[#allocation12_spill] sm:$0xff] }
 0x2de   :  { %v431_v19 = vmax.f32 %v429_v35, %v430_v5  ;;  %v538_v35 = vmul.f32 1.442695, %v456_v63  ;;  %5930 = vpow2.f32 %v546_v21  ;;  %v618_v63 = vmul.f32 1.442695, %v496_v53  ;;  %v10577_v21 = vld [vmem:[#allocation13_spill] sm:$0xff] }
 0x2df   :  { %5932 = vpow2.f32 %v542_v11  ;;  %v444_v61 = vsub.f32 %v10577_v21, %v7308_v22  ;;  %v522_v11 = vmul.f32 1.442695, %v448_v51  ;;  %v486_v53 = vsub.f32 %v7245_v25, %v7308_v22  ;;  %v10581_v25 = vld [vmem:[#allocation23_spill] sm:$0xff] }
 0x2e0   :  { %v432_v7 = vrot.slane %v431_v19, 4  ;;  %v5925_v34 = vpop.eup %5924  ;;  %5934 = vpow2.f32 %v538_v35  ;;  %v442_v35 = vsub.f32 %v10578_v59, %v7308_v22  ;;  %v606_v51 = vmul.f32 1.442695, %v490_v0 }
 0x2e1   :  { %681 = vmatpush.msra.mxu0 %v5925_v34  ;;  %v5927_v55 = vpop.eup %5926  ;;  %5936 = vpow2.f32 %v534_v10  ;;  %v614_v34 = vmul.f32 1.442695, %v494_v36  ;;  %v514_v10 = vmul.f32 1.442695, %v444_v61  ;;  %v598_v61 = vmul.f32 1.442695, %v486_v53 }
 0x2e2   :  { %v433_v5 = vmax.f32 %v431_v19, %v432_v7  ;;  %v450_v19 = vsub.f32 %v7155_v49, %v7308_v22  ;;  %v5929_v26 = vpop.eup %5928  ;;  %v622_v7 = vmul.f32 1.442695, %v498_v57  ;;  %v446_v49 = vsub.f32 %v7145_v45, %v7308_v22 }
 0x2e3   :  { %682 = vmatpush.msra.mxu0 %v5927_v55  ;;  %5938 = vpow2.f32 %v530_v40  ;;  %v488_v57 = vsub.f32 %v7251_v28, %v7308_v22  ;;  %v10580_v28 = vld [vmem:[#allocation10_spill] sm:$0xff] }
 0x2e4   :  { %v434_v42 = vrot.slane %v433_v5, 2  ;;  %v5931_v2 = vpop.eup %5930  ;;  %v526_v8 = vmul.f32 1.442695, %v450_v19  ;;  %5940 = vpow2.f32 %v622_v7  ;;  %v518_v31 = vmul.f32 1.442695, %v446_v49  ;;  %v10579_v19 = vld [vmem:[#allocation11_spill] sm:$0xff] }
 0x2e5   :  { %683 = vmatpush.msra.mxu0 %v5929_v26  ;;  %v5933_v47 = vpop.eup %5932  ;;  %v440_v30 = vsub.f32 %v10579_v19, %v7308_v22  ;;  %v438_v36 = vsub.f32 %v10580_v28, %v7308_v22  ;;  %v510_v7 = vmul.f32 1.442695, %v442_v35  ;;  %v484_v49 = vsub.f32 %v7241_v24, %v7308_v22  ;;  %v10582_v24 = vld [vmem:[#allocation22_spill] sm:$0xff] }
 0x2e6   :  { %v435_v18 = vmax.f32 %v433_v5, %v434_v42  ;;  %v5935_v45 = vpop.eup %5934  ;;  %5942 = vpow2.f32 %v526_v8  ;;  %v610_v42 = vmul.f32 1.442695, %v492_v38  ;;  %v602_v8 = vmul.f32 1.442695, %v488_v57 }
 0x2e7   :  { %684 = vmatpush.msra.mxu0 %v5931_v2  ;;  %5944 = vpow2.f32 %v618_v63  ;;  %v5937_v55 = vpop.eup %5936  ;;  %v506_v63 = vmul.f32 1.442695, %v440_v30  ;;  %v480_v0 = vsub.f32 %v10582_v24, %v7308_v22  ;;  %v594_v59 = vmul.f32 1.442695, %v484_v49  ;;  %v10587_v24 = vld [vmem:[#allocation14_spill] sm:$0xff] }
 0x2e8   :  { %v436_v5 = vrot.slane %v435_v18, 1  ;;  %5946 = vpow2.f32 %v522_v11 }
 0x2e9   :  { %685 = vmatpush.msra.mxu0 %v5933_v47  ;;  %5948 = vpow2.f32 %v614_v34  ;;  %v5939_v40 = vpop.eup %5938  ;;  %v586_v53 = vmul.f32 1.442695, %v480_v0  ;;  %v470_v0 = vsub.f32 %v10587_v24, %v7308_v22 }
 0x2ea   :  { %v7391_v26 = vmax.f32 %v435_v18, %v436_v5  ;;  %5950 = vpow2.f32 %v518_v31  ;;  %v5941_v2 = vpop.eup %5940  ;;  %v482_v18 = vsub.f32 %v10581_v25, %v7308_v22  ;;  %v502_v5 = vmul.f32 1.442695, %v438_v36 }
 0x2eb   :  { %686 = vmatpush.msra.mxu0 %v5935_v45  ;;  %5952 = vpow2.f32 %v610_v42  ;;  %704 = vmatpush.msra.mxu1 %v5941_v2 }
 0x2ec   :  { %v5943_v38 = vpop.eup %5942  ;;  %5954 = vpow2.f32 %v514_v10  ;;  %v469_v21 = vsub.f32 %v7201_v6, %v7391_v26  ;;  %v467_v45 = vsub.f32 %v7197_v4, %v7391_v26  ;;  %v10583_v6 = vld [vmem:[#allocation21_spill] sm:$0xff]  ;;  %v590_v57 = vmul.f32 1.442695, %v482_v18  ;;  %v10584_v4 = vld [vmem:[#allocation20_spill] sm:$0xff] }
 0x2ed   :  { %687 = vmatpush.msra.mxu0 %v5937_v55  ;;  %v5945_v47 = vpop.eup %5944  ;;  %5956 = vpow2.f32 %v606_v51  ;;  %v478_v31 = vsub.f32 %v10583_v6, %v7308_v22  ;;  %v465_v55 = vsub.f32 %v7191_v1, %v7391_v26  ;;  %v476_v10 = vsub.f32 %v10584_v4, %v7308_v22  ;;  %v10585_v1 = vld [vmem:[#allocation17_spill] sm:$0xff] }
 0x2ee   :  { %v5947_v11 = vpop.eup %5946  ;;  %5958 = vpow2.f32 %v510_v7  ;;  %705 = vmatpush.msra.mxu1 %v5945_v47  ;;  %v564_v19 = vmul.f32 1.442695, %v469_v21  ;;  %v560_v28 = vmul.f32 1.442695, %v467_v45  ;;  %v474_v7 = vsub.f32 %v10585_v1, %v7308_v22 }
 0x2ef   :  { %688 = vmatpush.msra.mxu0 %v5939_v40  ;;  %v5949_v34 = vpop.eup %5948  ;;  %5960 = vpow2.f32 %v602_v8  ;;  %v463_v40 = vsub.f32 %v7187_v62, %v7391_v26  ;;  %v582_v2 = vmul.f32 1.442695, %v478_v31  ;;  %v461_v8 = vsub.f32 %v7181_v60, %v7391_v26  ;;  %v10586_v62 = vld [vmem:[#allocation15_spill] sm:$0xff] }
 0x2f0   :  { %v5951_v35 = vpop.eup %5950  ;;  %5962 = vpow2.f32 %v506_v63  ;;  %706 = vmatpush.msra.mxu1 %v5949_v34  ;;  %v472_v18 = vsub.f32 %v10586_v62, %v7308_v22  ;;  %v578_v63 = vmul.f32 1.442695, %v476_v10  ;;  %v459_v21 = vsub.f32 %v7177_v58, %v7391_v26 }
 0x2f1   :  { %689 = vmatpush.msra.mxu0 %v5943_v38  ;;  %v5953_v42 = vpop.eup %5952  ;;  %5964 = vpow2.f32 %v598_v61  ;;  %v556_v38 = vmul.f32 1.442695, %v465_v55  ;;  %v552_v61 = vmul.f32 1.442695, %v463_v40  ;;  %v457_v45 = vsub.f32 %v7171_v56, %v7391_v26 }
 0x2f2   :  { %v5955_v30 = vpop.eup %5954  ;;  %5966 = vpow2.f32 %v502_v5  ;;  %707 = vmatpush.msra.mxu1 %v5953_v42  ;;  %v574_v5 = vmul.f32 1.442695, %v474_v7  ;;  %v570_v6 = vmul.f32 1.442695, %v472_v18  ;;  %v455_v31 = vsub.f32 %v7167_v54, %v7391_v26 }
 0x2f3   :  { %690 = vmatpush.msra.mxu0 %v5947_v11  ;;  %v5957_v51 = vpop.eup %5956  ;;  %5968 = vpow2.f32 %v594_v59  ;;  %v7421_v11 = vpop.f32.mrf.mxu0  ;;  %v548_v59 = vmul.f32 1.442695, %v461_v8  ;;  %v453_v56 = vsub.f32 %v7161_v52, %v7391_v26  ;;  %v566_v55 = vmul.f32 1.442695, %v470_v0 }
 0x2f4   :  { %v5959_v36 = vpop.eup %5958  ;;  %5970 = vpow2.f32 %v590_v57  ;;  %708 = vmatpush.msra.mxu1 %v5957_v51  ;;  %v544_v57 = vmul.f32 1.442695, %v459_v21  ;;  %v451_v54 = vsub.f32 %v7157_v50, %v7391_v26  ;;  %v497_v52 = vsub.f32 %v7316_v14, %v7391_v26 }
 0x2f5   :  { %691 = vmatpush.msra.mxu0 %v5951_v35  ;;  %v5961_v49 = vpop.eup %5960  ;;  %5972 = vpow2.f32 %v564_v19  ;;  %v501_v35 = vsub.f32 %v7342_v12, %v7391_v26  ;;  %v499_v19 = vsub.f32 %v7328_v16, %v7391_v26  ;;  %v536_v51 = vmul.f32 1.442695, %v455_v31 }
 0x2f6   :  { %v5963_v25 = vpop.eup %5962  ;;  %5974 = vpow2.f32 %v586_v53  ;;  %709 = vmatpush.msra.mxu1 %v5961_v49  ;;  %v449_v16 = vsub.f32 %v7151_v48, %v7391_v26  ;;  %v495_v50 = vsub.f32 %v7304_v33, %v7391_v26  ;;  %v447_v14 = vsub.f32 %v7147_v46, %v7391_v26 }
 0x2f7   :  { %692 = vmatpush.msra.mxu0 %v5955_v30  ;;  %v5965_v47 = vpop.eup %5964  ;;  %5976 = vpow2.f32 %v560_v28  ;;  %v540_v30 = vmul.f32 1.442695, %v457_v45  ;;  %v628_v10 = vmul.f32 1.442695, %v501_v35  ;;  %v532_v28 = vmul.f32 1.442695, %v453_v56 }
 0x2f8   :  { %v5967_v60 = vpop.eup %5966  ;;  %5978 = vpow2.f32 %v582_v2  ;;  %710 = vmatpush.msra.mxu1 %v5965_v47  ;;  %v624_v1 = vmul.f32 1.442695, %v499_v19  ;;  %v528_v2 = vmul.f32 1.442695, %v451_v54  ;;  %v493_v48 = vsub.f32 %v7299_v9, %v7391_v26 }
 0x2f9   :  { %693 = vmatpush.msra.mxu0 %v5959_v36  ;;  %v5969_v34 = vpop.eup %5968  ;;  %5980 = vpow2.f32 %v556_v38  ;;  %v620_v8 = vmul.f32 1.442695, %v497_v52  ;;  %v10433_v38 = vmov 1.0   ;;  %v524_v62 = vmul.f32 1.442695, %v449_v16 }
 0x2fa   :  { %v5971_v58 = vpop.eup %5970  ;;  %5982 = vpow2.f32 %v578_v63  ;;  %711 = vmatpush.msra.mxu1 %v5969_v34  ;;  %v491_v18 = vsub.f32 %v7287_v43, %v7391_v26  ;;  %v616_v63 = vmul.f32 1.442695, %v495_v50  ;;  %v443_v47 = vsub.f32 %v7132_v41, %v7391_v26 }
 0x2fb   :  { %694 = vmatpush.msra.mxu0 %v5963_v25  ;;  %v5973_v22 = vpop.eup %5972  ;;  %5984 = vpow2.f32 %v552_v61  ;;  %v445_v25 = vsub.f32 %v7141_v44, %v7391_v26  ;;  %v520_v21 = vmul.f32 1.442695, %v447_v14  ;;  %v7455_v61 = vpop.f32.mrf.mxu1  ;;  %v612_v24 = vmul.f32 1.442695, %v493_v48 }
 0x2fc   :  { %v5975_v42 = vpop.eup %5974  ;;  %5986 = vpow2.f32 %v574_v5  ;;  %712 = vmatpush.msra.mxu1 %v5971_v58  ;;  %v441_v43 = vsub.f32 %v7126_v39, %v7391_v26  ;;  %v487_v34 = vsub.f32 %v7259_v32, %v7391_v26  ;;  %v608_v45 = vmul.f32 1.442695, %v491_v18 }
 0x2fd   :  { %695 = vmatpush.msra.mxu0 %v5967_v60  ;;  %v5977_v12 = vpop.eup %5976  ;;  %5988 = vpow2.f32 %v548_v59  ;;  %v489_v60 = vsub.f32 %v7273_v13, %v7391_v26  ;;  %v516_v5 = vmul.f32 1.442695, %v445_v25  ;;  %v439_v13 = vsub.f32 %v7122_v37, %v7391_v26  ;;  %v10590_v25 = vld [vmem:[#allocation18_spill] sm:$0xff] }
 0x2fe   :  { %696 = vmatmul.f32.vlgmr.msra.gmra.mxu0 %v7421_v11  ;;  %v5979_v4 = vpop.eup %5978  ;;  %5990 = vpow2.f32 %v570_v6  ;;  %713 = vmatpush.msra.mxu1 %v5975_v42  ;;  %v512_v58 = vmul.f32 1.442695, %v443_v47  ;;  %v485_v35 = vsub.f32 %v7253_v29, %v7391_v26  ;;  %v508_v32 = vmul.f32 1.442695, %v441_v43 }
 0x2ff   :  { %726 = vmatpush.msrb.mxu0 %v5973_v22  ;;  %v5981_v53 = vpop.eup %5980  ;;  %5992 = vpow2.f32 %v544_v57  ;;  %v604_v6 = vmul.f32 1.442695, %v489_v60  ;;  %v483_v57 = vsub.f32 %v7249_v27, %v7391_v26  ;;  %v600_v37 = vmul.f32 1.442695, %v487_v34 }
 0x300   :  { %v5983_v40 = vpop.eup %5982  ;;  %5994 = vpow2.f32 %v566_v55  ;;  %714 = vmatpush.msra.mxu1 %v5979_v4  ;;  %v504_v56 = vmul.f32 1.442695, %v439_v13  ;;  %v481_v29 = vsub.f32 %v7243_v3, %v7391_v26  ;;  %v479_v27 = vsub.f32 %v7239_v23, %v7391_v26 }
 0x301   :  { %727 = vmatpush.msrb.mxu0 %v5977_v12  ;;  %v5985_v36 = vpop.eup %5984  ;;  %5996 = vpow2.f32 %v540_v30  ;;  %v596_v12 = vmul.f32 1.442695, %v485_v35  ;;  %v592_v4 = vmul.f32 1.442695, %v483_v57  ;;  %v473_v50 = vsub.f32 %v7219_v15, %v7391_v26 }
 0x302   :  { %v5987_v7 = vpop.eup %5986  ;;  %5998 = vpow2.f32 %v628_v10  ;;  %715 = vmatpush.msra.mxu1 %v5983_v40  ;;  %v7475_v10 = vpop.trf.xlu0  ;;  %v588_v52 = vmul.f32 1.442695, %v481_v29  ;;  %v475_v40 = vsub.f32 %v7227_v17, %v7391_v26  ;;  %v584_v16 = vmul.f32 1.442695, %v479_v27 }
 0x303   :  { %728 = vmatpush.msrb.mxu0 %v5981_v53  ;;  %v5989_v49 = vpop.eup %5988  ;;  %6000 = vpow2.f32 %v536_v51  ;;  %v477_v53 = vsub.f32 %v7233_v20, %v7391_v26  ;;  %v10588_v20 = vld [vmem:[#allocation8_spill] sm:$0xff]  ;;  %v1992_v15 = vrot.slane %v10590_v25, 4 }
 0x304   :  { %v5991_v33 = vpop.eup %5990  ;;  %6002 = vpow2.f32 %v532_v28  ;;  %716 = vmatpush.msra.mxu1 %v5987_v7  ;;  %v812_v7 = vrot.slane %v10588_v20, 1  ;;  %v576_v48 = vmul.f32 1.442695, %v475_v40 }
 0x305   :  { %729 = vmatpush.msrb.mxu0 %v5985_v36  ;;  %v5993_v46 = vpop.eup %5992  ;;  %6004 = vpow2.f32 %v624_v1  ;;  %v580_v1 = vmul.f32 1.442695, %v477_v53 }
 0x306   :  { %699 = vmatmul.f32.gmra.mxu0 %v10433_v38  ;;  %v5995_v9 = vpop.eup %5994  ;;  %6006 = vpow2.f32 %v528_v2  ;;  %717 = vmatpush.msra.mxu1 %v5991_v33 }
 0x307   :  { %730 = vmatpush.msrb.mxu0 %v5989_v49  ;;  %v5997_v44 = vpop.eup %5996  ;;  %6008 = vpow2.f32 %v620_v8  ;;  %v10589_v49 = vld [vmem:[#allocation16_spill] sm:$0xff] }
 0x308   :  { %v5999_v0 = vpop.eup %5998  ;;  %6010 = vpow2.f32 %v524_v62  ;;  %718 = vmatpush.msra.mxu1 %v5995_v9  ;;  %v471_v17 = vsub.f32 %v10589_v49, %v7391_v26  ;;  %v572_v62 = vmul.f32 1.442695, %v473_v50 }
 0x309   :  { %731 = vmatpush.msrb.mxu0 %v5993_v46  ;;  %v6001_v41 = vpop.eup %6000  ;;  %6012 = vpow2.f32 %v616_v63  ;;  %719 = vmatmul.f32.vlgmr.msra.gmra.mxu1 %v7455_v61  ;;  %v863_v46 = vsel %vm179_vm1, %v812_v7, 0 }
 0x30a   :  { %v6003_v59 = vpop.eup %6002  ;;  %6014 = vpow2.f32 %v520_v21  ;;  %749 = vmatpush.msrb.mxu1 %v5999_v0  ;;  %v7486_v8 = vpop.trf.xlu0  ;;  %v568_v63 = vmul.f32 1.442695, %v471_v17  ;;  %v10592_v0 = vld [vmem:[#allocation19_spill] sm:$0xff] }
 0x30b   :  { %732 = vmatpush.msrb.mxu0 %v5997_v44  ;;  %v6005_v39 = vpop.eup %6004  ;;  %6016 = vpow2.f32 %v612_v24  ;;  %v10591_v44 = vld [vmem:[#allocation9_spill] sm:$0xff]  ;;  %v1993_v43 = vrot.slane %v10592_v0, 4 }
 0x30c   :  { %v6007_v22 = vpop.eup %6006  ;;  %6018 = vpow2.f32 %v516_v5  ;;  %750 = vmatpush.msrb.mxu1 %v6005_v39  ;;  %v813_v60 = vrot.slane %v10591_v44, 1 }
 0x30d   :  { %733 = vmatpush.msrb.mxu0 %v6001_v41  ;;  %v6009_v31 = vpop.eup %6008  ;;  %6020 = vpow2.f32 %v608_v45 }
 0x30e   :  { %v6011_v42 = vpop.eup %6010  ;;  %6022 = vpow2.f32 %v512_v58  ;;  %751 = vmatpush.msrb.mxu1 %v6009_v31  ;;  %v866_v5 = vsel %vm179_vm1, %v813_v60, 0 }
 0x30f   :  { %734 = vmatpush.msrb.mxu0 %v6003_v59  ;;  %v6013_v55 = vpop.eup %6012  ;;  %6024 = vpow2.f32 %v604_v6 }
 0x310   :  { %v6015_v19 = vpop.eup %6014  ;;  %6026 = vpow2.f32 %v508_v32  ;;  %752 = vmatpush.msrb.mxu1 %v6013_v55 }
 0x311   :  { %735 = vmatpush.msrb.mxu0 %v6007_v22  ;;  %v6017_v30 = vpop.eup %6016  ;;  %6028 = vpow2.f32 %v600_v37  ;;  %722 = vmatmul.f32.gmra.mxu1 %v10433_v38 }
 0x312   :  { %v6019_v54 = vpop.eup %6018  ;;  %6030 = vpow2.f32 %v504_v56  ;;  %753 = vmatpush.msrb.mxu1 %v6017_v30  ;;  %v796_v47 = vpop.trf.xlu0 }
 0x313   :  { %736 = vmatpush.msrb.mxu0 %v6011_v42  ;;  %v6021_v3 = vpop.eup %6020  ;;  %6032 = vpow2.f32 %v596_v12 }
 0x314   :  { %v6023_v51 = vpop.eup %6022  ;;  %754 = vmatpush.msrb.mxu1 %v6021_v3  ;;  %6034 = vpow2.f32 %v592_v4 }
 0x315   :  { %737 = vmatpush.msrb.mxu0 %v6015_v19  ;;  %v6025_v23 = vpop.eup %6024  ;;  %6036 = vpow2.f32 %v588_v52 }
 0x316   :  { %v6027_v28 = vpop.eup %6026  ;;  %755 = vmatpush.msrb.mxu1 %v6025_v23  ;;  %6038 = vpow2.f32 %v584_v16 }
 0x317   :  { %738 = vmatpush.msrb.mxu0 %v6019_v54  ;;  %v6029_v36 = vpop.eup %6028  ;;  %6040 = vpow2.f32 %v580_v1 }
 0x318   :  { %v6031_v14 = vpop.eup %6030  ;;  %756 = vmatpush.msrb.mxu1 %v6029_v36  ;;  %6042 = vpow2.f32 %v576_v48 }
 0x319   :  { %739 = vmatpush.msrb.mxu0 %v6023_v51  ;;  %v6033_v2 = vpop.eup %6032  ;;  %6044 = vpow2.f32 %v572_v62 }
 0x31a   :  { %757 = vmatpush.msrb.mxu1 %v6033_v2  ;;  %v6035_v33 = vpop.eup %6034  ;;  %6046 = vpow2.f32 %v568_v63  ;;  %v797_v41 = vpop.trf.xlu0 }
 0x31b   :  { %740 = vmatpush.msrb.mxu0 %v6027_v28  ;;  %v6037_v18 = vpop.eup %6036 }
 0x31c   :  { %758 = vmatpush.msrb.mxu1 %v6035_v33  ;;  %v6039_v26 = vpop.eup %6038 }
 0x31d   :  { %741 = vmatpush.msrb.mxu0 %v6031_v14  ;;  %v6041_v9 = vpop.eup %6040 }
 0x31e   :  { %742 = vmatmul.f32.vlgmr.msrb.gmra.mxu0 %v7421_v11  ;;  %759 = vmatpush.msrb.mxu1 %v6037_v18  ;;  %v6043_v21 = vpop.eup %6042 }
 0x31f   :  { %875 = vmatpush.bf16.msra.mxu0 %v863_v46  ;;  %v6045_v11 = vpop.eup %6044 }
 0x320   :  { %760 = vmatpush.msrb.mxu1 %v6039_v26  ;;  %v6047_v24 = vpop.eup %6046 }
 0x322   :  { %761 = vmatpush.msrb.mxu1 %v6041_v9  ;;  %v798_v34 = vpop.trf.xlu0 }
 0x323   :  { %5718 = vmatpush.msk.msrb.mxu0 %vm633_vm3, %v1992_v15 }
 0x324   :  { %762 = vmatpush.msrb.mxu1 %v6043_v21 }
 0x326   :  { %745 = vmatmul.f32.gmra.mxu0 %v10433_v38  ;;  %763 = vmatpush.msrb.mxu1 %v6045_v11 }
 0x328   :  { %764 = vmatpush.msrb.mxu1 %v6047_v24 }
 0x329   :  { %765 = vmatmul.f32.vlgmr.msrb.gmra.mxu1 %v7455_v61 }
 0x32a   :  { %964 = vmatpush.bf16.msra.mxu1 %v866_v5  ;;  %v799_v45 = vpop.trf.xlu0 }
 0x32e   :  { %5720 = vmatpush.msk.msrb.mxu1 %vm633_vm3, %v1993_v43  ;;  %5650 = vmatmul.msk.bf16.vlgmr.msra.gmra.mxu0 %vm130_vm2, %v7475_v10 }
 0x331   :  { %768 = vmatmul.f32.gmra.mxu1 %v10433_v38 }
 0x332   :  { %v800_v59 = vpop.trf.xlu0 }
 0x339   :  { %5666 = vmatmul.msk.bf16.vlgmr.msra.gmra.mxu1 %vm130_vm2, %v7475_v10 }
 0x33a   :  { %v801_v61 = vpop.trf.xlu0 }
 0x33e   :  { %5651 = vmatmul.msk.bf16.gmra.mxu0 %vm130_vm2, %v796_v47 }
 0x342   :  { %v802_v13 = vpop.trf.xlu0 }
 0x349   :  { %5667 = vmatmul.msk.bf16.gmra.mxu1 %vm130_vm2, %v796_v47 }
 0x34a   :  { %v7508_v58 = vpop.trf.xlu0 }
 0x34e   :  { %5652 = vmatmul.msk.bf16.gmra.mxu0 %vm130_vm2, %v798_v34 }
 0x352   :  { %v804_v39 = vpop.trf.xlu0 }
 0x359   :  { %5668 = vmatmul.msk.bf16.gmra.mxu1 %vm130_vm2, %v798_v34 }
 0x35a   :  { %v7513_v35 = vpop.trf.xlu0 }
 0x35e   :  { %5653 = vmatmul.msk.bf16.gmra.mxu0 %vm130_vm2, %v800_v59 }
 0x362   :  { %v806_v22 = vpop.trf.xlu0 }
 0x369   :  { %5669 = vmatmul.msk.bf16.gmra.mxu1 %vm130_vm2, %v800_v59 }
 0x36a   :  { %v807_v42 = vpop.trf.xlu0 }
 0x36e   :  { %5654 = vmatmul.msk.bf16.gmra.mxu0 %vm130_vm2, %v802_v13 }
 0x372   :  { %v808_v19 = vpop.trf.xlu0 }
 0x379   :  { %5670 = vmatmul.msk.bf16.gmra.mxu1 %vm130_vm2, %v802_v13 }
 0x37a   :  { %v809_v5 = vpop.trf.xlu0 }
 0x37b   :  { %v697_v6 = vpop.f32.mrf.mxu0 }
 0x37e   :  { %5655 = vmatmul.msk.bf16.gmra.mxu0 %vm130_vm2, %v804_v39 }
 0x383   :  { %v700_v57 = vpop.f32.mrf.mxu0 }
 0x386   :  { %v720_v32 = vpop.f32.mrf.mxu1 }
 0x387   :  { %v721_v31 = vadd.f32 %v720_v32, %v697_v6  ;;  %v7621_v6 = vpop.permute.xlu1 %1312 }
 0x388   :  { %10603 = vst [vmem:[#allocation14_spill] sm:$0xff] %v7621_v6  ;;  %5683 = vmatmul.msk.f32.vlgmr.msrb.gmra.mxu2 %vm130_vm2, %v7621_v6  ;;  %5685 = vmatmul.msk.f32.vlgmr.msrb.gmra.mxu3 %vm130_vm2, %v7621_v6 }
 0x389   :  { %5671 = vmatmul.msk.bf16.gmra.mxu1 %vm130_vm2, %v804_v39 }
 0x38e   :  { %5656 = vmatmul.msk.bf16.gmra.mxu0 %vm130_vm2, %v806_v22  ;;  %v723_v37 = vpop.f32.mrf.mxu1 }
 0x38f   :  { %v724_v56 = vadd.f32 %v723_v37, %v700_v57 }
 0x391   :  { %6048 = vrcp.f32 %v724_v56 }
 0x397   :  { %v6049_v55 = vpop.eup %6048 }
 0x398   :  { %v774_v29 = vperm.slane %v6049_v55, 0 }
 0x399   :  { %5672 = vmatmul.msk.bf16.gmra.mxu1 %vm130_vm2, %v806_v22 }
 0x39a   :  { %v7519_v30 = vmul.f32 %v774_v29, %v721_v31 }
 0x39b   :  { %v743_v12 = vpop.f32.mrf.mxu0 }
 0x39c   :  { %10593 = vst [vmem:[#allocation13_spill] sm:$0xff] %v7519_v30 }
 0x39e   :  { %5657 = vmatmul.msk.bf16.gmra.mxu0 %vm130_vm2, %v808_v19 }
 0x3a3   :  { %v746_v27 = vpop.f32.mrf.mxu0 }
 0x3a6   :  { %v766_v4 = vpop.f32.mrf.mxu1 }
 0x3a7   :  { %v767_v10 = vadd.f32 %v766_v4, %v743_v12 }
 0x3a9   :  { %5673 = vmatmul.msk.bf16.gmra.mxu1 %vm130_vm2, %v808_v19 }
 0x3ab   :  { %v7522_v54 = vpop.f32.mrf.mxu0 }
 0x3ac   :  { %10594 = vst [vmem:[#allocation12_spill] sm:$0xff] %v7522_v54 }
 0x3ae   :  { %5658 = vmatmul.msk.bf16.gmra.mxu0 %vm130_vm2, %v7486_v8  ;;  %v769_v3 = vpop.f32.mrf.mxu1 }
 0x3af   :  { %v770_v53 = vadd.f32 %v769_v3, %v746_v27 }
 0x3b1   :  { %6050 = vrcp.f32 %v770_v53 }
 0x3b3   :  { %v7527_v52 = vpop.f32.mrf.mxu0 }
 0x3b4   :  { %10595 = vst [vmem:[#allocation11_spill] sm:$0xff] %v7527_v52 }
 0x3b6   :  { %v7529_v51 = vpop.f32.mrf.mxu1 }
 0x3b7   :  { %v6051_v23 = vpop.eup %6050 }
 0x3b8   :  { %v775_v40 = vperm.slane %v6051_v23, 0 }
 0x3b9   :  { %5674 = vmatmul.msk.bf16.gmra.mxu1 %vm130_vm2, %v7486_v8 }
 0x3ba   :  { %v7535_v28 = vmul.f32 %v775_v40, %v767_v10 }
 0x3bb   :  { %v7531_v16 = vpop.f32.mrf.mxu0 }
 0x3bc   :  { %10596 = vst [vmem:[#allocation10_spill] sm:$0xff] %v7531_v16  ;;  %v1046_v23 = vmax.f32 %v7522_v54, %v7531_v16 }
 0x3bd   :  { %10597 = vst [vmem:[#allocation23_spill] sm:$0xff] %v7535_v28 }
 0x3be   :  { %5659 = vmatmul.msk.bf16.gmra.mxu0 %vm130_vm2, %v797_v41  ;;  %v7538_v36 = vpop.f32.mrf.mxu1 }
 0x3c3   :  { %v7540_v50 = vpop.f32.mrf.mxu0 }
 0x3c4   :  { %10598 = vst [vmem:[#allocation22_spill] sm:$0xff] %v7540_v50  ;;  %v1047_v40 = vmax.f32 %v7527_v52, %v7540_v50 }
 0x3c6   :  { %v7542_v1 = vpop.f32.mrf.mxu1 }
 0x3c9   :  { %5675 = vmatmul.msk.bf16.gmra.mxu1 %vm130_vm2, %v797_v41 }
 0x3cb   :  { %v7544_v7 = vpop.f32.mrf.mxu0 }
 0x3ce   :  { %5660 = vmatmul.msk.bf16.gmra.mxu0 %vm130_vm2, %v799_v45  ;;  %v7548_v14 = vpop.f32.mrf.mxu1 }
 0x3d3   :  { %v7550_v2 = vpop.f32.mrf.mxu0 }
 0x3d4   :  { %v1049_v38 = vmax.f32 %v1047_v40, %v7550_v2 }
 0x3d6   :  { %v7552_v49 = vpop.f32.mrf.mxu1 }
 0x3d9   :  { %5676 = vmatmul.msk.bf16.gmra.mxu1 %vm130_vm2, %v799_v45 }
 0x3db   :  { %v7554_v17 = vpop.f32.mrf.mxu0 }
 0x3de   :  { %5661 = vmatmul.msk.bf16.gmra.mxu0 %vm130_vm2, %v801_v61  ;;  %v7558_v48 = vpop.f32.mrf.mxu1 }
 0x3e3   :  { %v7560_v8 = vpop.f32.mrf.mxu0 }
 0x3e4   :  { %v1051_v30 = vmax.f32 %v1049_v38, %v7560_v8 }
 0x3e6   :  { %v7562_v33 = vpop.f32.mrf.mxu1 }
 0x3e9   :  { %5677 = vmatmul.msk.bf16.gmra.mxu1 %vm130_vm2, %v801_v61 }
 0x3eb   :  { %v7564_v15 = vpop.f32.mrf.mxu0 }
 0x3ee   :  { %5662 = vmatmul.msk.bf16.gmra.mxu0 %vm130_vm2, %v7508_v58  ;;  %v7569_v62 = vpop.f32.mrf.mxu1 }
 0x3f3   :  { %v7571_v46 = vpop.f32.mrf.mxu0 }
 0x3f4   :  { %v1053_v44 = vmax.f32 %v1051_v30, %v7571_v46 }
 0x3f6   :  { %v7573_v18 = vpop.f32.mrf.mxu1 }
 0x3f9   :  { %5678 = vmatmul.msk.bf16.gmra.mxu1 %vm130_vm2, %v7508_v58 }
 0x3fb   :  { %v7575_v63 = vpop.f32.mrf.mxu0 }
 0x3fe   :  { %5663 = vmatmul.msk.bf16.gmra.mxu0 %vm130_vm2, %v7513_v35  ;;  %v7581_v26 = vpop.f32.mrf.mxu1 }
 0x403   :  { %v7583_v9 = vpop.f32.mrf.mxu0 }
 0x404   :  { %v1055_v20 = vmax.f32 %v1053_v44, %v7583_v9 }
 0x406   :  { %v7585_v47 = vpop.f32.mrf.mxu1 }
 0x409   :  { %5679 = vmatmul.msk.bf16.gmra.mxu1 %vm130_vm2, %v7513_v35 }
 0x40b   :  { %v7587_v21 = vpop.f32.mrf.mxu0 }
 0x40e   :  { %5664 = vmatmul.msk.bf16.gmra.mxu0 %vm130_vm2, %v807_v42  ;;  %v7592_v11 = vpop.f32.mrf.mxu1 }
 0x413   :  { %v7594_v60 = vpop.f32.mrf.mxu0 }
 0x414   :  { %v1057_v40 = vmax.f32 %v1055_v20, %v7594_v60 }
 0x416   :  { %v7596_v24 = vpop.f32.mrf.mxu1 }
 0x419   :  { %5680 = vmatmul.msk.bf16.gmra.mxu1 %vm130_vm2, %v807_v42 }
 0x41b   :  { %v7598_v43 = vpop.f32.mrf.mxu0 }
 0x41e   :  { %5665 = vmatmul.msk.bf16.gmra.mxu0 %vm130_vm2, %v809_v5  ;;  %v7602_v41 = vpop.f32.mrf.mxu1 }
 0x423   :  { %v7604_v34 = vpop.f32.mrf.mxu0 }
 0x424   :  { %v1059_v38 = vmax.f32 %v1057_v40, %v7604_v34 }
 0x426   :  { %v7606_v45 = vpop.f32.mrf.mxu1 }
 0x429   :  { %5681 = vmatmul.msk.bf16.gmra.mxu1 %vm130_vm2, %v809_v5  ;;  %v1048_v5 = vmax.f32 %v1046_v23, %v7544_v7 }
 0x42b   :  { %v7608_v59 = vpop.f32.mrf.mxu0  ;;  %v1050_v28 = vmax.f32 %v1048_v5, %v7554_v17 }
 0x42c   :  { %10599 = vst [vmem:[#allocation21_spill] sm:$0xff] %v7608_v59 }
 0x42d   :  { %v1052_v0 = vmax.f32 %v1050_v28, %v7564_v15 }
 0x42e   :  { %v7611_v61 = vpop.f32.mrf.mxu1 }
 0x42f   :  { %v1054_v25 = vmax.f32 %v1052_v0, %v7575_v63 }
 0x431   :  { %v1056_v23 = vmax.f32 %v1054_v25, %v7587_v21 }
 0x433   :  { %v7613_v13 = vpop.f32.mrf.mxu0  ;;  %v1058_v5 = vmax.f32 %v1056_v23, %v7598_v43 }
 0x434   :  { %10600 = vst [vmem:[#allocation20_spill] sm:$0xff] %v7613_v13  ;;  %v1061_v30 = vmax.f32 %v1059_v38, %v7613_v13 }
 0x435   :  { %v1060_v28 = vmax.f32 %v1058_v5, %v7608_v59 }
 0x436   :  { %v7615_v58 = vpop.f32.mrf.mxu1 }
 0x437   :  { %10601 = vst [vmem:[#allocation17_spill] sm:$0xff] %v7615_v58 }
 0x43b   :  { %v7617_v39 = vpop.f32.mrf.mxu0 }
 0x43c   :  { %10602 = vst [vmem:[#allocation15_spill] sm:$0xff] %v7617_v39  ;;  %v1062_v0 = vmax.f32 %v1060_v28, %v7617_v39 }
 0x43e   :  { %v7619_v35 = vpop.f32.mrf.mxu1 }
 0x443   :  { %v7623_v22 = vpop.f32.mrf.mxu0 }
 0x444   :  { %10604 = vst [vmem:[#allocation16_spill] sm:$0xff] %v7623_v22  ;;  %v1063_v44 = vmax.f32 %v1061_v30, %v7623_v22 }
 0x446   :  { %v7629_v32 = vpop.f32.mrf.mxu1 }
 0x44b   :  { %v7631_v31 = vpop.f32.mrf.mxu0 }
 0x44c   :  { %10605 = vst [vmem:[#allocation24_spill] sm:$0xff] %v7631_v31  ;;  %v1064_v16 = vmax.f32 %v1062_v0, %v7631_v31 }
 0x44e   :  { %v7635_v37 = vpop.f32.mrf.mxu1 }
 0x453   :  { %v7633_v57 = vpop.f32.mrf.mxu0 }
 0x454   :  { %10606 = vst [vmem:[#allocation25_spill] sm:$0xff] %v7633_v57  ;;  %v1065_v25 = vmax.f32 %v1063_v44, %v7633_v57 }
 0x456   :  { %v7639_v56 = vpop.f32.mrf.mxu1 }
 0x45b   :  { %v7637_v42 = vpop.f32.mrf.mxu0 }
 0x45c   :  { %10607 = vst [vmem:[#allocation26_spill] sm:$0xff] %v7637_v42  ;;  %v1066_v23 = vmax.f32 %v1064_v16, %v7637_v42 }
 0x45e   :  { %v7643_v29 = vpop.f32.mrf.mxu1 }
 0x463   :  { %v7641_v55 = vpop.f32.mrf.mxu0 }
 0x464   :  { %v1067_v40 = vmax.f32 %v1065_v25, %v7641_v55 }
 0x466   :  { %v7647_v19 = vpop.f32.mrf.mxu1 }
 0x46b   :  { %v7645_v12 = vpop.f32.mrf.mxu0 }
 0x46c   :  { %v1068_v5 = vmax.f32 %v1066_v23, %v7645_v12 }
 0x46e   :  { %v7653_v10 = vpop.f32.mrf.mxu1 }
 0x473   :  { %v7649_v27 = vpop.f32.mrf.mxu0 }
 0x474   :  { %v1069_v38 = vmax.f32 %v1067_v40, %v7649_v27 }
 0x476   :  { %v7657_v53 = vpop.f32.mrf.mxu1 }
 0x47b   :  { %v7651_v4 = vpop.f32.mrf.mxu0 }
 0x47c   :  { %v1070_v28 = vmax.f32 %v1068_v5, %v7651_v4 }
 0x47e   :  { %v7673_v54 = vpop.f32.mrf.mxu1 }
 0x483   :  { %v7655_v3 = vpop.f32.mrf.mxu0 }
 0x484   :  { %v1071_v30 = vmax.f32 %v1069_v38, %v7655_v3  ;;  %v1084_v38 = vmax.f32 %v7538_v36, %v7548_v14 }
 0x486   :  { %v7687_v50 = vpop.f32.mrf.mxu1 }
 0x48b   :  { %v7665_v6 = vpop.f32.mrf.mxu0 }
 0x48c   :  { %v1072_v0 = vmax.f32 %v1070_v28, %v7665_v6 }
 0x48e   :  { %v7699_v13 = vpop.f32.mrf.mxu1 }
 0x493   :  { %v7677_v52 = vpop.f32.mrf.mxu0 }
 0x494   :  { %v1073_v44 = vmax.f32 %v1071_v30, %v7677_v52  ;;  %v1083_v30 = vmax.f32 %v7529_v51, %v7542_v1 }
 0x496   :  { %v7702_v57 = vpop.f32.mrf.mxu1 }
 0x49b   :  { %v7689_v20 = vpop.f32.mrf.mxu0 }
 0x49c   :  { %v1074_v39 = vmax.f32 %v1072_v0, %v7689_v20  ;;  %v1086_v0 = vmax.f32 %v1084_v38, %v7558_v48 }
 0x4a3   :  { %v954_v59 = vpop.f32.mrf.mxu0 }
 0x4a4   :  { %v1075_v16 = vmax.f32 %v1073_v44, %v954_v59  ;;  %v1088_v44 = vmax.f32 %v1086_v0, %v7569_v62 }
 0x4a6   :  { %v1076_v22 = vmax.f32 %v1074_v39, %v1075_v16  ;;  %v7714_v16 = vpop.f32.mrf.mxu1 }
 0x4a8   :  { %v1077_v25 = vrot.slane %v1076_v22, 4 }
 0x4aa   :  { %v1078_v31 = vmax.f32 %v1076_v22, %v1077_v25  ;;  %v1085_v22 = vmax.f32 %v1083_v30, %v7552_v49  ;;  %v1090_v25 = vmax.f32 %v1088_v44, %v7581_v26 }
 0x4ac   :  { %v1079_v23 = vrot.slane %v1078_v31, 2 }
 0x4ae   :  { %v1080_v40 = vmax.f32 %v1078_v31, %v1079_v23  ;;  %v1087_v31 = vmax.f32 %v1085_v22, %v7562_v33  ;;  %v7728_v44 = vpop.f32.mrf.mxu1 }
 0x4b0   :  { %v1081_v5 = vrot.slane %v1080_v40, 1  ;;  %v1089_v23 = vmax.f32 %v1087_v31, %v7573_v18 }
 0x4b2   :  { %v7704_v42 = vmax.f32 %v1080_v40, %v1081_v5  ;;  %v1091_v40 = vmax.f32 %v1089_v23, %v7585_v47 }
 0x4b4   :  { %v1182_v28 = vsub.f32 %v954_v59, %v7704_v42  ;;  %v1092_v59 = vmax.f32 %v1090_v25, %v7592_v11  ;;  %v1093_v30 = vmax.f32 %v1091_v40, %v7596_v24 }
 0x4b6   :  { %v1308_v39 = vmul.f32 1.442695, %v1182_v28  ;;  %v1094_v5 = vmax.f32 %v1092_v59, %v7602_v41  ;;  %v1150_v28 = vsub.f32 %v7604_v34, %v7704_v42 }
 0x4b8   :  { %6052 = vpow2.f32 %v1308_v39  ;;  %v1096_v0 = vmax.f32 %v1094_v5, %v7611_v61  ;;  %v1095_v39 = vmax.f32 %v1093_v30, %v7606_v45  ;;  %v1244_v31 = vmul.f32 1.442695, %v1150_v28 }
 0x4ba   :  { %v1098_v22 = vmax.f32 %v1096_v0, %v7619_v35  ;;  %v1097_v25 = vmax.f32 %v1095_v39, %v7615_v58  ;;  %6054 = vpow2.f32 %v1244_v31  ;;  %v7740_v58 = vpop.f32.mrf.mxu1 }
 0x4bc   :  { %v1100_v23 = vmax.f32 %v1098_v22, %v7635_v37  ;;  %v1099_v59 = vmax.f32 %v1097_v25, %v7629_v32 }
 0x4be   :  { %v6053_v38 = vpop.eup %6052  ;;  %v1102_v34 = vmax.f32 %v1100_v23, %v7643_v29  ;;  %v1101_v40 = vmax.f32 %v1099_v59, %v7639_v56  ;;  %v1148_v59 = vsub.f32 %v7598_v43, %v7704_v42  ;;  %v1138_v43 = vsub.f32 %v7571_v46, %v7704_v42 }
 0x4bf   :  { %1385 = vmatpush.msra.mxu3 %v6053_v38 }
 0x4c0   :  { %v1104_v5 = vmax.f32 %v1102_v34, %v7653_v10  ;;  %v1103_v38 = vmax.f32 %v1101_v40, %v7647_v19  ;;  %v6055_v0 = vpop.eup %6054  ;;  %v1146_v40 = vsub.f32 %v7594_v60, %v7704_v42 }
 0x4c1   :  { %1362 = vmatpush.msra.mxu2 %v6055_v0  ;;  %v1142_v0 = vsub.f32 %v7583_v9, %v7704_v42  ;;  %v1134_v9 = vsub.f32 %v7560_v8, %v7704_v42  ;;  %v1130_v8 = vsub.f32 %v7550_v2, %v7704_v42 }
 0x4c2   :  { %v1106_v30 = vmax.f32 %v1104_v5, %v7673_v54  ;;  %v1105_v28 = vmax.f32 %v1103_v38, %v7657_v53  ;;  %v1144_v38 = vsub.f32 %v7587_v21, %v7704_v42  ;;  %v1136_v21 = vsub.f32 %v7564_v15, %v7704_v42 }
 0x4c3   :  { %v1178_v15 = vsub.f32 %v7677_v52, %v7704_v42  ;;  %v1174_v52 = vsub.f32 %v7655_v3, %v7704_v42 }
 0x4c4   :  { %v1108_v39 = vmax.f32 %v1106_v30, %v7699_v13  ;;  %v1107_v22 = vmax.f32 %v1105_v28, %v7687_v50  ;;  %v1240_v30 = vmul.f32 1.442695, %v1148_v59  ;;  %v1236_v28 = vmul.f32 1.442695, %v1146_v40 }
 0x4c6   :  { %v1110_v31 = vmax.f32 %v1108_v39, %v7714_v16  ;;  %v1109_v25 = vmax.f32 %v1107_v22, %v7702_v57  ;;  %v1140_v22 = vsub.f32 %v7575_v63, %v7704_v42  ;;  %6056 = vpow2.f32 %v1240_v30 }
 0x4c7   :  { %6058 = vpow2.f32 %v1236_v28  ;;  %v1180_v63 = vsub.f32 %v7689_v20, %v7704_v42  ;;  %v1176_v20 = vsub.f32 %v7665_v6, %v7704_v42  ;;  %v1172_v6 = vsub.f32 %v7651_v4, %v7704_v42 }
 0x4c8   :  { %v1112_v23 = vmax.f32 %v1110_v31, %v7740_v58  ;;  %v1111_v34 = vmax.f32 %v1109_v25, %v7728_v44  ;;  %v1232_v31 = vmul.f32 1.442695, %v1144_v38  ;;  %v1228_v25 = vmul.f32 1.442695, %v1142_v0 }
 0x4c9   :  { %v1216_v38 = vmul.f32 1.442695, %v1136_v21  ;;  %v1212_v0 = vmul.f32 1.442695, %v1134_v9  ;;  %v10609_v9 = vld [vmem:[#allocation10_spill] sm:$0xff] }
 0x4ca   :  { %v1113_v5 = vmax.f32 %v1111_v34, %v1112_v23  ;;  %v1224_v23 = vmul.f32 1.442695, %v1140_v22  ;;  %6060 = vpow2.f32 %v1232_v31  ;;  %v1220_v34 = vmul.f32 1.442695, %v1138_v43 }
 0x4cb   :  { %6062 = vpow2.f32 %v1228_v25  ;;  %v1300_v43 = vmul.f32 1.442695, %v1178_v15  ;;  %v10608_v25 = vld [vmem:[#allocation22_spill] sm:$0xff]  ;;  %v1168_v15 = vsub.f32 %v7645_v12, %v7704_v42 }
 0x4cc   :  { %v1114_v39 = vrot.slane %v1113_v5, 4  ;;  %v6057_v59 = vpop.eup %6056  ;;  %6064 = vpow2.f32 %v1224_v23  ;;  %v1126_v21 = vsub.f32 %v10608_v25, %v7704_v42  ;;  %v1204_v23 = vmul.f32 1.442695, %v1130_v8  ;;  %v10612_v12 = vld [vmem:[#allocation26_spill] sm:$0xff] }
 0x4cd   :  { %1363 = vmatpush.msra.mxu2 %v6057_v59  ;;  %v6059_v46 = vpop.eup %6058  ;;  %6066 = vpow2.f32 %v1220_v34  ;;  %v1296_v59 = vmul.f32 1.442695, %v1176_v20  ;;  %v1124_v34 = vsub.f32 %v10609_v9, %v7704_v42  ;;  %v1288_v8 = vmul.f32 1.442695, %v1172_v6 }
 0x4ce   :  { %v1115_v60 = vmax.f32 %v1113_v5, %v1114_v39  ;;  %v1132_v5 = vsub.f32 %v7554_v17, %v7704_v42  ;;  %v1304_v39 = vmul.f32 1.442695, %v1180_v63  ;;  %v1128_v17 = vsub.f32 %v7544_v7, %v7704_v42 }
 0x4cf   :  { %1364 = vmatpush.msra.mxu2 %v6059_v46  ;;  %6068 = vpow2.f32 %v1216_v38  ;;  %v1170_v63 = vsub.f32 %v7649_v27, %v7704_v42  ;;  %v1196_v38 = vmul.f32 1.442695, %v1126_v21  ;;  %v10611_v27 = vld [vmem:[#allocation12_spill] sm:$0xff]  ;;  %v1280_v21 = vmul.f32 1.442695, %v1168_v15 }
 0x4d0   :  { %v1116_v40 = vrot.slane %v1115_v60, 2  ;;  %v6061_v30 = vpop.eup %6060  ;;  %v1208_v31 = vmul.f32 1.442695, %v1132_v5  ;;  %6070 = vpow2.f32 %v1212_v0  ;;  %v1200_v3 = vmul.f32 1.442695, %v1128_v17  ;;  %v10610_v5 = vld [vmem:[#allocation11_spill] sm:$0xff] }
 0x4d1   :  { %1365 = vmatpush.msra.mxu2 %v6061_v30  ;;  %v6063_v22 = vpop.eup %6062  ;;  %6072 = vpow2.f32 %v1304_v39  ;;  %v1122_v4 = vsub.f32 %v10610_v5, %v7704_v42  ;;  %v1120_v20 = vsub.f32 %v10611_v27, %v7704_v42  ;;  %v1192_v39 = vmul.f32 1.442695, %v1124_v34 }
 0x4d2   :  { %v1117_v28 = vmax.f32 %v1115_v60, %v1116_v40  ;;  %v6065_v2 = vpop.eup %6064  ;;  %6074 = vpow2.f32 %v1208_v31  ;;  %v1292_v40 = vmul.f32 1.442695, %v1174_v52  ;;  %v1166_v17 = vsub.f32 %v7641_v55, %v7704_v42  ;;  %v10613_v55 = vld [vmem:[#allocation25_spill] sm:$0xff] }
 0x4d3   :  { %1366 = vmatpush.msra.mxu2 %v6063_v22  ;;  %v6067_v7 = vpop.eup %6066  ;;  %6076 = vpow2.f32 %v1300_v43  ;;  %v1284_v31 = vmul.f32 1.442695, %v1170_v63  ;;  %v1188_v43 = vmul.f32 1.442695, %v1122_v4  ;;  %v1162_v6 = vsub.f32 %v10613_v55, %v7704_v42  ;;  %v10618_v55 = vld [vmem:[#allocation21_spill] sm:$0xff] }
 0x4d4   :  { %v1118_v60 = vrot.slane %v1117_v28, 1  ;;  %6078 = vpow2.f32 %v1204_v23  ;;  %v1276_v9 = vmul.f32 1.442695, %v1166_v17 }
 0x4d5   :  { %1367 = vmatpush.msra.mxu2 %v6065_v2  ;;  %v6069_v46 = vpop.eup %6068  ;;  %6080 = vpow2.f32 %v1296_v59  ;;  %v1268_v15 = vmul.f32 1.442695, %v1162_v6  ;;  %v1152_v6 = vsub.f32 %v10618_v55, %v7704_v42 }
 0x4d6   :  { %v7789_v30 = vmax.f32 %v1117_v28, %v1118_v60  ;;  %v6071_v0 = vpop.eup %6070  ;;  %6082 = vpow2.f32 %v1200_v3  ;;  %v1164_v28 = vsub.f32 %v10612_v12, %v7704_v42  ;;  %v1184_v60 = vmul.f32 1.442695, %v1120_v20 }
 0x4d7   :  { %1368 = vmatpush.msra.mxu2 %v6067_v7  ;;  %v6073_v22 = vpop.eup %6072  ;;  %6084 = vpow2.f32 %v1292_v40 }
 0x4d8   :  { %v6075_v52 = vpop.eup %6074  ;;  %6086 = vpow2.f32 %v1196_v38  ;;  %1386 = vmatpush.msra.mxu3 %v6073_v22  ;;  %v1151_v25 = vsub.f32 %v7611_v61, %v7789_v30  ;;  %v1149_v7 = vsub.f32 %v7606_v45, %v7789_v30  ;;  %v10614_v61 = vld [vmem:[#allocation24_spill] sm:$0xff]  ;;  %v1272_v63 = vmul.f32 1.442695, %v1164_v28 }
 0x4d9   :  { %1369 = vmatpush.msra.mxu2 %v6069_v46  ;;  %v6077_v2 = vpop.eup %6076  ;;  %6088 = vpow2.f32 %v1288_v8  ;;  %v1160_v3 = vsub.f32 %v10614_v61, %v7704_v42  ;;  %v1147_v46 = vsub.f32 %v7602_v41, %v7789_v30  ;;  %v10615_v45 = vld [vmem:[#allocation16_spill] sm:$0xff]  ;;  %v10616_v41 = vld [vmem:[#allocation15_spill] sm:$0xff] }
 0x4da   :  { %v6079_v23 = vpop.eup %6078  ;;  %6090 = vpow2.f32 %v1192_v39  ;;  %1387 = vmatpush.msra.mxu3 %v6077_v2  ;;  %v1246_v5 = vmul.f32 1.442695, %v1151_v25  ;;  %v1158_v38 = vsub.f32 %v10615_v45, %v7704_v42  ;;  %v1242_v27 = vmul.f32 1.442695, %v1149_v7 }
 0x4db   :  { %1370 = vmatpush.msra.mxu2 %v6071_v0  ;;  %v6081_v59 = vpop.eup %6080  ;;  %6092 = vpow2.f32 %v1284_v31  ;;  %v1145_v0 = vsub.f32 %v7596_v24, %v7789_v30  ;;  %v1156_v39 = vsub.f32 %v10616_v41, %v7704_v42  ;;  %v1264_v22 = vmul.f32 1.442695, %v1160_v3  ;;  %v10617_v24 = vld [vmem:[#allocation20_spill] sm:$0xff] }
 0x4dc   :  { %v6083_v34 = vpop.eup %6082  ;;  %6094 = vpow2.f32 %v1188_v43  ;;  %1388 = vmatpush.msra.mxu3 %v6081_v59  ;;  %v1143_v31 = vsub.f32 %v7592_v11, %v7789_v30  ;;  %v1154_v28 = vsub.f32 %v10617_v24, %v7704_v42  ;;  %v1260_v43 = vmul.f32 1.442695, %v1158_v38 }
 0x4dd   :  { %1371 = vmatpush.msra.mxu2 %v6075_v52  ;;  %v6085_v40 = vpop.eup %6084  ;;  %6096 = vpow2.f32 %v1280_v21  ;;  %v1238_v52 = vmul.f32 1.442695, %v1147_v46  ;;  %v1141_v25 = vsub.f32 %v7585_v47, %v7789_v30  ;;  %v1234_v21 = vmul.f32 1.442695, %v1145_v0 }
 0x4de   :  { %v6087_v4 = vpop.eup %6086  ;;  %6098 = vpow2.f32 %v1184_v60  ;;  %1389 = vmatpush.msra.mxu3 %v6085_v40  ;;  %v1256_v60 = vmul.f32 1.442695, %v1156_v39  ;;  %v1139_v7 = vsub.f32 %v7581_v26, %v7789_v30  ;;  %v1252_v61 = vmul.f32 1.442695, %v1154_v28 }
 0x4df   :  { %1372 = vmatpush.msra.mxu2 %v6079_v23  ;;  %v6089_v8 = vpop.eup %6088  ;;  %6100 = vpow2.f32 %v1276_v9  ;;  %v7819_v23 = vpop.f32.mrf.mxu2  ;;  %v1230_v9 = vmul.f32 1.442695, %v1143_v31  ;;  %v1137_v3 = vsub.f32 %v7573_v18, %v7789_v30  ;;  %v1135_v26 = vsub.f32 %v7569_v62, %v7789_v30 }
 0x4e0   :  { %v6091_v20 = vpop.eup %6090  ;;  %6102 = vpow2.f32 %v1272_v63  ;;  %1390 = vmatpush.msra.mxu3 %v6089_v8  ;;  %v1226_v63 = vmul.f32 1.442695, %v1141_v25  ;;  %v1248_v46 = vmul.f32 1.442695, %v1152_v6  ;;  %v1133_v18 = vsub.f32 %v7562_v33, %v7789_v30 }
 0x4e1   :  { %1373 = vmatpush.msra.mxu2 %v6083_v34  ;;  %v6093_v17 = vpop.eup %6092  ;;  %6104 = vpow2.f32 %v1246_v5  ;;  %v1183_v34 = vsub.f32 %v7740_v58, %v7789_v30  ;;  %v1181_v5 = vsub.f32 %v7728_v44, %v7789_v30  ;;  %v1179_v62 = vsub.f32 %v7714_v16, %v7789_v30 }
 0x4e2   :  { %v6095_v12 = vpop.eup %6094  ;;  %6106 = vpow2.f32 %v1268_v15  ;;  %1391 = vmatpush.msra.mxu3 %v6093_v17  ;;  %v1218_v8 = vmul.f32 1.442695, %v1137_v3  ;;  %v1131_v44 = vsub.f32 %v7558_v48, %v7789_v30  ;;  %v1177_v33 = vsub.f32 %v7702_v57, %v7789_v30 }
 0x4e3   :  { %1374 = vmatpush.msra.mxu2 %v6087_v4  ;;  %v6097_v2 = vpop.eup %6096  ;;  %6108 = vpow2.f32 %v1242_v27  ;;  %v1222_v4 = vmul.f32 1.442695, %v1139_v7  ;;  %v1310_v38 = vmul.f32 1.442695, %v1183_v34  ;;  %v1214_v27 = vmul.f32 1.442695, %v1135_v26 }
 0x4e4   :  { %v6099_v11 = vpop.eup %6098  ;;  %6110 = vpow2.f32 %v1264_v22  ;;  %1392 = vmatpush.msra.mxu3 %v6097_v2  ;;  %v1306_v41 = vmul.f32 1.442695, %v1181_v5  ;;  %v1129_v16 = vsub.f32 %v7552_v49, %v7789_v30  ;;  %v1210_v22 = vmul.f32 1.442695, %v1133_v18 }
 0x4e5   :  { %1375 = vmatpush.msra.mxu2 %v6091_v20  ;;  %v6101_v59 = vpop.eup %6100  ;;  %6112 = vpow2.f32 %v1238_v52  ;;  %v1175_v48 = vsub.f32 %v7699_v13, %v7789_v30  ;;  %v1302_v31 = vmul.f32 1.442695, %v1179_v62  ;;  %v10619_v52 = vmov 1.0  }
 0x4e6   :  { %v6103_v47 = vpop.eup %6102  ;;  %6114 = vpow2.f32 %v1260_v43  ;;  %1393 = vmatpush.msra.mxu3 %v6101_v59  ;;  %v1127_v57 = vsub.f32 %v7548_v14, %v7789_v30  ;;  %v1206_v24 = vmul.f32 1.442695, %v1131_v44  ;;  %v1173_v28 = vsub.f32 %v7687_v50, %v7789_v30 }
 0x4e7   :  { %1376 = vmatpush.msra.mxu2 %v6095_v12  ;;  %v6105_v42 = vpop.eup %6104  ;;  %6116 = vpow2.f32 %v1234_v21  ;;  %v1298_v43 = vmul.f32 1.442695, %v1177_v33  ;;  %v1125_v13 = vsub.f32 %v7542_v1, %v7789_v30  ;;  %v1202_v25 = vmul.f32 1.442695, %v1129_v16  ;;  %v7853_v21 = vpop.f32.mrf.mxu3 }
 0x4e8   :  { %v6107_v40 = vpop.eup %6106  ;;  %6118 = vpow2.f32 %v1256_v60  ;;  %1394 = vmatpush.msra.mxu3 %v6103_v47  ;;  %v1294_v55 = vmul.f32 1.442695, %v1175_v48  ;;  %v1123_v50 = vsub.f32 %v7538_v36, %v7789_v30  ;;  %v1198_v60 = vmul.f32 1.442695, %v1127_v57  ;;  %v10622_v57 = vld [vmem:[#allocation18_spill] sm:$0xff] }
 0x4e9   :  { %1377 = vmatpush.msra.mxu2 %v6099_v11  ;;  %v6109_v58 = vpop.eup %6108  ;;  %6120 = vpow2.f32 %v1230_v9  ;;  %v1171_v11 = vsub.f32 %v7673_v54, %v7789_v30  ;;  %v1169_v59 = vsub.f32 %v7657_v53, %v7789_v30  ;;  %v1290_v7 = vmul.f32 1.442695, %v1173_v28 }
 0x4ea   :  { %1378 = vmatmul.f32.vlgmr.msra.gmra.mxu2 %v7819_v23  ;;  %v6111_v45 = vpop.eup %6110  ;;  %6122 = vpow2.f32 %v1252_v61  ;;  %1395 = vmatpush.msra.mxu3 %v6107_v40  ;;  %v1121_v54 = vsub.f32 %v7529_v51, %v7789_v30  ;;  %v1194_v47 = vmul.f32 1.442695, %v1125_v13  ;;  %v1167_v34 = vsub.f32 %v7653_v10, %v7789_v30 }
 0x4eb   :  { %1408 = vmatpush.msrb.mxu2 %v6105_v42  ;;  %v6113_v15 = vpop.eup %6112  ;;  %6124 = vpow2.f32 %v1226_v63  ;;  %v1286_v61 = vmul.f32 1.442695, %v1171_v11  ;;  %v1190_v53 = vmul.f32 1.442695, %v1123_v50  ;;  %v1165_v63 = vsub.f32 %v7647_v19, %v7789_v30 }
 0x4ec   :  { %v6115_v0 = vpop.eup %6114  ;;  %6126 = vpow2.f32 %v1248_v46  ;;  %1396 = vmatpush.msra.mxu3 %v6111_v45  ;;  %v1282_v51 = vmul.f32 1.442695, %v1169_v59  ;;  %v1186_v26 = vmul.f32 1.442695, %v1121_v54  ;;  %v1163_v10 = vsub.f32 %v7643_v29, %v7789_v30 }
 0x4ed   :  { %1409 = vmatpush.msrb.mxu2 %v6109_v58  ;;  %v6117_v20 = vpop.eup %6116  ;;  %6128 = vpow2.f32 %v1222_v4  ;;  %v1278_v58 = vmul.f32 1.442695, %v1167_v34  ;;  %v1161_v19 = vsub.f32 %v7639_v56, %v7789_v30  ;;  %v1274_v45 = vmul.f32 1.442695, %v1165_v63 }
 0x4ee   :  { %v6119_v39 = vpop.eup %6118  ;;  %6130 = vpow2.f32 %v1310_v38  ;;  %1397 = vmatpush.msra.mxu3 %v6115_v0  ;;  %v7873_v38 = vpop.trf.xlu1  ;;  %v1270_v62 = vmul.f32 1.442695, %v1163_v10  ;;  %v1157_v0 = vsub.f32 %v7629_v32, %v7789_v30  ;;  %v1155_v33 = vsub.f32 %v7619_v35, %v7789_v30 }
 0x4ef   :  { %1410 = vmatpush.msrb.mxu2 %v6113_v15  ;;  %v6121_v17 = vpop.eup %6120  ;;  %6132 = vpow2.f32 %v1218_v8  ;;  %v1159_v15 = vsub.f32 %v7635_v37, %v7789_v30  ;;  %v1266_v44 = vmul.f32 1.442695, %v1161_v19  ;;  %v10620_v37 = vld [vmem:[#allocation8_spill] sm:$0xff]  ;;  %v2670_v35 = vrot.slane %v10622_v57, 6  ;;  %v10625_v19 = vld [vmem:[#allocation13_spill] sm:$0xff] }
 0x4f0   :  { %v6123_v12 = vpop.eup %6122  ;;  %6134 = vpow2.f32 %v1214_v27  ;;  %1398 = vmatpush.msra.mxu3 %v6119_v39  ;;  %v1490_v39 = vrot.slane %v10620_v37, 2  ;;  %v1258_v48 = vmul.f32 1.442695, %v1157_v0 }
 0x4f1   :  { %1411 = vmatpush.msrb.mxu2 %v6117_v20  ;;  %v6125_v49 = vpop.eup %6124  ;;  %6136 = vpow2.f32 %v1306_v41  ;;  %v1262_v41 = vmul.f32 1.442695, %v1159_v15 }
 0x4f2   :  { %1381 = vmatmul.f32.gmra.mxu2 %v10619_v52  ;;  %v6127_v2 = vpop.eup %6126  ;;  %6138 = vpow2.f32 %v1210_v22  ;;  %1399 = vmatpush.msra.mxu3 %v6123_v12 }
 0x4f3   :  { %1412 = vmatpush.msrb.mxu2 %v6121_v17  ;;  %v6129_v14 = vpop.eup %6128  ;;  %6140 = vpow2.f32 %v1302_v31  ;;  %v10621_v17 = vld [vmem:[#allocation17_spill] sm:$0xff] }
 0x4f4   :  { %v6131_v6 = vpop.eup %6130  ;;  %6142 = vpow2.f32 %v1206_v24  ;;  %1400 = vmatpush.msra.mxu3 %v6127_v2  ;;  %v1153_v32 = vsub.f32 %v10621_v17, %v7789_v30  ;;  %v1254_v24 = vmul.f32 1.442695, %v1155_v33 }
 0x4f5   :  { %1413 = vmatpush.msrb.mxu2 %v6125_v49  ;;  %v6133_v1 = vpop.eup %6132  ;;  %6144 = vpow2.f32 %v1298_v43  ;;  %1401 = vmatmul.f32.vlgmr.msra.gmra.mxu3 %v7853_v21  ;;  %v1541_v49 = vsel %vm179_vm1, %v1490_v39, 0 }
 0x4f6   :  { %v6135_v9 = vpop.eup %6134  ;;  %6146 = vpow2.f32 %v1202_v25  ;;  %1431 = vmatpush.msrb.mxu3 %v6131_v6  ;;  %v7884_v31 = vpop.trf.xlu1  ;;  %v1250_v43 = vmul.f32 1.442695, %v1153_v32  ;;  %v10624_v6 = vld [vmem:[#allocation19_spill] sm:$0xff] }
 0x4f7   :  { %1414 = vmatpush.msrb.mxu2 %v6129_v14  ;;  %v6137_v36 = vpop.eup %6136  ;;  %6148 = vpow2.f32 %v1294_v55  ;;  %v10623_v14 = vld [vmem:[#allocation9_spill] sm:$0xff]  ;;  %v2671_v50 = vrot.slane %v10624_v6, 6 }
 0x4f8   :  { %v6139_v42 = vpop.eup %6138  ;;  %6150 = vpow2.f32 %v1198_v60  ;;  %1432 = vmatpush.msrb.mxu3 %v6137_v36  ;;  %v1491_v11 = vrot.slane %v10623_v14, 2 }
 0x4f9   :  { %1415 = vmatpush.msrb.mxu2 %v6133_v1  ;;  %v6141_v3 = vpop.eup %6140  ;;  %6152 = vpow2.f32 %v1290_v7 }
 0x4fa   :  { %v6143_v40 = vpop.eup %6142  ;;  %6154 = vpow2.f32 %v1194_v47  ;;  %1433 = vmatpush.msrb.mxu3 %v6141_v3  ;;  %v1544_v60 = vsel %vm179_vm1, %v1491_v11, 0 }
 0x4fb   :  { %1416 = vmatpush.msrb.mxu2 %v6135_v9  ;;  %v6145_v46 = vpop.eup %6144  ;;  %6156 = vpow2.f32 %v1286_v61 }
 0x4fc   :  { %v6147_v5 = vpop.eup %6146  ;;  %6158 = vpow2.f32 %v1190_v53  ;;  %1434 = vmatpush.msrb.mxu3 %v6145_v46 }
 0x4fd   :  { %1417 = vmatpush.msrb.mxu2 %v6139_v42  ;;  %v6149_v4 = vpop.eup %6148  ;;  %6160 = vpow2.f32 %v1282_v51  ;;  %1404 = vmatmul.f32.gmra.mxu3 %v10619_v52 }
 0x4fe   :  { %v6151_v18 = vpop.eup %6150  ;;  %6162 = vpow2.f32 %v1186_v26  ;;  %1435 = vmatpush.msrb.mxu3 %v6149_v4  ;;  %v1476_v13 = vpop.trf.xlu1 }
 0x4ff   :  { %1418 = vmatpush.msrb.mxu2 %v6143_v40  ;;  %v6153_v29 = vpop.eup %6152  ;;  %6164 = vpow2.f32 %v1278_v58 }
 0x500   :  { %v6155_v8 = vpop.eup %6154  ;;  %1436 = vmatpush.msrb.mxu3 %v6153_v29  ;;  %6166 = vpow2.f32 %v1274_v45 }
 0x501   :  { %1419 = vmatpush.msrb.mxu2 %v6147_v5  ;;  %v6157_v56 = vpop.eup %6156  ;;  %6168 = vpow2.f32 %v1270_v62 }
 0x502   :  { %v6159_v27 = vpop.eup %6158  ;;  %1437 = vmatpush.msrb.mxu3 %v6157_v56  ;;  %6170 = vpow2.f32 %v1266_v44 }
 0x503   :  { %1420 = vmatpush.msrb.mxu2 %v6151_v18  ;;  %v6161_v20 = vpop.eup %6160  ;;  %6172 = vpow2.f32 %v1262_v41  ;;  %v10630_v41 = vld [vmem:[#allocation23_spill] sm:$0xff] }
 0x504   :  { %v6163_v16 = vpop.eup %6162  ;;  %1438 = vmatpush.msrb.mxu3 %v6161_v20  ;;  %6174 = vpow2.f32 %v1258_v48 }
 0x505   :  { %1421 = vmatpush.msrb.mxu2 %v6155_v8  ;;  %v6165_v22 = vpop.eup %6164  ;;  %6176 = vpow2.f32 %v1254_v24 }
 0x506   :  { %1439 = vmatpush.msrb.mxu3 %v6165_v22  ;;  %v6167_v12 = vpop.eup %6166  ;;  %6178 = vpow2.f32 %v1250_v43  ;;  %v1477_v1 = vpop.trf.xlu1 }
 0x507   :  { %1422 = vmatpush.msrb.mxu2 %v6159_v27  ;;  %v6169_v28 = vpop.eup %6168 }
 0x508   :  { %1440 = vmatpush.msrb.mxu3 %v6167_v12  ;;  %v6171_v30 = vpop.eup %6170 }
 0x509   :  { %1423 = vmatpush.msrb.mxu2 %v6163_v16  ;;  %v6173_v2 = vpop.eup %6172 }
 0x50a   :  { %1424 = vmatmul.f32.vlgmr.msrb.gmra.mxu2 %v7819_v23  ;;  %1441 = vmatpush.msrb.mxu3 %v6169_v28  ;;  %v6175_v25 = vpop.eup %6174 }
 0x50b   :  { %1553 = vmatpush.bf16.msra.mxu2 %v1541_v49  ;;  %v6177_v23 = vpop.eup %6176 }
 0x50c   :  { %1442 = vmatpush.msrb.mxu3 %v6171_v30  ;;  %v6179_v55 = vpop.eup %6178 }
 0x50e   :  { %1443 = vmatpush.msrb.mxu3 %v6173_v2  ;;  %v1478_v59 = vpop.trf.xlu1 }
 0x50f   :  { %5754 = vmatpush.msk.msrb.mxu2 %vm633_vm3, %v2670_v35 }
 0x510   :  { %1444 = vmatpush.msrb.mxu3 %v6175_v25 }
 0x512   :  { %1427 = vmatmul.f32.gmra.mxu2 %v10619_v52  ;;  %1445 = vmatpush.msrb.mxu3 %v6177_v23 }
 0x514   :  { %1446 = vmatpush.msrb.mxu3 %v6179_v55 }
 0x515   :  { %1447 = vmatmul.f32.vlgmr.msrb.gmra.mxu3 %v7853_v21 }
 0x516   :  { %1642 = vmatpush.bf16.msra.mxu3 %v1544_v60  ;;  %v1479_v7 = vpop.trf.xlu1 }
 0x51a   :  { %5756 = vmatpush.msk.msrb.mxu3 %vm633_vm3, %v2671_v50  ;;  %5686 = vmatmul.msk.bf16.vlgmr.msra.gmra.mxu2 %vm130_vm2, %v7873_v38 }
 0x51d   :  { %1450 = vmatmul.f32.gmra.mxu3 %v10619_v52 }
 0x51e   :  { %v1480_v9 = vpop.trf.xlu1 }
 0x525   :  { %5702 = vmatmul.msk.bf16.vlgmr.msra.gmra.mxu3 %vm130_vm2, %v7873_v38 }
 0x526   :  { %v1481_v21 = vpop.trf.xlu1 }
 0x52a   :  { %5687 = vmatmul.msk.bf16.gmra.mxu2 %vm130_vm2, %v1476_v13 }
 0x52e   :  { %v1482_v54 = vpop.trf.xlu1 }
 0x535   :  { %5703 = vmatmul.msk.bf16.gmra.mxu3 %vm130_vm2, %v1476_v13 }
 0x536   :  { %v7906_v47 = vpop.trf.xlu1 }
 0x53a   :  { %5688 = vmatmul.msk.bf16.gmra.mxu2 %vm130_vm2, %v1478_v59 }
 0x53e   :  { %v1484_v36 = vpop.trf.xlu1 }
 0x545   :  { %5704 = vmatmul.msk.bf16.gmra.mxu3 %vm130_vm2, %v1478_v59 }
 0x546   :  { %v7911_v34 = vpop.trf.xlu1 }
 0x54a   :  { %5689 = vmatmul.msk.bf16.gmra.mxu2 %vm130_vm2, %v1480_v9 }
 0x54e   :  { %v1486_v61 = vpop.trf.xlu1 }
 0x555   :  { %5705 = vmatmul.msk.bf16.gmra.mxu3 %vm130_vm2, %v1480_v9 }
 0x556   :  { %v7916_v63 = vpop.trf.xlu1 }
 0x55a   :  { %5690 = vmatmul.msk.bf16.gmra.mxu2 %vm130_vm2, %v1482_v54 }
 0x55e   :  { %v1488_v46 = vpop.trf.xlu1 }
 0x565   :  { %5706 = vmatmul.msk.bf16.gmra.mxu3 %vm130_vm2, %v1482_v54 }
 0x566   :  { %v1489_v60 = vpop.trf.xlu1 }
 0x56a   :  { %5691 = vmatmul.msk.bf16.gmra.mxu2 %vm130_vm2, %v1484_v36 }
 0x56d   :  { %v1379_v42 = vpop.f32.mrf.mxu2 }
 0x575   :  { %5707 = vmatmul.msk.bf16.gmra.mxu3 %vm130_vm2, %v1484_v36  ;;  %v1382_v51 = vpop.f32.mrf.mxu2 }
 0x578   :  { %v1402_v53 = vpop.f32.mrf.mxu3 }
 0x579   :  { %v1403_v3 = vadd.f32 %v1402_v53, %v1379_v42 }
 0x57a   :  { %5692 = vmatmul.msk.bf16.gmra.mxu2 %vm130_vm2, %v1486_v61 }
 0x580   :  { %v1405_v40 = vpop.f32.mrf.mxu3 }
 0x581   :  { %v1406_v26 = vadd.f32 %v1405_v40, %v1382_v51 }
 0x583   :  { %6180 = vrcp.f32 %v1406_v26 }
 0x585   :  { %5708 = vmatmul.msk.bf16.gmra.mxu3 %vm130_vm2, %v1486_v61 }
 0x589   :  { %v6181_v10 = vpop.eup %6180 }
 0x58a   :  { %5693 = vmatmul.msk.bf16.gmra.mxu2 %vm130_vm2, %v1488_v46  ;;  %v1456_v58 = vperm.slane %v6181_v10, 0 }
 0x58c   :  { %v1458_v4 = vmul.f32 %v1456_v58, %v1403_v3 }
 0x58d   :  { %v1425_v5 = vpop.f32.mrf.mxu2 }
 0x58e   :  { %v7921_v45 = vadd.f32 %v1458_v4, %v10625_v19 }
 0x590   :  { %10626 = vst [vmem:[#allocation22_spill] sm:$0xff] %v7921_v45 }
 0x595   :  { %v1428_v38 = vpop.f32.mrf.mxu2  ;;  %5709 = vmatmul.msk.bf16.gmra.mxu3 %vm130_vm2, %v1488_v46 }
 0x598   :  { %v1448_v18 = vpop.f32.mrf.mxu3 }
 0x599   :  { %v1449_v29 = vadd.f32 %v1448_v18, %v1425_v5 }
 0x59a   :  { %5694 = vmatmul.msk.bf16.gmra.mxu2 %vm130_vm2, %v7884_v31 }
 0x59d   :  { %v7926_v15 = vpop.f32.mrf.mxu2 }
 0x59e   :  { %10627 = vst [vmem:[#allocation10_spill] sm:$0xff] %v7926_v15 }
 0x5a0   :  { %v1451_v62 = vpop.f32.mrf.mxu3 }
 0x5a1   :  { %v1452_v8 = vadd.f32 %v1451_v62, %v1428_v38 }
 0x5a3   :  { %6182 = vrcp.f32 %v1452_v8 }
 0x5a5   :  { %v7928_v56 = vpop.f32.mrf.mxu2  ;;  %5710 = vmatmul.msk.bf16.gmra.mxu3 %vm130_vm2, %v7884_v31 }
 0x5a6   :  { %10628 = vst [vmem:[#allocation11_spill] sm:$0xff] %v7928_v56 }
 0x5a8   :  { %v7933_v0 = vpop.f32.mrf.mxu3 }
 0x5a9   :  { %v6183_v44 = vpop.eup %6182 }
 0x5aa   :  { %5695 = vmatmul.msk.bf16.gmra.mxu2 %vm130_vm2, %v1477_v1  ;;  %v1457_v27 = vperm.slane %v6183_v44, 0 }
 0x5ac   :  { %v1459_v33 = vmul.f32 %v1457_v27, %v1449_v29 }
 0x5ad   :  { %v7935_v20 = vpop.f32.mrf.mxu2 }
 0x5ae   :  { %10629 = vst [vmem:[#allocation12_spill] sm:$0xff] %v7935_v20  ;;  %v7938_v39 = vadd.f32 %v1459_v33, %v10630_v41  ;;  %v1724_v44 = vmax.f32 %v7926_v15, %v7935_v20 }
 0x5b0   :  { %10631 = vst [vmem:[#allocation26_spill] sm:$0xff] %v7938_v39  ;;  %v7940_v16 = vpop.f32.mrf.mxu3 }
 0x5b5   :  { %v7942_v22 = vpop.f32.mrf.mxu2  ;;  %5711 = vmatmul.msk.bf16.gmra.mxu3 %vm130_vm2, %v1477_v1 }
 0x5b6   :  { %10632 = vst [vmem:[#allocation25_spill] sm:$0xff] %v7942_v22  ;;  %v1725_v27 = vmax.f32 %v7928_v56, %v7942_v22 }
 0x5b8   :  { %v7946_v17 = vpop.f32.mrf.mxu3 }
 0x5ba   :  { %5696 = vmatmul.msk.bf16.gmra.mxu2 %vm130_vm2, %v1479_v7 }
 0x5bd   :  { %v7948_v32 = vpop.f32.mrf.mxu2 }
 0x5be   :  { %v1726_v33 = vmax.f32 %v1724_v44, %v7948_v32 }
 0x5c0   :  { %v7950_v48 = vpop.f32.mrf.mxu3 }
 0x5c5   :  { %v7952_v31 = vpop.f32.mrf.mxu2  ;;  %5712 = vmatmul.msk.bf16.gmra.mxu3 %vm130_vm2, %v1479_v7 }
 0x5c6   :  { %v1727_v41 = vmax.f32 %v1725_v27, %v7952_v31 }
 0x5c8   :  { %v7956_v12 = vpop.f32.mrf.mxu3 }
 0x5ca   :  { %5697 = vmatmul.msk.bf16.gmra.mxu2 %vm130_vm2, %v1481_v21 }
 0x5cd   :  { %v7958_v57 = vpop.f32.mrf.mxu2 }
 0x5d0   :  { %v7960_v35 = vpop.f32.mrf.mxu3 }
 0x5d5   :  { %v7962_v24 = vpop.f32.mrf.mxu2  ;;  %5713 = vmatmul.msk.bf16.gmra.mxu3 %vm130_vm2, %v1481_v21 }
 0x5d6   :  { %v1729_v39 = vmax.f32 %v1727_v41, %v7962_v24 }
 0x5d8   :  { %v7967_v49 = vpop.f32.mrf.mxu3 }
 0x5da   :  { %5698 = vmatmul.msk.bf16.gmra.mxu2 %vm130_vm2, %v7906_v47 }
 0x5dd   :  { %v7969_v28 = vpop.f32.mrf.mxu2 }
 0x5e0   :  { %v7971_v43 = vpop.f32.mrf.mxu3 }
 0x5e5   :  { %v7973_v30 = vpop.f32.mrf.mxu2  ;;  %5714 = vmatmul.msk.bf16.gmra.mxu3 %vm130_vm2, %v7906_v47 }
 0x5e6   :  { %v1731_v14 = vmax.f32 %v1729_v39, %v7973_v30 }
 0x5e8   :  { %v7979_v2 = vpop.f32.mrf.mxu3 }
 0x5ea   :  { %5699 = vmatmul.msk.bf16.gmra.mxu2 %vm130_vm2, %v7911_v34 }
 0x5ed   :  { %v7981_v13 = vpop.f32.mrf.mxu2 }
 0x5f0   :  { %v7983_v25 = vpop.f32.mrf.mxu3 }
 0x5f5   :  { %v7985_v23 = vpop.f32.mrf.mxu2  ;;  %5715 = vmatmul.msk.bf16.gmra.mxu3 %vm130_vm2, %v7911_v34 }
 0x5f6   :  { %v1733_v52 = vmax.f32 %v1731_v14, %v7985_v23 }
 0x5f8   :  { %v7991_v11 = vpop.f32.mrf.mxu3 }
 0x5fa   :  { %5700 = vmatmul.msk.bf16.gmra.mxu2 %vm130_vm2, %v7916_v63 }
 0x5fd   :  { %v7993_v55 = vpop.f32.mrf.mxu2 }
 0x600   :  { %v7995_v6 = vpop.f32.mrf.mxu3 }
 0x605   :  { %v7997_v50 = vpop.f32.mrf.mxu2  ;;  %5716 = vmatmul.msk.bf16.gmra.mxu3 %vm130_vm2, %v7916_v63  ;;  %v8029_v63 = vpop.permute.xlu2 %1990 }
 0x606   :  { %10638 = vst [vmem:[#allocation17_spill] sm:$0xff] %v8029_v63  ;;  %5719 = vmatmul.msk.f32.vlgmr.msrb.gmra.mxu0 %vm130_vm2, %v8029_v63  ;;  %5721 = vmatmul.msk.f32.vlgmr.msrb.gmra.mxu1 %vm130_vm2, %v8029_v63  ;;  %v1728_v63 = vmax.f32 %v1726_v33, %v7958_v57  ;;  %v1735_v27 = vmax.f32 %v1733_v52, %v7997_v50 }
 0x608   :  { %v8002_v1 = vpop.f32.mrf.mxu3  ;;  %v1730_v45 = vmax.f32 %v1728_v63, %v7969_v28 }
 0x60a   :  { %5701 = vmatmul.msk.bf16.gmra.mxu2 %vm130_vm2, %v1489_v60  ;;  %v1732_v37 = vmax.f32 %v1730_v45, %v7981_v13 }
 0x60c   :  { %v1734_v44 = vmax.f32 %v1732_v37, %v7993_v55 }
 0x60d   :  { %v8004_v59 = vpop.f32.mrf.mxu2 }
 0x60e   :  { %v1736_v33 = vmax.f32 %v1734_v44, %v8004_v59 }
 0x610   :  { %v8006_v7 = vpop.f32.mrf.mxu3 }
 0x615   :  { %v8008_v9 = vpop.f32.mrf.mxu2  ;;  %5717 = vmatmul.msk.bf16.gmra.mxu3 %vm130_vm2, %v1489_v60 }
 0x616   :  { %v1737_v41 = vmax.f32 %v1735_v27, %v8008_v9 }
 0x618   :  { %v8011_v21 = vpop.f32.mrf.mxu3 }
 0x61d   :  { %v8013_v54 = vpop.f32.mrf.mxu2 }
 0x61e   :  { %10633 = vst [vmem:[#allocation24_spill] sm:$0xff] %v8013_v54  ;;  %v1738_v63 = vmax.f32 %v1736_v33, %v8013_v54 }
 0x620   :  { %v8015_v47 = vpop.f32.mrf.mxu3 }
 0x625   :  { %v8017_v36 = vpop.f32.mrf.mxu2 }
 0x626   :  { %10634 = vst [vmem:[#allocation16_spill] sm:$0xff] %v8017_v36  ;;  %v1739_v39 = vmax.f32 %v1737_v41, %v8017_v36 }
 0x628   :  { %v8019_v34 = vpop.f32.mrf.mxu3 }
 0x629   :  { %10635 = vst [vmem:[#allocation15_spill] sm:$0xff] %v8019_v34 }
 0x62d   :  { %v8021_v61 = vpop.f32.mrf.mxu2 }
 0x62e   :  { %10636 = vst [vmem:[#allocation20_spill] sm:$0xff] %v8021_v61  ;;  %v1740_v45 = vmax.f32 %v1738_v63, %v8021_v61 }
 0x630   :  { %v8023_v42 = vpop.f32.mrf.mxu3 }
 0x635   :  { %v8025_v53 = vpop.f32.mrf.mxu2 }
 0x636   :  { %10637 = vst [vmem:[#allocation21_spill] sm:$0xff] %v8025_v53  ;;  %v1741_v14 = vmax.f32 %v1739_v39, %v8025_v53 }
 0x638   :  { %v8027_v3 = vpop.f32.mrf.mxu3 }
 0x63d   :  { %v8031_v51 = vpop.f32.mrf.mxu2 }
 0x63e   :  { %10639 = vst [vmem:[#allocation18_spill] sm:$0xff] %v8031_v51  ;;  %v1742_v20 = vmax.f32 %v1740_v45, %v8031_v51 }
 0x640   :  { %v8039_v26 = vpop.f32.mrf.mxu3 }
 0x645   :  { %v8037_v40 = vpop.f32.mrf.mxu2 }
 0x646   :  { %10640 = vst [vmem:[#allocation19_spill] sm:$0xff] %v8037_v40  ;;  %v1743_v37 = vmax.f32 %v1741_v14, %v8037_v40 }
 0x648   :  { %v8043_v10 = vpop.f32.mrf.mxu3 }
 0x64d   :  { %v8041_v46 = vpop.f32.mrf.mxu2 }
 0x64e   :  { %10641 = vst [vmem:[#allocation13_spill] sm:$0xff] %v8041_v46  ;;  %v1744_v44 = vmax.f32 %v1742_v20, %v8041_v46 }
 0x650   :  { %v8047_v5 = vpop.f32.mrf.mxu3 }
 0x655   :  { %v8045_v58 = vpop.f32.mrf.mxu2 }
 0x656   :  { %v1745_v27 = vmax.f32 %v1743_v37, %v8045_v58 }
 0x658   :  { %v8051_v19 = vpop.f32.mrf.mxu3 }
 0x65d   :  { %v8049_v4 = vpop.f32.mrf.mxu2 }
 0x65e   :  { %v1746_v33 = vmax.f32 %v1744_v44, %v8049_v4 }
 0x660   :  { %v8057_v29 = vpop.f32.mrf.mxu3 }
 0x665   :  { %v8053_v38 = vpop.f32.mrf.mxu2 }
 0x666   :  { %v1747_v41 = vmax.f32 %v1745_v27, %v8053_v38 }
 0x668   :  { %v8061_v8 = vpop.f32.mrf.mxu3 }
 0x66d   :  { %v8055_v18 = vpop.f32.mrf.mxu2 }
 0x66e   :  { %v1748_v63 = vmax.f32 %v1746_v33, %v8055_v18 }
 0x670   :  { %v8077_v15 = vpop.f32.mrf.mxu3 }
 0x675   :  { %v8059_v62 = vpop.f32.mrf.mxu2 }
 0x676   :  { %v1749_v39 = vmax.f32 %v1747_v41, %v8059_v62  ;;  %v1762_v41 = vmax.f32 %v7940_v16, %v7950_v48 }
 0x678   :  { %v8091_v22 = vpop.f32.mrf.mxu3 }
 0x67d   :  { %v8069_v60 = vpop.f32.mrf.mxu2 }
 0x67e   :  { %v1750_v45 = vmax.f32 %v1748_v63, %v8069_v60 }
 0x680   :  { %v8103_v36 = vpop.f32.mrf.mxu3 }
 0x685   :  { %v8081_v56 = vpop.f32.mrf.mxu2 }
 0x686   :  { %v1751_v14 = vmax.f32 %v1749_v39, %v8081_v56  ;;  %v1761_v39 = vmax.f32 %v7933_v0, %v7946_v17 }
 0x688   :  { %v8106_v40 = vpop.f32.mrf.mxu3 }
 0x68d   :  { %v8093_v52 = vpop.f32.mrf.mxu2 }
 0x68e   :  { %v1752_v61 = vmax.f32 %v1750_v45, %v8093_v52  ;;  %v1764_v45 = vmax.f32 %v1762_v41, %v7960_v35 }
 0x695   :  { %v1632_v54 = vpop.f32.mrf.mxu2 }
 0x696   :  { %v1753_v20 = vmax.f32 %v1751_v14, %v1632_v54  ;;  %v1766_v14 = vmax.f32 %v1764_v45, %v7971_v43 }
 0x698   :  { %v1754_v53 = vmax.f32 %v1752_v61, %v1753_v20  ;;  %v8118_v20 = vpop.f32.mrf.mxu3 }
 0x69a   :  { %v1755_v37 = vrot.slane %v1754_v53, 4 }
 0x69c   :  { %v1756_v51 = vmax.f32 %v1754_v53, %v1755_v37  ;;  %v1763_v53 = vmax.f32 %v1761_v39, %v7956_v12  ;;  %v1768_v37 = vmax.f32 %v1766_v14, %v7983_v25 }
 0x69e   :  { %v1757_v44 = vrot.slane %v1756_v51, 2 }
 0x6a0   :  { %v1758_v27 = vmax.f32 %v1756_v51, %v1757_v44  ;;  %v1765_v51 = vmax.f32 %v1763_v53, %v7967_v49  ;;  %v8132_v14 = vpop.f32.mrf.mxu3 }
 0x6a2   :  { %v1759_v33 = vrot.slane %v1758_v27, 1  ;;  %v1767_v44 = vmax.f32 %v1765_v51, %v7979_v2 }
 0x6a4   :  { %v8108_v46 = vmax.f32 %v1758_v27, %v1759_v33  ;;  %v1769_v27 = vmax.f32 %v1767_v44, %v7991_v11 }
 0x6a6   :  { %v1860_v63 = vsub.f32 %v1632_v54, %v8108_v46  ;;  %v1770_v54 = vmax.f32 %v1768_v37, %v7995_v6  ;;  %v1771_v39 = vmax.f32 %v1769_v27, %v8002_v1 }
 0x6a8   :  { %v1986_v61 = vmul.f32 1.442695, %v1860_v63  ;;  %v1772_v33 = vmax.f32 %v1770_v54, %v8006_v7  ;;  %v1828_v63 = vsub.f32 %v8008_v9, %v8108_v46 }
 0x6aa   :  { %6184 = vpow2.f32 %v1986_v61  ;;  %v1774_v45 = vmax.f32 %v1772_v33, %v8015_v47  ;;  %v1773_v61 = vmax.f32 %v1771_v39, %v8011_v21  ;;  %v1922_v51 = vmul.f32 1.442695, %v1828_v63 }
 0x6ac   :  { %v1776_v53 = vmax.f32 %v1774_v45, %v8023_v42  ;;  %v1775_v37 = vmax.f32 %v1773_v61, %v8019_v34  ;;  %6186 = vpow2.f32 %v1922_v51  ;;  %v8144_v34 = vpop.f32.mrf.mxu3 }
 0x6ae   :  { %v1778_v44 = vmax.f32 %v1776_v53, %v8039_v26  ;;  %v1777_v54 = vmax.f32 %v1775_v37, %v8027_v3 }
 0x6b0   :  { %v6185_v41 = vpop.eup %6184  ;;  %v1780_v9 = vmax.f32 %v1778_v44, %v8047_v5  ;;  %v1779_v27 = vmax.f32 %v1777_v54, %v8043_v10  ;;  %v1826_v54 = vsub.f32 %v8004_v59, %v8108_v46  ;;  %v1816_v59 = vsub.f32 %v7973_v30, %v8108_v46 }
 0x6b1   :  { %2063 = vmatpush.msra.mxu1 %v6185_v41 }
 0x6b2   :  { %v1782_v33 = vmax.f32 %v1780_v9, %v8057_v29  ;;  %v1781_v41 = vmax.f32 %v1779_v27, %v8051_v19  ;;  %v6187_v45 = vpop.eup %6186  ;;  %v1824_v27 = vsub.f32 %v7997_v50, %v8108_v46 }
 0x6b3   :  { %2040 = vmatpush.msra.mxu0 %v6187_v45  ;;  %v1820_v45 = vsub.f32 %v7985_v23, %v8108_v46  ;;  %v1812_v23 = vsub.f32 %v7962_v24, %v8108_v46  ;;  %v1808_v24 = vsub.f32 %v7952_v31, %v8108_v46 }
 0x6b4   :  { %v1784_v39 = vmax.f32 %v1782_v33, %v8077_v15  ;;  %v1783_v63 = vmax.f32 %v1781_v41, %v8061_v8  ;;  %v1822_v41 = vsub.f32 %v7993_v55, %v8108_v46  ;;  %v1814_v55 = vsub.f32 %v7969_v28, %v8108_v46 }
 0x6b5   :  { %v1856_v28 = vsub.f32 %v8081_v56, %v8108_v46  ;;  %v1852_v56 = vsub.f32 %v8059_v62, %v8108_v46 }
 0x6b6   :  { %v1786_v61 = vmax.f32 %v1784_v39, %v8103_v36  ;;  %v1785_v53 = vmax.f32 %v1783_v63, %v8091_v22  ;;  %v1918_v39 = vmul.f32 1.442695, %v1826_v54  ;;  %v1914_v63 = vmul.f32 1.442695, %v1824_v27 }
 0x6b8   :  { %v1788_v51 = vmax.f32 %v1786_v61, %v8118_v20  ;;  %v1787_v37 = vmax.f32 %v1785_v53, %v8106_v40  ;;  %v1818_v53 = vsub.f32 %v7981_v13, %v8108_v46  ;;  %6188 = vpow2.f32 %v1918_v39 }
 0x6b9   :  { %6190 = vpow2.f32 %v1914_v63  ;;  %v1858_v13 = vsub.f32 %v8093_v52, %v8108_v46  ;;  %v1854_v52 = vsub.f32 %v8069_v60, %v8108_v46  ;;  %v1850_v60 = vsub.f32 %v8055_v18, %v8108_v46 }
 0x6ba   :  { %v1790_v44 = vmax.f32 %v1788_v51, %v8144_v34  ;;  %v1789_v9 = vmax.f32 %v1787_v37, %v8132_v14  ;;  %v1910_v51 = vmul.f32 1.442695, %v1822_v41  ;;  %v1906_v37 = vmul.f32 1.442695, %v1820_v45 }
 0x6bb   :  { %v1894_v41 = vmul.f32 1.442695, %v1814_v55  ;;  %v1890_v45 = vmul.f32 1.442695, %v1812_v23  ;;  %v10643_v23 = vld [vmem:[#allocation12_spill] sm:$0xff] }
 0x6bc   :  { %v1791_v33 = vmax.f32 %v1789_v9, %v1790_v44  ;;  %v1902_v44 = vmul.f32 1.442695, %v1818_v53  ;;  %6192 = vpow2.f32 %v1910_v51  ;;  %v1898_v9 = vmul.f32 1.442695, %v1816_v59 }
 0x6bd   :  { %6194 = vpow2.f32 %v1906_v37  ;;  %v1978_v59 = vmul.f32 1.442695, %v1856_v28  ;;  %v10642_v37 = vld [vmem:[#allocation25_spill] sm:$0xff]  ;;  %v1846_v28 = vsub.f32 %v8049_v4, %v8108_v46 }
 0x6be   :  { %v1792_v61 = vrot.slane %v1791_v33, 4  ;;  %v6189_v54 = vpop.eup %6188  ;;  %6196 = vpow2.f32 %v1902_v44  ;;  %v1804_v55 = vsub.f32 %v10642_v37, %v8108_v46  ;;  %v1882_v44 = vmul.f32 1.442695, %v1808_v24  ;;  %v10646_v4 = vld [vmem:[#allocation13_spill] sm:$0xff] }
 0x6bf   :  { %2041 = vmatpush.msra.mxu0 %v6189_v54  ;;  %v6191_v30 = vpop.eup %6190  ;;  %6198 = vpow2.f32 %v1898_v9  ;;  %v1974_v54 = vmul.f32 1.442695, %v1854_v52  ;;  %v1802_v9 = vsub.f32 %v10643_v23, %v8108_v46  ;;  %v1966_v24 = vmul.f32 1.442695, %v1850_v60 }
 0x6c0   :  { %v1793_v50 = vmax.f32 %v1791_v33, %v1792_v61  ;;  %v1810_v33 = vsub.f32 %v7958_v57, %v8108_v46  ;;  %v1982_v61 = vmul.f32 1.442695, %v1858_v13  ;;  %v1806_v57 = vsub.f32 %v7948_v32, %v8108_v46 }
 0x6c1   :  { %2042 = vmatpush.msra.mxu0 %v6191_v30  ;;  %6200 = vpow2.f32 %v1894_v41  ;;  %v1848_v13 = vsub.f32 %v8053_v38, %v8108_v46  ;;  %v1874_v41 = vmul.f32 1.442695, %v1804_v55  ;;  %v10645_v38 = vld [vmem:[#allocation10_spill] sm:$0xff]  ;;  %v1958_v55 = vmul.f32 1.442695, %v1846_v28 }
 0x6c2   :  { %v1794_v27 = vrot.slane %v1793_v50, 2  ;;  %v6193_v39 = vpop.eup %6192  ;;  %v1886_v51 = vmul.f32 1.442695, %v1810_v33  ;;  %6202 = vpow2.f32 %v1890_v45  ;;  %v1878_v62 = vmul.f32 1.442695, %v1806_v57  ;;  %v10644_v33 = vld [vmem:[#allocation11_spill] sm:$0xff] }
 0x6c3   :  { %2043 = vmatpush.msra.mxu0 %v6193_v39  ;;  %v6195_v53 = vpop.eup %6194  ;;  %6204 = vpow2.f32 %v1982_v61  ;;  %v1800_v18 = vsub.f32 %v10644_v33, %v8108_v46  ;;  %v1798_v52 = vsub.f32 %v10645_v38, %v8108_v46  ;;  %v1870_v61 = vmul.f32 1.442695, %v1802_v9 }
 0x6c4   :  { %v1795_v63 = vmax.f32 %v1793_v50, %v1794_v27  ;;  %v6197_v31 = vpop.eup %6196  ;;  %6206 = vpow2.f32 %v1886_v51  ;;  %v1970_v27 = vmul.f32 1.442695, %v1852_v56  ;;  %v1844_v57 = vsub.f32 %v8045_v58, %v8108_v46  ;;  %v10647_v58 = vld [vmem:[#allocation19_spill] sm:$0xff] }
 0x6c5   :  { %2044 = vmatpush.msra.mxu0 %v6195_v53  ;;  %v6199_v32 = vpop.eup %6198  ;;  %6208 = vpow2.f32 %v1978_v59  ;;  %v1962_v51 = vmul.f32 1.442695, %v1848_v13  ;;  %v1866_v59 = vmul.f32 1.442695, %v1800_v18  ;;  %v1840_v60 = vsub.f32 %v10647_v58, %v8108_v46  ;;  %v10652_v58 = vld [vmem:[#allocation24_spill] sm:$0xff] }
 0x6c6   :  { %v1796_v50 = vrot.slane %v1795_v63, 1  ;;  %6210 = vpow2.f32 %v1882_v44  ;;  %v1954_v23 = vmul.f32 1.442695, %v1844_v57 }
 0x6c7   :  { %2045 = vmatpush.msra.mxu0 %v6197_v31  ;;  %v6201_v30 = vpop.eup %6200  ;;  %6212 = vpow2.f32 %v1974_v54  ;;  %v1946_v28 = vmul.f32 1.442695, %v1840_v60  ;;  %v1830_v60 = vsub.f32 %v10652_v58, %v8108_v46 }
 0x6c8   :  { %v8193_v39 = vmax.f32 %v1795_v63, %v1796_v50  ;;  %v6203_v45 = vpop.eup %6202  ;;  %6214 = vpow2.f32 %v1878_v62  ;;  %v1842_v63 = vsub.f32 %v10646_v4, %v8108_v46  ;;  %v1862_v50 = vmul.f32 1.442695, %v1798_v52 }
 0x6c9   :  { %2046 = vmatpush.msra.mxu0 %v6199_v32  ;;  %v6205_v53 = vpop.eup %6204  ;;  %6216 = vpow2.f32 %v1970_v27 }
 0x6ca   :  { %v6207_v56 = vpop.eup %6206  ;;  %6218 = vpow2.f32 %v1874_v41  ;;  %2064 = vmatpush.msra.mxu1 %v6205_v53  ;;  %v1829_v37 = vsub.f32 %v8015_v47, %v8193_v39  ;;  %v1827_v32 = vsub.f32 %v8011_v21, %v8193_v39  ;;  %v10648_v47 = vld [vmem:[#allocation18_spill] sm:$0xff]  ;;  %v1950_v13 = vmul.f32 1.442695, %v1842_v63  ;;  %v10649_v21 = vld [vmem:[#allocation21_spill] sm:$0xff] }
 0x6cb   :  { %2047 = vmatpush.msra.mxu0 %v6201_v30  ;;  %v6209_v31 = vpop.eup %6208  ;;  %6220 = vpow2.f32 %v1966_v24  ;;  %v1838_v62 = vsub.f32 %v10648_v47, %v8108_v46  ;;  %v1825_v30 = vsub.f32 %v8006_v7, %v8193_v39  ;;  %v1836_v41 = vsub.f32 %v10649_v21, %v8108_v46  ;;  %v10650_v7 = vld [vmem:[#allocation20_spill] sm:$0xff] }
 0x6cc   :  { %v6211_v44 = vpop.eup %6210  ;;  %6222 = vpow2.f32 %v1870_v61  ;;  %2065 = vmatpush.msra.mxu1 %v6209_v31  ;;  %v1924_v33 = vmul.f32 1.442695, %v1829_v37  ;;  %v1920_v38 = vmul.f32 1.442695, %v1827_v32  ;;  %v1834_v61 = vsub.f32 %v10650_v7, %v8108_v46 }
 0x6cd   :  { %2048 = vmatpush.msra.mxu0 %v6203_v45  ;;  %v6213_v54 = vpop.eup %6212  ;;  %6224 = vpow2.f32 %v1962_v51  ;;  %v1823_v45 = vsub.f32 %v8002_v1, %v8193_v39  ;;  %v1942_v53 = vmul.f32 1.442695, %v1838_v62  ;;  %v1821_v51 = vsub.f32 %v7995_v6, %v8193_v39  ;;  %v10651_v1 = vld [vmem:[#allocation16_spill] sm:$0xff] }
 0x6ce   :  { %v6215_v9 = vpop.eup %6214  ;;  %6226 = vpow2.f32 %v1866_v59  ;;  %2066 = vmatpush.msra.mxu1 %v6213_v54  ;;  %v1832_v63 = vsub.f32 %v10651_v1, %v8108_v46  ;;  %v1938_v59 = vmul.f32 1.442695, %v1836_v41  ;;  %v1819_v37 = vsub.f32 %v7991_v11, %v8193_v39 }
 0x6cf   :  { %2049 = vmatpush.msra.mxu0 %v6207_v56  ;;  %v6217_v27 = vpop.eup %6216  ;;  %6228 = vpow2.f32 %v1958_v55  ;;  %v1916_v56 = vmul.f32 1.442695, %v1825_v30  ;;  %v1912_v55 = vmul.f32 1.442695, %v1823_v45  ;;  %v1817_v32 = vsub.f32 %v7983_v25, %v8193_v39 }
 0x6d0   :  { %v6219_v18 = vpop.eup %6218  ;;  %6230 = vpow2.f32 %v1862_v50  ;;  %2067 = vmatpush.msra.mxu1 %v6217_v27  ;;  %v1934_v50 = vmul.f32 1.442695, %v1834_v61  ;;  %v1930_v47 = vmul.f32 1.442695, %v1832_v63  ;;  %v1815_v62 = vsub.f32 %v7979_v2, %v8193_v39 }
 0x6d1   :  { %2050 = vmatpush.msra.mxu0 %v6211_v44  ;;  %v6221_v24 = vpop.eup %6220  ;;  %6232 = vpow2.f32 %v1954_v23  ;;  %v8223_v44 = vpop.f32.mrf.mxu0  ;;  %v1908_v23 = vmul.f32 1.442695, %v1821_v51  ;;  %v1813_v25 = vsub.f32 %v7971_v43, %v8193_v39  ;;  %v1926_v30 = vmul.f32 1.442695, %v1830_v60 }
 0x6d2   :  { %v6223_v52 = vpop.eup %6222  ;;  %6234 = vpow2.f32 %v1950_v13  ;;  %2068 = vmatpush.msra.mxu1 %v6221_v24  ;;  %v1904_v13 = vmul.f32 1.442695, %v1819_v37  ;;  %v1811_v2 = vsub.f32 %v7967_v49, %v8193_v39  ;;  %v1857_v43 = vsub.f32 %v8118_v20, %v8193_v39 }
 0x6d3   :  { %2051 = vmatpush.msra.mxu0 %v6215_v9  ;;  %v6225_v57 = vpop.eup %6224  ;;  %6236 = vpow2.f32 %v1924_v33  ;;  %v1861_v9 = vsub.f32 %v8144_v34, %v8193_v39  ;;  %v1859_v33 = vsub.f32 %v8132_v14, %v8193_v39  ;;  %v1896_v24 = vmul.f32 1.442695, %v1815_v62 }
 0x6d4   :  { %v6227_v4 = vpop.eup %6226  ;;  %6238 = vpow2.f32 %v1946_v28  ;;  %2069 = vmatpush.msra.mxu1 %v6225_v57  ;;  %v1809_v14 = vsub.f32 %v7960_v35, %v8193_v39  ;;  %v1855_v49 = vsub.f32 %v8106_v40, %v8193_v39  ;;  %v1807_v20 = vsub.f32 %v7956_v12, %v8193_v39 }
 0x6d5   :  { %2052 = vmatpush.msra.mxu0 %v6219_v18  ;;  %v6229_v31 = vpop.eup %6228  ;;  %6240 = vpow2.f32 %v1920_v38  ;;  %v1900_v18 = vmul.f32 1.442695, %v1817_v32  ;;  %v1988_v41 = vmul.f32 1.442695, %v1861_v9  ;;  %v1892_v38 = vmul.f32 1.442695, %v1813_v25 }
 0x6d6   :  { %v6231_v6 = vpop.eup %6230  ;;  %6242 = vpow2.f32 %v1942_v53  ;;  %2070 = vmatpush.msra.mxu1 %v6229_v31  ;;  %v1984_v7 = vmul.f32 1.442695, %v1859_v33  ;;  %v1888_v53 = vmul.f32 1.442695, %v1811_v2  ;;  %v1853_v35 = vsub.f32 %v8103_v36, %v8193_v39 }
 0x6d7   :  { %2053 = vmatpush.msra.mxu0 %v6223_v52  ;;  %v6233_v54 = vpop.eup %6232  ;;  %6244 = vpow2.f32 %v1916_v56  ;;  %v1980_v51 = vmul.f32 1.442695, %v1857_v43  ;;  %v10653_v56 = vmov 1.0   ;;  %v1805_v40 = vsub.f32 %v7950_v48, %v8193_v39 }
 0x6d8   :  { %v6235_v11 = vpop.eup %6234  ;;  %6246 = vpow2.f32 %v1938_v59  ;;  %2071 = vmatpush.msra.mxu1 %v6233_v54  ;;  %v1884_v1 = vmul.f32 1.442695, %v1809_v14  ;;  %v1851_v63 = vsub.f32 %v8091_v22, %v8193_v39  ;;  %v1976_v59 = vmul.f32 1.442695, %v1855_v49 }
 0x6d9   :  { %2054 = vmatpush.msra.mxu0 %v6227_v4  ;;  %v6237_v46 = vpop.eup %6236  ;;  %6248 = vpow2.f32 %v1912_v55  ;;  %v1803_v36 = vsub.f32 %v7946_v17, %v8193_v39  ;;  %v1880_v37 = vmul.f32 1.442695, %v1807_v20  ;;  %v8257_v55 = vpop.f32.mrf.mxu1  ;;  %v1972_v58 = vmul.f32 1.442695, %v1853_v35 }
 0x6da   :  { %v6239_v27 = vpop.eup %6238  ;;  %6250 = vpow2.f32 %v1934_v50  ;;  %2072 = vmatpush.msra.mxu1 %v6235_v11  ;;  %v1801_v22 = vsub.f32 %v7940_v16, %v8193_v39  ;;  %v1876_v50 = vmul.f32 1.442695, %v1805_v40  ;;  %v1847_v54 = vsub.f32 %v8061_v8, %v8193_v39 }
 0x6db   :  { %2055 = vmatpush.msra.mxu0 %v6231_v6  ;;  %v6241_v34 = vpop.eup %6240  ;;  %6252 = vpow2.f32 %v1908_v23  ;;  %v1849_v6 = vsub.f32 %v8077_v15, %v8193_v39  ;;  %v1968_v32 = vmul.f32 1.442695, %v1851_v63  ;;  %v1799_v15 = vsub.f32 %v7933_v0, %v8193_v39 }
 0x6dc   :  { %2056 = vmatmul.f32.vlgmr.msra.gmra.mxu0 %v8223_v44  ;;  %v6243_v21 = vpop.eup %6242  ;;  %6254 = vpow2.f32 %v1930_v47  ;;  %2073 = vmatpush.msra.mxu1 %v6239_v27  ;;  %v1872_v11 = vmul.f32 1.442695, %v1803_v36  ;;  %v1845_v9 = vsub.f32 %v8057_v29, %v8193_v39  ;;  %v1868_v8 = vmul.f32 1.442695, %v1801_v22  ;;  %v10656_v36 = vld [vmem:[#allocation9_spill] sm:$0xff] }
 0x6dd   :  { %2086 = vmatpush.msrb.mxu0 %v6237_v46  ;;  %v6245_v28 = vpop.eup %6244  ;;  %6256 = vpow2.f32 %v1904_v13  ;;  %v1964_v47 = vmul.f32 1.442695, %v1849_v6  ;;  %v1843_v13 = vsub.f32 %v8051_v19, %v8193_v39  ;;  %v1960_v0 = vmul.f32 1.442695, %v1847_v54 }
 0x6de   :  { %v6247_v45 = vpop.eup %6246  ;;  %6258 = vpow2.f32 %v1926_v30  ;;  %2074 = vmatpush.msra.mxu1 %v6243_v21  ;;  %v1864_v25 = vmul.f32 1.442695, %v1799_v15  ;;  %v1841_v29 = vsub.f32 %v8047_v5, %v8193_v39  ;;  %v1839_v19 = vsub.f32 %v8043_v10, %v8193_v39 }
 0x6df   :  { %2087 = vmatpush.msrb.mxu0 %v6241_v34  ;;  %v6249_v52 = vpop.eup %6248  ;;  %6260 = vpow2.f32 %v1900_v18  ;;  %v1956_v34 = vmul.f32 1.442695, %v1845_v9  ;;  %v1952_v21 = vmul.f32 1.442695, %v1843_v13  ;;  %v1833_v49 = vsub.f32 %v8023_v42, %v8193_v39 }
 0x6e0   :  { %v6251_v61 = vpop.eup %6250  ;;  %6262 = vpow2.f32 %v1988_v41  ;;  %2075 = vmatpush.msra.mxu1 %v6247_v45  ;;  %v8277_v41 = vpop.trf.xlu2  ;;  %v1948_v43 = vmul.f32 1.442695, %v1841_v29  ;;  %v1835_v45 = vsub.f32 %v8027_v3, %v8193_v39  ;;  %v1944_v14 = vmul.f32 1.442695, %v1839_v19 }
 0x6e1   :  { %2088 = vmatpush.msrb.mxu0 %v6245_v28  ;;  %v6253_v57 = vpop.eup %6252  ;;  %6264 = vpow2.f32 %v1896_v24  ;;  %v1837_v28 = vsub.f32 %v8039_v26, %v8193_v39  ;;  %v10654_v26 = vld [vmem:[#allocation8_spill] sm:$0xff]  ;;  %v1932_v40 = vmul.f32 1.442695, %v1833_v49 }
 0x6e2   :  { %v6255_v4 = vpop.eup %6254  ;;  %6266 = vpow2.f32 %v1892_v38  ;;  %2076 = vmatpush.msra.mxu1 %v6251_v61  ;;  %v2168_v61 = vrot.slane %v10654_v26, 3  ;;  %v1936_v35 = vmul.f32 1.442695, %v1835_v45  ;;  %v10660_v45 = vld [vmem:[#allocation22_spill] sm:$0xff] }
 0x6e3   :  { %2089 = vmatpush.msrb.mxu0 %v6249_v52  ;;  %v6257_v12 = vpop.eup %6256  ;;  %6268 = vpow2.f32 %v1984_v7  ;;  %v1940_v7 = vmul.f32 1.442695, %v1837_v28 }
 0x6e4   :  { %2059 = vmatmul.f32.gmra.mxu0 %v10653_v56  ;;  %v6259_v31 = vpop.eup %6258  ;;  %6270 = vpow2.f32 %v1888_v53  ;;  %2077 = vmatpush.msra.mxu1 %v6255_v4  ;;  %v2219_v42 = vsel %vm179_vm1, %v2168_v61, 0 }
 0x6e5   :  { %2090 = vmatpush.msrb.mxu0 %v6253_v57  ;;  %v6261_v48 = vpop.eup %6260  ;;  %6272 = vpow2.f32 %v1980_v51  ;;  %v10655_v57 = vld [vmem:[#allocation15_spill] sm:$0xff] }
 0x6e6   :  { %v6263_v60 = vpop.eup %6262  ;;  %6274 = vpow2.f32 %v1884_v1  ;;  %2078 = vmatpush.msra.mxu1 %v6259_v31  ;;  %v1831_v3 = vsub.f32 %v10655_v57, %v8193_v39  ;;  %v10663_v57 = vld [vmem:[#allocation26_spill] sm:$0xff] }
 0x6e7   :  { %2091 = vmatpush.msrb.mxu0 %v6257_v12  ;;  %v6265_v17 = vpop.eup %6264  ;;  %6276 = vpow2.f32 %v1976_v59  ;;  %2079 = vmatmul.f32.vlgmr.msra.gmra.mxu1 %v8257_v55 }
 0x6e8   :  { %v6267_v23 = vpop.eup %6266  ;;  %6278 = vpow2.f32 %v1880_v37  ;;  %2109 = vmatpush.msrb.mxu1 %v6263_v60  ;;  %v8288_v51 = vpop.trf.xlu2  ;;  %v1928_v12 = vmul.f32 1.442695, %v1831_v3  ;;  %v2169_v37 = vrot.slane %v10656_v36, 3 }
 0x6e9   :  { %2092 = vmatpush.msrb.mxu0 %v6261_v48  ;;  %v6269_v16 = vpop.eup %6268  ;;  %6280 = vpow2.f32 %v1972_v58 }
 0x6ea   :  { %v6271_v46 = vpop.eup %6270  ;;  %6282 = vpow2.f32 %v1876_v50  ;;  %2110 = vmatpush.msrb.mxu1 %v6269_v16  ;;  %v2222_v6 = vsel %vm179_vm1, %v2169_v37, 0 }
 0x6eb   :  { %2093 = vmatpush.msrb.mxu0 %v6265_v17  ;;  %v6273_v62 = vpop.eup %6272  ;;  %6284 = vpow2.f32 %v1968_v32 }
 0x6ec   :  { %v6275_v27 = vpop.eup %6274  ;;  %6286 = vpow2.f32 %v1872_v11  ;;  %2111 = vmatpush.msrb.mxu1 %v6273_v62 }
 0x6ed   :  { %2094 = vmatpush.msrb.mxu0 %v6267_v23  ;;  %v6277_v30 = vpop.eup %6276  ;;  %6288 = vpow2.f32 %v1964_v47  ;;  %v6976_v47 = vld [vmem:[#allocation2] sm:$0xff] }
 0x6ee   :  { %v6279_v33 = vpop.eup %6278  ;;  %6290 = vpow2.f32 %v1868_v8  ;;  %2112 = vmatpush.msrb.mxu1 %v6277_v30  ;;  %2668 = vrot.lane.b32.xlu2 %v6976_v47, %s7041_s5 }
 0x6ef   :  { %2095 = vmatpush.msrb.mxu0 %v6271_v46  ;;  %v6281_v18 = vpop.eup %6280  ;;  %6292 = vpow2.f32 %v1960_v0  ;;  %2082 = vmatmul.f32.gmra.mxu1 %v10653_v56 }
 0x6f0   :  { %v6283_v2 = vpop.eup %6282  ;;  %6294 = vpow2.f32 %v1864_v25  ;;  %2113 = vmatpush.msrb.mxu1 %v6281_v18  ;;  %v2154_v59 = vpop.trf.xlu2 }
 0x6f1   :  { %2096 = vmatpush.msrb.mxu0 %v6275_v27  ;;  %v6285_v5 = vpop.eup %6284  ;;  %6296 = vpow2.f32 %v1956_v34 }
 0x6f2   :  { %v6287_v24 = vpop.eup %6286  ;;  %2114 = vmatpush.msrb.mxu1 %v6285_v5  ;;  %6298 = vpow2.f32 %v1952_v21 }
 0x6f3   :  { %2097 = vmatpush.msrb.mxu0 %v6279_v33  ;;  %v6289_v10 = vpop.eup %6288  ;;  %6300 = vpow2.f32 %v1948_v43 }
 0x6f4   :  { %v6291_v38 = vpop.eup %6290  ;;  %2115 = vmatpush.msrb.mxu1 %v6289_v10  ;;  %6302 = vpow2.f32 %v1944_v14 }
 0x6f5   :  { %2098 = vmatpush.msrb.mxu0 %v6283_v2  ;;  %v6293_v52 = vpop.eup %6292  ;;  %6304 = vpow2.f32 %v1940_v7 }
 0x6f6   :  { %v6295_v20 = vpop.eup %6294  ;;  %2116 = vmatpush.msrb.mxu1 %v6293_v52  ;;  %6306 = vpow2.f32 %v1936_v35 }
 0x6f7   :  { %2099 = vmatpush.msrb.mxu0 %v6287_v24  ;;  %v6297_v53 = vpop.eup %6296  ;;  %6308 = vpow2.f32 %v1932_v40 }
 0x6f8   :  { %2117 = vmatpush.msrb.mxu1 %v6297_v53  ;;  %v6299_v4 = vpop.eup %6298  ;;  %6310 = vpow2.f32 %v1928_v12  ;;  %v8296_v58 = vpop.trf.xlu2 }
 0x6f9   :  { %2100 = vmatpush.msrb.mxu0 %v6291_v38  ;;  %v6301_v1 = vpop.eup %6300 }
 0x6fa   :  { %2118 = vmatpush.msrb.mxu1 %v6299_v4  ;;  %v6303_v39 = vpop.eup %6302 }
 0x6fb   :  { %2101 = vmatpush.msrb.mxu0 %v6295_v20  ;;  %v6305_v63 = vpop.eup %6304 }
 0x6fc   :  { %2102 = vmatmul.f32.vlgmr.msrb.gmra.mxu0 %v8223_v44  ;;  %2119 = vmatpush.msrb.mxu1 %v6301_v1  ;;  %v6307_v31 = vpop.eup %6306 }
 0x6fd   :  { %2231 = vmatpush.bf16.msra.mxu0 %v2219_v42  ;;  %v6309_v44 = vpop.eup %6308 }
 0x6fe   :  { %2120 = vmatpush.msrb.mxu1 %v6303_v39  ;;  %v6311_v48 = vpop.eup %6310 }
 0x700   :  { %2121 = vmatpush.msrb.mxu1 %v6305_v63  ;;  %v2156_v60 = vpop.trf.xlu2 }
 0x702   :  { %2122 = vmatpush.msrb.mxu1 %v6307_v31 }
 0x704   :  { %2105 = vmatmul.f32.gmra.mxu0 %v10653_v56  ;;  %2123 = vmatpush.msrb.mxu1 %v6309_v44 }
 0x706   :  { %2124 = vmatpush.msrb.mxu1 %v6311_v48 }
 0x707   :  { %2125 = vmatmul.f32.vlgmr.msrb.gmra.mxu1 %v8257_v55 }
 0x708   :  { %2320 = vmatpush.bf16.msra.mxu1 %v2222_v6  ;;  %v8304_v22 = vpop.trf.xlu2 }
 0x70c   :  { %5722 = vmatmul.msk.bf16.vlgmr.msra.gmra.mxu0 %vm130_vm2, %v8277_v41 }
 0x70f   :  { %2128 = vmatmul.f32.gmra.mxu1 %v10653_v56 }
 0x710   :  { %v2158_v50 = vpop.trf.xlu2 }
 0x717   :  { %5738 = vmatmul.msk.bf16.vlgmr.msra.gmra.mxu1 %vm130_vm2, %v8277_v41 }
 0x718   :  { %v8308_v55 = vpop.trf.xlu2 }
 0x71c   :  { %5723 = vmatmul.msk.bf16.gmra.mxu0 %vm130_vm2, %v2154_v59 }
 0x720   :  { %v2160_v17 = vpop.trf.xlu2 }
 0x727   :  { %5739 = vmatmul.msk.bf16.gmra.mxu1 %vm130_vm2, %v2154_v59 }
 0x728   :  { %v8312_v54 = vpop.trf.xlu2 }
 0x72c   :  { %5724 = vmatmul.msk.bf16.gmra.mxu0 %vm130_vm2, %v2156_v60 }
 0x730   :  { %v2162_v32 = vpop.trf.xlu2 }
 0x737   :  { %5740 = vmatmul.msk.bf16.gmra.mxu1 %vm130_vm2, %v2156_v60 }
 0x738   :  { %v8317_v23 = vpop.trf.xlu2 }
 0x73c   :  { %5725 = vmatmul.msk.bf16.gmra.mxu0 %vm130_vm2, %v2158_v50 }
 0x740   :  { %v2164_v11 = vpop.trf.xlu2 }
 0x747   :  { %5741 = vmatmul.msk.bf16.gmra.mxu1 %vm130_vm2, %v2158_v50 }
 0x748   :  { %v8322_v62 = vpop.trf.xlu2 }
 0x74c   :  { %5726 = vmatmul.msk.bf16.gmra.mxu0 %vm130_vm2, %v2160_v17 }
 0x750   :  { %v2166_v30 = vpop.trf.xlu2 }
 0x757   :  { %5742 = vmatmul.msk.bf16.gmra.mxu1 %vm130_vm2, %v2160_v17 }
 0x759   :  { %v2057_v15 = vpop.f32.mrf.mxu0 }
 0x75c   :  { %5727 = vmatmul.msk.bf16.gmra.mxu0 %vm130_vm2, %v2162_v32 }
 0x761   :  { %v2060_v46 = vpop.f32.mrf.mxu0 }
 0x764   :  { %v2080_v16 = vpop.f32.mrf.mxu1 }
 0x765   :  { %v2081_v9 = vadd.f32 %v2080_v16, %v2057_v15 }
 0x767   :  { %5743 = vmatmul.msk.bf16.gmra.mxu1 %vm130_vm2, %v2162_v32 }
 0x76c   :  { %5728 = vmatmul.msk.bf16.gmra.mxu0 %vm130_vm2, %v2164_v11  ;;  %v2083_v8 = vpop.f32.mrf.mxu1 }
 0x76d   :  { %v2084_v13 = vadd.f32 %v2083_v8, %v2060_v46 }
 0x76f   :  { %6312 = vrcp.f32 %v2084_v13 }
 0x775   :  { %v6313_v0 = vpop.eup %6312 }
 0x776   :  { %v2134_v27 = vperm.slane %v6313_v0, 0 }
 0x777   :  { %5744 = vmatmul.msk.bf16.gmra.mxu1 %vm130_vm2, %v2164_v11 }
 0x778   :  { %v2136_v29 = vmul.f32 %v2134_v27, %v2081_v9 }
 0x779   :  { %v2103_v25 = vpop.f32.mrf.mxu0 }
 0x77a   :  { %v8342_v14 = vadd.f32 %v2136_v29, %v10660_v45 }
 0x77c   :  { %5729 = vmatmul.msk.bf16.gmra.mxu0 %vm130_vm2, %v2166_v30  ;;  %10661 = vst [vmem:[#allocation11_spill] sm:$0xff] %v8342_v14 }
 0x781   :  { %v2106_v34 = vpop.f32.mrf.mxu0 }
 0x784   :  { %v2126_v33 = vpop.f32.mrf.mxu1 }
 0x785   :  { %v2127_v18 = vadd.f32 %v2126_v33, %v2103_v25 }
 0x787   :  { %5745 = vmatmul.msk.bf16.gmra.mxu1 %vm130_vm2, %v2166_v30 }
 0x789   :  { %v8326_v19 = vpop.f32.mrf.mxu0 }
 0x78a   :  { %10657 = vst [vmem:[#allocation23_spill] sm:$0xff] %v8326_v19 }
 0x78c   :  { %5730 = vmatmul.msk.bf16.gmra.mxu0 %vm130_vm2, %v8288_v51  ;;  %v2129_v21 = vpop.f32.mrf.mxu1 }
 0x78d   :  { %v2130_v41 = vadd.f32 %v2129_v21, %v2106_v34 }
 0x78f   :  { %6314 = vrcp.f32 %v2130_v41 }
 0x791   :  { %v8331_v2 = vpop.f32.mrf.mxu0 }
 0x792   :  { %10658 = vst [vmem:[#allocation25_spill] sm:$0xff] %v8331_v2 }
 0x794   :  { %v8333_v5 = vpop.f32.mrf.mxu1 }
 0x795   :  { %v6315_v28 = vpop.eup %6314 }
 0x796   :  { %v2135_v43 = vperm.slane %v6315_v28, 0 }
 0x797   :  { %5746 = vmatmul.msk.bf16.gmra.mxu1 %vm130_vm2, %v8288_v51 }
 0x798   :  { %v2137_v10 = vmul.f32 %v2135_v43, %v2127_v18 }
 0x799   :  { %v8335_v24 = vpop.f32.mrf.mxu0 }
 0x79a   :  { %10659 = vst [vmem:[#allocation12_spill] sm:$0xff] %v8335_v24  ;;  %v8369_v3 = vadd.f32 %v2137_v10, %v10663_v57  ;;  %v2402_v41 = vmax.f32 %v8326_v19, %v8335_v24 }
 0x79c   :  { %5731 = vmatmul.msk.bf16.gmra.mxu0 %vm130_vm2, %v8296_v58  ;;  %v8344_v38 = vpop.f32.mrf.mxu1  ;;  %10664 = vst [vmem:[#allocation13_spill] sm:$0xff] %v8369_v3 }
 0x7a1   :  { %v8346_v52 = vpop.f32.mrf.mxu0 }
 0x7a2   :  { %10662 = vst [vmem:[#allocation10_spill] sm:$0xff] %v8346_v52  ;;  %v2403_v28 = vmax.f32 %v8331_v2, %v8346_v52 }
 0x7a4   :  { %v8348_v49 = vpop.f32.mrf.mxu1 }
 0x7a7   :  { %5747 = vmatmul.msk.bf16.gmra.mxu1 %vm130_vm2, %v8296_v58  ;;  %v2167_v58 = vpop.trf.xlu2 }
 0x7a9   :  { %v8350_v7 = vpop.f32.mrf.mxu0 }
 0x7aa   :  { %v2404_v43 = vmax.f32 %v2402_v41, %v8350_v7 }
 0x7ac   :  { %5732 = vmatmul.msk.bf16.gmra.mxu0 %vm130_vm2, %v8304_v22  ;;  %v8356_v26 = vpop.f32.mrf.mxu1 }
 0x7af   :  { %v8437_v11 = vpop.permute.xlu2 %2668 }
 0x7b0   :  { %10669 = vst [vmem:[#allocation16_spill] sm:$0xff] %v8437_v11  ;;  %5755 = vmatmul.msk.f32.vlgmr.msrb.gmra.mxu2 %vm130_vm2, %v8437_v11  ;;  %5757 = vmatmul.msk.f32.vlgmr.msrb.gmra.mxu3 %vm130_vm2, %v8437_v11 }
 0x7b1   :  { %v8358_v61 = vpop.f32.mrf.mxu0 }
 0x7b2   :  { %v2405_v10 = vmax.f32 %v2403_v28, %v8358_v61 }
 0x7b4   :  { %v8360_v20 = vpop.f32.mrf.mxu1 }
 0x7b7   :  { %5748 = vmatmul.msk.bf16.gmra.mxu1 %vm130_vm2, %v8304_v22 }
 0x7b9   :  { %v8362_v53 = vpop.f32.mrf.mxu0 }
 0x7ba   :  { %v2406_v57 = vmax.f32 %v2404_v43, %v8362_v53 }
 0x7bc   :  { %5733 = vmatmul.msk.bf16.gmra.mxu0 %vm130_vm2, %v8308_v55  ;;  %v8371_v35 = vpop.f32.mrf.mxu1 }
 0x7c1   :  { %v8373_v51 = vpop.f32.mrf.mxu0 }
 0x7c4   :  { %v8375_v4 = vpop.f32.mrf.mxu1 }
 0x7c7   :  { %5749 = vmatmul.msk.bf16.gmra.mxu1 %vm130_vm2, %v8308_v55 }
 0x7c9   :  { %v8377_v40 = vpop.f32.mrf.mxu0 }
 0x7ca   :  { %v2408_v11 = vmax.f32 %v2406_v57, %v8377_v40 }
 0x7cc   :  { %5734 = vmatmul.msk.bf16.gmra.mxu0 %vm130_vm2, %v8312_v54  ;;  %v8383_v42 = vpop.f32.mrf.mxu1 }
 0x7d1   :  { %v8385_v1 = vpop.f32.mrf.mxu0 }
 0x7d4   :  { %v8387_v12 = vpop.f32.mrf.mxu1 }
 0x7d7   :  { %5750 = vmatmul.msk.bf16.gmra.mxu1 %vm130_vm2, %v8312_v54 }
 0x7d9   :  { %v8389_v39 = vpop.f32.mrf.mxu0 }
 0x7da   :  { %v2410_v14 = vmax.f32 %v2408_v11, %v8389_v39 }
 0x7dc   :  { %5735 = vmatmul.msk.bf16.gmra.mxu0 %vm130_vm2, %v8317_v23  ;;  %v8395_v63 = vpop.f32.mrf.mxu1 }
 0x7e1   :  { %v8397_v59 = vpop.f32.mrf.mxu0 }
 0x7e4   :  { %v8399_v31 = vpop.f32.mrf.mxu1 }
 0x7e7   :  { %5751 = vmatmul.msk.bf16.gmra.mxu1 %vm130_vm2, %v8317_v23 }
 0x7e9   :  { %v8401_v44 = vpop.f32.mrf.mxu0 }
 0x7ea   :  { %v2412_v41 = vmax.f32 %v2410_v14, %v8401_v44 }
 0x7ec   :  { %5736 = vmatmul.msk.bf16.gmra.mxu0 %vm130_vm2, %v8322_v62  ;;  %v8407_v36 = vpop.f32.mrf.mxu1 }
 0x7f1   :  { %v8409_v37 = vpop.f32.mrf.mxu0 }
 0x7f4   :  { %v8411_v48 = vpop.f32.mrf.mxu1 }
 0x7f7   :  { %5752 = vmatmul.msk.bf16.gmra.mxu1 %vm130_vm2, %v8322_v62 }
 0x7f9   :  { %v8413_v6 = vpop.f32.mrf.mxu0 }
 0x7fa   :  { %v2414_v43 = vmax.f32 %v2412_v41, %v8413_v6 }
 0x7fc   :  { %5737 = vmatmul.msk.bf16.gmra.mxu0 %vm130_vm2, %v2167_v58  ;;  %v8418_v60 = vpop.f32.mrf.mxu1 }
 0x801   :  { %v8420_v22 = vpop.f32.mrf.mxu0 }
 0x804   :  { %v8422_v50 = vpop.f32.mrf.mxu1 }
 0x807   :  { %5753 = vmatmul.msk.bf16.gmra.mxu1 %vm130_vm2, %v2167_v58  ;;  %v2407_v58 = vmax.f32 %v2405_v10, %v8373_v51 }
 0x809   :  { %v8424_v55 = vpop.f32.mrf.mxu0  ;;  %v2409_v3 = vmax.f32 %v2407_v58, %v8385_v1 }
 0x80a   :  { %10665 = vst [vmem:[#allocation19_spill] sm:$0xff] %v8424_v55  ;;  %v2416_v57 = vmax.f32 %v2414_v43, %v8424_v55 }
 0x80b   :  { %v2411_v56 = vmax.f32 %v2409_v3, %v8397_v59 }
 0x80c   :  { %v8427_v17 = vpop.f32.mrf.mxu1 }
 0x80d   :  { %v2413_v28 = vmax.f32 %v2411_v56, %v8409_v37 }
 0x80f   :  { %v2415_v10 = vmax.f32 %v2413_v28, %v8420_v22 }
 0x811   :  { %v8429_v54 = vpop.f32.mrf.mxu0 }
 0x812   :  { %10666 = vst [vmem:[#allocation18_spill] sm:$0xff] %v8429_v54  ;;  %v2417_v58 = vmax.f32 %v2415_v10, %v8429_v54 }
 0x814   :  { %v8431_v32 = vpop.f32.mrf.mxu1 }
 0x815   :  { %10667 = vst [vmem:[#allocation21_spill] sm:$0xff] %v8431_v32 }
 0x819   :  { %v8433_v23 = vpop.f32.mrf.mxu0 }
 0x81a   :  { %10668 = vst [vmem:[#allocation20_spill] sm:$0xff] %v8433_v23  ;;  %v2418_v11 = vmax.f32 %v2416_v57, %v8433_v23 }
 0x81c   :  { %v8435_v15 = vpop.f32.mrf.mxu1 }
 0x821   :  { %v8439_v16 = vpop.f32.mrf.mxu0 }
 0x822   :  { %10670 = vst [vmem:[#allocation24_spill] sm:$0xff] %v8439_v16  ;;  %v2419_v3 = vmax.f32 %v2417_v58, %v8439_v16 }
 0x824   :  { %v8445_v9 = vpop.f32.mrf.mxu1 }
 0x829   :  { %v8447_v47 = vpop.f32.mrf.mxu0 }
 0x82a   :  { %10671 = vst [vmem:[#allocation8_spill] sm:$0xff] %v8447_v47  ;;  %v2420_v24 = vmax.f32 %v2418_v11, %v8447_v47 }
 0x82c   :  { %v8451_v8 = vpop.f32.mrf.mxu1 }
 0x831   :  { %v8449_v46 = vpop.f32.mrf.mxu0 }
 0x832   :  { %10672 = vst [vmem:[#allocation15_spill] sm:$0xff] %v8449_v46  ;;  %v2421_v14 = vmax.f32 %v2419_v3, %v8449_v46 }
 0x834   :  { %v8455_v13 = vpop.f32.mrf.mxu1 }
 0x839   :  { %v8453_v62 = vpop.f32.mrf.mxu0 }
 0x83a   :  { %10673 = vst [vmem:[#allocation9_spill] sm:$0xff] %v8453_v62  ;;  %v2422_v41 = vmax.f32 %v2420_v24, %v8453_v62 }
 0x83c   :  { %v8459_v27 = vpop.f32.mrf.mxu1 }
 0x841   :  { %v8457_v0 = vpop.f32.mrf.mxu0 }
 0x842   :  { %v2423_v28 = vmax.f32 %v2421_v14, %v8457_v0 }
 0x844   :  { %v8463_v30 = vpop.f32.mrf.mxu1 }
 0x849   :  { %v8461_v25 = vpop.f32.mrf.mxu0 }
 0x84a   :  { %v2424_v43 = vmax.f32 %v2422_v41, %v8461_v25 }
 0x84c   :  { %v8469_v33 = vpop.f32.mrf.mxu1 }
 0x851   :  { %v8465_v29 = vpop.f32.mrf.mxu0 }
 0x852   :  { %v2425_v10 = vmax.f32 %v2423_v28, %v8465_v29 }
 0x854   :  { %v8473_v21 = vpop.f32.mrf.mxu1 }
 0x859   :  { %v8467_v34 = vpop.f32.mrf.mxu0 }
 0x85a   :  { %v2426_v57 = vmax.f32 %v2424_v43, %v8467_v34 }
 0x85c   :  { %v8489_v19 = vpop.f32.mrf.mxu1 }
 0x861   :  { %v8471_v18 = vpop.f32.mrf.mxu0 }
 0x862   :  { %v2427_v58 = vmax.f32 %v2425_v10, %v8471_v18  ;;  %v2440_v10 = vmax.f32 %v8344_v38, %v8356_v26 }
 0x864   :  { %v8503_v52 = vpop.f32.mrf.mxu1 }
 0x869   :  { %v8481_v45 = vpop.f32.mrf.mxu0 }
 0x86a   :  { %v2428_v11 = vmax.f32 %v2426_v57, %v8481_v45 }
 0x86c   :  { %v8515_v54 = vpop.f32.mrf.mxu1 }
 0x871   :  { %v8493_v2 = vpop.f32.mrf.mxu0 }
 0x872   :  { %v2429_v3 = vmax.f32 %v2427_v58, %v8493_v2  ;;  %v2439_v58 = vmax.f32 %v8333_v5, %v8348_v49 }
 0x874   :  { %v8518_v46 = vpop.f32.mrf.mxu1 }
 0x879   :  { %v8505_v56 = vpop.f32.mrf.mxu0 }
 0x87a   :  { %v2430_v23 = vmax.f32 %v2428_v11, %v8505_v56  ;;  %v2442_v11 = vmax.f32 %v2440_v10, %v8371_v35 }
 0x881   :  { %v2310_v55 = vpop.f32.mrf.mxu0 }
 0x882   :  { %v2431_v24 = vmax.f32 %v2429_v3, %v2310_v55  ;;  %v2444_v3 = vmax.f32 %v2442_v11, %v8383_v42 }
 0x884   :  { %v2432_v16 = vmax.f32 %v2430_v23, %v2431_v24  ;;  %v8530_v24 = vpop.f32.mrf.mxu1 }
 0x886   :  { %v2433_v14 = vrot.slane %v2432_v16, 4 }
 0x888   :  { %v2434_v47 = vmax.f32 %v2432_v16, %v2433_v14  ;;  %v2441_v16 = vmax.f32 %v2439_v58, %v8360_v20  ;;  %v2446_v14 = vmax.f32 %v2444_v3, %v8395_v63 }
 0x88a   :  { %v2435_v41 = vrot.slane %v2434_v47, 2 }
 0x88c   :  { %v2436_v28 = vmax.f32 %v2434_v47, %v2435_v41  ;;  %v2443_v47 = vmax.f32 %v2441_v16, %v8375_v4  ;;  %v8544_v3 = vpop.f32.mrf.mxu1 }
 0x88e   :  { %v2437_v43 = vrot.slane %v2436_v28, 1  ;;  %v2445_v41 = vmax.f32 %v2443_v47, %v8387_v12 }
 0x890   :  { %v8520_v62 = vmax.f32 %v2436_v28, %v2437_v43  ;;  %v2447_v28 = vmax.f32 %v2445_v41, %v8399_v31 }
 0x892   :  { %v2538_v57 = vsub.f32 %v2310_v55, %v8520_v62  ;;  %v2448_v55 = vmax.f32 %v2446_v14, %v8407_v36  ;;  %v2449_v58 = vmax.f32 %v2447_v28, %v8411_v48 }
 0x894   :  { %v2664_v23 = vmul.f32 1.442695, %v2538_v57  ;;  %v2450_v43 = vmax.f32 %v2448_v55, %v8418_v60  ;;  %v2506_v57 = vsub.f32 %v8420_v22, %v8520_v62 }
 0x896   :  { %6316 = vpow2.f32 %v2664_v23  ;;  %v2452_v11 = vmax.f32 %v2450_v43, %v8427_v17  ;;  %v2451_v23 = vmax.f32 %v2449_v58, %v8422_v50  ;;  %v2600_v47 = vmul.f32 1.442695, %v2506_v57 }
 0x898   :  { %v2454_v16 = vmax.f32 %v2452_v11, %v8435_v15  ;;  %v2453_v14 = vmax.f32 %v2451_v23, %v8431_v32  ;;  %6318 = vpow2.f32 %v2600_v47  ;;  %v8556_v32 = vpop.f32.mrf.mxu1 }
 0x89a   :  { %v2456_v41 = vmax.f32 %v2454_v16, %v8451_v8  ;;  %v2455_v55 = vmax.f32 %v2453_v14, %v8445_v9 }
 0x89c   :  { %v6317_v10 = vpop.eup %6316  ;;  %v2458_v22 = vmax.f32 %v2456_v41, %v8459_v27  ;;  %v2457_v28 = vmax.f32 %v2455_v55, %v8455_v13  ;;  %v2504_v55 = vsub.f32 %v8413_v6, %v8520_v62  ;;  %v2494_v6 = vsub.f32 %v8385_v1, %v8520_v62 }
 0x89d   :  { %2741 = vmatpush.msra.mxu3 %v6317_v10 }
 0x89e   :  { %v2460_v43 = vmax.f32 %v2458_v22, %v8469_v33  ;;  %v2459_v10 = vmax.f32 %v2457_v28, %v8463_v30  ;;  %v6319_v11 = vpop.eup %6318  ;;  %v2502_v28 = vsub.f32 %v8409_v37, %v8520_v62 }
 0x89f   :  { %2718 = vmatpush.msra.mxu2 %v6319_v11  ;;  %v2498_v11 = vsub.f32 %v8397_v59, %v8520_v62  ;;  %v2490_v59 = vsub.f32 %v8373_v51, %v8520_v62  ;;  %v2486_v51 = vsub.f32 %v8358_v61, %v8520_v62 }
 0x8a0   :  { %v2462_v58 = vmax.f32 %v2460_v43, %v8489_v19  ;;  %v2461_v57 = vmax.f32 %v2459_v10, %v8473_v21  ;;  %v2500_v10 = vsub.f32 %v8401_v44, %v8520_v62  ;;  %v2492_v44 = vsub.f32 %v8377_v40, %v8520_v62 }
 0x8a1   :  { %v2534_v40 = vsub.f32 %v8493_v2, %v8520_v62  ;;  %v2530_v2 = vsub.f32 %v8471_v18, %v8520_v62 }
 0x8a2   :  { %v2464_v23 = vmax.f32 %v2462_v58, %v8515_v54  ;;  %v2463_v16 = vmax.f32 %v2461_v57, %v8503_v52  ;;  %v2596_v58 = vmul.f32 1.442695, %v2504_v55  ;;  %v2592_v57 = vmul.f32 1.442695, %v2502_v28 }
 0x8a4   :  { %v2466_v47 = vmax.f32 %v2464_v23, %v8530_v24  ;;  %v2465_v14 = vmax.f32 %v2463_v16, %v8518_v46  ;;  %v2496_v16 = vsub.f32 %v8389_v39, %v8520_v62  ;;  %6320 = vpow2.f32 %v2596_v58 }
 0x8a5   :  { %6322 = vpow2.f32 %v2592_v57  ;;  %v2536_v39 = vsub.f32 %v8505_v56, %v8520_v62  ;;  %v2532_v56 = vsub.f32 %v8481_v45, %v8520_v62  ;;  %v2528_v45 = vsub.f32 %v8467_v34, %v8520_v62 }
 0x8a6   :  { %v2468_v41 = vmax.f32 %v2466_v47, %v8556_v32  ;;  %v2467_v22 = vmax.f32 %v2465_v14, %v8544_v3  ;;  %v2588_v47 = vmul.f32 1.442695, %v2500_v10  ;;  %v2584_v14 = vmul.f32 1.442695, %v2498_v11 }
 0x8a7   :  { %v2572_v10 = vmul.f32 1.442695, %v2492_v44  ;;  %v2568_v11 = vmul.f32 1.442695, %v2490_v59  ;;  %v10675_v59 = vld [vmem:[#allocation12_spill] sm:$0xff] }
 0x8a8   :  { %v2469_v43 = vmax.f32 %v2467_v22, %v2468_v41  ;;  %v2580_v41 = vmul.f32 1.442695, %v2496_v16  ;;  %6324 = vpow2.f32 %v2588_v47  ;;  %v2576_v22 = vmul.f32 1.442695, %v2494_v6 }
 0x8a9   :  { %6326 = vpow2.f32 %v2584_v14  ;;  %v2656_v6 = vmul.f32 1.442695, %v2534_v40  ;;  %v10674_v14 = vld [vmem:[#allocation10_spill] sm:$0xff]  ;;  %v2524_v40 = vsub.f32 %v8461_v25, %v8520_v62  ;;  %v10678_v25 = vld [vmem:[#allocation9_spill] sm:$0xff] }
 0x8aa   :  { %v2470_v23 = vrot.slane %v2469_v43, 4  ;;  %v6321_v55 = vpop.eup %6320  ;;  %6328 = vpow2.f32 %v2580_v41  ;;  %v2482_v44 = vsub.f32 %v10674_v14, %v8520_v62  ;;  %v2560_v41 = vmul.f32 1.442695, %v2486_v51 }
 0x8ab   :  { %2719 = vmatpush.msra.mxu2 %v6321_v55  ;;  %v6323_v1 = vpop.eup %6322  ;;  %6330 = vpow2.f32 %v2576_v22  ;;  %v2652_v55 = vmul.f32 1.442695, %v2532_v56  ;;  %v2480_v22 = vsub.f32 %v10675_v59, %v8520_v62  ;;  %v2644_v51 = vmul.f32 1.442695, %v2528_v45 }
 0x8ac   :  { %v2471_v37 = vmax.f32 %v2469_v43, %v2470_v23  ;;  %v2488_v43 = vsub.f32 %v8362_v53, %v8520_v62  ;;  %v2660_v23 = vmul.f32 1.442695, %v2536_v39  ;;  %v2484_v53 = vsub.f32 %v8350_v7, %v8520_v62 }
 0x8ad   :  { %2720 = vmatpush.msra.mxu2 %v6323_v1  ;;  %6332 = vpow2.f32 %v2572_v10  ;;  %v2526_v39 = vsub.f32 %v8465_v29, %v8520_v62  ;;  %v2552_v10 = vmul.f32 1.442695, %v2482_v44  ;;  %v10677_v29 = vld [vmem:[#allocation23_spill] sm:$0xff]  ;;  %v2636_v44 = vmul.f32 1.442695, %v2524_v40 }
 0x8ae   :  { %v2472_v28 = vrot.slane %v2471_v37, 2  ;;  %v6325_v58 = vpop.eup %6324  ;;  %v2564_v47 = vmul.f32 1.442695, %v2488_v43  ;;  %6334 = vpow2.f32 %v2568_v11  ;;  %v2556_v18 = vmul.f32 1.442695, %v2484_v53  ;;  %v10676_v43 = vld [vmem:[#allocation25_spill] sm:$0xff] }
 0x8af   :  { %2721 = vmatpush.msra.mxu2 %v6325_v58  ;;  %v6327_v16 = vpop.eup %6326  ;;  %6336 = vpow2.f32 %v2660_v23  ;;  %v2478_v34 = vsub.f32 %v10676_v43, %v8520_v62  ;;  %v2476_v56 = vsub.f32 %v10677_v29, %v8520_v62  ;;  %v2548_v23 = vmul.f32 1.442695, %v2480_v22 }
 0x8b0   :  { %v2473_v57 = vmax.f32 %v2471_v37, %v2472_v28  ;;  %v6329_v61 = vpop.eup %6328  ;;  %6338 = vpow2.f32 %v2564_v47  ;;  %v2648_v28 = vmul.f32 1.442695, %v2530_v2  ;;  %v2522_v53 = vsub.f32 %v8457_v0, %v8520_v62  ;;  %v10679_v0 = vld [vmem:[#allocation15_spill] sm:$0xff] }
 0x8b1   :  { %2722 = vmatpush.msra.mxu2 %v6327_v16  ;;  %v6331_v7 = vpop.eup %6330  ;;  %6340 = vpow2.f32 %v2656_v6  ;;  %v2640_v47 = vmul.f32 1.442695, %v2526_v39  ;;  %v2544_v6 = vmul.f32 1.442695, %v2478_v34  ;;  %v2518_v45 = vsub.f32 %v10679_v0, %v8520_v62  ;;  %v10684_v0 = vld [vmem:[#allocation19_spill] sm:$0xff] }
 0x8b2   :  { %v2474_v37 = vrot.slane %v2473_v57, 1  ;;  %6342 = vpow2.f32 %v2560_v41  ;;  %v2632_v59 = vmul.f32 1.442695, %v2522_v53 }
 0x8b3   :  { %2723 = vmatpush.msra.mxu2 %v6329_v61  ;;  %v6333_v1 = vpop.eup %6332  ;;  %6344 = vpow2.f32 %v2652_v55  ;;  %v2624_v40 = vmul.f32 1.442695, %v2518_v45  ;;  %v2508_v45 = vsub.f32 %v10684_v0, %v8520_v62 }
 0x8b4   :  { %v8605_v58 = vmax.f32 %v2473_v57, %v2474_v37  ;;  %v6335_v11 = vpop.eup %6334  ;;  %6346 = vpow2.f32 %v2556_v18  ;;  %v2520_v57 = vsub.f32 %v10678_v25, %v8520_v62  ;;  %v2540_v37 = vmul.f32 1.442695, %v2476_v56 }
 0x8b5   :  { %2724 = vmatpush.msra.mxu2 %v6331_v7  ;;  %v6337_v16 = vpop.eup %6336  ;;  %6348 = vpow2.f32 %v2648_v28 }
 0x8b6   :  { %v6339_v2 = vpop.eup %6338  ;;  %6350 = vpow2.f32 %v2552_v10  ;;  %2742 = vmatpush.msra.mxu3 %v6337_v16  ;;  %v2507_v14 = vsub.f32 %v8427_v17, %v8605_v58  ;;  %v2505_v7 = vsub.f32 %v8422_v50, %v8605_v58  ;;  %v10680_v17 = vld [vmem:[#allocation8_spill] sm:$0xff]  ;;  %v2628_v39 = vmul.f32 1.442695, %v2520_v57 }
 0x8b7   :  { %2725 = vmatpush.msra.mxu2 %v6333_v1  ;;  %v6341_v61 = vpop.eup %6340  ;;  %6352 = vpow2.f32 %v2644_v51  ;;  %v2516_v18 = vsub.f32 %v10680_v17, %v8520_v62  ;;  %v2503_v1 = vsub.f32 %v8418_v60, %v8605_v58  ;;  %v10681_v50 = vld [vmem:[#allocation24_spill] sm:$0xff] }
 0x8b8   :  { %v6343_v41 = vpop.eup %6342  ;;  %6354 = vpow2.f32 %v2548_v23  ;;  %2743 = vmatpush.msra.mxu3 %v6341_v61  ;;  %v2602_v43 = vmul.f32 1.442695, %v2507_v14  ;;  %v2514_v10 = vsub.f32 %v10681_v50, %v8520_v62  ;;  %v2598_v29 = vmul.f32 1.442695, %v2505_v7  ;;  %v10682_v60 = vld [vmem:[#allocation20_spill] sm:$0xff] }
 0x8b9   :  { %2726 = vmatpush.msra.mxu2 %v6335_v11  ;;  %v6345_v55 = vpop.eup %6344  ;;  %6356 = vpow2.f32 %v2640_v47  ;;  %v2501_v11 = vsub.f32 %v8411_v48, %v8605_v58  ;;  %v2512_v23 = vsub.f32 %v10682_v60, %v8520_v62  ;;  %v2620_v16 = vmul.f32 1.442695, %v2516_v18  ;;  %v10683_v48 = vld [vmem:[#allocation18_spill] sm:$0xff] }
 0x8ba   :  { %v6347_v22 = vpop.eup %6346  ;;  %6358 = vpow2.f32 %v2544_v6  ;;  %2744 = vmatpush.msra.mxu3 %v6345_v55  ;;  %v2499_v47 = vsub.f32 %v8407_v36, %v8605_v58  ;;  %v2510_v57 = vsub.f32 %v10683_v48, %v8520_v62  ;;  %v2616_v6 = vmul.f32 1.442695, %v2514_v10 }
 0x8bb   :  { %2727 = vmatpush.msra.mxu2 %v6339_v2  ;;  %v6349_v28 = vpop.eup %6348  ;;  %6360 = vpow2.f32 %v2636_v44  ;;  %v2594_v2 = vmul.f32 1.442695, %v2503_v1  ;;  %v2497_v14 = vsub.f32 %v8399_v31, %v8605_v58  ;;  %v2590_v44 = vmul.f32 1.442695, %v2501_v11 }
 0x8bc   :  { %v6351_v34 = vpop.eup %6350  ;;  %6362 = vpow2.f32 %v2540_v37  ;;  %2745 = vmatpush.msra.mxu3 %v6349_v28  ;;  %v2612_v37 = vmul.f32 1.442695, %v2512_v23  ;;  %v2495_v7 = vsub.f32 %v8395_v63, %v8605_v58  ;;  %v2608_v17 = vmul.f32 1.442695, %v2510_v57 }
 0x8bd   :  { %2728 = vmatpush.msra.mxu2 %v6343_v41  ;;  %v6353_v51 = vpop.eup %6352  ;;  %6364 = vpow2.f32 %v2632_v59  ;;  %v8635_v41 = vpop.f32.mrf.mxu2  ;;  %v2586_v59 = vmul.f32 1.442695, %v2499_v47  ;;  %v2493_v18 = vsub.f32 %v8387_v12, %v8605_v58  ;;  %v2491_v63 = vsub.f32 %v8383_v42, %v8605_v58 }
 0x8be   :  { %v6355_v56 = vpop.eup %6354  ;;  %6366 = vpow2.f32 %v2628_v39  ;;  %2746 = vmatpush.msra.mxu3 %v6353_v51  ;;  %v2582_v39 = vmul.f32 1.442695, %v2497_v14  ;;  %v2604_v1 = vmul.f32 1.442695, %v2508_v45  ;;  %v2489_v12 = vsub.f32 %v8375_v4, %v8605_v58 }
 0x8bf   :  { %2729 = vmatpush.msra.mxu2 %v6347_v22  ;;  %v6357_v53 = vpop.eup %6356  ;;  %6368 = vpow2.f32 %v2602_v43  ;;  %v2539_v22 = vsub.f32 %v8556_v32, %v8605_v58  ;;  %v2537_v43 = vsub.f32 %v8544_v3, %v8605_v58  ;;  %v2535_v42 = vsub.f32 %v8530_v24, %v8605_v58 }
 0x8c0   :  { %v6359_v25 = vpop.eup %6358  ;;  %6370 = vpow2.f32 %v2624_v40  ;;  %2747 = vmatpush.msra.mxu3 %v6357_v53  ;;  %v2574_v51 = vmul.f32 1.442695, %v2493_v18  ;;  %v2487_v3 = vsub.f32 %v8371_v35, %v8605_v58  ;;  %v2533_v4 = vsub.f32 %v8518_v46, %v8605_v58 }
 0x8c1   :  { %2730 = vmatpush.msra.mxu2 %v6351_v34  ;;  %v6361_v61 = vpop.eup %6360  ;;  %6372 = vpow2.f32 %v2598_v29  ;;  %v2578_v34 = vmul.f32 1.442695, %v2495_v7  ;;  %v2666_v10 = vmul.f32 1.442695, %v2539_v22  ;;  %v2570_v29 = vmul.f32 1.442695, %v2491_v63 }
 0x8c2   :  { %v6363_v36 = vpop.eup %6362  ;;  %6374 = vpow2.f32 %v2620_v16  ;;  %2748 = vmatpush.msra.mxu3 %v6361_v61  ;;  %v2662_v60 = vmul.f32 1.442695, %v2537_v43  ;;  %v2485_v24 = vsub.f32 %v8360_v20, %v8605_v58  ;;  %v2566_v16 = vmul.f32 1.442695, %v2489_v12 }
 0x8c3   :  { %2731 = vmatpush.msra.mxu2 %v6355_v56  ;;  %v6365_v55 = vpop.eup %6364  ;;  %6376 = vpow2.f32 %v2594_v2  ;;  %v2531_v35 = vsub.f32 %v8515_v54, %v8605_v58  ;;  %v2658_v47 = vmul.f32 1.442695, %v2535_v42  ;;  %v10685_v2 = vmov 1.0  }
 0x8c4   :  { %v6367_v31 = vpop.eup %6366  ;;  %6378 = vpow2.f32 %v2616_v6  ;;  %2749 = vmatpush.msra.mxu3 %v6365_v55  ;;  %v2483_v46 = vsub.f32 %v8356_v26, %v8605_v58  ;;  %v2562_v48 = vmul.f32 1.442695, %v2487_v3  ;;  %v2529_v57 = vsub.f32 %v8503_v52, %v8605_v58 }
 0x8c5   :  { %2732 = vmatpush.msra.mxu2 %v6359_v25  ;;  %v6369_v62 = vpop.eup %6368  ;;  %6380 = vpow2.f32 %v2590_v44  ;;  %v2654_v6 = vmul.f32 1.442695, %v2533_v4  ;;  %v2481_v54 = vsub.f32 %v8348_v49, %v8605_v58  ;;  %v2558_v14 = vmul.f32 1.442695, %v2485_v24  ;;  %v8669_v44 = vpop.f32.mrf.mxu3 }
 0x8c6   :  { %v6371_v28 = vpop.eup %6370  ;;  %6382 = vpow2.f32 %v2612_v37  ;;  %2750 = vmatpush.msra.mxu3 %v6367_v31  ;;  %v2650_v0 = vmul.f32 1.442695, %v2531_v35  ;;  %v2479_v52 = vsub.f32 %v8344_v38, %v8605_v58  ;;  %v2554_v37 = vmul.f32 1.442695, %v2483_v46 }
 0x8c7   :  { %2733 = vmatpush.msra.mxu2 %v6363_v36  ;;  %v6373_v32 = vpop.eup %6372  ;;  %6384 = vpow2.f32 %v2586_v59  ;;  %v2527_v36 = vsub.f32 %v8489_v19, %v8605_v58  ;;  %v2525_v55 = vsub.f32 %v8473_v21, %v8605_v58  ;;  %v2646_v7 = vmul.f32 1.442695, %v2529_v57  ;;  %v6977_v57 = vld [vmem:[%s10409_s1] sm:$0xff] }
 0x8c8   :  { %2734 = vmatmul.f32.vlgmr.msra.gmra.mxu2 %v8635_v41  ;;  %v6375_v50 = vpop.eup %6374  ;;  %6386 = vpow2.f32 %v2608_v17  ;;  %2751 = vmatpush.msra.mxu3 %v6371_v28  ;;  %v2477_v19 = vsub.f32 %v8333_v5, %v8605_v58  ;;  %v2550_v31 = vmul.f32 1.442695, %v2481_v54  ;;  %v2523_v22 = vsub.f32 %v8469_v33, %v8605_v58 }
 0x8c9   :  { %2764 = vmatpush.msrb.mxu2 %v6369_v62  ;;  %v6377_v40 = vpop.eup %6376  ;;  %6388 = vpow2.f32 %v2582_v39  ;;  %v2642_v17 = vmul.f32 1.442695, %v2527_v36  ;;  %v2546_v21 = vmul.f32 1.442695, %v2479_v52  ;;  %v2521_v39 = vsub.f32 %v8463_v30, %v8605_v58 }
 0x8ca   :  { %v6379_v11 = vpop.eup %6378  ;;  %6390 = vpow2.f32 %v2604_v1  ;;  %2752 = vmatpush.msra.mxu3 %v6375_v50  ;;  %v2638_v5 = vmul.f32 1.442695, %v2525_v55  ;;  %v2542_v63 = vmul.f32 1.442695, %v2477_v19  ;;  %v2519_v33 = vsub.f32 %v8459_v27, %v8605_v58  ;;  %v10687_v55 = vld [vmem:[#allocation11_spill] sm:$0xff] }
 0x8cb   :  { %2765 = vmatpush.msrb.mxu2 %v6373_v32  ;;  %v6381_v56 = vpop.eup %6380  ;;  %6392 = vpow2.f32 %v2578_v34  ;;  %v2634_v32 = vmul.f32 1.442695, %v2523_v22  ;;  %v2517_v30 = vsub.f32 %v8455_v13, %v8605_v58  ;;  %v2630_v50 = vmul.f32 1.442695, %v2521_v39 }
 0x8cc   :  { %v6383_v23 = vpop.eup %6382  ;;  %6394 = vpow2.f32 %v2666_v10  ;;  %2753 = vmatpush.msra.mxu3 %v6379_v11  ;;  %v2515_v27 = vsub.f32 %v8451_v8, %v8605_v58  ;;  %v2513_v13 = vsub.f32 %v8445_v9, %v8605_v58  ;;  %v5758_v9 = vld [vmem:[%s10408_s0 + $0x10] sm:$0xff] }
 0x8cd   :  { %2766 = vmatpush.msrb.mxu2 %v6377_v40  ;;  %v6385_v53 = vpop.eup %6384  ;;  %6396 = vpow2.f32 %v2574_v51  ;;  %v2626_v40 = vmul.f32 1.442695, %v2519_v33  ;;  %v2622_v11 = vmul.f32 1.442695, %v2517_v30 }
 0x8ce   :  { %v6387_v25 = vpop.eup %6386  ;;  %6398 = vpow2.f32 %v2570_v29  ;;  %2754 = vmatpush.msra.mxu3 %v6383_v23  ;;  %v2618_v4 = vmul.f32 1.442695, %v2515_v27  ;;  %v10686_v23 = vld [vmem:[#allocation21_spill] sm:$0xff] }
 0x8cf   :  { %2767 = vmatpush.msrb.mxu2 %v6381_v56  ;;  %v6389_v20 = vpop.eup %6388  ;;  %6400 = vpow2.f32 %v2662_v60  ;;  %v2511_v56 = vsub.f32 %v8435_v15, %v8605_v58  ;;  %v2509_v24 = vsub.f32 %v10686_v23, %v8605_v58 }
 0x8d0   :  { %2737 = vmatmul.f32.gmra.mxu2 %v10685_v2  ;;  %v6391_v61 = vpop.eup %6390  ;;  %6402 = vpow2.f32 %v2566_v16  ;;  %2755 = vmatpush.msra.mxu3 %v6387_v25  ;;  %v2614_v16 = vmul.f32 1.442695, %v2513_v13 }
 0x8d1   :  { %2768 = vmatpush.msrb.mxu2 %v6385_v53  ;;  %v6393_v26 = vpop.eup %6392  ;;  %6404 = vpow2.f32 %v2658_v47  ;;  %v2610_v35 = vmul.f32 1.442695, %v2511_v56  ;;  %v2606_v47 = vmul.f32 1.442695, %v2509_v24 }
 0x8d2   :  { %v6395_v45 = vpop.eup %6394  ;;  %6406 = vpow2.f32 %v2562_v48  ;;  %2756 = vmatpush.msra.mxu3 %v6391_v61  ;;  %v6979_v61 = vld [vmem:[%s10409_s1 + $0x10] sm:$0xff] }
 0x8d3   :  { %2769 = vmatpush.msrb.mxu2 %v6389_v20  ;;  %v6397_v49 = vpop.eup %6396  ;;  %6408 = vpow2.f32 %v2654_v6  ;;  %2757 = vmatmul.f32.vlgmr.msra.gmra.mxu3 %v8669_v44  ;;  %v6978_v6 = vld [vmem:[%s10409_s1 + $0x8] sm:$0xff] }
 0x8d4   :  { %v6399_v59 = vpop.eup %6398  ;;  %6410 = vpow2.f32 %v2558_v14  ;;  %2787 = vmatpush.msrb.mxu3 %v6395_v45 }
 0x8d5   :  { %2770 = vmatpush.msrb.mxu2 %v6393_v26  ;;  %v6401_v38 = vpop.eup %6400  ;;  %6412 = vpow2.f32 %v2650_v0 }
 0x8d6   :  { %v6403_v62 = vpop.eup %6402  ;;  %6414 = vpow2.f32 %v2554_v37  ;;  %2788 = vmatpush.msrb.mxu3 %v6401_v38 }
 0x8d7   :  { %2771 = vmatpush.msrb.mxu2 %v6397_v49  ;;  %v6405_v18 = vpop.eup %6404  ;;  %6416 = vpow2.f32 %v2646_v7 }
 0x8d8   :  { %v6407_v28 = vpop.eup %6406  ;;  %6418 = vpow2.f32 %v2550_v31  ;;  %2789 = vmatpush.msrb.mxu3 %v6405_v18 }
 0x8d9   :  { %2772 = vmatpush.msrb.mxu2 %v6399_v59  ;;  %v6409_v1 = vpop.eup %6408  ;;  %6420 = vpow2.f32 %v2642_v17 }
 0x8da   :  { %v6411_v43 = vpop.eup %6410  ;;  %6422 = vpow2.f32 %v2546_v21  ;;  %2790 = vmatpush.msrb.mxu3 %v6409_v1 }
 0x8db   :  { %2773 = vmatpush.msrb.mxu2 %v6403_v62  ;;  %v6413_v34 = vpop.eup %6412  ;;  %6424 = vpow2.f32 %v2638_v5  ;;  %2760 = vmatmul.f32.gmra.mxu3 %v10685_v2 }
 0x8dc   :  { %v6415_v10 = vpop.eup %6414  ;;  %6426 = vpow2.f32 %v2542_v63  ;;  %2791 = vmatpush.msrb.mxu3 %v6413_v34 }
 0x8dd   :  { %2774 = vmatpush.msrb.mxu2 %v6407_v28  ;;  %v6417_v12 = vpop.eup %6416  ;;  %6428 = vpow2.f32 %v2634_v32 }
 0x8de   :  { %v6419_v42 = vpop.eup %6418  ;;  %2792 = vmatpush.msrb.mxu3 %v6417_v12  ;;  %6430 = vpow2.f32 %v2630_v50 }
 0x8df   :  { %2775 = vmatpush.msrb.mxu2 %v6411_v43  ;;  %v6421_v51 = vpop.eup %6420  ;;  %6432 = vpow2.f32 %v2626_v40  ;;  %v10690_v43 = vld [vmem:[#allocation13_spill] sm:$0xff] }
 0x8e0   :  { %v6423_v3 = vpop.eup %6422  ;;  %2793 = vmatpush.msrb.mxu3 %v6421_v51  ;;  %6434 = vpow2.f32 %v2622_v11 }
 0x8e1   :  { %2776 = vmatpush.msrb.mxu2 %v6415_v10  ;;  %v6425_v29 = vpop.eup %6424  ;;  %6436 = vpow2.f32 %v2618_v4  ;;  %v7042_v4 = vmov 0  }
 0x8e2   :  { %v6427_v8 = vpop.eup %6426  ;;  %2794 = vmatpush.msrb.mxu3 %v6425_v29  ;;  %6438 = vpow2.f32 %v2614_v16 }
 0x8e3   :  { %2777 = vmatpush.msrb.mxu2 %v6419_v42  ;;  %v6429_v60 = vpop.eup %6428  ;;  %6440 = vpow2.f32 %v2610_v35  ;;  %v37_v35 = vld [vmem:[%s10411_s3] sm:$0xff] }
 0x8e4   :  { %2795 = vmatpush.msrb.mxu3 %v6429_v60  ;;  %v6431_v53 = vpop.eup %6430  ;;  %6442 = vpow2.f32 %v2606_v47 }
 0x8e5   :  { %2778 = vmatpush.msrb.mxu2 %v6423_v3  ;;  %v6433_v15 = vpop.eup %6432 }
 0x8e6   :  { %2796 = vmatpush.msrb.mxu3 %v6431_v53  ;;  %v6435_v58 = vpop.eup %6434 }
 0x8e7   :  { %2779 = vmatpush.msrb.mxu2 %v6427_v8  ;;  %v6437_v25 = vpop.eup %6436 }
 0x8e8   :  { %2780 = vmatmul.f32.vlgmr.msrb.gmra.mxu2 %v8635_v41  ;;  %2797 = vmatpush.msrb.mxu3 %v6433_v15  ;;  %v6439_v46 = vpop.eup %6438  ;;  %v5759_v41 = vld [vmem:[%s10408_s0 + $0x18] sm:$0xff] }
 0x8e9   :  { %2847 = vmatpush.msra.mxu2 %v5758_v9  ;;  %v6441_v48 = vpop.eup %6440 }
 0x8ea   :  { %2798 = vmatpush.msrb.mxu3 %v6435_v58  ;;  %v6443_v20 = vpop.eup %6442 }
 0x8ec   :  { %2799 = vmatpush.msrb.mxu3 %v6437_v25 }
 0x8ee   :  { %2800 = vmatpush.msrb.mxu3 %v6439_v46 }
 0x8f0   :  { %2783 = vmatmul.f32.gmra.mxu2 %v10685_v2  ;;  %2801 = vmatpush.msrb.mxu3 %v6441_v48 }
 0x8f2   :  { %2802 = vmatpush.msrb.mxu3 %v6443_v20 }
 0x8f3   :  { %2803 = vmatmul.f32.vlgmr.msrb.gmra.mxu3 %v8669_v44 }
 0x8f4   :  { %2873 = vmatpush.msra.mxu3 %v5759_v41 }
 0x8f8   :  { %5760 = vmatmul.msk.f32.vlgmr.msra.gmra.mxu2 %vm40_vm0, %v6977_v57 }
 0x8fb   :  { %2806 = vmatmul.f32.gmra.mxu3 %v10685_v2 }
 0x900   :  { %5761 = vmatmul.msk.f32.gmra.mxu2 %vm40_vm0, %v6978_v6 }
 0x903   :  { %5763 = vmatmul.msk.f32.vlgmr.msra.gmra.mxu3 %vm40_vm0, %v6977_v57 }
 0x908   :  { %5762 = vmatmul.msk.f32.gmra.mxu2 %vm40_vm0, %v6979_v61 }
 0x90b   :  { %5764 = vmatmul.msk.f32.gmra.mxu3 %vm40_vm0, %v6978_v6 }
 0x913   :  { %5765 = vmatmul.msk.f32.gmra.mxu3 %vm40_vm0, %v6979_v61 }
 0x94b   :  { %v2735_v54 = vpop.f32.mrf.mxu2 }
 0x953   :  { %v2738_v26 = vpop.f32.mrf.mxu2 }
 0x956   :  { %v2758_v14 = vpop.f32.mrf.mxu3 }
 0x957   :  { %v2759_v44 = vadd.f32 %v2758_v14, %v2735_v54 }
 0x95e   :  { %v2761_v36 = vpop.f32.mrf.mxu3 }
 0x95f   :  { %v2762_v0 = vadd.f32 %v2761_v36, %v2738_v26 }
 0x961   :  { %6444 = vrcp.f32 %v2762_v0 }
 0x967   :  { %v6445_v45 = vpop.eup %6444 }
 0x968   :  { %v2812_v52 = vperm.slane %v6445_v45, 0 }
 0x96a   :  { %v2814_v49 = vmul.f32 %v2812_v52, %v2759_v44 }
 0x96b   :  { %v2781_v37 = vpop.f32.mrf.mxu2 }
 0x96c   :  { %v8723_v7 = vadd.f32 %v2814_v49, %v10687_v55 }
 0x973   :  { %v2784_v59 = vpop.f32.mrf.mxu2 }
 0x976   :  { %v2804_v19 = vpop.f32.mrf.mxu3 }
 0x977   :  { %v2805_v31 = vadd.f32 %v2804_v19, %v2781_v37 }
 0x97b   :  { %v2849_v38 = vpop.f32.mrf.mxu2 }
 0x97c   :  { %v8725_v22 = vpack.c.bf16 %v2849_v38, %v2849_v38 }
 0x97e   :  { %10688 = vst [vmem:[#allocation22_spill] sm:$0xff] %v8725_v22  ;;  %v2961_v17 = vsel %vm179_vm1, %v8725_v22, 0  ;;  %v2807_v62 = vpop.f32.mrf.mxu3 }
 0x97f   :  { %2973 = vmatpush.bf16.msrb.mxu0 %v2961_v17  ;;  %v2808_v21 = vadd.f32 %v2807_v62, %v2784_v59 }
 0x981   :  { %6446 = vrcp.f32 %v2808_v21 }
 0x983   :  { %v2852_v63 = vpop.f32.mrf.mxu2 }
 0x984   :  { %v2884_v32 = vpack.c.bf16 %v2852_v63, %v2852_v63 }
 0x986   :  { %v2875_v18 = vpop.f32.mrf.mxu3  ;;  %v3558_v10 = vrot.slane %v2884_v32, 1  ;;  %v4908_v12 = vrot.slane %v2884_v32, 3  ;;  %v4234_v42 = vrot.slane %v2884_v32, 2 }
 0x987   :  { %v6447_v39 = vpop.eup %6446  ;;  %v8729_v5 = vpack.c.bf16 %v2875_v18, %v2875_v18 }
 0x988   :  { %v2813_v28 = vperm.slane %v6447_v39, 0 }
 0x989   :  { %10689 = vst [vmem:[#allocation26_spill] sm:$0xff] %v8729_v5  ;;  %v2964_v1 = vsel %vm179_vm1, %v8729_v5, 0 }
 0x98a   :  { %v2815_v33 = vmul.f32 %v2813_v28, %v2805_v31  ;;  %3062 = vmatpush.bf16.msrb.mxu1 %v2964_v1 }
 0x98c   :  { %v8734_v34 = vadd.f32 %v2815_v33, %v10690_v43  ;;  %v6980_v33 = vld [vmem:[%s10408_s0] sm:$0xff]  ;;  %v6981_v43 = vld [vmem:[%s10408_s0 + $0x8] sm:$0xff] }
 0x98e   :  { %v2878_v30 = vpop.f32.mrf.mxu3 }
 0x98f   :  { %v2885_v50 = vpack.c.bf16 %v2878_v30, %v2878_v30 }
 0x991   :  { %2888 = vxpose.binary.xlu1.c.b16.start.end [1/2] (short) %v2885_v50, %v2884_v32, 128  ;;  %v3559_v27 = vrot.slane %v2885_v50, 1  ;;  %v4909_v40 = vrot.slane %v2885_v50, 3  ;;  %v4235_v51 = vrot.slane %v2885_v50, 2 }
 0x993   :  { %3562 = vxpose.binary.xlu0.c.b16.start.end [1/2] (short) %v3559_v27, %v3558_v10, 128 }
 0x994   :  { %4912 = vxpose.binary.xlu2.c.b16.start.end [1/2] (short) %v4909_v40, %v4908_v12, 128 }
 0x9fa   :  { %5919 = vset.pattern.permute.xlu0 %v7042_v4  ;;  %v8861_v4 = vpop.f32.mrf.mxu2 }
 0x9fb   :  { %10712 = vst [vmem:[#allocation34_spill] sm:$0xff] %v8861_v4  ;;  %5798 = vmatpush.msk.msrb.mxu2 %vm633_vm3, %v8861_v4 }
 0xa11   :  { %4238 = vxpose.binary.xlu1.c.b16.start.end [1/2] (short) %v4235_v51, %v4234_v42, 128 }
 0xa3d   :  { %v2896_v13 = vpop.trf.xlu1 }
 0xa3e   :  { %5766 = vmatmul.msk.bf16.vlgmr.msrb.gmra.mxu0 %vm130_vm2, %v2896_v13  ;;  %5782 = vmatmul.msk.bf16.vlgmr.msrb.gmra.mxu1 %vm130_vm2, %v2896_v13 }
 0xa3f   :  { %v8738_v11 = vpop.trf.xlu0 }
 0xa40   :  { %10691 = vst [vmem:[#allocation10_spill] sm:$0xff] %v8738_v11 }
 0xa45   :  { %v2897_v3 = vpop.trf.xlu1 }
 0xa47   :  { %v8742_v56 = vpop.trf.xlu0 }
 0xa48   :  { %10692 = vst [vmem:[#allocation12_spill] sm:$0xff] %v8742_v56 }
 0xa4d   :  { %v2898_v29 = vpop.trf.xlu1 }
 0xa4e   :  { %5767 = vmatmul.msk.bf16.gmra.mxu0 %vm130_vm2, %v2898_v29  ;;  %5783 = vmatmul.msk.bf16.gmra.mxu1 %vm130_vm2, %v2898_v29 }
 0xa4f   :  { %v8744_v60 = vpop.trf.xlu0 }
 0xa50   :  { %10693 = vst [vmem:[#allocation25_spill] sm:$0xff] %v8744_v60 }
 0xa55   :  { %v2899_v8 = vpop.trf.xlu1 }
 0xa57   :  { %v8748_v24 = vpop.trf.xlu0 }
 0xa58   :  { %10694 = vst [vmem:[#allocation23_spill] sm:$0xff] %v8748_v24 }
 0xa5d   :  { %v2900_v23 = vpop.trf.xlu1 }
 0xa5e   :  { %5768 = vmatmul.msk.bf16.gmra.mxu0 %vm130_vm2, %v2900_v23  ;;  %5784 = vmatmul.msk.bf16.gmra.mxu1 %vm130_vm2, %v2900_v23  ;;  %v4088_v23 = vrot.slane %v8861_v4, 2 }
 0xa5f   :  { %v8750_v9 = vpop.trf.xlu0 }
 0xa60   :  { %10695 = vst [vmem:[#allocation9_spill] sm:$0xff] %v8750_v9  ;;  %5834 = vmatpush.msk.msra.mxu0 %vm633_vm3, %v4088_v23 }
 0xa65   :  { %v2901_v16 = vpop.trf.xlu1 }
 0xa67   :  { %v8757_v47 = vpop.trf.xlu0 }
 0xa68   :  { %10696 = vst [vmem:[#allocation15_spill] sm:$0xff] %v8757_v47 }
 0xa6d   :  { %v2902_v53 = vpop.trf.xlu1 }
 0xa6e   :  { %5769 = vmatmul.msk.bf16.gmra.mxu0 %vm130_vm2, %v2902_v53  ;;  %5785 = vmatmul.msk.bf16.gmra.mxu1 %vm130_vm2, %v2902_v53  ;;  %v6982_v53 = vld [vmem:[#allocation2] sm:$0xff] }
 0xa6f   :  { %v8761_v25 = vpop.trf.xlu0  ;;  %5799 = vmatmul.msk.f32.vlgmr.msrb.gmra.mxu2 %vm130_vm2, %v6982_v53 }
 0xa70   :  { %10697 = vst [vmem:[#allocation8_spill] sm:$0xff] %v8761_v25 }
 0xa71   :  { %2820 = vperm.xlu0 %5919, %v37_v35  }
 0xa75   :  { %v2903_v15 = vpop.trf.xlu1 }
 0xa77   :  { %v8763_v48 = vpop.trf.xlu0 }
 0xa78   :  { %10698 = vst [vmem:[#allocation24_spill] sm:$0xff] %v8763_v48 }
 0xa7d   :  { %v2904_v58 = vpop.trf.xlu1 }
 0xa7e   :  { %5770 = vmatmul.msk.bf16.gmra.mxu0 %vm130_vm2, %v2904_v58  ;;  %5786 = vmatmul.msk.bf16.gmra.mxu1 %vm130_vm2, %v2904_v58 }
 0xa7f   :  { %v8767_v41 = vpop.trf.xlu0 }
 0xa80   :  { %10699 = vst [vmem:[#allocation20_spill] sm:$0xff] %v8767_v41 }
 0xa85   :  { %v2905_v46 = vpop.trf.xlu1 }
 0xa87   :  { %v8771_v61 = vpop.trf.xlu0 }
 0xa88   :  { %10700 = vst [vmem:[#allocation18_spill] sm:$0xff] %v8771_v61 }
 0xa8d   :  { %v2906_v20 = vpop.trf.xlu1 }
 0xa8e   :  { %5771 = vmatmul.msk.bf16.gmra.mxu0 %vm130_vm2, %v2906_v20  ;;  %5787 = vmatmul.msk.bf16.gmra.mxu1 %vm130_vm2, %v2906_v20 }
 0xa8f   :  { %v8775_v14 = vpop.trf.xlu0 }
 0xa90   :  { %10701 = vst [vmem:[#allocation19_spill] sm:$0xff] %v8775_v14 }
 0xa95   :  { %v2907_v57 = vpop.trf.xlu1 }
 0xa97   :  { %v8779_v26 = vpop.trf.xlu0 }
 0xa98   :  { %10702 = vst [vmem:[#allocation21_spill] sm:$0xff] %v8779_v26 }
 0xa9d   :  { %v2908_v6 = vpop.trf.xlu1 }
 0xa9e   :  { %5772 = vmatmul.msk.bf16.gmra.mxu0 %vm130_vm2, %v2908_v6  ;;  %5788 = vmatmul.msk.bf16.gmra.mxu1 %vm130_vm2, %v2908_v6 }
 0xa9f   :  { %v8785_v45 = vpop.trf.xlu0 }
 0xaa0   :  { %10703 = vst [vmem:[#allocation11_spill] sm:$0xff] %v8785_v45 }
 0xaa5   :  { %v8773_v54 = vpop.trf.xlu1 }
 0xaa7   :  { %v8793_v49 = vpop.trf.xlu0 }
 0xaa8   :  { %10705 = vst [vmem:[#allocation27_spill] sm:$0xff] %v8793_v49 }
 0xaad   :  { %v2910_v44 = vpop.trf.xlu1 }
 0xaae   :  { %5773 = vmatmul.msk.bf16.gmra.mxu0 %vm130_vm2, %v2910_v44  ;;  %5789 = vmatmul.msk.bf16.gmra.mxu1 %vm130_vm2, %v2910_v44 }
 0xaaf   :  { %v8801_v19 = vpop.trf.xlu0 }
 0xab0   :  { %10707 = vst [vmem:[#allocation29_spill] sm:$0xff] %v8801_v19 }
 0xab7   :  { %v8807_v17 = vpop.trf.xlu0 }
 0xab8   :  { %10709 = vst [vmem:[#allocation31_spill] sm:$0xff] %v8807_v17 }
 0xabb   :  { %v8781_v36 = vpop.f32.mrf.mxu0  ;;  %v8783_v0 = vpop.f32.mrf.mxu1 }
 0xabe   :  { %5774 = vmatmul.msk.bf16.gmra.mxu0 %vm130_vm2, %v2897_v3  ;;  %5790 = vmatmul.msk.bf16.gmra.mxu1 %vm130_vm2, %v2897_v3 }
 0xac3   :  { %v8789_v52 = vpop.f32.mrf.mxu0  ;;  %v8791_v37 = vpop.f32.mrf.mxu1 }
 0xac4   :  { %10704 = vst [vmem:[#allocation13_spill] sm:$0xff] %v8789_v52 }
 0xacb   :  { %v8795_v55 = vpop.f32.mrf.mxu0  ;;  %v8797_v59 = vpop.f32.mrf.mxu1 }
 0xacc   :  { %10706 = vst [vmem:[#allocation28_spill] sm:$0xff] %v8795_v55  ;;  %v3144_v14 = vmax.f32 %v8781_v36, %v8795_v55 }
 0xace   :  { %5775 = vmatmul.msk.bf16.gmra.mxu0 %vm130_vm2, %v2899_v8  ;;  %5791 = vmatmul.msk.bf16.gmra.mxu1 %vm130_vm2, %v2899_v8  ;;  %v8863_v8 = vpop.f32.mrf.mxu3 }
 0xacf   :  { %10713 = vst [vmem:[#allocation35_spill] sm:$0xff] %v8863_v8  ;;  %5800 = vmatpush.msk.msrb.mxu3 %vm633_vm3, %v8863_v8 }
 0xad0   :  { %5801 = vmatmul.msk.f32.vlgmr.msrb.gmra.mxu3 %vm130_vm2, %v6982_v53 }
 0xad3   :  { %v8803_v31 = vpop.f32.mrf.mxu0  ;;  %v8805_v38 = vpop.f32.mrf.mxu1 }
 0xad4   :  { %10708 = vst [vmem:[#allocation30_spill] sm:$0xff] %v8803_v31  ;;  %v3145_v41 = vmax.f32 %v8789_v52, %v8803_v31 }
 0xadb   :  { %v8809_v62 = vpop.f32.mrf.mxu0  ;;  %v8811_v21 = vpop.f32.mrf.mxu1 }
 0xadc   :  { %10710 = vst [vmem:[#allocation32_spill] sm:$0xff] %v8809_v62  ;;  %v3146_v25 = vmax.f32 %v3144_v14, %v8809_v62 }
 0xade   :  { %5776 = vmatmul.msk.bf16.gmra.mxu0 %vm130_vm2, %v2901_v16  ;;  %5792 = vmatmul.msk.bf16.gmra.mxu1 %vm130_vm2, %v2901_v16  ;;  %v4089_v16 = vrot.slane %v8863_v8, 2 }
 0xae0   :  { %5836 = vmatpush.msk.msra.mxu1 %vm633_vm3, %v4089_v16 }
 0xae3   :  { %v8815_v18 = vpop.f32.mrf.mxu0  ;;  %v8817_v39 = vpop.f32.mrf.mxu1 }
 0xae4   :  { %v8819_v28 = vpop.permute.xlu0 %2820  ;;  %v3147_v9 = vmax.f32 %v3145_v41, %v8815_v18 }
 0xae5   :  { %10711 = vst [vmem:[#allocation33_spill] sm:$0xff] %v8819_v28  ;;  %v2823_v63 = vadd.f32 %v8819_v28, %v8723_v7  ;;  %v2824_v1 = vadd.f32 %v8819_v28, %v8734_v34 }
 0xae7   :  { %v2825_v32 = vadd.f32 %v6980_v33, %v2823_v63  ;;  %v2826_v30 = vadd.f32 %v6981_v43, %v2824_v1 }
 0xae9   :  { %2827 = vst [vmem:[#allocation5] sm:$0xff] %v2825_v32 }
 0xaea   :  { %2828 = vst [vmem:[#allocation5 + $0x8] sm:$0xff] %v2826_v30 }
 0xaeb   :  { %v8831_v50 = vpop.f32.mrf.mxu0  ;;  %v8833_v10 = vpop.f32.mrf.mxu1 }
 0xaec   :  { %v3148_v11 = vmax.f32 %v3146_v25, %v8831_v50 }
 0xaee   :  { %5777 = vmatmul.msk.bf16.gmra.mxu0 %vm130_vm2, %v2903_v15  ;;  %5793 = vmatmul.msk.bf16.gmra.mxu1 %vm130_vm2, %v2903_v15 }
 0xaf3   :  { %v8837_v7 = vpop.f32.mrf.mxu0  ;;  %v8839_v34 = vpop.f32.mrf.mxu1 }
 0xaf4   :  { %v3149_v8 = vmax.f32 %v3147_v9, %v8837_v7 }
 0xafb   :  { %v8841_v12 = vpop.f32.mrf.mxu0  ;;  %v8843_v27 = vpop.f32.mrf.mxu1 }
 0xafc   :  { %v3150_v5 = vmax.f32 %v3148_v11, %v8841_v12 }
 0xafe   :  { %5778 = vmatmul.msk.bf16.gmra.mxu0 %vm130_vm2, %v2905_v46  ;;  %5794 = vmatmul.msk.bf16.gmra.mxu1 %vm130_vm2, %v2905_v46 }
 0xb03   :  { %v8847_v40 = vpop.f32.mrf.mxu0  ;;  %v8849_v42 = vpop.f32.mrf.mxu1 }
 0xb04   :  { %v3151_v4 = vmax.f32 %v3149_v8, %v8847_v40 }
 0xb0b   :  { %v8851_v51 = vpop.f32.mrf.mxu0  ;;  %v8853_v13 = vpop.f32.mrf.mxu1 }
 0xb0c   :  { %v3152_v2 = vmax.f32 %v3150_v5, %v8851_v51 }
 0xb0e   :  { %5779 = vmatmul.msk.bf16.gmra.mxu0 %vm130_vm2, %v2907_v57  ;;  %5795 = vmatmul.msk.bf16.gmra.mxu1 %vm130_vm2, %v2907_v57  ;;  %v2911_v57 = vpop.trf.xlu1 }
 0xb13   :  { %v8857_v3 = vpop.f32.mrf.mxu0  ;;  %v8859_v29 = vpop.f32.mrf.mxu1 }
 0xb14   :  { %v3153_v52 = vmax.f32 %v3151_v4, %v8857_v3 }
 0xb1b   :  { %v8875_v35 = vpop.f32.mrf.mxu0  ;;  %v8877_v15 = vpop.f32.mrf.mxu1 }
 0xb1c   :  { %v3154_v14 = vmax.f32 %v3152_v2, %v8875_v35 }
 0xb1e   :  { %5780 = vmatmul.msk.bf16.gmra.mxu0 %vm130_vm2, %v8773_v54  ;;  %5796 = vmatmul.msk.bf16.gmra.mxu1 %vm130_vm2, %v8773_v54  ;;  %v10715_v54 = vld [vmem:[#allocation14_spill] sm:$0xff] }
 0xb23   :  { %v8883_v58 = vpop.f32.mrf.mxu0  ;;  %v8885_v46 = vpop.f32.mrf.mxu1 }
 0xb24   :  { %v3155_v41 = vmax.f32 %v3153_v52, %v8883_v58 }
 0xb2b   :  { %v8887_v20 = vpop.f32.mrf.mxu0  ;;  %v8891_v6 = vpop.f32.mrf.mxu1 }
 0xb2c   :  { %v3156_v25 = vmax.f32 %v3154_v14, %v8887_v20 }
 0xb2e   :  { %5781 = vmatmul.msk.bf16.gmra.mxu0 %vm130_vm2, %v2911_v57  ;;  %5797 = vmatmul.msk.bf16.gmra.mxu1 %vm130_vm2, %v2911_v57 }
 0xb33   :  { %v8893_v44 = vpop.f32.mrf.mxu0  ;;  %v8895_v63 = vpop.f32.mrf.mxu1 }
 0xb34   :  { %v3157_v9 = vmax.f32 %v3155_v41, %v8893_v44 }
 0xb3b   :  { %v8897_v1 = vpop.f32.mrf.mxu0  ;;  %v8905_v32 = vpop.f32.mrf.mxu1 }
 0xb3c   :  { %10714 = vst [vmem:[#allocation36_spill] sm:$0xff] %v8897_v1  ;;  %v3158_v11 = vmax.f32 %v3156_v25, %v8897_v1 }
 0xb3d   :  { %10717 = vst [vmem:[#allocation37_spill] sm:$0xff] %v8905_v32 }
 0xb3e   :  { %5835 = vmatmul.msk.f32.vlgmr.msra.gmra.mxu0 %vm130_vm2, %v10715_v54  ;;  %5837 = vmatmul.msk.f32.vlgmr.msra.gmra.mxu1 %vm130_vm2, %v10715_v54 }
 0xb43   :  { %v8903_v33 = vpop.f32.mrf.mxu0  ;;  %v8909_v30 = vpop.f32.mrf.mxu1 }
 0xb44   :  { %10716 = vst [vmem:[#allocation14_spill] sm:$0xff] %v8903_v33  ;;  %v3159_v8 = vmax.f32 %v3157_v9, %v8903_v33 }
 0xb45   :  { %10719 = vst [vmem:[#allocation39_spill] sm:$0xff] %v8909_v30 }
 0xb4b   :  { %v8907_v43 = vpop.f32.mrf.mxu0  ;;  %v8913_v16 = vpop.f32.mrf.mxu1 }
 0xb4c   :  { %10718 = vst [vmem:[#allocation38_spill] sm:$0xff] %v8907_v43  ;;  %v3160_v31 = vmax.f32 %v3158_v11, %v8907_v43 }
 0xb53   :  { %v8911_v23 = vpop.f32.mrf.mxu0  ;;  %v8917_v57 = vpop.f32.mrf.mxu1 }
 0xb54   :  { %10720 = vst [vmem:[#allocation40_spill] sm:$0xff] %v8911_v23  ;;  %v3161_v5 = vmax.f32 %v3159_v8, %v8911_v23 }
 0xb5b   :  { %v8915_v53 = vpop.f32.mrf.mxu0  ;;  %v8923_v54 = vpop.f32.mrf.mxu1 }
 0xb5c   :  { %10721 = vst [vmem:[#allocation41_spill] sm:$0xff] %v8915_v53  ;;  %v3162_v2 = vmax.f32 %v3160_v31, %v8915_v53 }
 0xb63   :  { %v8919_v28 = vpop.f32.mrf.mxu0  ;;  %v8927_v26 = vpop.f32.mrf.mxu1 }
 0xb64   :  { %10722 = vst [vmem:[#allocation42_spill] sm:$0xff] %v8919_v28  ;;  %v3163_v52 = vmax.f32 %v3161_v5, %v8919_v28 }
 0xb6b   :  { %v8921_v17 = vpop.f32.mrf.mxu0  ;;  %v8931_v48 = vpop.f32.mrf.mxu1 }
 0xb6c   :  { %10723 = vst [vmem:[#allocation43_spill] sm:$0xff] %v8921_v17  ;;  %v3164_v14 = vmax.f32 %v3162_v2, %v8921_v17 }
 0xb73   :  { %v8925_v49 = vpop.f32.mrf.mxu0  ;;  %v8935_v24 = vpop.f32.mrf.mxu1 }
 0xb74   :  { %v3165_v41 = vmax.f32 %v3163_v52, %v8925_v49 }
 0xb7b   :  { %v8929_v61 = vpop.f32.mrf.mxu0  ;;  %v8941_v45 = vpop.f32.mrf.mxu1 }
 0xb7c   :  { %v3166_v25 = vmax.f32 %v3164_v14, %v8929_v61 }
 0xb83   :  { %v8933_v47 = vpop.f32.mrf.mxu0  ;;  %v8955_v22 = vpop.f32.mrf.mxu1 }
 0xb84   :  { %v3167_v9 = vmax.f32 %v3165_v41, %v8933_v47 }
 0xb8b   :  { %v8937_v56 = vpop.f32.mrf.mxu0  ;;  %v8969_v62 = vpop.f32.mrf.mxu1 }
 0xb8c   :  { %v3168_v11 = vmax.f32 %v3166_v25, %v8937_v56 }
 0xb93   :  { %v8939_v19 = vpop.f32.mrf.mxu0  ;;  %v8981_v1 = vpop.f32.mrf.mxu1 }
 0xb94   :  { %v3169_v8 = vmax.f32 %v3167_v9, %v8939_v19  ;;  %v3182_v9 = vmax.f32 %v8791_v37, %v8805_v38 }
 0xb9b   :  { %v8949_v60 = vpop.f32.mrf.mxu0  ;;  %v8986_v14 = vpop.f32.mrf.mxu1 }
 0xb9c   :  { %v3170_v31 = vmax.f32 %v3168_v11, %v8949_v60  ;;  %v3181_v11 = vmax.f32 %v8783_v0, %v8797_v59 }
 0xba3   :  { %v8961_v55 = vpop.f32.mrf.mxu0 }
 0xba4   :  { %v3171_v5 = vmax.f32 %v3169_v8, %v8961_v55  ;;  %v3184_v8 = vmax.f32 %v3182_v9, %v8817_v39 }
 0xbab   :  { %v8973_v4 = vpop.f32.mrf.mxu0 }
 0xbac   :  { %v3172_v43 = vmax.f32 %v3170_v31, %v8973_v4 }
 0xbb3   :  { %v3052_v33 = vpop.f32.mrf.mxu0 }
 0xbb4   :  { %v3173_v2 = vmax.f32 %v3171_v5, %v3052_v33  ;;  %v8998_v5 = vpop.f32.mrf.mxu1 }
 0xbb6   :  { %v3174_v23 = vmax.f32 %v3172_v43, %v3173_v2  ;;  %v3183_v43 = vmax.f32 %v3181_v11, %v8811_v21 }
 0xbb8   :  { %v3175_v52 = vrot.slane %v3174_v23, 4  ;;  %v3185_v2 = vmax.f32 %v3183_v43, %v8833_v10 }
 0xbba   :  { %v3176_v53 = vmax.f32 %v3174_v23, %v3175_v52  ;;  %v3186_v23 = vmax.f32 %v3184_v8, %v8839_v34 }
 0xbbc   :  { %v3177_v41 = vrot.slane %v3176_v53, 2  ;;  %v3188_v52 = vmax.f32 %v3186_v23, %v8849_v42  ;;  %v9010_v23 = vpop.f32.mrf.mxu1 }
 0xbbe   :  { %v3178_v28 = vmax.f32 %v3176_v53, %v3177_v41  ;;  %v3190_v41 = vmax.f32 %v3188_v52, %v8859_v29 }
 0xbc0   :  { %v3179_v25 = vrot.slane %v3178_v28, 1 }
 0xbc2   :  { %v8990_v17 = vmax.f32 %v3178_v28, %v3179_v25  ;;  %v3187_v28 = vmax.f32 %v3185_v2, %v8843_v27 }
 0xbc4   :  { %v3280_v31 = vsub.f32 %v3052_v33, %v8990_v17  ;;  %v3189_v25 = vmax.f32 %v3187_v28, %v8853_v13  ;;  %v3192_v33 = vmax.f32 %v3190_v41, %v8885_v46 }
 0xbc6   :  { %v3406_v53 = vmul.f32 1.442695, %v3280_v31  ;;  %v3191_v9 = vmax.f32 %v3189_v25, %v8877_v15  ;;  %v3194_v11 = vmax.f32 %v3192_v33, %v8895_v63 }
 0xbc8   :  { %6448 = vpow2.f32 %v3406_v53  ;;  %v3193_v31 = vmax.f32 %v3191_v9, %v8891_v6  ;;  %v3196_v43 = vmax.f32 %v3194_v11, %v8909_v30  ;;  %v9022_v30 = vpop.f32.mrf.mxu1 }
 0xbca   :  { %v3195_v53 = vmax.f32 %v3193_v31, %v8905_v32  ;;  %v3198_v2 = vmax.f32 %v3196_v43, %v8917_v57 }
 0xbcc   :  { %v3197_v52 = vmax.f32 %v3195_v53, %v8913_v16  ;;  %v3200_v28 = vmax.f32 %v3198_v2, %v8927_v26 }
 0xbce   :  { %v6449_v8 = vpop.eup %6448  ;;  %v3199_v41 = vmax.f32 %v3197_v52, %v8923_v54  ;;  %v3202_v25 = vmax.f32 %v3200_v28, %v8935_v24  ;;  %v3248_v52 = vsub.f32 %v8893_v44, %v8990_v17  ;;  %v3238_v44 = vsub.f32 %v8851_v51, %v8990_v17 }
 0xbcf   :  { %3479 = vmatpush.msra.mxu3 %v6449_v8  ;;  %v3278_v51 = vsub.f32 %v8973_v4, %v8990_v17  ;;  %v3274_v4 = vsub.f32 %v8949_v60, %v8990_v17 }
 0xbd0   :  { %v3201_v33 = vmax.f32 %v3199_v41, %v8931_v48  ;;  %v3204_v9 = vmax.f32 %v3202_v25, %v8955_v22  ;;  %v3246_v41 = vsub.f32 %v8887_v20, %v8990_v17 }
 0xbd2   :  { %v3203_v11 = vmax.f32 %v3201_v33, %v8941_v45  ;;  %v3206_v8 = vmax.f32 %v3204_v9, %v8981_v1  ;;  %v3244_v33 = vsub.f32 %v8883_v58, %v8990_v17  ;;  %v3342_v9 = vmul.f32 1.442695, %v3248_v52 }
 0xbd3   :  { %v3236_v58 = vsub.f32 %v8847_v40, %v8990_v17  ;;  %v3232_v40 = vsub.f32 %v8837_v7, %v8990_v17 }
 0xbd4   :  { %v3205_v31 = vmax.f32 %v3203_v11, %v8969_v62  ;;  %v3208_v43 = vmax.f32 %v3206_v8, %v8998_v5  ;;  %v3242_v11 = vsub.f32 %v8875_v35, %v8990_v17  ;;  %v3338_v8 = vmul.f32 1.442695, %v3246_v41 }
 0xbd5   :  { %v3334_v32 = vmul.f32 1.442695, %v3244_v33  ;;  %6450 = vpow2.f32 %v3342_v9  ;;  %v3218_v35 = vsub.f32 %v8781_v36, %v8990_v17  ;;  %v3318_v33 = vmul.f32 1.442695, %v3236_v58  ;;  %v10724_v58 = vld [vmem:[#allocation32_spill] sm:$0xff] }
 0xbd6   :  { %v3207_v53 = vmax.f32 %v3205_v31, %v8986_v14  ;;  %v3210_v2 = vmax.f32 %v3208_v43, %v9022_v30  ;;  %v3240_v43 = vsub.f32 %v8857_v3, %v8990_v17  ;;  %6452 = vpow2.f32 %v3338_v8 }
 0xbd7   :  { %6454 = vpow2.f32 %v3334_v32  ;;  %v3234_v3 = vsub.f32 %v8841_v12, %v8990_v17  ;;  %v3276_v36 = vsub.f32 %v8961_v55, %v8990_v17  ;;  %v3282_v32 = vmul.f32 1.442695, %v3218_v35 }
 0xbd8   :  { %v3209_v28 = vmax.f32 %v3207_v53, %v9010_v23  ;;  %v3330_v53 = vmul.f32 1.442695, %v3242_v11  ;;  %v3230_v12 = vsub.f32 %v8831_v50, %v8990_v17  ;;  %v3272_v55 = vsub.f32 %v8939_v19, %v8990_v17 }
 0xbd9   :  { %v3314_v11 = vmul.f32 1.442695, %v3234_v3  ;;  %v10725_v3 = vld [vmem:[#allocation30_spill] sm:$0xff] }
 0xbda   :  { %v3211_v25 = vmax.f32 %v3209_v28, %v3210_v2  ;;  %v3326_v2 = vmul.f32 1.442695, %v3240_v43  ;;  %v3322_v28 = vmul.f32 1.442695, %v3238_v44  ;;  %6456 = vpow2.f32 %v3330_v53 }
 0xbdb   :  { %v6451_v52 = vpop.eup %6450  ;;  %v3228_v43 = vsub.f32 %v8815_v18, %v8990_v17  ;;  %v3310_v44 = vmul.f32 1.442695, %v3232_v40  ;;  %v3398_v53 = vmul.f32 1.442695, %v3276_v36  ;;  %v3306_v60 = vmul.f32 1.442695, %v3230_v12 }
 0xbdc   :  { %v3212_v31 = vrot.slane %v3211_v25, 4  ;;  %3456 = vmatpush.msra.mxu2 %v6451_v52  ;;  %6458 = vpow2.f32 %v3326_v2  ;;  %v3226_v2 = vsub.f32 %v10724_v58, %v8990_v17  ;;  %v3394_v52 = vmul.f32 1.442695, %v3274_v4  ;;  %v10726_v40 = vld [vmem:[#allocation28_spill] sm:$0xff] }
 0xbdd   :  { %6460 = vpow2.f32 %v3322_v28  ;;  %v3224_v19 = vsub.f32 %v10725_v3, %v8990_v17  ;;  %v3302_v28 = vmul.f32 1.442695, %v3228_v43  ;;  %v3264_v43 = vsub.f32 %v8925_v49, %v8990_v17  ;;  %v10729_v49 = vld [vmem:[#allocation42_spill] sm:$0xff] }
 0xbde   :  { %v3213_v20 = vmax.f32 %v3211_v25, %v3212_v31  ;;  %v6453_v25 = vpop.eup %6452  ;;  %v3402_v31 = vmul.f32 1.442695, %v3278_v51  ;;  %6462 = vpow2.f32 %v3318_v33  ;;  %v3268_v51 = vsub.f32 %v8933_v47, %v8990_v17 }
 0xbdf   :  { %3457 = vmatpush.msra.mxu2 %v6453_v25  ;;  %v6455_v9 = vpop.eup %6454  ;;  %6464 = vpow2.f32 %v3282_v32  ;;  %v3298_v33 = vmul.f32 1.442695, %v3226_v2  ;;  %v3266_v32 = vsub.f32 %v8929_v61, %v8990_v17  ;;  %v10728_v61 = vld [vmem:[#allocation43_spill] sm:$0xff]  ;;  %v3374_v3 = vmul.f32 1.442695, %v3264_v43 }
 0xbe0   :  { %v3214_v41 = vrot.slane %v3213_v20, 2  ;;  %v6457_v7 = vpop.eup %6456  ;;  %6466 = vpow2.f32 %v3314_v11  ;;  %v10727_v11 = vld [vmem:[#allocation13_spill] sm:$0xff] }
 0xbe1   :  { %3458 = vmatpush.msra.mxu2 %v6455_v9  ;;  %6468 = vpow2.f32 %v3402_v31  ;;  %v3220_v4 = vsub.f32 %v10727_v11, %v8990_v17  ;;  %v3294_v31 = vmul.f32 1.442695, %v3224_v19  ;;  %v3378_v2 = vmul.f32 1.442695, %v3266_v32 }
 0xbe2   :  { %v3215_v8 = vmax.f32 %v3213_v20, %v3214_v41  ;;  %v6459_v50 = vpop.eup %6458  ;;  %v3270_v20 = vsub.f32 %v8937_v56, %v8990_v17  ;;  %6470 = vpow2.f32 %v3310_v44  ;;  %v3390_v41 = vmul.f32 1.442695, %v3272_v55 }
 0xbe3   :  { %3459 = vmatpush.msra.mxu2 %v6457_v7  ;;  %v6461_v18 = vpop.eup %6460  ;;  %6472 = vpow2.f32 %v3398_v53  ;;  %v3222_v56 = vsub.f32 %v10726_v40, %v8990_v17  ;;  %v3382_v44 = vmul.f32 1.442695, %v3268_v51 }
 0xbe4   :  { %v3216_v35 = vrot.slane %v3215_v8, 1  ;;  %v6463_v25 = vpop.eup %6462  ;;  %6474 = vpow2.f32 %v3306_v60  ;;  %v3386_v12 = vmul.f32 1.442695, %v3270_v20  ;;  %v3260_v20 = vsub.f32 %v10729_v49, %v8990_v17 }
 0xbe5   :  { %3460 = vmatpush.msra.mxu2 %v6459_v50  ;;  %v9071_v36 = vpop.eup %6464  ;;  %6476 = vpow2.f32 %v3394_v52  ;;  %v3290_v53 = vmul.f32 1.442695, %v3222_v56 }
 0xbe6   :  { %v9075_v9 = vmax.f32 %v3215_v8, %v3216_v35  ;;  %v6467_v47 = vpop.eup %6466  ;;  %6478 = vpow2.f32 %v3302_v28  ;;  %v3262_v8 = vsub.f32 %v10728_v61, %v8990_v17  ;;  %v3286_v35 = vmul.f32 1.442695, %v3220_v4 }
 0xbe7   :  { %3461 = vmatpush.msra.mxu2 %v6461_v18  ;;  %v6469_v7 = vpop.eup %6468  ;;  %6480 = vpow2.f32 %v3390_v41  ;;  %v3366_v32 = vmul.f32 1.442695, %v3260_v20 }
 0xbe8   :  { %v6471_v55 = vpop.eup %6470  ;;  %6482 = vpow2.f32 %v3298_v33  ;;  %3480 = vmatpush.msra.mxu3 %v6469_v7  ;;  %v3249_v58 = vsub.f32 %v8895_v63, %v9075_v9  ;;  %v3247_v18 = vsub.f32 %v8891_v6, %v9075_v9  ;;  %v10730_v63 = vld [vmem:[#allocation41_spill] sm:$0xff]  ;;  %v3370_v51 = vmul.f32 1.442695, %v3262_v8  ;;  %v10731_v6 = vld [vmem:[#allocation40_spill] sm:$0xff] }
 0xbe9   :  { %3462 = vmatpush.msra.mxu2 %v6463_v25  ;;  %v6473_v50 = vpop.eup %6472  ;;  %6484 = vpow2.f32 %v3386_v12  ;;  %v3258_v28 = vsub.f32 %v10730_v63, %v8990_v17  ;;  %v3245_v25 = vsub.f32 %v8885_v46, %v9075_v9  ;;  %v3256_v33 = vsub.f32 %v10731_v6, %v8990_v17  ;;  %v10732_v46 = vld [vmem:[#allocation38_spill] sm:$0xff]  ;;  %v9111_v63 = vpop.f32.mrf.mxu2 }
 0xbea   :  { %v6475_v60 = vpop.eup %6474  ;;  %6486 = vpow2.f32 %v3294_v31  ;;  %3481 = vmatpush.msra.mxu3 %v6473_v50  ;;  %v3344_v40 = vmul.f32 1.442695, %v3249_v58  ;;  %v3340_v11 = vmul.f32 1.442695, %v3247_v18  ;;  %v3254_v31 = vsub.f32 %v10732_v46, %v8990_v17 }
 0xbeb   :  { %3463 = vmatpush.msra.mxu2 %v6467_v47  ;;  %v6477_v52 = vpop.eup %6476  ;;  %6488 = vpow2.f32 %v3382_v44  ;;  %v3243_v47 = vsub.f32 %v8877_v15, %v9075_v9  ;;  %v3362_v7 = vmul.f32 1.442695, %v3258_v28  ;;  %v3241_v44 = vsub.f32 %v8859_v29, %v9075_v9  ;;  %v10733_v15 = vld [vmem:[#allocation14_spill] sm:$0xff]  ;;  %v10734_v29 = vld [vmem:[#allocation36_spill] sm:$0xff] }
 0xbec   :  { %v6479_v19 = vpop.eup %6478  ;;  %6490 = vpow2.f32 %v3290_v53  ;;  %3482 = vmatpush.msra.mxu3 %v6477_v52  ;;  %v3252_v8 = vsub.f32 %v10733_v15, %v8990_v17  ;;  %v3358_v53 = vmul.f32 1.442695, %v3256_v33  ;;  %v3239_v58 = vsub.f32 %v8853_v13, %v9075_v9 }
 0xbed   :  { %3464 = vmatpush.msra.mxu2 %v6471_v55  ;;  %v6481_v41 = vpop.eup %6480  ;;  %6492 = vpow2.f32 %v3378_v2  ;;  %v3336_v55 = vmul.f32 1.442695, %v3245_v25  ;;  %v3332_v2 = vmul.f32 1.442695, %v3243_v47  ;;  %v3250_v49 = vsub.f32 %v10734_v29, %v8990_v17 }
 0xbee   :  { %v6483_v56 = vpop.eup %6482  ;;  %6494 = vpow2.f32 %v3286_v35  ;;  %3483 = vmatpush.msra.mxu3 %v6481_v41  ;;  %v3354_v20 = vmul.f32 1.442695, %v3254_v31  ;;  %v3237_v52 = vsub.f32 %v8849_v42, %v9075_v9  ;;  %v3328_v18 = vmul.f32 1.442695, %v3241_v44 }
 0xbef   :  { %3465 = vmatpush.msra.mxu2 %v6475_v60  ;;  %v6485_v12 = vpop.eup %6484  ;;  %6496 = vpow2.f32 %v3374_v3  ;;  %v3281_v13 = vsub.f32 %v9022_v30, %v9075_v9  ;;  %v3235_v28 = vsub.f32 %v8843_v27, %v9075_v9  ;;  %v3279_v41 = vsub.f32 %v9010_v23, %v9075_v9 }
 0xbf0   :  { %v6487_v4 = vpop.eup %6486  ;;  %6498 = vpow2.f32 %v3370_v51  ;;  %3484 = vmatpush.msra.mxu3 %v6485_v12  ;;  %v3324_v51 = vmul.f32 1.442695, %v3239_v58  ;;  %v3346_v25 = vmul.f32 1.442695, %v3250_v49  ;;  %v3231_v33 = vsub.f32 %v8833_v10, %v9075_v9 }
 0xbf1   :  { %3466 = vmatpush.msra.mxu2 %v6479_v19  ;;  %v6489_v43 = vpop.eup %6488  ;;  %6500 = vpow2.f32 %v3344_v40  ;;  %v3350_v19 = vmul.f32 1.442695, %v3252_v8  ;;  %v3233_v40 = vsub.f32 %v8839_v34, %v9075_v9  ;;  %v3408_v6 = vmul.f32 1.442695, %v3281_v13 }
 0xbf2   :  { %v6491_v61 = vpop.eup %6490  ;;  %6502 = vpow2.f32 %v3366_v32  ;;  %3485 = vmatpush.msra.mxu3 %v6489_v43  ;;  %v3316_v32 = vmul.f32 1.442695, %v3235_v28  ;;  %v3275_v34 = vsub.f32 %v8986_v14, %v9075_v9  ;;  %v3404_v47 = vmul.f32 1.442695, %v3279_v41 }
 0xbf3   :  { %3467 = vmatpush.msra.mxu2 %v6483_v56  ;;  %v6493_v50 = vpop.eup %6492  ;;  %6504 = vpow2.f32 %v3340_v11  ;;  %v3320_v56 = vmul.f32 1.442695, %v3237_v52  ;;  %v3273_v10 = vsub.f32 %v8981_v1, %v9075_v9  ;;  %v3227_v14 = vsub.f32 %v8811_v21, %v9075_v9 }
 0xbf4   :  { %v6495_v60 = vpop.eup %6494  ;;  %6506 = vpow2.f32 %v3362_v7  ;;  %3486 = vmatpush.msra.mxu3 %v6493_v50  ;;  %v3308_v43 = vmul.f32 1.442695, %v3231_v33  ;;  %v3225_v1 = vsub.f32 %v8805_v38, %v9075_v9  ;;  %v10735_v8 = vmov 1.0  }
 0xbf5   :  { %3468 = vmatpush.msra.mxu2 %v6487_v4  ;;  %v6497_v35 = vpop.eup %6496  ;;  %6508 = vpow2.f32 %v3336_v55  ;;  %v3312_v4 = vmul.f32 1.442695, %v3233_v40  ;;  %v3396_v55 = vmul.f32 1.442695, %v3275_v34  ;;  %v3269_v21 = vsub.f32 %v8955_v22, %v9075_v9 }
 0xbf6   :  { %v6499_v3 = vpop.eup %6498  ;;  %6510 = vpow2.f32 %v3358_v53  ;;  %3487 = vmatpush.msra.mxu3 %v6497_v35  ;;  %v3392_v50 = vmul.f32 1.442695, %v3273_v10  ;;  %v3223_v58 = vsub.f32 %v8797_v59, %v9075_v9  ;;  %v3267_v29 = vsub.f32 %v8941_v45, %v9075_v9  ;;  %v10738_v10 = vld [vmem:[#allocation37_spill] sm:$0xff] }
 0xbf7   :  { %3469 = vmatpush.msra.mxu2 %v6491_v61  ;;  %v6501_v17 = vpop.eup %6500  ;;  %6512 = vpow2.f32 %v3332_v2  ;;  %v3300_v2 = vmul.f32 1.442695, %v3227_v14  ;;  %v3296_v35 = vmul.f32 1.442695, %v3225_v1  ;;  %v3265_v52 = vsub.f32 %v8935_v24, %v9075_v9 }
 0xbf8   :  { %v6503_v42 = vpop.eup %6502  ;;  %6514 = vpow2.f32 %v3354_v20  ;;  %3488 = vmatpush.msra.mxu3 %v6499_v3  ;;  %v3221_v20 = vsub.f32 %v8791_v37, %v9075_v9  ;;  %v3219_v3 = vsub.f32 %v8783_v0, %v9075_v9  ;;  %v3292_v13 = vmul.f32 1.442695, %v3223_v58  ;;  %v10741_v58 = vld [vmem:[#allocation35_spill] sm:$0xff] }
 0xbf9   :  { %3470 = vmatpush.msra.mxu2 %v6495_v60  ;;  %v6505_v30 = vpop.eup %6504  ;;  %6516 = vpow2.f32 %v3328_v18  ;;  %v9142_v60 = vpop.f32.mrf.mxu3  ;;  %v3384_v18 = vmul.f32 1.442695, %v3269_v21  ;;  %v3376_v41 = vmul.f32 1.442695, %v3265_v52  ;;  %v10740_v21 = vld [vmem:[#allocation26_spill] sm:$0xff]  ;;  %v10748_v52 = vld [vmem:[#allocation11_spill] sm:$0xff] }
 0xbfa   :  { %v6507_v27 = vpop.eup %6506  ;;  %6518 = vpow2.f32 %v3350_v19  ;;  %3489 = vmatpush.msra.mxu3 %v6503_v42  ;;  %v3263_v19 = vsub.f32 %v8931_v48, %v9075_v9  ;;  %v3288_v28 = vmul.f32 1.442695, %v3221_v20  ;;  %v3261_v42 = vsub.f32 %v8927_v26, %v9075_v9  ;;  %v10746_v20 = vld [vmem:[#allocation20_spill] sm:$0xff] }
 0xbfb   :  { %3471 = vmatpush.msra.mxu2 %v9071_v36  ;;  %v3277_v36 = vsub.f32 %v8998_v5, %v9075_v9  ;;  %v6509_v23 = vpop.eup %6508  ;;  %6520 = vpow2.f32 %v3324_v51  ;;  %v3229_v5 = vsub.f32 %v8817_v39, %v9075_v9  ;;  %v3271_v39 = vsub.f32 %v8969_v62, %v9075_v9 }
 0xbfc   :  { %3472 = vmatmul.f32.vlgmr.msra.gmra.mxu2 %v9111_v63  ;;  %v6511_v12 = vpop.eup %6510  ;;  %6522 = vpow2.f32 %v3346_v25  ;;  %3490 = vmatpush.msra.mxu3 %v6507_v27  ;;  %v3284_v25 = vmul.f32 1.442695, %v3219_v3  ;;  %v3259_v48 = vsub.f32 %v8923_v54, %v9075_v9  ;;  %v3372_v40 = vmul.f32 1.442695, %v3263_v19  ;;  %v10749_v19 = vld [vmem:[#allocation29_spill] sm:$0xff] }
 0xbfd   :  { %3502 = vmatpush.msrb.mxu2 %v6501_v17  ;;  %v6513_v11 = vpop.eup %6512  ;;  %6524 = vpow2.f32 %v3320_v56  ;;  %v3400_v31 = vmul.f32 1.442695, %v3277_v36  ;;  %v3304_v15 = vmul.f32 1.442695, %v3229_v5  ;;  %v3388_v49 = vmul.f32 1.442695, %v3271_v39 }
 0xbfe   :  { %v6515_v46 = vpop.eup %6514  ;;  %6526 = vpow2.f32 %v3408_v6  ;;  %3491 = vmatpush.msra.mxu3 %v6511_v12  ;;  %v3380_v17 = vmul.f32 1.442695, %v3267_v29  ;;  %v3257_v26 = vsub.f32 %v8917_v57, %v9075_v9  ;;  %v3368_v6 = vmul.f32 1.442695, %v3261_v42  ;;  %v10736_v57 = vld [vmem:[#allocation39_spill] sm:$0xff]  ;;  %v10737_v5 = vld [vmem:[#allocation22_spill] sm:$0xff] }
 0xbff   :  { %3503 = vmatpush.msrb.mxu2 %v6505_v30  ;;  %v6517_v7 = vpop.eup %6516  ;;  %6528 = vpow2.f32 %v3316_v32  ;;  %v3255_v54 = vsub.f32 %v8913_v16, %v9075_v9  ;;  %v3364_v33 = vmul.f32 1.442695, %v3259_v48  ;;  %v3253_v34 = vsub.f32 %v10736_v57, %v9075_v9  ;;  %v10742_v29 = vld [vmem:[#allocation10_spill] sm:$0xff]  ;;  %v10758_v57 = vld [vmem:[#allocation15_spill] sm:$0xff] }
 0xc00   :  { %v6519_v44 = vpop.eup %6518  ;;  %6530 = vpow2.f32 %v3404_v47  ;;  %3492 = vmatpush.msra.mxu3 %v6515_v46  ;;  %v3360_v47 = vmul.f32 1.442695, %v3257_v26  ;;  %v3251_v16 = vsub.f32 %v10738_v10, %v9075_v9  ;;  %v10754_v26 = vld [vmem:[#allocation23_spill] sm:$0xff] }
 0xc01   :  { %3504 = vmatpush.msrb.mxu2 %v6509_v23  ;;  %v6521_v61 = vpop.eup %6520  ;;  %6532 = vpow2.f32 %v3312_v4  ;;  %v3588_v4 = vrot.slane %v10737_v5, 1 }
 0xc02   :  { %v6523_v53 = vpop.eup %6522  ;;  %6534 = vpow2.f32 %v3400_v31  ;;  %3493 = vmatpush.msra.mxu3 %v6519_v44  ;;  %v3356_v31 = vmul.f32 1.442695, %v3255_v54  ;;  %v10739_v44 = vld [vmem:[#allocation34_spill] sm:$0xff]  ;;  %v3348_v1 = vmul.f32 1.442695, %v3251_v16 }
 0xc03   :  { %3505 = vmatpush.msrb.mxu2 %v6513_v11  ;;  %v6525_v62 = vpop.eup %6524  ;;  %6536 = vpow2.f32 %v3308_v43  ;;  %v3352_v43 = vmul.f32 1.442695, %v3253_v34  ;;  %v4762_v39 = vrot.slane %v10739_v44, 4 }
 0xc04   :  { %3475 = vmatmul.f32.gmra.mxu2 %v10735_v8  ;;  %v6527_v38 = vpop.eup %6526  ;;  %6538 = vpow2.f32 %v3396_v55  ;;  %3494 = vmatpush.msra.mxu3 %v6523_v53  ;;  %v3639_v55 = vsel %vm179_vm1, %v3588_v4, 0 }
 0xc05   :  { %3506 = vmatpush.msrb.mxu2 %v6517_v7  ;;  %v6529_v22 = vpop.eup %6528  ;;  %6540 = vpow2.f32 %v3304_v15  ;;  %3495 = vmatmul.f32.vlgmr.msra.gmra.mxu3 %v9142_v60 }
 0xc06   :  { %3525 = vmatpush.msrb.mxu3 %v6527_v38  ;;  %v6531_v59 = vpop.eup %6530  ;;  %6542 = vpow2.f32 %v3392_v50  ;;  %v3589_v50 = vrot.slane %v10740_v21, 1 }
 0xc07   :  { %3507 = vmatpush.msrb.mxu2 %v6521_v61  ;;  %v6533_v45 = vpop.eup %6532  ;;  %6544 = vpow2.f32 %v3300_v2  ;;  %v4763_v2 = vrot.slane %v10741_v58, 4 }
 0xc08   :  { %3526 = vmatpush.msrb.mxu3 %v6531_v59  ;;  %v6535_v37 = vpop.eup %6534  ;;  %6546 = vpow2.f32 %v3388_v49  ;;  %v3642_v38 = vsel %vm179_vm1, %v3589_v50, 0  ;;  %v10743_v49 = vld [vmem:[#allocation25_spill] sm:$0xff]  ;;  %v10763_v50 = vld [vmem:[#allocation27_spill] sm:$0xff] }
 0xc09   :  { %3508 = vmatpush.msrb.mxu2 %v6525_v62  ;;  %v6537_v24 = vpop.eup %6536  ;;  %6548 = vpow2.f32 %v3296_v35  ;;  %v10747_v35 = vld [vmem:[#allocation19_spill] sm:$0xff] }
 0xc0a   :  { %3527 = vmatpush.msrb.mxu3 %v6535_v37  ;;  %v6539_v51 = vpop.eup %6538  ;;  %6550 = vpow2.f32 %v3384_v18 }
 0xc0b   :  { %3509 = vmatpush.msrb.mxu2 %v6529_v22  ;;  %v6541_v0 = vpop.eup %6540  ;;  %6552 = vpow2.f32 %v3292_v13  ;;  %v10745_v22 = vld [vmem:[#allocation8_spill] sm:$0xff] }
 0xc0c   :  { %3528 = vmatpush.msrb.mxu3 %v6539_v51  ;;  %v6543_v30 = vpop.eup %6542  ;;  %6554 = vpow2.f32 %v3380_v17 }
 0xc0d   :  { %3510 = vmatpush.msrb.mxu2 %v6533_v45  ;;  %v6545_v56 = vpop.eup %6544  ;;  %6556 = vpow2.f32 %v3288_v28  ;;  %3498 = vmatmul.f32.gmra.mxu3 %v10735_v8 }
 0xc0e   :  { %3529 = vmatpush.msrb.mxu3 %v6543_v30  ;;  %v6547_v27 = vpop.eup %6546  ;;  %6558 = vpow2.f32 %v3376_v41 }
 0xc0f   :  { %3511 = vmatpush.msrb.mxu2 %v6537_v24  ;;  %v6549_v36 = vpop.eup %6548  ;;  %6560 = vpow2.f32 %v3284_v25 }
 0xc10   :  { %3530 = vmatpush.msrb.mxu3 %v6547_v27  ;;  %v6551_v23 = vpop.eup %6550  ;;  %6562 = vpow2.f32 %v3372_v40 }
 0xc11   :  { %3512 = vmatpush.msrb.mxu2 %v6541_v0  ;;  %v6553_v32 = vpop.eup %6552  ;;  %6564 = vpow2.f32 %v3368_v6  ;;  %v10751_v0 = vld [vmem:[#allocation12_spill] sm:$0xff] }
 0xc12   :  { %3531 = vmatpush.msrb.mxu3 %v6551_v23  ;;  %v6555_v12 = vpop.eup %6554  ;;  %6566 = vpow2.f32 %v3364_v33 }
 0xc13   :  { %3513 = vmatpush.msrb.mxu2 %v6545_v56  ;;  %v6557_v11 = vpop.eup %6556  ;;  %6568 = vpow2.f32 %v3360_v47 }
 0xc14   :  { %3532 = vmatpush.msrb.mxu3 %v6555_v12  ;;  %v6559_v46 = vpop.eup %6558  ;;  %6570 = vpow2.f32 %v3356_v31 }
 0xc15   :  { %3514 = vmatpush.msrb.mxu2 %v6549_v36  ;;  %v6561_v7 = vpop.eup %6560  ;;  %6572 = vpow2.f32 %v3352_v43 }
 0xc16   :  { %3533 = vmatpush.msrb.mxu3 %v6559_v46  ;;  %v6563_v14 = vpop.eup %6562  ;;  %6574 = vpow2.f32 %v3348_v1  ;;  %v10760_v46 = vld [vmem:[#allocation24_spill] sm:$0xff]  ;;  %v10762_v1 = vld [vmem:[#allocation21_spill] sm:$0xff] }
 0xc17   :  { %3515 = vmatpush.msrb.mxu2 %v6553_v32  ;;  %v6565_v61 = vpop.eup %6564 }
 0xc18   :  { %3534 = vmatpush.msrb.mxu3 %v6563_v14  ;;  %v6567_v9 = vpop.eup %6566  ;;  %v10761_v14 = vld [vmem:[#allocation18_spill] sm:$0xff] }
 0xc19   :  { %3516 = vmatpush.msrb.mxu2 %v6557_v11  ;;  %v6569_v15 = vpop.eup %6568 }
 0xc1a   :  { %3535 = vmatpush.msrb.mxu3 %v6565_v61  ;;  %v6571_v53 = vpop.eup %6570 }
 0xc1b   :  { %3517 = vmatpush.msrb.mxu2 %v6561_v7 }
 0xc1c   :  { %3518 = vmatmul.f32.vlgmr.msrb.gmra.mxu2 %v9111_v63  ;;  %3536 = vmatpush.msrb.mxu3 %v6567_v9  ;;  %v6573_v63 = vpop.eup %6572 }
 0xc1d   :  { %3651 = vmatpush.bf16.msra.mxu2 %v3639_v55  ;;  %v6575_v62 = vpop.eup %6574 }
 0xc1e   :  { %3537 = vmatpush.msrb.mxu3 %v6569_v15 }
 0xc20   :  { %3538 = vmatpush.msrb.mxu3 %v6571_v53 }
 0xc21   :  { %5870 = vmatpush.msk.msrb.mxu2 %vm633_vm3, %v4762_v39 }
 0xc22   :  { %3539 = vmatpush.msrb.mxu3 %v6573_v63 }
 0xc24   :  { %3521 = vmatmul.f32.gmra.mxu2 %v10735_v8  ;;  %3540 = vmatpush.msrb.mxu3 %v6575_v62 }
 0xc25   :  { %3541 = vmatmul.f32.vlgmr.msrb.gmra.mxu3 %v9142_v60  ;;  %v10744_v60 = vld [vmem:[#allocation9_spill] sm:$0xff] }
 0xc26   :  { %3740 = vmatpush.bf16.msra.mxu3 %v3642_v38 }
 0xc2a   :  { %5872 = vmatpush.msk.msrb.mxu3 %vm633_vm3, %v4763_v2 }
 0xc2c   :  { %5802 = vmatmul.msk.bf16.vlgmr.msra.gmra.mxu2 %vm130_vm2, %v10742_v29 }
 0xc2d   :  { %3544 = vmatmul.f32.gmra.mxu3 %v10735_v8 }
 0xc35   :  { %5818 = vmatmul.msk.bf16.vlgmr.msra.gmra.mxu3 %vm130_vm2, %v10742_v29 }
 0xc3c   :  { %5803 = vmatmul.msk.bf16.gmra.mxu2 %vm130_vm2, %v10743_v49 }
 0xc45   :  { %5819 = vmatmul.msk.bf16.gmra.mxu3 %vm130_vm2, %v10743_v49  ;;  %v10764_v49 = vld [vmem:[#allocation31_spill] sm:$0xff] }
 0xc4c   :  { %5804 = vmatmul.msk.bf16.gmra.mxu2 %vm130_vm2, %v10744_v60 }
 0xc55   :  { %5820 = vmatmul.msk.bf16.gmra.mxu3 %vm130_vm2, %v10744_v60 }
 0xc5c   :  { %5805 = vmatmul.msk.bf16.gmra.mxu2 %vm130_vm2, %v10745_v22 }
 0xc65   :  { %5821 = vmatmul.msk.bf16.gmra.mxu3 %vm130_vm2, %v10745_v22 }
 0xc6c   :  { %5806 = vmatmul.msk.bf16.gmra.mxu2 %vm130_vm2, %v10746_v20 }
 0xc75   :  { %5822 = vmatmul.msk.bf16.gmra.mxu3 %vm130_vm2, %v10746_v20 }
 0xc7c   :  { %5807 = vmatmul.msk.bf16.gmra.mxu2 %vm130_vm2, %v10747_v35 }
 0xc7f   :  { %v3473_v59 = vpop.f32.mrf.mxu2 }
 0xc85   :  { %5823 = vmatmul.msk.bf16.gmra.mxu3 %vm130_vm2, %v10747_v35 }
 0xc87   :  { %v3476_v3 = vpop.f32.mrf.mxu2 }
 0xc88   :  { %v3496_v18 = vpop.f32.mrf.mxu3 }
 0xc89   :  { %v3497_v45 = vadd.f32 %v3496_v18, %v3473_v59  ;;  %v10765_v59 = vld [vmem:[#allocation17_spill] sm:$0xff] }
 0xc8c   :  { %5808 = vmatmul.msk.bf16.gmra.mxu2 %vm130_vm2, %v10748_v52 }
 0xc90   :  { %v3499_v13 = vpop.f32.mrf.mxu3 }
 0xc91   :  { %v3500_v37 = vadd.f32 %v3499_v13, %v3476_v3 }
 0xc93   :  { %6576 = vrcp.f32 %v3500_v37 }
 0xc95   :  { %5824 = vmatmul.msk.bf16.gmra.mxu3 %vm130_vm2, %v10748_v52 }
 0xc99   :  { %v6577_v17 = vpop.eup %6576 }
 0xc9a   :  { %v3550_v28 = vperm.slane %v6577_v17, 0 }
 0xc9c   :  { %5809 = vmatmul.msk.bf16.gmra.mxu2 %vm130_vm2, %v10749_v19  ;;  %v9210_v51 = vmul.f32 %v3550_v28, %v3497_v45 }
 0xc9e   :  { %10750 = vst [vmem:[#allocation32_spill] sm:$0xff] %v9210_v51 }
 0xc9f   :  { %v3519_v24 = vpop.f32.mrf.mxu2 }
 0xca5   :  { %5825 = vmatmul.msk.bf16.gmra.mxu3 %vm130_vm2, %v10749_v19 }
 0xca7   :  { %v3522_v42 = vpop.f32.mrf.mxu2 }
 0xca8   :  { %v3542_v41 = vpop.f32.mrf.mxu3 }
 0xca9   :  { %v3543_v25 = vadd.f32 %v3542_v41, %v3519_v24 }
 0xcac   :  { %5810 = vmatmul.msk.bf16.gmra.mxu2 %vm130_vm2, %v10751_v0 }
 0xcaf   :  { %v9216_v30 = vpop.f32.mrf.mxu2 }
 0xcb0   :  { %10752 = vst [vmem:[#allocation30_spill] sm:$0xff] %v9216_v30  ;;  %v3545_v48 = vpop.f32.mrf.mxu3 }
 0xcb1   :  { %v3546_v40 = vadd.f32 %v3545_v48, %v3522_v42 }
 0xcb3   :  { %6578 = vrcp.f32 %v3546_v40 }
 0xcb5   :  { %5826 = vmatmul.msk.bf16.gmra.mxu3 %vm130_vm2, %v10751_v0 }
 0xcb7   :  { %v9218_v56 = vpop.f32.mrf.mxu2 }
 0xcb8   :  { %10753 = vst [vmem:[#allocation28_spill] sm:$0xff] %v9218_v56  ;;  %v9222_v27 = vpop.f32.mrf.mxu3 }
 0xcb9   :  { %v6579_v6 = vpop.eup %6578 }
 0xcba   :  { %v3551_v36 = vperm.slane %v6579_v6, 0 }
 0xcbc   :  { %5811 = vmatmul.msk.bf16.gmra.mxu2 %vm130_vm2, %v10754_v26  ;;  %v9228_v54 = vmul.f32 %v3551_v36, %v3543_v25 }
 0xcbe   :  { %10756 = vst [vmem:[#allocation43_spill] sm:$0xff] %v9228_v54 }
 0xcbf   :  { %v9226_v23 = vpop.f32.mrf.mxu2 }
 0xcc0   :  { %10755 = vst [vmem:[#allocation13_spill] sm:$0xff] %v9226_v23  ;;  %v9230_v33 = vpop.f32.mrf.mxu3 }
 0xcc5   :  { %5827 = vmatmul.msk.bf16.gmra.mxu3 %vm130_vm2, %v10754_v26 }
 0xcc7   :  { %v9232_v32 = vpop.f32.mrf.mxu2 }
 0xcc8   :  { %10757 = vst [vmem:[#allocation42_spill] sm:$0xff] %v9232_v32  ;;  %v9236_v12 = vpop.f32.mrf.mxu3 }
 0xccc   :  { %5812 = vmatmul.msk.bf16.gmra.mxu2 %vm130_vm2, %v10758_v57 }
 0xccf   :  { %v9240_v34 = vpop.f32.mrf.mxu2 }
 0xcd0   :  { %10759 = vst [vmem:[#allocation41_spill] sm:$0xff] %v9240_v34  ;;  %v9242_v47 = vpop.f32.mrf.mxu3 }
 0xcd5   :  { %5828 = vmatmul.msk.bf16.gmra.mxu3 %vm130_vm2, %v10758_v57 }
 0xcd7   :  { %v9244_v11 = vpop.f32.mrf.mxu2 }
 0xcd8   :  { %v9248_v4 = vpop.f32.mrf.mxu3 }
 0xcdc   :  { %5813 = vmatmul.msk.bf16.gmra.mxu2 %vm130_vm2, %v10760_v46 }
 0xcdf   :  { %v9252_v10 = vpop.f32.mrf.mxu2 }
 0xce0   :  { %v9254_v16 = vpop.f32.mrf.mxu3 }
 0xce5   :  { %5829 = vmatmul.msk.bf16.gmra.mxu3 %vm130_vm2, %v10760_v46 }
 0xce7   :  { %v9256_v31 = vpop.f32.mrf.mxu2 }
 0xce8   :  { %v9260_v7 = vpop.f32.mrf.mxu3 }
 0xcec   :  { %5814 = vmatmul.msk.bf16.gmra.mxu2 %vm130_vm2, %v10761_v14 }
 0xcef   :  { %v9264_v43 = vpop.f32.mrf.mxu2 }
 0xcf0   :  { %v9266_v39 = vpop.f32.mrf.mxu3 }
 0xcf5   :  { %5830 = vmatmul.msk.bf16.gmra.mxu3 %vm130_vm2, %v10761_v14  ;;  %v3822_v14 = vmax.f32 %v9216_v30, %v9226_v23 }
 0xcf7   :  { %v9268_v55 = vpop.f32.mrf.mxu2 }
 0xcf8   :  { %v9272_v61 = vpop.f32.mrf.mxu3 }
 0xcfc   :  { %5815 = vmatmul.msk.bf16.gmra.mxu2 %vm130_vm2, %v10762_v1 }
 0xcff   :  { %v9276_v9 = vpop.f32.mrf.mxu2 }
 0xd00   :  { %v9278_v15 = vpop.f32.mrf.mxu3 }
 0xd05   :  { %5831 = vmatmul.msk.bf16.gmra.mxu3 %vm130_vm2, %v10762_v1  ;;  %v3823_v1 = vmax.f32 %v9218_v56, %v9232_v32 }
 0xd07   :  { %v9280_v53 = vpop.f32.mrf.mxu2 }
 0xd08   :  { %v9284_v63 = vpop.f32.mrf.mxu3 }
 0xd0c   :  { %5816 = vmatmul.msk.bf16.gmra.mxu2 %vm130_vm2, %v10763_v50 }
 0xd0f   :  { %v9288_v62 = vpop.f32.mrf.mxu2 }
 0xd10   :  { %v9290_v2 = vpop.f32.mrf.mxu3 }
 0xd15   :  { %5832 = vmatmul.msk.bf16.gmra.mxu3 %vm130_vm2, %v10763_v50 }
 0xd17   :  { %v9292_v38 = vpop.f32.mrf.mxu2 }
 0xd18   :  { %v9296_v29 = vpop.f32.mrf.mxu3 }
 0xd1c   :  { %5817 = vmatmul.msk.bf16.gmra.mxu2 %vm130_vm2, %v10764_v49 }
 0xd1f   :  { %v9300_v60 = vpop.f32.mrf.mxu2 }
 0xd20   :  { %v9302_v22 = vpop.f32.mrf.mxu3 }
 0xd25   :  { %5833 = vmatmul.msk.bf16.gmra.mxu3 %vm130_vm2, %v10764_v49  ;;  %v3824_v49 = vmax.f32 %v3822_v14, %v9240_v34 }
 0xd27   :  { %v9304_v20 = vpop.f32.mrf.mxu2  ;;  %v3826_v51 = vmax.f32 %v3824_v49, %v9252_v10 }
 0xd28   :  { %v9308_v35 = vpop.f32.mrf.mxu3 }
 0xd29   :  { %v3828_v21 = vmax.f32 %v3826_v51, %v9264_v43 }
 0xd2b   :  { %v3830_v5 = vmax.f32 %v3828_v21, %v9276_v9 }
 0xd2c   :  { %5871 = vmatmul.msk.f32.vlgmr.msrb.gmra.mxu2 %vm130_vm2, %v10765_v59 }
 0xd2d   :  { %v3832_v30 = vmax.f32 %v3830_v5, %v9288_v62 }
 0xd2f   :  { %v9312_v52 = vpop.f32.mrf.mxu2  ;;  %v3834_v49 = vmax.f32 %v3832_v30, %v9300_v60 }
 0xd30   :  { %10766 = vst [vmem:[#allocation40_spill] sm:$0xff] %v9312_v52  ;;  %v9314_v18 = vpop.f32.mrf.mxu3 }
 0xd31   :  { %v3836_v51 = vmax.f32 %v3834_v49, %v9312_v52 }
 0xd35   :  { %5873 = vmatmul.msk.f32.vlgmr.msrb.gmra.mxu3 %vm130_vm2, %v10765_v59  ;;  %v3825_v59 = vmax.f32 %v3823_v1, %v9244_v11 }
 0xd37   :  { %v9316_v45 = vpop.f32.mrf.mxu2  ;;  %v3827_v58 = vmax.f32 %v3825_v59, %v9256_v31 }
 0xd38   :  { %10767 = vst [vmem:[#allocation38_spill] sm:$0xff] %v9316_v45  ;;  %v9320_v3 = vpop.f32.mrf.mxu3 }
 0xd39   :  { %10768 = vst [vmem:[#allocation14_spill] sm:$0xff] %v9320_v3  ;;  %v3829_v44 = vmax.f32 %v3827_v58, %v9268_v55 }
 0xd3b   :  { %v3831_v8 = vmax.f32 %v3829_v44, %v9280_v53 }
 0xd3d   :  { %v3833_v14 = vmax.f32 %v3831_v8, %v9292_v38 }
 0xd3f   :  { %v9322_v13 = vpop.f32.mrf.mxu2  ;;  %v3835_v59 = vmax.f32 %v3833_v14, %v9304_v20 }
 0xd40   :  { %10769 = vst [vmem:[#allocation36_spill] sm:$0xff] %v9322_v13  ;;  %v9324_v37 = vpop.f32.mrf.mxu3  ;;  %v3838_v21 = vmax.f32 %v3836_v51, %v9322_v13 }
 0xd41   :  { %10770 = vst [vmem:[#allocation39_spill] sm:$0xff] %v9324_v37  ;;  %v3837_v58 = vmax.f32 %v3835_v59, %v9316_v45 }
 0xd47   :  { %v9326_v19 = vpop.f32.mrf.mxu2 }
 0xd48   :  { %10771 = vst [vmem:[#allocation37_spill] sm:$0xff] %v9326_v19  ;;  %v9330_v24 = vpop.f32.mrf.mxu3  ;;  %v3839_v44 = vmax.f32 %v3837_v58, %v9326_v19 }
 0xd4f   :  { %v9328_v17 = vpop.f32.mrf.mxu2 }
 0xd50   :  { %10772 = vst [vmem:[#allocation10_spill] sm:$0xff] %v9328_v17  ;;  %v9334_v42 = vpop.f32.mrf.mxu3  ;;  %v3840_v5 = vmax.f32 %v3838_v21, %v9328_v17 }
 0xd57   :  { %v9332_v28 = vpop.f32.mrf.mxu2 }
 0xd58   :  { %10773 = vst [vmem:[#allocation25_spill] sm:$0xff] %v9332_v28  ;;  %v9338_v0 = vpop.f32.mrf.mxu3  ;;  %v3841_v8 = vmax.f32 %v3839_v44, %v9332_v28 }
 0xd5f   :  { %v9336_v41 = vpop.f32.mrf.mxu2 }
 0xd60   :  { %v9342_v48 = vpop.f32.mrf.mxu3  ;;  %v3842_v32 = vmax.f32 %v3840_v5, %v9336_v41 }
 0xd67   :  { %v9340_v25 = vpop.f32.mrf.mxu2 }
 0xd68   :  { %v9348_v6 = vpop.f32.mrf.mxu3  ;;  %v3843_v30 = vmax.f32 %v3841_v8, %v9340_v25 }
 0xd6f   :  { %v9344_v40 = vpop.f32.mrf.mxu2 }
 0xd70   :  { %v9352_v57 = vpop.f32.mrf.mxu3  ;;  %v3844_v14 = vmax.f32 %v3842_v32, %v9344_v40 }
 0xd77   :  { %v9346_v26 = vpop.f32.mrf.mxu2 }
 0xd78   :  { %v9360_v50 = vpop.f32.mrf.mxu3  ;;  %v3845_v49 = vmax.f32 %v3843_v30, %v9346_v26 }
 0xd7f   :  { %v9350_v36 = vpop.f32.mrf.mxu2 }
 0xd80   :  { %v9374_v56 = vpop.f32.mrf.mxu3  ;;  %v3846_v59 = vmax.f32 %v3844_v14, %v9350_v36 }
 0xd87   :  { %v9354_v46 = vpop.f32.mrf.mxu2 }
 0xd88   :  { %v9390_v34 = vpop.f32.mrf.mxu3  ;;  %v3847_v51 = vmax.f32 %v3845_v49, %v9354_v46 }
 0xd8f   :  { %v9364_v54 = vpop.f32.mrf.mxu2 }
 0xd90   :  { %v3848_v58 = vmax.f32 %v3846_v59, %v9364_v54  ;;  %v9399_v45 = vpop.f32.mrf.mxu3  ;;  %v3860_v59 = vmax.f32 %v9230_v33, %v9242_v47 }
 0xd97   :  { %v9376_v1 = vpop.f32.mrf.mxu2 }
 0xd98   :  { %v3849_v21 = vmax.f32 %v3847_v51, %v9376_v1  ;;  %v9401_v30 = vpop.f32.mrf.mxu3 }
 0xd9f   :  { %v9386_v23 = vpop.f32.mrf.mxu2 }
 0xda0   :  { %v3850_v52 = vmax.f32 %v3848_v58, %v9386_v23  ;;  %v3859_v58 = vmax.f32 %v9222_v27, %v9236_v12 }
 0xda7   :  { %v3730_v44 = vpop.f32.mrf.mxu2 }
 0xda8   :  { %v3851_v5 = vmax.f32 %v3849_v21, %v3730_v44  ;;  %v9413_v21 = vpop.f32.mrf.mxu3 }
 0xdaa   :  { %v3852_v8 = vmax.f32 %v3850_v52, %v3851_v5  ;;  %v3862_v52 = vmax.f32 %v3860_v59, %v9254_v16 }
 0xdac   :  { %v3853_v13 = vrot.slane %v3852_v8, 4 }
 0xdae   :  { %v3854_v19 = vmax.f32 %v3852_v8, %v3853_v13  ;;  %v3861_v13 = vmax.f32 %v3859_v58, %v9248_v4 }
 0xdb0   :  { %v3855_v32 = vrot.slane %v3854_v19, 2 }
 0xdb2   :  { %v3856_v17 = vmax.f32 %v3854_v19, %v3855_v32  ;;  %v3864_v19 = vmax.f32 %v3862_v52, %v9266_v39 }
 0xdb4   :  { %v3857_v14 = vrot.slane %v3856_v17, 1 }
 0xdb6   :  { %v9403_v28 = vmax.f32 %v3856_v17, %v3857_v14  ;;  %v3863_v17 = vmax.f32 %v3861_v13, %v9260_v7  ;;  %v9425_v13 = vpop.f32.mrf.mxu3 }
 0xdb8   :  { %v3958_v49 = vsub.f32 %v3730_v44, %v9403_v28  ;;  %v3866_v44 = vmax.f32 %v3864_v19, %v9278_v15  ;;  %v3865_v5 = vmax.f32 %v3863_v17, %v9272_v61 }
 0xdba   :  { %v4084_v51 = vmul.f32 1.442695, %v3958_v49  ;;  %v3868_v8 = vmax.f32 %v3866_v44, %v9290_v2  ;;  %v3867_v14 = vmax.f32 %v3865_v5, %v9284_v63 }
 0xdbc   :  { %6580 = vpow2.f32 %v4084_v51  ;;  %v3870_v49 = vmax.f32 %v3868_v8, %v9302_v22  ;;  %v3869_v59 = vmax.f32 %v3867_v14, %v9296_v29 }
 0xdbe   :  { %v3872_v51 = vmax.f32 %v3870_v49, %v9314_v18  ;;  %v3871_v58 = vmax.f32 %v3869_v59, %v9308_v35 }
 0xdc0   :  { %v3874_v52 = vmax.f32 %v3872_v51, %v9324_v37  ;;  %v3873_v19 = vmax.f32 %v3871_v58, %v9320_v3  ;;  %v9437_v37 = vpop.f32.mrf.mxu3 }
 0xdc2   :  { %v6581_v32 = vpop.eup %6580  ;;  %v3876_v17 = vmax.f32 %v3874_v52, %v9334_v42  ;;  %v3875_v44 = vmax.f32 %v3873_v19, %v9330_v24 }
 0xdc3   :  { %4157 = vmatpush.msrb.mxu1 %v6581_v32 }
 0xdc4   :  { %v3878_v5 = vmax.f32 %v3876_v17, %v9342_v48  ;;  %v3877_v8 = vmax.f32 %v3875_v44, %v9338_v0  ;;  %v3926_v17 = vsub.f32 %v9304_v20, %v9403_v28 }
 0xdc6   :  { %v3880_v32 = vmax.f32 %v3878_v5, %v9352_v57  ;;  %v3879_v14 = vmax.f32 %v3877_v8, %v9348_v6  ;;  %v3924_v8 = vsub.f32 %v9300_v60, %v9403_v28 }
 0xdc8   :  { %v3882_v49 = vmax.f32 %v3880_v32, %v9374_v56  ;;  %v3881_v59 = vmax.f32 %v3879_v14, %v9360_v50  ;;  %v3922_v32 = vsub.f32 %v9292_v38, %v9403_v28  ;;  %v3914_v38 = vsub.f32 %v9268_v55, %v9403_v28 }
 0xdc9   :  { %v3954_v55 = vsub.f32 %v9376_v1, %v9403_v28  ;;  %v3950_v1 = vsub.f32 %v9354_v46, %v9403_v28 }
 0xdca   :  { %v3884_v51 = vmax.f32 %v3882_v49, %v9399_v45  ;;  %v3883_v58 = vmax.f32 %v3881_v59, %v9390_v34  ;;  %v4020_v49 = vmul.f32 1.442695, %v3926_v17  ;;  %v3920_v59 = vsub.f32 %v9288_v62, %v9403_v28 }
 0xdcb   :  { %v4012_v3 = vmul.f32 1.442695, %v3922_v32  ;;  %v3912_v62 = vsub.f32 %v9264_v43, %v9403_v28  ;;  %v3908_v43 = vsub.f32 %v9252_v10, %v9403_v28 }
 0xdcc   :  { %v3886_v52 = vmax.f32 %v3884_v51, %v9413_v21  ;;  %v3885_v19 = vmax.f32 %v3883_v58, %v9401_v30  ;;  %v4016_v51 = vmul.f32 1.442695, %v3924_v8  ;;  %v3918_v58 = vsub.f32 %v9280_v53, %v9403_v28 }
 0xdcd   :  { %6582 = vpow2.f32 %v4020_v49  ;;  %v3956_v53 = vsub.f32 %v9386_v23, %v9403_v28  ;;  %v3996_v49 = vmul.f32 1.442695, %v3914_v38  ;;  %v3952_v23 = vsub.f32 %v9364_v54, %v9403_v28 }
 0xdce   :  { %v3888_v44 = vmax.f32 %v3886_v52, %v9437_v37  ;;  %v3887_v5 = vmax.f32 %v3885_v19, %v9425_v13  ;;  %v3916_v52 = vsub.f32 %v9276_v9, %v9403_v28  ;;  %v4008_v19 = vmul.f32 1.442695, %v3920_v59 }
 0xdcf   :  { %6584 = vpow2.f32 %v4016_v51  ;;  %v4004_v17 = vmul.f32 1.442695, %v3918_v58  ;;  %v3910_v9 = vsub.f32 %v9256_v31, %v9403_v28  ;;  %v4080_v59 = vmul.f32 1.442695, %v3956_v53 }
 0xdd0   :  { %v3889_v14 = vmax.f32 %v3887_v5, %v3888_v44  ;;  %6586 = vpow2.f32 %v4012_v3  ;;  %v4000_v5 = vmul.f32 1.442695, %v3916_v52  ;;  %v3906_v31 = vsub.f32 %v9244_v11, %v9403_v28 }
 0xdd1   :  { %6588 = vpow2.f32 %v4008_v19  ;;  %v4076_v52 = vmul.f32 1.442695, %v3954_v55  ;;  %v10774_v19 = vld [vmem:[#allocation41_spill] sm:$0xff]  ;;  %v3948_v54 = vsub.f32 %v9350_v36, %v9403_v28  ;;  %v3946_v53 = vsub.f32 %v9346_v26, %v9403_v28 }
 0xdd2   :  { %v3890_v20 = vrot.slane %v3889_v14, 4  ;;  %6590 = vpow2.f32 %v4004_v17  ;;  %v3904_v38 = vsub.f32 %v10774_v19, %v9403_v28  ;;  %v3984_v17 = vmul.f32 1.442695, %v3908_v43 }
 0xdd3   :  { %v6583_v44 = vpop.eup %6582  ;;  %6592 = vpow2.f32 %v4000_v5  ;;  %v3980_v46 = vmul.f32 1.442695, %v3906_v31  ;;  %v3944_v55 = vsub.f32 %v9344_v40, %v9403_v28  ;;  %v3942_v31 = vsub.f32 %v9340_v25, %v9403_v28  ;;  %v10778_v40 = vld [vmem:[#allocation30_spill] sm:$0xff] }
 0xdd4   :  { %v3891_v60 = vmax.f32 %v3889_v14, %v3890_v20  ;;  %4134 = vmatpush.msrb.mxu0 %v6583_v44  ;;  %v3992_v14 = vmul.f32 1.442695, %v3912_v62  ;;  %v3988_v20 = vmul.f32 1.442695, %v3910_v9  ;;  %6594 = vpow2.f32 %v3996_v49 }
 0xdd5   :  { %v6585_v8 = vpop.eup %6584  ;;  %v4072_v44 = vmul.f32 1.442695, %v3952_v23  ;;  %v3976_v49 = vmul.f32 1.442695, %v3904_v38  ;;  %v4056_v38 = vmul.f32 1.442695, %v3944_v55 }
 0xdd6   :  { %v3892_v32 = vrot.slane %v3891_v60, 2  ;;  %4135 = vmatpush.msrb.mxu0 %v6585_v8  ;;  %v6587_v3 = vpop.eup %6586  ;;  %6596 = vpow2.f32 %v3992_v14  ;;  %v4068_v8 = vmul.f32 1.442695, %v3950_v1  ;;  %v10777_v14 = vld [vmem:[#allocation28_spill] sm:$0xff] }
 0xdd7   :  { %v6589_v51 = vpop.eup %6588  ;;  %6598 = vpow2.f32 %v4080_v59  ;;  %v3898_v23 = vsub.f32 %v10777_v14, %v9403_v28 }
 0xdd8   :  { %4136 = vmatpush.msrb.mxu0 %v6587_v3  ;;  %v3893_v58 = vmax.f32 %v3891_v60, %v3892_v32  ;;  %v6591_v10 = vpop.eup %6590  ;;  %v10775_v60 = vld [vmem:[#allocation42_spill] sm:$0xff]  ;;  %6600 = vpow2.f32 %v3988_v20  ;;  %v10776_v32 = vld [vmem:[#allocation13_spill] sm:$0xff]  ;;  %v4064_v3 = vmul.f32 1.442695, %v3948_v54  ;;  %v4060_v20 = vmul.f32 1.442695, %v3946_v53 }
 0xdd9   :  { %v6593_v11 = vpop.eup %6592  ;;  %v3902_v62 = vsub.f32 %v10775_v60, %v9403_v28  ;;  %6602 = vpow2.f32 %v4076_v52  ;;  %v3900_v36 = vsub.f32 %v10776_v32, %v9403_v28  ;;  %v3896_v52 = vsub.f32 %v10778_v40, %v9403_v28 }
 0xdda   :  { %4137 = vmatpush.msrb.mxu0 %v6589_v51  ;;  %v3894_v5 = vrot.slane %v3893_v58, 1  ;;  %v6595_v9 = vpop.eup %6594  ;;  %6604 = vpow2.f32 %v3984_v17  ;;  %v3964_v54 = vmul.f32 1.442695, %v3898_v23 }
 0xddb   :  { %6606 = vpow2.f32 %v4072_v44  ;;  %v3972_v59 = vmul.f32 1.442695, %v3902_v62  ;;  %v4052_v62 = vmul.f32 1.442695, %v3942_v31 }
 0xddc   :  { %4138 = vmatpush.msrb.mxu0 %v6591_v10  ;;  %v6597_v43 = vpop.eup %6596  ;;  %v9488_v26 = vmax.f32 %v3893_v58, %v3894_v5  ;;  %6608 = vpow2.f32 %v3980_v46  ;;  %v3968_v10 = vmul.f32 1.442695, %v3900_v36  ;;  %v3940_v58 = vsub.f32 %v9336_v41, %v9403_v28 }
 0xddd   :  { %v6599_v51 = vpop.eup %6598  ;;  %6610 = vpow2.f32 %v4068_v8  ;;  %v3960_v46 = vmul.f32 1.442695, %v3896_v52 }
 0xdde   :  { %4139 = vmatpush.msrb.mxu0 %v6593_v11  ;;  %v6601_v1 = vpop.eup %6600  ;;  %6612 = vpow2.f32 %v3976_v49  ;;  %4158 = vmatpush.msrb.mxu1 %v6599_v51  ;;  %v3927_v25 = vsub.f32 %v9314_v18, %v9488_v26  ;;  %v10779_v11 = vld [vmem:[#allocation25_spill] sm:$0xff]  ;;  %v3925_v41 = vsub.f32 %v9308_v35, %v9488_v26  ;;  %v10780_v18 = vld [vmem:[#allocation10_spill] sm:$0xff]  ;;  %v3923_v36 = vsub.f32 %v9302_v22, %v9488_v26  ;;  %v10782_v22 = vld [vmem:[#allocation36_spill] sm:$0xff] }
 0xddf   :  { %v6603_v19 = vpop.eup %6602  ;;  %6614 = vpow2.f32 %v4064_v3  ;;  %v3938_v60 = vsub.f32 %v10779_v11, %v9403_v28  ;;  %v3936_v8 = vsub.f32 %v10780_v18, %v9403_v28  ;;  %v10781_v35 = vld [vmem:[#allocation37_spill] sm:$0xff]  ;;  %v3921_v23 = vsub.f32 %v9296_v29, %v9488_v26  ;;  %v10783_v29 = vld [vmem:[#allocation38_spill] sm:$0xff] }
 0xde0   :  { %4140 = vmatpush.msrb.mxu0 %v6595_v9  ;;  %v6605_v17 = vpop.eup %6604  ;;  %6616 = vpow2.f32 %v3972_v59  ;;  %4159 = vmatpush.msrb.mxu1 %v6603_v19  ;;  %v4048_v9 = vmul.f32 1.442695, %v3940_v58  ;;  %v4022_v49 = vmul.f32 1.442695, %v3927_v25  ;;  %v3934_v3 = vsub.f32 %v10781_v35, %v9403_v28 }
 0xde1   :  { %v6607_v44 = vpop.eup %6606  ;;  %6618 = vpow2.f32 %v4060_v20  ;;  %v4018_v59 = vmul.f32 1.442695, %v3925_v41  ;;  %v3932_v31 = vsub.f32 %v10782_v22, %v9403_v28  ;;  %v4040_v20 = vmul.f32 1.442695, %v3936_v8 }
 0xde2   :  { %4141 = vmatpush.msrb.mxu0 %v6597_v43  ;;  %v6609_v5 = vpop.eup %6608  ;;  %6620 = vpow2.f32 %v3968_v10  ;;  %4160 = vmatpush.msrb.mxu1 %v6607_v44  ;;  %v4044_v43 = vmul.f32 1.442695, %v3938_v60  ;;  %v3919_v40 = vsub.f32 %v9290_v2, %v9488_v26  ;;  %v4014_v52 = vmul.f32 1.442695, %v3923_v36  ;;  %v10784_v2 = vld [vmem:[#allocation40_spill] sm:$0xff] }
 0xde3   :  { %v6611_v53 = vpop.eup %6610  ;;  %6622 = vpow2.f32 %v4056_v38  ;;  %v3930_v19 = vsub.f32 %v10783_v29, %v9403_v28  ;;  %v4036_v58 = vmul.f32 1.442695, %v3934_v3  ;;  %v4010_v25 = vmul.f32 1.442695, %v3921_v23 }
 0xde4   :  { %4142 = vmatpush.msrb.mxu0 %v6601_v1  ;;  %v6613_v32 = vpop.eup %6612  ;;  %6624 = vpow2.f32 %v3964_v54  ;;  %4161 = vmatpush.msrb.mxu1 %v6611_v53  ;;  %v3928_v44 = vsub.f32 %v10784_v2, %v9403_v28  ;;  %v4032_v11 = vmul.f32 1.442695, %v3932_v31  ;;  %v3913_v18 = vsub.f32 %v9272_v61, %v9488_v26 }
 0xde5   :  { %v6615_v55 = vpop.eup %6614  ;;  %6626 = vpow2.f32 %v4052_v62  ;;  %v3915_v62 = vsub.f32 %v9278_v15, %v9488_v26  ;;  %v4028_v53 = vmul.f32 1.442695, %v3930_v19  ;;  %v3911_v36 = vsub.f32 %v9266_v39, %v9488_v26 }
 0xde6   :  { %4143 = vmatpush.msrb.mxu0 %v6605_v17  ;;  %v6617_v14 = vpop.eup %6616  ;;  %6628 = vpow2.f32 %v3960_v46  ;;  %4162 = vmatpush.msrb.mxu1 %v6615_v55  ;;  %v3917_v17 = vsub.f32 %v9284_v63, %v9488_v26  ;;  %v9522_v46 = vpop.f32.mrf.mxu0  ;;  %v3959_v63 = vsub.f32 %v9437_v37, %v9488_v26  ;;  %v3955_v35 = vsub.f32 %v9413_v21, %v9488_v26 }
 0xde7   :  { %v6619_v51 = vpop.eup %6618  ;;  %6630 = vpow2.f32 %v4048_v9  ;;  %v3957_v9 = vsub.f32 %v9425_v13, %v9488_v26  ;;  %v3909_v13 = vsub.f32 %v9260_v7, %v9488_v26  ;;  %v3953_v39 = vsub.f32 %v9401_v30, %v9488_v26 }
 0xde8   :  { %4144 = vmatpush.msrb.mxu0 %v6609_v5  ;;  %v6621_v1 = vpop.eup %6620  ;;  %6632 = vpow2.f32 %v4022_v49  ;;  %4163 = vmatpush.msrb.mxu1 %v6619_v51  ;;  %v4006_v5 = vmul.f32 1.442695, %v3919_v40  ;;  %v4002_v8 = vmul.f32 1.442695, %v3917_v17  ;;  %v3998_v49 = vmul.f32 1.442695, %v3915_v62 }
 0xde9   :  { %v6623_v10 = vpop.eup %6622  ;;  %6634 = vpow2.f32 %v4044_v43  ;;  %v4086_v55 = vmul.f32 1.442695, %v3959_v63  ;;  %v3994_v43 = vmul.f32 1.442695, %v3913_v18  ;;  %v4082_v23 = vmul.f32 1.442695, %v3957_v9 }
 0xdea   :  { %4145 = vmatpush.msrb.mxu0 %v6613_v32  ;;  %v6625_v38 = vpop.eup %6624  ;;  %6636 = vpow2.f32 %v4018_v59  ;;  %4164 = vmatpush.msrb.mxu1 %v6623_v10  ;;  %v4024_v32 = vmul.f32 1.442695, %v3928_v44  ;;  %v3907_v21 = vsub.f32 %v9254_v16, %v9488_v26  ;;  %v3990_v51 = vmul.f32 1.442695, %v3911_v36 }
 0xdeb   :  { %v6627_v54 = vpop.eup %6626  ;;  %6638 = vpow2.f32 %v4040_v20  ;;  %v3951_v7 = vsub.f32 %v9399_v45, %v9488_v26  ;;  %v4078_v31 = vmul.f32 1.442695, %v3955_v35  ;;  %v3905_v30 = vsub.f32 %v9248_v4, %v9488_v26 }
 0xdec   :  { %4146 = vmatpush.msrb.mxu0 %v6617_v14  ;;  %v6629_v60 = vpop.eup %6628  ;;  %6640 = vpow2.f32 %v4014_v52  ;;  %4165 = vmatpush.msrb.mxu1 %v6627_v54  ;;  %v10785_v40 = vmov 1.0   ;;  %v3949_v52 = vsub.f32 %v9390_v34, %v9488_v26  ;;  %v4074_v10 = vmul.f32 1.442695, %v3953_v39 }
 0xded   :  { %v6631_v41 = vpop.eup %6630  ;;  %6642 = vpow2.f32 %v4036_v58  ;;  %v3903_v45 = vsub.f32 %v9242_v47, %v9488_v26  ;;  %v3982_v19 = vmul.f32 1.442695, %v3907_v21  ;;  %v3947_v58 = vsub.f32 %v9374_v56, %v9488_v26 }
 0xdee   :  { %4147 = vmatpush.msrb.mxu0 %v6621_v1  ;;  %v6633_v28 = vpop.eup %6632  ;;  %6644 = vpow2.f32 %v4010_v25  ;;  %4166 = vmatpush.msrb.mxu1 %v6631_v41  ;;  %v3986_v1 = vmul.f32 1.442695, %v3909_v13  ;;  %v9552_v25 = vpop.f32.mrf.mxu1  ;;  %v3901_v34 = vsub.f32 %v9236_v12, %v9488_v26  ;;  %v3978_v54 = vmul.f32 1.442695, %v3905_v30 }
 0xdef   :  { %v6635_v15 = vpop.eup %6634  ;;  %6646 = vpow2.f32 %v4032_v11  ;;  %v3945_v2 = vsub.f32 %v9360_v50, %v9488_v26  ;;  %v4066_v44 = vmul.f32 1.442695, %v3949_v52  ;;  %v3899_v11 = vsub.f32 %v9230_v33, %v9488_v26 }
 0xdf0   :  { %4148 = vmatpush.msrb.mxu0 %v6625_v38  ;;  %v6637_v37 = vpop.eup %6636  ;;  %6648 = vpow2.f32 %v4006_v5  ;;  %4167 = vmatpush.msrb.mxu1 %v6635_v15  ;;  %v4070_v38 = vmul.f32 1.442695, %v3951_v7  ;;  %v3943_v62 = vsub.f32 %v9352_v57, %v9488_v26  ;;  %v4062_v5 = vmul.f32 1.442695, %v3947_v58 }
 0xdf1   :  { %v6639_v61 = vpop.eup %6638  ;;  %6650 = vpow2.f32 %v4028_v53  ;;  %v3897_v41 = vsub.f32 %v9222_v27, %v9488_v26  ;;  %v3970_v63 = vmul.f32 1.442695, %v3901_v34  ;;  %v3941_v33 = vsub.f32 %v9348_v6, %v9488_v26  ;;  %v10790_v34 = vld [vmem:[#allocation26_spill] sm:$0xff] }
 0xdf2   :  { %4149 = vmatpush.msrb.mxu0 %v6629_v60  ;;  %v6641_v3 = vpop.eup %6640  ;;  %6652 = vpow2.f32 %v4002_v8  ;;  %4168 = vmatpush.msrb.mxu1 %v6639_v61  ;;  %v3974_v60 = vmul.f32 1.442695, %v3903_v45  ;;  %v3966_v8 = vmul.f32 1.442695, %v3899_v11  ;;  %v3939_v15 = vsub.f32 %v9342_v48, %v9488_v26 }
 0xdf3   :  { %4150 = vmatmul.f32.vlgmr.msrb.gmra.mxu0 %v9522_v46  ;;  %v6643_v14 = vpop.eup %6642  ;;  %6654 = vpow2.f32 %v4024_v32  ;;  %v4054_v9 = vmul.f32 1.442695, %v3943_v62  ;;  %v3962_v32 = vmul.f32 1.442695, %v3897_v41  ;;  %v3937_v6 = vsub.f32 %v9338_v0, %v9488_v26 }
 0xdf4   :  { %4180 = vmatpush.msra.mxu0 %v6633_v28  ;;  %v6645_v59 = vpop.eup %6644  ;;  %6656 = vpow2.f32 %v3998_v49  ;;  %4169 = vmatpush.msrb.mxu1 %v6643_v14  ;;  %v4058_v28 = vmul.f32 1.442695, %v3945_v2  ;;  %v4050_v36 = vmul.f32 1.442695, %v3941_v33  ;;  %v9572_v49 = vpop.trf.xlu1  ;;  %v4046_v35 = vmul.f32 1.442695, %v3939_v15 }
 0xdf5   :  { %v6647_v22 = vpop.eup %6646  ;;  %6658 = vpow2.f32 %v4086_v55  ;;  %v3935_v55 = vsub.f32 %v9334_v42, %v9488_v26  ;;  %v3933_v13 = vsub.f32 %v9330_v24, %v9488_v26  ;;  %v10791_v2 = vld [vmem:[#allocation35_spill] sm:$0xff] }
 0xdf6   :  { %4181 = vmatpush.msra.mxu0 %v6637_v37  ;;  %v6649_v20 = vpop.eup %6648  ;;  %6660 = vpow2.f32 %v3994_v43  ;;  %4170 = vmatpush.msrb.mxu1 %v6647_v22  ;;  %v4042_v43 = vmul.f32 1.442695, %v3937_v6 }
 0xdf7   :  { %v6651_v16 = vpop.eup %6650  ;;  %6662 = vpow2.f32 %v4082_v23  ;;  %v10786_v23 = vld [vmem:[#allocation39_spill] sm:$0xff]  ;;  %v4038_v42 = vmul.f32 1.442695, %v3935_v55 }
 0xdf8   :  { %4182 = vmatpush.msra.mxu0 %v6641_v3  ;;  %v6653_v29 = vpop.eup %6652  ;;  %6664 = vpow2.f32 %v3990_v51  ;;  %4171 = vmatpush.msrb.mxu1 %v6651_v16  ;;  %v10787_v51 = vld [vmem:[#allocation22_spill] sm:$0xff] }
 0xdf9   :  { %v6655_v4 = vpop.eup %6654  ;;  %6666 = vpow2.f32 %v4078_v31  ;;  %v4262_v22 = vrot.slane %v10787_v51, 2  ;;  %v10788_v31 = vld [vmem:[#allocation14_spill] sm:$0xff] }
 0xdfa   :  { %4183 = vmatpush.msra.mxu0 %v6645_v59  ;;  %v6657_v17 = vpop.eup %6656  ;;  %6668 = vpow2.f32 %v3986_v1  ;;  %4172 = vmatpush.msrb.mxu1 %v6655_v4  ;;  %v3931_v59 = vsub.f32 %v10786_v23, %v9488_v26  ;;  %v3929_v24 = vsub.f32 %v10788_v31, %v9488_v26 }
 0xdfb   :  { %4153 = vmatmul.f32.gmra.mxu0 %v10785_v40  ;;  %v6659_v47 = vpop.eup %6658  ;;  %6670 = vpow2.f32 %v4074_v10  ;;  %4173 = vmatmul.f32.vlgmr.msrb.gmra.mxu1 %v9552_v25  ;;  %v10789_v10 = vld [vmem:[#allocation34_spill] sm:$0xff]  ;;  %v4313_v45 = vsel %vm179_vm1, %v4262_v22, 0 }
 0xdfc   :  { %4184 = vmatpush.msra.mxu0 %v6649_v20  ;;  %v6661_v56 = vpop.eup %6660  ;;  %6672 = vpow2.f32 %v3982_v19  ;;  %4203 = vmatpush.msra.mxu1 %v6659_v47  ;;  %v4034_v20 = vmul.f32 1.442695, %v3933_v13  ;;  %v9583_v30 = vpop.trf.xlu1  ;;  %v4030_v52 = vmul.f32 1.442695, %v3931_v59  ;;  %v4026_v26 = vmul.f32 1.442695, %v3929_v24 }
 0xdfd   :  { %v6663_v12 = vpop.eup %6662  ;;  %6674 = vpow2.f32 %v4070_v38 }
 0xdfe   :  { %4185 = vmatpush.msra.mxu0 %v6653_v29  ;;  %v6665_v50 = vpop.eup %6664  ;;  %6676 = vpow2.f32 %v3978_v54  ;;  %4204 = vmatpush.msra.mxu1 %v6663_v12  ;;  %v5436_v29 = vrot.slane %v10789_v10, 6  ;;  %v4263_v54 = vrot.slane %v10790_v34, 2 }
 0xdff   :  { %v6667_v53 = vpop.eup %6666  ;;  %6678 = vpow2.f32 %v4066_v44  ;;  %v5437_v44 = vrot.slane %v10791_v2, 6 }
 0xe00   :  { %4186 = vmatpush.msra.mxu0 %v6657_v17  ;;  %v6669_v18 = vpop.eup %6668  ;;  %6680 = vpow2.f32 %v3974_v60  ;;  %4205 = vmatpush.msra.mxu1 %v6667_v53 }
 0xe01   :  { %v6671_v57 = vpop.eup %6670  ;;  %6682 = vpow2.f32 %v4062_v5 }
 0xe02   :  { %4187 = vmatpush.msra.mxu0 %v6661_v56  ;;  %v6673_v27 = vpop.eup %6672  ;;  %6684 = vpow2.f32 %v3970_v63  ;;  %4206 = vmatpush.msra.mxu1 %v6671_v57  ;;  %v4316_v56 = vsel %vm179_vm1, %v4263_v54, 0 }
 0xe03   :  { %v6675_v37 = vpop.eup %6674  ;;  %6686 = vpow2.f32 %v4058_v28  ;;  %4176 = vmatmul.f32.gmra.mxu1 %v10785_v40 }
 0xe04   :  { %4188 = vmatpush.msra.mxu0 %v6665_v50  ;;  %v6677_v61 = vpop.eup %6676  ;;  %6688 = vpow2.f32 %v3966_v8  ;;  %4207 = vmatpush.msra.mxu1 %v6675_v37  ;;  %v4248_v38 = vpop.trf.xlu1 }
 0xe05   :  { %v6679_v48 = vpop.eup %6678  ;;  %6690 = vpow2.f32 %v4054_v9 }
 0xe06   :  { %4189 = vmatpush.msra.mxu0 %v6669_v18  ;;  %v6681_v3 = vpop.eup %6680  ;;  %6692 = vpow2.f32 %v3962_v32  ;;  %4208 = vmatpush.msra.mxu1 %v6679_v48 }
 0xe07   :  { %v6683_v0 = vpop.eup %6682  ;;  %6694 = vpow2.f32 %v4050_v36 }
 0xe08   :  { %4190 = vmatpush.msra.mxu0 %v6673_v27  ;;  %v6685_v14 = vpop.eup %6684  ;;  %4209 = vmatpush.msra.mxu1 %v6683_v0  ;;  %6696 = vpow2.f32 %v4046_v35 }
 0xe09   :  { %v6687_v39 = vpop.eup %6686  ;;  %6698 = vpow2.f32 %v4042_v43 }
 0xe0a   :  { %4191 = vmatpush.msra.mxu0 %v6677_v61  ;;  %v6689_v21 = vpop.eup %6688  ;;  %4210 = vmatpush.msra.mxu1 %v6687_v39  ;;  %6700 = vpow2.f32 %v4038_v42 }
 0xe0b   :  { %v6691_v7 = vpop.eup %6690  ;;  %6702 = vpow2.f32 %v4034_v20 }
 0xe0c   :  { %4192 = vmatpush.msra.mxu0 %v6681_v3  ;;  %v6693_v1 = vpop.eup %6692  ;;  %4211 = vmatpush.msra.mxu1 %v6691_v7  ;;  %6704 = vpow2.f32 %v4030_v52  ;;  %v4249_v11 = vpop.trf.xlu1 }
 0xe0d   :  { %v6695_v16 = vpop.eup %6694  ;;  %6706 = vpow2.f32 %v4026_v26 }
 0xe0e   :  { %4193 = vmatpush.msra.mxu0 %v6685_v14  ;;  %4212 = vmatpush.msra.mxu1 %v6695_v16  ;;  %v6697_v19 = vpop.eup %6696 }
 0xe0f   :  { %v6699_v4 = vpop.eup %6698 }
 0xe10   :  { %4194 = vmatpush.msra.mxu0 %v6689_v21  ;;  %4213 = vmatpush.msra.mxu1 %v6697_v19  ;;  %v6701_v58 = vpop.eup %6700  ;;  %v10797_v21 = vld [vmem:[#allocation43_spill] sm:$0xff] }
 0xe11   :  { %v6703_v17 = vpop.eup %6702 }
 0xe12   :  { %4195 = vmatpush.msra.mxu0 %v6693_v1  ;;  %4214 = vmatpush.msra.mxu1 %v6699_v4 }
 0xe13   :  { %4196 = vmatmul.f32.vlgmr.msra.gmra.mxu0 %v9522_v46  ;;  %v6705_v46 = vpop.eup %6704 }
 0xe14   :  { %4325 = vmatpush.bf16.msrb.mxu0 %v4313_v45  ;;  %4215 = vmatpush.msra.mxu1 %v6701_v58  ;;  %v6707_v47 = vpop.eup %6706  ;;  %v4250_v60 = vpop.trf.xlu1 }
 0xe16   :  { %4216 = vmatpush.msra.mxu1 %v6703_v17 }
 0xe18   :  { %5906 = vmatpush.msk.msra.mxu0 %vm633_vm3, %v5436_v29  ;;  %4217 = vmatpush.msra.mxu1 %v6705_v46 }
 0xe1a   :  { %4218 = vmatpush.msra.mxu1 %v6707_v47 }
 0xe1b   :  { %4199 = vmatmul.f32.gmra.mxu0 %v10785_v40  ;;  %4219 = vmatmul.f32.vlgmr.msra.gmra.mxu1 %v9552_v25 }
 0xe1c   :  { %4414 = vmatpush.bf16.msrb.mxu1 %v4316_v56  ;;  %v4251_v12 = vpop.trf.xlu1 }
 0xe20   :  { %5908 = vmatpush.msk.msra.mxu1 %vm633_vm3, %v5437_v44 }
 0xe23   :  { %5838 = vmatmul.msk.bf16.vlgmr.msrb.gmra.mxu0 %vm130_vm2, %v9572_v49  ;;  %4222 = vmatmul.f32.gmra.mxu1 %v10785_v40 }
 0xe24   :  { %v4252_v25 = vpop.trf.xlu1 }
 0xe2b   :  { %5854 = vmatmul.msk.bf16.vlgmr.msrb.gmra.mxu1 %vm130_vm2, %v9572_v49  ;;  %v10792_v49 = vld [vmem:[#allocation32_spill] sm:$0xff] }
 0xe2c   :  { %v9603_v62 = vpop.trf.xlu1 }
 0xe33   :  { %5839 = vmatmul.msk.bf16.gmra.mxu0 %vm130_vm2, %v4248_v38 }
 0xe34   :  { %v4254_v5 = vpop.trf.xlu1 }
 0xe3b   :  { %5855 = vmatmul.msk.bf16.gmra.mxu1 %vm130_vm2, %v4248_v38 }
 0xe3c   :  { %v9607_v50 = vpop.trf.xlu1 }
 0xe43   :  { %5840 = vmatmul.msk.bf16.gmra.mxu0 %vm130_vm2, %v4250_v60 }
 0xe44   :  { %v4256_v41 = vpop.trf.xlu1 }
 0xe4b   :  { %5856 = vmatmul.msk.bf16.gmra.mxu1 %vm130_vm2, %v4250_v60 }
 0xe4c   :  { %v9613_v63 = vpop.trf.xlu1 }
 0xe53   :  { %5841 = vmatmul.msk.bf16.gmra.mxu0 %vm130_vm2, %v4252_v25 }
 0xe54   :  { %v4258_v33 = vpop.trf.xlu1 }
 0xe5b   :  { %5857 = vmatmul.msk.bf16.gmra.mxu1 %vm130_vm2, %v4252_v25 }
 0xe5c   :  { %v4259_v9 = vpop.trf.xlu1 }
 0xe63   :  { %5842 = vmatmul.msk.bf16.gmra.mxu0 %vm130_vm2, %v4254_v5 }
 0xe64   :  { %v4260_v6 = vpop.trf.xlu1 }
 0xe6b   :  { %5858 = vmatmul.msk.bf16.gmra.mxu1 %vm130_vm2, %v4254_v5 }
 0xe6c   :  { %v4261_v60 = vpop.trf.xlu1 }
 0xe70   :  { %v4151_v53 = vpop.f32.mrf.mxu0 }
 0xe73   :  { %5843 = vmatmul.msk.bf16.gmra.mxu0 %vm130_vm2, %v4256_v41 }
 0xe78   :  { %v4174_v28 = vpop.f32.mrf.mxu1  ;;  %v4154_v8 = vpop.f32.mrf.mxu0 }
 0xe79   :  { %v4175_v18 = vadd.f32 %v4174_v28, %v4151_v53 }
 0xe7b   :  { %5859 = vmatmul.msk.bf16.gmra.mxu1 %vm130_vm2, %v4256_v41 }
 0xe80   :  { %v4177_v57 = vpop.f32.mrf.mxu1 }
 0xe81   :  { %v4178_v15 = vadd.f32 %v4177_v57, %v4154_v8 }
 0xe83   :  { %5844 = vmatmul.msk.bf16.gmra.mxu0 %vm130_vm2, %v4258_v33  ;;  %6708 = vrcp.f32 %v4178_v15 }
 0xe89   :  { %v6709_v27 = vpop.eup %6708 }
 0xe8a   :  { %v4228_v32 = vperm.slane %v6709_v27, 0 }
 0xe8b   :  { %5860 = vmatmul.msk.bf16.gmra.mxu1 %vm130_vm2, %v4258_v33 }
 0xe8c   :  { %v4230_v36 = vmul.f32 %v4228_v32, %v4175_v18 }
 0xe8e   :  { %v9619_v61 = vadd.f32 %v4230_v36, %v10792_v49 }
 0xe90   :  { %v4197_v37 = vpop.f32.mrf.mxu0  ;;  %10793 = vst [vmem:[#allocation9_spill] sm:$0xff] %v9619_v61 }
 0xe93   :  { %5845 = vmatmul.msk.bf16.gmra.mxu0 %vm130_vm2, %v4260_v6 }
 0xe98   :  { %v4200_v48 = vpop.f32.mrf.mxu0  ;;  %v4220_v55 = vpop.f32.mrf.mxu1 }
 0xe99   :  { %v4221_v35 = vadd.f32 %v4220_v55, %v4197_v37 }
 0xe9b   :  { %5861 = vmatmul.msk.bf16.gmra.mxu1 %vm130_vm2, %v4260_v6 }
 0xea0   :  { %v9623_v3 = vpop.f32.mrf.mxu0  ;;  %v4223_v0 = vpop.f32.mrf.mxu1 }
 0xea1   :  { %10794 = vst [vmem:[#allocation8_spill] sm:$0xff] %v9623_v3  ;;  %v4224_v13 = vadd.f32 %v4223_v0, %v4200_v48 }
 0xea3   :  { %5846 = vmatmul.msk.bf16.gmra.mxu0 %vm130_vm2, %v9583_v30  ;;  %6710 = vrcp.f32 %v4224_v13 }
 0xea8   :  { %v9627_v43 = vpop.f32.mrf.mxu0  ;;  %v9629_v14 = vpop.f32.mrf.mxu1 }
 0xea9   :  { %10795 = vst [vmem:[#allocation20_spill] sm:$0xff] %v9627_v43  ;;  %v6711_v39 = vpop.eup %6710 }
 0xeaa   :  { %v4229_v23 = vperm.slane %v6711_v39, 0 }
 0xeab   :  { %5862 = vmatmul.msk.bf16.gmra.mxu1 %vm130_vm2, %v9583_v30 }
 0xeac   :  { %v4231_v42 = vmul.f32 %v4229_v23, %v4221_v35 }
 0xeae   :  { %v9636_v22 = vadd.f32 %v4231_v42, %v10797_v21 }
 0xeb0   :  { %v9633_v59 = vpop.f32.mrf.mxu0  ;;  %10798 = vst [vmem:[#allocation11_spill] sm:$0xff] %v9636_v22  ;;  %v9639_v7 = vpop.f32.mrf.mxu1 }
 0xeb1   :  { %10796 = vst [vmem:[#allocation19_spill] sm:$0xff] %v9633_v59  ;;  %v4496_v13 = vmax.f32 %v9623_v3, %v9633_v59 }
 0xeb3   :  { %5847 = vmatmul.msk.bf16.gmra.mxu0 %vm130_vm2, %v4249_v11 }
 0xeb8   :  { %v9641_v31 = vpop.f32.mrf.mxu0  ;;  %v9643_v24 = vpop.f32.mrf.mxu1 }
 0xeb9   :  { %10799 = vst [vmem:[#allocation29_spill] sm:$0xff] %v9641_v31  ;;  %v4497_v39 = vmax.f32 %v9627_v43, %v9641_v31 }
 0xebb   :  { %5863 = vmatmul.msk.bf16.gmra.mxu1 %vm130_vm2, %v4249_v11 }
 0xec0   :  { %v9646_v20 = vpop.f32.mrf.mxu0  ;;  %v9649_v30 = vpop.f32.mrf.mxu1 }
 0xec1   :  { %10800 = vst [vmem:[#allocation12_spill] sm:$0xff] %v9646_v20  ;;  %v4498_v42 = vmax.f32 %v4496_v13, %v9646_v20 }
 0xec3   :  { %5848 = vmatmul.msk.bf16.gmra.mxu0 %vm130_vm2, %v4251_v12 }
 0xec8   :  { %v9651_v1 = vpop.f32.mrf.mxu0  ;;  %v9653_v16 = vpop.f32.mrf.mxu1 }
 0xec9   :  { %v4499_v21 = vmax.f32 %v4497_v39, %v9651_v1 }
 0xecb   :  { %5864 = vmatmul.msk.bf16.gmra.mxu1 %vm130_vm2, %v4251_v12 }
 0xed0   :  { %v9656_v52 = vpop.f32.mrf.mxu0  ;;  %v9660_v10 = vpop.f32.mrf.mxu1 }
 0xed3   :  { %5849 = vmatmul.msk.bf16.gmra.mxu0 %vm130_vm2, %v9603_v62 }
 0xed8   :  { %v9662_v29 = vpop.f32.mrf.mxu0  ;;  %v9664_v45 = vpop.f32.mrf.mxu1 }
 0xed9   :  { %v4501_v22 = vmax.f32 %v4499_v21, %v9662_v29 }
 0xedb   :  { %5865 = vmatmul.msk.bf16.gmra.mxu1 %vm130_vm2, %v9603_v62 }
 0xee0   :  { %v9668_v19 = vpop.f32.mrf.mxu0  ;;  %v9672_v26 = vpop.f32.mrf.mxu1 }
 0xee3   :  { %5850 = vmatmul.msk.bf16.gmra.mxu0 %vm130_vm2, %v9607_v50 }
 0xee8   :  { %v9674_v4 = vpop.f32.mrf.mxu0  ;;  %v9676_v58 = vpop.f32.mrf.mxu1 }
 0xee9   :  { %v4503_v34 = vmax.f32 %v4501_v22, %v9674_v4 }
 0xeeb   :  { %5866 = vmatmul.msk.bf16.gmra.mxu1 %vm130_vm2, %v9607_v50  ;;  %v10802_v50 = vld [vmem:[#allocation16_spill] sm:$0xff] }
 0xef0   :  { %v9680_v38 = vpop.f32.mrf.mxu0  ;;  %v9684_v17 = vpop.f32.mrf.mxu1 }
 0xef3   :  { %5851 = vmatmul.msk.bf16.gmra.mxu0 %vm130_vm2, %v9613_v63 }
 0xef8   :  { %v9686_v46 = vpop.f32.mrf.mxu0  ;;  %v9688_v54 = vpop.f32.mrf.mxu1 }
 0xef9   :  { %v4505_v40 = vmax.f32 %v4503_v34, %v9686_v46 }
 0xefb   :  { %5867 = vmatmul.msk.bf16.gmra.mxu1 %vm130_vm2, %v9613_v63 }
 0xf00   :  { %v9692_v47 = vpop.f32.mrf.mxu0  ;;  %v9695_v2 = vpop.f32.mrf.mxu1 }
 0xf03   :  { %5852 = vmatmul.msk.bf16.gmra.mxu0 %vm130_vm2, %v4259_v9 }
 0xf08   :  { %v9697_v44 = vpop.f32.mrf.mxu0  ;;  %v9699_v56 = vpop.f32.mrf.mxu1 }
 0xf09   :  { %v4507_v13 = vmax.f32 %v4505_v40, %v9697_v44 }
 0xf0b   :  { %5868 = vmatmul.msk.bf16.gmra.mxu1 %vm130_vm2, %v4259_v9 }
 0xf10   :  { %v9702_v11 = vpop.f32.mrf.mxu0  ;;  %v9705_v12 = vpop.f32.mrf.mxu1 }
 0xf13   :  { %5853 = vmatmul.msk.bf16.gmra.mxu0 %vm130_vm2, %v4261_v60 }
 0xf18   :  { %v9707_v25 = vpop.f32.mrf.mxu0  ;;  %v9709_v62 = vpop.f32.mrf.mxu1 }
 0xf19   :  { %v4509_v21 = vmax.f32 %v4507_v13, %v9707_v25 }
 0xf1b   :  { %5869 = vmatmul.msk.bf16.gmra.mxu1 %vm130_vm2, %v4261_v60 }
 0xf20   :  { %v9712_v5 = vpop.f32.mrf.mxu0  ;;  %v9716_v41 = vpop.f32.mrf.mxu1 }
 0xf21   :  { %10801 = vst [vmem:[#allocation23_spill] sm:$0xff] %v9712_v5 }
 0xf23   :  { %5907 = vmatmul.msk.f32.vlgmr.msra.gmra.mxu0 %vm130_vm2, %v10802_v50 }
 0xf28   :  { %v9718_v63 = vpop.f32.mrf.mxu0  ;;  %v9720_v53 = vpop.f32.mrf.mxu1 }
 0xf29   :  { %10803 = vst [vmem:[#allocation15_spill] sm:$0xff] %v9718_v63  ;;  %v4511_v22 = vmax.f32 %v4509_v21, %v9718_v63 }
 0xf2a   :  { %10804 = vst [vmem:[#allocation24_spill] sm:$0xff] %v9720_v53 }
 0xf2b   :  { %5909 = vmatmul.msk.f32.vlgmr.msra.gmra.mxu1 %vm130_vm2, %v10802_v50  ;;  %v4500_v50 = vmax.f32 %v4498_v42, %v9656_v52 }
 0xf2d   :  { %v4502_v61 = vmax.f32 %v4500_v50, %v9668_v19 }
 0xf2f   :  { %v4504_v51 = vmax.f32 %v4502_v61, %v9680_v38 }
 0xf30   :  { %v9724_v33 = vpop.f32.mrf.mxu0  ;;  %v9726_v28 = vpop.f32.mrf.mxu1 }
 0xf31   :  { %10805 = vst [vmem:[#allocation18_spill] sm:$0xff] %v9724_v33  ;;  %v4506_v3 = vmax.f32 %v4504_v51, %v9692_v47 }
 0xf32   :  { %10806 = vst [vmem:[#allocation21_spill] sm:$0xff] %v9726_v28 }
 0xf33   :  { %v4508_v42 = vmax.f32 %v4506_v3, %v9702_v11 }
 0xf35   :  { %v4510_v50 = vmax.f32 %v4508_v42, %v9712_v5 }
 0xf37   :  { %v4512_v61 = vmax.f32 %v4510_v50, %v9724_v33 }
 0xf38   :  { %v9728_v18 = vpop.f32.mrf.mxu0  ;;  %v9732_v57 = vpop.f32.mrf.mxu1 }
 0xf39   :  { %10807 = vst [vmem:[#allocation27_spill] sm:$0xff] %v9728_v18  ;;  %v4513_v34 = vmax.f32 %v4511_v22, %v9728_v18 }
 0xf40   :  { %v9730_v8 = vpop.f32.mrf.mxu0  ;;  %v9736_v9 = vpop.f32.mrf.mxu1 }
 0xf41   :  { %10808 = vst [vmem:[#allocation31_spill] sm:$0xff] %v9730_v8  ;;  %v4514_v51 = vmax.f32 %v4512_v61, %v9730_v8 }
 0xf48   :  { %v9734_v15 = vpop.f32.mrf.mxu0  ;;  %v9740_v32 = vpop.f32.mrf.mxu1 }
 0xf49   :  { %10809 = vst [vmem:[#allocation17_spill] sm:$0xff] %v9734_v15  ;;  %v4515_v40 = vmax.f32 %v4513_v34, %v9734_v15 }
 0xf50   :  { %v9738_v27 = vpop.f32.mrf.mxu0  ;;  %v9744_v6 = vpop.f32.mrf.mxu1 }
 0xf51   :  { %v4516_v31 = vmax.f32 %v4514_v51, %v9738_v27 }
 0xf58   :  { %v9742_v37 = vpop.f32.mrf.mxu0  ;;  %v9750_v48 = vpop.f32.mrf.mxu1 }
 0xf59   :  { %v4517_v3 = vmax.f32 %v4515_v40, %v9742_v37 }
 0xf60   :  { %v9746_v36 = vpop.f32.mrf.mxu0  ;;  %v9754_v35 = vpop.f32.mrf.mxu1 }
 0xf61   :  { %v4518_v13 = vmax.f32 %v4516_v31, %v9746_v36 }
 0xf68   :  { %v9748_v49 = vpop.f32.mrf.mxu0  ;;  %v9762_v23 = vpop.f32.mrf.mxu1 }
 0xf69   :  { %v4519_v42 = vmax.f32 %v4517_v3, %v9748_v49 }
 0xf70   :  { %v9752_v55 = vpop.f32.mrf.mxu0  ;;  %v9776_v43 = vpop.f32.mrf.mxu1 }
 0xf71   :  { %v4520_v21 = vmax.f32 %v4518_v13, %v9752_v55 }
 0xf78   :  { %v9756_v0 = vpop.f32.mrf.mxu0  ;;  %v9792_v20 = vpop.f32.mrf.mxu1 }
 0xf79   :  { %v4521_v50 = vmax.f32 %v4519_v42, %v9756_v0 }
 0xf80   :  { %v9766_v60 = vpop.f32.mrf.mxu0  ;;  %v9801_v63 = vpop.f32.mrf.mxu1 }
 0xf81   :  { %v4522_v22 = vmax.f32 %v4520_v21, %v9766_v60  ;;  %v4534_v21 = vmax.f32 %v9639_v7, %v9649_v30 }
 0xf88   :  { %v9778_v39 = vpop.f32.mrf.mxu0  ;;  %v9803_v3 = vpop.f32.mrf.mxu1 }
 0xf89   :  { %v4523_v61 = vmax.f32 %v4521_v50, %v9778_v39 }
 0xf90   :  { %v9788_v59 = vpop.f32.mrf.mxu0 }
 0xf91   :  { %v4524_v5 = vmax.f32 %v4522_v22, %v9788_v59  ;;  %v4533_v22 = vmax.f32 %v9629_v14, %v9643_v24 }
 0xf98   :  { %v4404_v34 = vpop.f32.mrf.mxu0 }
 0xf99   :  { %v4525_v51 = vmax.f32 %v4523_v61, %v4404_v34  ;;  %v9815_v61 = vpop.f32.mrf.mxu1 }
 0xf9b   :  { %v4526_v40 = vmax.f32 %v4524_v5, %v4525_v51  ;;  %v4536_v5 = vmax.f32 %v4534_v21, %v9660_v10 }
 0xf9d   :  { %v4527_v33 = vrot.slane %v4526_v40, 4 }
 0xf9f   :  { %v4528_v18 = vmax.f32 %v4526_v40, %v4527_v33  ;;  %v4535_v33 = vmax.f32 %v4533_v22, %v9653_v16 }
 0xfa1   :  { %v4529_v31 = vrot.slane %v4528_v18, 2 }
 0xfa3   :  { %v4530_v8 = vmax.f32 %v4528_v18, %v4529_v31  ;;  %v4538_v18 = vmax.f32 %v4536_v5, %v9672_v26 }
 0xfa5   :  { %v4531_v13 = vrot.slane %v4530_v8, 1 }
 0xfa7   :  { %v9805_v15 = vmax.f32 %v4530_v8, %v4531_v13  ;;  %v4537_v8 = vmax.f32 %v4535_v33, %v9664_v45  ;;  %v9827_v33 = vpop.f32.mrf.mxu1 }
 0xfa9   :  { %v4632_v42 = vsub.f32 %v4404_v34, %v9805_v15  ;;  %v4540_v34 = vmax.f32 %v4538_v18, %v9684_v17  ;;  %v4539_v51 = vmax.f32 %v4537_v8, %v9676_v58 }
 0xfab   :  { %v4758_v50 = vmul.f32 1.442695, %v4632_v42  ;;  %v4542_v40 = vmax.f32 %v4540_v34, %v9695_v2  ;;  %v4541_v13 = vmax.f32 %v4539_v51, %v9688_v54 }
 0xfad   :  { %6712 = vpow2.f32 %v4758_v50  ;;  %v4544_v42 = vmax.f32 %v4542_v40, %v9705_v12  ;;  %v4543_v21 = vmax.f32 %v4541_v13, %v9699_v56 }
 0xfaf   :  { %v4546_v50 = vmax.f32 %v4544_v42, %v9716_v41  ;;  %v4545_v22 = vmax.f32 %v4543_v21, %v9709_v62 }
 0xfb1   :  { %v4548_v5 = vmax.f32 %v4546_v50, %v9726_v28  ;;  %v4547_v18 = vmax.f32 %v4545_v22, %v9720_v53  ;;  %v9839_v28 = vpop.f32.mrf.mxu1 }
 0xfb3   :  { %v6713_v31 = vpop.eup %6712  ;;  %v4550_v8 = vmax.f32 %v4548_v5, %v9736_v9  ;;  %v4549_v34 = vmax.f32 %v4547_v18, %v9732_v57 }
 0xfb4   :  { %4831 = vmatpush.msra.mxu3 %v6713_v31 }
 0xfb5   :  { %v4552_v51 = vmax.f32 %v4550_v8, %v9744_v6  ;;  %v4551_v40 = vmax.f32 %v4549_v34, %v9740_v32  ;;  %v4600_v8 = vsub.f32 %v9707_v25, %v9805_v15 }
 0xfb7   :  { %v4554_v31 = vmax.f32 %v4552_v51, %v9754_v35  ;;  %v4553_v13 = vmax.f32 %v4551_v40, %v9750_v48  ;;  %v4598_v40 = vsub.f32 %v9702_v11, %v9805_v15 }
 0xfb9   :  { %v4556_v42 = vmax.f32 %v4554_v31, %v9776_v43  ;;  %v4555_v21 = vmax.f32 %v4553_v13, %v9762_v23  ;;  %v4596_v31 = vsub.f32 %v9697_v44, %v9805_v15  ;;  %v4588_v44 = vsub.f32 %v9674_v4, %v9805_v15 }
 0xfba   :  { %v4628_v4 = vsub.f32 %v9778_v39, %v9805_v15  ;;  %v4624_v39 = vsub.f32 %v9756_v0, %v9805_v15 }
 0xfbb   :  { %v4558_v50 = vmax.f32 %v4556_v42, %v9801_v63  ;;  %v4557_v22 = vmax.f32 %v4555_v21, %v9792_v20  ;;  %v4694_v42 = vmul.f32 1.442695, %v4600_v8  ;;  %v4594_v21 = vsub.f32 %v9692_v47, %v9805_v15 }
 0xfbc   :  { %v4686_v53 = vmul.f32 1.442695, %v4596_v31  ;;  %v4586_v47 = vsub.f32 %v9668_v19, %v9805_v15  ;;  %v4582_v19 = vsub.f32 %v9656_v52, %v9805_v15 }
 0xfbd   :  { %v4560_v5 = vmax.f32 %v4558_v50, %v9815_v61  ;;  %v4559_v18 = vmax.f32 %v4557_v22, %v9803_v3  ;;  %v4690_v50 = vmul.f32 1.442695, %v4598_v40  ;;  %v4592_v22 = vsub.f32 %v9686_v46, %v9805_v15 }
 0xfbe   :  { %6714 = vpow2.f32 %v4694_v42  ;;  %v4630_v46 = vsub.f32 %v9788_v59, %v9805_v15  ;;  %v4670_v42 = vmul.f32 1.442695, %v4588_v44  ;;  %v4626_v59 = vsub.f32 %v9766_v60, %v9805_v15 }
 0xfbf   :  { %v4562_v34 = vmax.f32 %v4560_v5, %v9839_v28  ;;  %v4561_v51 = vmax.f32 %v4559_v18, %v9827_v33  ;;  %v4590_v5 = vsub.f32 %v9680_v38, %v9805_v15  ;;  %v4682_v18 = vmul.f32 1.442695, %v4594_v21 }
 0xfc0   :  { %6716 = vpow2.f32 %v4690_v50  ;;  %v4678_v8 = vmul.f32 1.442695, %v4592_v22  ;;  %v4584_v38 = vsub.f32 %v9662_v29, %v9805_v15  ;;  %v4754_v21 = vmul.f32 1.442695, %v4630_v46 }
 0xfc1   :  { %v4563_v13 = vmax.f32 %v4561_v51, %v4562_v34  ;;  %6718 = vpow2.f32 %v4686_v53  ;;  %v4674_v51 = vmul.f32 1.442695, %v4590_v5  ;;  %v4580_v29 = vsub.f32 %v9651_v1, %v9805_v15 }
 0xfc2   :  { %6720 = vpow2.f32 %v4682_v18  ;;  %v4750_v5 = vmul.f32 1.442695, %v4628_v4  ;;  %v10810_v18 = vld [vmem:[#allocation12_spill] sm:$0xff]  ;;  %v4622_v60 = vsub.f32 %v9752_v55, %v9805_v15  ;;  %v4620_v46 = vsub.f32 %v9748_v49, %v9805_v15 }
 0xfc3   :  { %v4564_v25 = vrot.slane %v4563_v13, 4  ;;  %6722 = vpow2.f32 %v4678_v8  ;;  %v4578_v44 = vsub.f32 %v10810_v18, %v9805_v15  ;;  %v4658_v8 = vmul.f32 1.442695, %v4582_v19 }
 0xfc4   :  { %v6715_v34 = vpop.eup %6714  ;;  %6724 = vpow2.f32 %v4674_v51  ;;  %v4654_v0 = vmul.f32 1.442695, %v4580_v29  ;;  %v4618_v4 = vsub.f32 %v9746_v36, %v9805_v15  ;;  %v4616_v29 = vsub.f32 %v9742_v37, %v9805_v15  ;;  %v10814_v36 = vld [vmem:[#allocation8_spill] sm:$0xff] }
 0xfc5   :  { %v4565_v11 = vmax.f32 %v4563_v13, %v4564_v25  ;;  %4808 = vmatpush.msra.mxu2 %v6715_v34  ;;  %v4666_v13 = vmul.f32 1.442695, %v4586_v47  ;;  %v4662_v25 = vmul.f32 1.442695, %v4584_v38  ;;  %6726 = vpow2.f32 %v4670_v42 }
 0xfc6   :  { %v6717_v40 = vpop.eup %6716  ;;  %v4746_v34 = vmul.f32 1.442695, %v4626_v59  ;;  %v4650_v42 = vmul.f32 1.442695, %v4578_v44  ;;  %v4730_v44 = vmul.f32 1.442695, %v4618_v4 }
 0xfc7   :  { %v4566_v31 = vrot.slane %v4565_v11, 2  ;;  %4809 = vmatpush.msra.mxu2 %v6717_v40  ;;  %v6719_v53 = vpop.eup %6718  ;;  %6728 = vpow2.f32 %v4666_v13  ;;  %v4742_v40 = vmul.f32 1.442695, %v4624_v39  ;;  %v10813_v13 = vld [vmem:[#allocation20_spill] sm:$0xff] }
 0xfc8   :  { %v6721_v50 = vpop.eup %6720  ;;  %6730 = vpow2.f32 %v4754_v21  ;;  %v4572_v59 = vsub.f32 %v10813_v13, %v9805_v15 }
 0xfc9   :  { %4810 = vmatpush.msra.mxu2 %v6719_v53  ;;  %v4567_v22 = vmax.f32 %v4565_v11, %v4566_v31  ;;  %v6723_v52 = vpop.eup %6722  ;;  %v10811_v11 = vld [vmem:[#allocation29_spill] sm:$0xff]  ;;  %6732 = vpow2.f32 %v4662_v25  ;;  %v10812_v31 = vld [vmem:[#allocation19_spill] sm:$0xff]  ;;  %v4738_v53 = vmul.f32 1.442695, %v4622_v60  ;;  %v4734_v25 = vmul.f32 1.442695, %v4620_v46 }
 0xfca   :  { %v6725_v1 = vpop.eup %6724  ;;  %v4576_v47 = vsub.f32 %v10811_v11, %v9805_v15  ;;  %6734 = vpow2.f32 %v4750_v5  ;;  %v4574_v55 = vsub.f32 %v10812_v31, %v9805_v15  ;;  %v4570_v5 = vsub.f32 %v10814_v36, %v9805_v15 }
 0xfcb   :  { %4811 = vmatpush.msra.mxu2 %v6721_v50  ;;  %v4568_v51 = vrot.slane %v4567_v22, 1  ;;  %v6727_v38 = vpop.eup %6726  ;;  %6736 = vpow2.f32 %v4658_v8  ;;  %v4638_v60 = vmul.f32 1.442695, %v4572_v59 }
 0xfcc   :  { %6738 = vpow2.f32 %v4746_v34  ;;  %v4646_v21 = vmul.f32 1.442695, %v4576_v47  ;;  %v4726_v47 = vmul.f32 1.442695, %v4616_v29 }
 0xfcd   :  { %4812 = vmatpush.msra.mxu2 %v6723_v52  ;;  %v6729_v19 = vpop.eup %6728  ;;  %v9890_v49 = vmax.f32 %v4567_v22, %v4568_v51  ;;  %6740 = vpow2.f32 %v4654_v0  ;;  %v4642_v52 = vmul.f32 1.442695, %v4574_v55  ;;  %v4614_v22 = vsub.f32 %v9738_v27, %v9805_v15 }
 0xfce   :  { %v6731_v50 = vpop.eup %6730  ;;  %6742 = vpow2.f32 %v4742_v40  ;;  %v4634_v0 = vmul.f32 1.442695, %v4570_v5 }
 0xfcf   :  { %4813 = vmatpush.msra.mxu2 %v6725_v1  ;;  %v6733_v39 = vpop.eup %6732  ;;  %6744 = vpow2.f32 %v4650_v42  ;;  %4832 = vmatpush.msra.mxu3 %v6731_v50  ;;  %v4601_v37 = vsub.f32 %v9716_v41, %v9890_v49  ;;  %v10815_v1 = vld [vmem:[#allocation17_spill] sm:$0xff]  ;;  %v4599_v27 = vsub.f32 %v9709_v62, %v9890_v49  ;;  %v10816_v41 = vld [vmem:[#allocation31_spill] sm:$0xff]  ;;  %v4597_v55 = vsub.f32 %v9705_v12, %v9890_v49  ;;  %v10818_v12 = vld [vmem:[#allocation18_spill] sm:$0xff] }
 0xfd0   :  { %v6735_v18 = vpop.eup %6734  ;;  %6746 = vpow2.f32 %v4738_v53  ;;  %v4612_v11 = vsub.f32 %v10815_v1, %v9805_v15  ;;  %v4610_v40 = vsub.f32 %v10816_v41, %v9805_v15  ;;  %v10817_v62 = vld [vmem:[#allocation27_spill] sm:$0xff]  ;;  %v4595_v59 = vsub.f32 %v9699_v56, %v9890_v49 }
 0xfd1   :  { %4814 = vmatpush.msra.mxu2 %v6727_v38  ;;  %v6737_v8 = vpop.eup %6736  ;;  %6748 = vpow2.f32 %v4646_v21  ;;  %4833 = vmatpush.msra.mxu3 %v6735_v18  ;;  %v4722_v38 = vmul.f32 1.442695, %v4614_v22  ;;  %v4696_v42 = vmul.f32 1.442695, %v4601_v37  ;;  %v4608_v53 = vsub.f32 %v10817_v62, %v9805_v15  ;;  %v10819_v56 = vld [vmem:[#allocation15_spill] sm:$0xff] }
 0xfd2   :  { %v6739_v34 = vpop.eup %6738  ;;  %6750 = vpow2.f32 %v4734_v25  ;;  %v4692_v21 = vmul.f32 1.442695, %v4599_v27  ;;  %v4606_v29 = vsub.f32 %v10818_v12, %v9805_v15  ;;  %v4714_v25 = vmul.f32 1.442695, %v4610_v40 }
 0xfd3   :  { %4815 = vmatpush.msra.mxu2 %v6729_v19  ;;  %v6741_v51 = vpop.eup %6740  ;;  %6752 = vpow2.f32 %v4642_v52  ;;  %4834 = vmatpush.msra.mxu3 %v6739_v34  ;;  %v4718_v19 = vmul.f32 1.442695, %v4612_v11  ;;  %v4593_v36 = vsub.f32 %v9695_v2, %v9890_v49  ;;  %v4688_v5 = vmul.f32 1.442695, %v4597_v55  ;;  %v10820_v2 = vld [vmem:[#allocation23_spill] sm:$0xff] }
 0xfd4   :  { %v6743_v46 = vpop.eup %6742  ;;  %6754 = vpow2.f32 %v4730_v44  ;;  %v4604_v18 = vsub.f32 %v10819_v56, %v9805_v15  ;;  %v4710_v22 = vmul.f32 1.442695, %v4608_v53  ;;  %v4684_v37 = vmul.f32 1.442695, %v4595_v59 }
 0xfd5   :  { %4816 = vmatpush.msra.mxu2 %v6733_v39  ;;  %v6745_v31 = vpop.eup %6744  ;;  %6756 = vpow2.f32 %v4638_v60  ;;  %4835 = vmatpush.msra.mxu3 %v6743_v46  ;;  %v4602_v34 = vsub.f32 %v10820_v2, %v9805_v15  ;;  %v4706_v1 = vmul.f32 1.442695, %v4606_v29  ;;  %v4587_v41 = vsub.f32 %v9676_v58, %v9890_v49 }
 0xfd6   :  { %v6747_v4 = vpop.eup %6746  ;;  %6758 = vpow2.f32 %v4726_v47  ;;  %v4589_v47 = vsub.f32 %v9684_v17, %v9890_v49  ;;  %v4702_v46 = vmul.f32 1.442695, %v4604_v18  ;;  %v4585_v55 = vsub.f32 %v9672_v26, %v9890_v49 }
 0xfd7   :  { %4817 = vmatpush.msra.mxu2 %v6737_v8  ;;  %v6749_v13 = vpop.eup %6748  ;;  %6760 = vpow2.f32 %v4634_v0  ;;  %4836 = vmatpush.msra.mxu3 %v6747_v4  ;;  %v4591_v8 = vsub.f32 %v9688_v54, %v9890_v49  ;;  %v9924_v0 = vpop.f32.mrf.mxu2  ;;  %v4633_v54 = vsub.f32 %v9839_v28, %v9890_v49  ;;  %v4629_v62 = vsub.f32 %v9815_v61, %v9890_v49 }
 0xfd8   :  { %v6751_v50 = vpop.eup %6750  ;;  %6762 = vpow2.f32 %v4722_v38  ;;  %v4631_v38 = vsub.f32 %v9827_v33, %v9890_v49  ;;  %v4583_v33 = vsub.f32 %v9664_v45, %v9890_v49  ;;  %v4627_v26 = vsub.f32 %v9803_v3, %v9890_v49 }
 0xfd9   :  { %4818 = vmatpush.msra.mxu2 %v6741_v51  ;;  %v6753_v39 = vpop.eup %6752  ;;  %6764 = vpow2.f32 %v4696_v42  ;;  %4837 = vmatpush.msra.mxu3 %v6751_v50  ;;  %v4680_v51 = vmul.f32 1.442695, %v4593_v36  ;;  %v4676_v40 = vmul.f32 1.442695, %v4591_v8  ;;  %v4672_v42 = vmul.f32 1.442695, %v4589_v47 }
 0xfda   :  { %v6755_v52 = vpop.eup %6754  ;;  %6766 = vpow2.f32 %v4718_v19  ;;  %v4760_v4 = vmul.f32 1.442695, %v4633_v54  ;;  %v4668_v19 = vmul.f32 1.442695, %v4587_v41  ;;  %v4756_v59 = vmul.f32 1.442695, %v4631_v38 }
 0xfdb   :  { %4819 = vmatpush.msra.mxu2 %v6745_v31  ;;  %v6757_v44 = vpop.eup %6756  ;;  %6768 = vpow2.f32 %v4692_v21  ;;  %4838 = vmatpush.msra.mxu3 %v6755_v52  ;;  %v4698_v31 = vmul.f32 1.442695, %v4602_v34  ;;  %v4581_v61 = vsub.f32 %v9660_v10, %v9890_v49  ;;  %v4664_v50 = vmul.f32 1.442695, %v4585_v55 }
 0xfdc   :  { %v6759_v60 = vpop.eup %6758  ;;  %6770 = vpow2.f32 %v4714_v25  ;;  %v4625_v45 = vsub.f32 %v9801_v63, %v9890_v49  ;;  %v4752_v29 = vmul.f32 1.442695, %v4629_v62  ;;  %v4579_v3 = vsub.f32 %v9653_v16, %v9890_v49 }
 0xfdd   :  { %4820 = vmatpush.msra.mxu2 %v6749_v13  ;;  %v6761_v11 = vpop.eup %6760  ;;  %6772 = vpow2.f32 %v4688_v5  ;;  %4839 = vmatpush.msra.mxu3 %v6759_v60  ;;  %v10821_v36 = vmov 1.0   ;;  %v4623_v5 = vsub.f32 %v9792_v20, %v9890_v49  ;;  %v4748_v52 = vmul.f32 1.442695, %v4627_v26 }
 0xfde   :  { %v6763_v27 = vpop.eup %6762  ;;  %6774 = vpow2.f32 %v4710_v22  ;;  %v4577_v63 = vsub.f32 %v9649_v30, %v9890_v49  ;;  %v4656_v18 = vmul.f32 1.442695, %v4581_v61  ;;  %v4621_v22 = vsub.f32 %v9776_v43, %v9890_v49 }
 0xfdf   :  { %4821 = vmatpush.msra.mxu2 %v6753_v39  ;;  %v6765_v15 = vpop.eup %6764  ;;  %6776 = vpow2.f32 %v4684_v37  ;;  %4840 = vmatpush.msra.mxu3 %v6763_v27  ;;  %v4660_v39 = vmul.f32 1.442695, %v4583_v33  ;;  %v9954_v37 = vpop.f32.mrf.mxu3  ;;  %v4575_v20 = vsub.f32 %v9643_v24, %v9890_v49  ;;  %v4652_v60 = vmul.f32 1.442695, %v4579_v3 }
 0xfe0   :  { %v6767_v17 = vpop.eup %6766  ;;  %6778 = vpow2.f32 %v4706_v1  ;;  %v4619_v2 = vsub.f32 %v9762_v23, %v9890_v49  ;;  %v4740_v34 = vmul.f32 1.442695, %v4623_v5  ;;  %v4573_v1 = vsub.f32 %v9639_v7, %v9890_v49 }
 0xfe1   :  { %4822 = vmatpush.msra.mxu2 %v6757_v44  ;;  %v6769_v28 = vpop.eup %6768  ;;  %6780 = vpow2.f32 %v4680_v51  ;;  %4841 = vmatpush.msra.mxu3 %v6767_v17  ;;  %v4744_v44 = vmul.f32 1.442695, %v4625_v45  ;;  %v4617_v47 = vsub.f32 %v9754_v35, %v9890_v49  ;;  %v4736_v51 = vmul.f32 1.442695, %v4621_v22 }
 0xfe2   :  { %v6771_v58 = vpop.eup %6770  ;;  %6782 = vpow2.f32 %v4702_v46  ;;  %v4571_v27 = vsub.f32 %v9629_v14, %v9890_v49  ;;  %v4644_v54 = vmul.f32 1.442695, %v4575_v20  ;;  %v4615_v7 = vsub.f32 %v9750_v48, %v9890_v49 }
 0xfe3   :  { %4823 = vmatpush.msra.mxu2 %v6761_v11  ;;  %v6773_v53 = vpop.eup %6772  ;;  %6784 = vpow2.f32 %v4676_v40  ;;  %4842 = vmatpush.msra.mxu3 %v6771_v58  ;;  %v4648_v11 = vmul.f32 1.442695, %v4577_v63  ;;  %v4640_v40 = vmul.f32 1.442695, %v4573_v1  ;;  %v4613_v17 = vsub.f32 %v9744_v6, %v9890_v49 }
 0xfe4   :  { %4824 = vmatmul.f32.vlgmr.msra.gmra.mxu2 %v9924_v0  ;;  %v6775_v13 = vpop.eup %6774  ;;  %6786 = vpow2.f32 %v4698_v31  ;;  %v4728_v38 = vmul.f32 1.442695, %v4617_v47  ;;  %v4636_v31 = vmul.f32 1.442695, %v4571_v27  ;;  %v4611_v48 = vsub.f32 %v9740_v32, %v9890_v49 }
 0xfe5   :  { %4854 = vmatpush.msrb.mxu2 %v6765_v15  ;;  %v6777_v21 = vpop.eup %6776  ;;  %6788 = vpow2.f32 %v4672_v42  ;;  %4843 = vmatpush.msra.mxu3 %v6775_v13  ;;  %v4732_v15 = vmul.f32 1.442695, %v4619_v2  ;;  %v4724_v55 = vmul.f32 1.442695, %v4615_v7  ;;  %v9974_v42 = vpop.trf.xlu2  ;;  %v4720_v62 = vmul.f32 1.442695, %v4613_v17 }
 0xfe6   :  { %v6779_v12 = vpop.eup %6778  ;;  %6790 = vpow2.f32 %v4760_v4  ;;  %v4609_v4 = vsub.f32 %v9736_v9, %v9890_v49  ;;  %v4607_v33 = vsub.f32 %v9732_v57, %v9890_v49 }
 0xfe7   :  { %4855 = vmatpush.msrb.mxu2 %v6769_v28  ;;  %v6781_v25 = vpop.eup %6780  ;;  %6792 = vpow2.f32 %v4668_v19  ;;  %4844 = vmatpush.msra.mxu3 %v6779_v12  ;;  %v4716_v19 = vmul.f32 1.442695, %v4611_v48 }
 0xfe8   :  { %v6783_v10 = vpop.eup %6782  ;;  %6794 = vpow2.f32 %v4756_v59  ;;  %v10822_v59 = vld [vmem:[#allocation21_spill] sm:$0xff]  ;;  %v4712_v9 = vmul.f32 1.442695, %v4609_v4 }
 0xfe9   :  { %4856 = vmatpush.msrb.mxu2 %v6773_v53  ;;  %v6785_v56 = vpop.eup %6784  ;;  %6796 = vpow2.f32 %v4664_v50  ;;  %4845 = vmatpush.msra.mxu3 %v6783_v10  ;;  %v10823_v50 = vld [vmem:[#allocation22_spill] sm:$0xff] }
 0xfea   :  { %v6787_v16 = vpop.eup %6786  ;;  %6798 = vpow2.f32 %v4752_v29  ;;  %v4936_v12 = vrot.slane %v10823_v50, 3  ;;  %v10824_v29 = vld [vmem:[#allocation24_spill] sm:$0xff] }
 0xfeb   :  { %4857 = vmatpush.msrb.mxu2 %v6777_v21  ;;  %v6789_v8 = vpop.eup %6788  ;;  %6800 = vpow2.f32 %v4660_v39  ;;  %4846 = vmatpush.msra.mxu3 %v6787_v16  ;;  %v4605_v21 = vsub.f32 %v10822_v59, %v9890_v49  ;;  %v4603_v57 = vsub.f32 %v10824_v29, %v9890_v49 }
 0xfec   :  { %4827 = vmatmul.f32.gmra.mxu2 %v10821_v36  ;;  %v6791_v30 = vpop.eup %6790  ;;  %6802 = vpow2.f32 %v4748_v52  ;;  %4847 = vmatmul.f32.vlgmr.msra.gmra.mxu3 %v9954_v37  ;;  %v4987_v52 = vsel %vm179_vm1, %v4936_v12, 0 }
 0xfed   :  { %4858 = vmatpush.msrb.mxu2 %v6781_v25  ;;  %v6793_v43 = vpop.eup %6792  ;;  %6804 = vpow2.f32 %v4656_v18  ;;  %4877 = vmatpush.msrb.mxu3 %v6791_v30  ;;  %v4708_v25 = vmul.f32 1.442695, %v4607_v33  ;;  %v9985_v3 = vpop.trf.xlu2  ;;  %v4704_v5 = vmul.f32 1.442695, %v4605_v21  ;;  %v4700_v63 = vmul.f32 1.442695, %v4603_v57 }
 0xfee   :  { %v6795_v24 = vpop.eup %6794  ;;  %6806 = vpow2.f32 %v4744_v44 }
 0xfef   :  { %4859 = vmatpush.msrb.mxu2 %v6785_v56  ;;  %v6797_v23 = vpop.eup %6796  ;;  %6808 = vpow2.f32 %v4652_v60  ;;  %4878 = vmatpush.msrb.mxu3 %v6795_v24 }
 0xff0   :  { %v6799_v46 = vpop.eup %6798  ;;  %6810 = vpow2.f32 %v4740_v34 }
 0xff1   :  { %4860 = vmatpush.msrb.mxu2 %v6789_v8  ;;  %v6801_v41 = vpop.eup %6800  ;;  %6812 = vpow2.f32 %v4648_v11  ;;  %4879 = vmatpush.msrb.mxu3 %v6799_v46 }
 0xff2   :  { %v6803_v35 = vpop.eup %6802  ;;  %6814 = vpow2.f32 %v4736_v51 }
 0xff3   :  { %4861 = vmatpush.msrb.mxu2 %v6793_v43  ;;  %v6805_v14 = vpop.eup %6804  ;;  %6816 = vpow2.f32 %v4644_v54  ;;  %4880 = vmatpush.msrb.mxu3 %v6803_v35 }
 0xff4   :  { %v6807_v28 = vpop.eup %6806  ;;  %6818 = vpow2.f32 %v4732_v15  ;;  %4850 = vmatmul.f32.gmra.mxu3 %v10821_v36 }
 0xff5   :  { %4862 = vmatpush.msrb.mxu2 %v6797_v23  ;;  %v6809_v58 = vpop.eup %6808  ;;  %6820 = vpow2.f32 %v4640_v40  ;;  %4881 = vmatpush.msrb.mxu3 %v6807_v28  ;;  %v4922_v16 = vpop.trf.xlu2 }
 0xff6   :  { %v6811_v6 = vpop.eup %6810  ;;  %6822 = vpow2.f32 %v4728_v38 }
 0xff7   :  { %4863 = vmatpush.msrb.mxu2 %v6801_v41  ;;  %v6813_v53 = vpop.eup %6812  ;;  %6824 = vpow2.f32 %v4636_v31  ;;  %4882 = vmatpush.msrb.mxu3 %v6811_v6  ;;  %v10826_v31 = vld [vmem:[#allocation9_spill] sm:$0xff] }
 0xff8   :  { %v6815_v32 = vpop.eup %6814  ;;  %6826 = vpow2.f32 %v4724_v55 }
 0xff9   :  { %4864 = vmatpush.msrb.mxu2 %v6805_v14  ;;  %v6817_v13 = vpop.eup %6816  ;;  %4883 = vmatpush.msrb.mxu3 %v6815_v32  ;;  %6828 = vpow2.f32 %v4720_v62 }
 0xffa   :  { %v6819_v26 = vpop.eup %6818  ;;  %6830 = vpow2.f32 %v4716_v19 }
 0xffb   :  { %4865 = vmatpush.msrb.mxu2 %v6809_v58  ;;  %v6821_v61 = vpop.eup %6820  ;;  %4884 = vmatpush.msrb.mxu3 %v6819_v26  ;;  %6832 = vpow2.f32 %v4712_v9  ;;  %v10831_v26 = vld [vmem:[#allocation11_spill] sm:$0xff] }
 0xffc   :  { %v6823_v45 = vpop.eup %6822  ;;  %6834 = vpow2.f32 %v4708_v25 }
 0xffd   :  { %4866 = vmatpush.msrb.mxu2 %v6813_v53  ;;  %v6825_v39 = vpop.eup %6824  ;;  %4885 = vmatpush.msrb.mxu3 %v6823_v45  ;;  %6836 = vpow2.f32 %v4704_v5  ;;  %v4923_v30 = vpop.trf.xlu2 }
 0xffe   :  { %v6827_v10 = vpop.eup %6826  ;;  %6838 = vpow2.f32 %v4700_v63 }
 0xfff   :  { %4867 = vmatpush.msrb.mxu2 %v6817_v13  ;;  %4886 = vmatpush.msrb.mxu3 %v6827_v10  ;;  %v6829_v56 = vpop.eup %6828 }
0x1000   :  { %v6831_v49 = vpop.eup %6830 }
0x1001   :  { %4868 = vmatpush.msrb.mxu2 %v6821_v61  ;;  %4887 = vmatpush.msrb.mxu3 %v6829_v56  ;;  %v6833_v18 = vpop.eup %6832 }
0x1002   :  { %v6835_v22 = vpop.eup %6834 }
0x1003   :  { %4869 = vmatpush.msrb.mxu2 %v6825_v39  ;;  %4888 = vmatpush.msrb.mxu3 %v6831_v49  ;;  %v6837_v44 = vpop.eup %6836 }
0x1004   :  { %4870 = vmatmul.f32.vlgmr.msrb.gmra.mxu2 %v9924_v0  ;;  %v10825_v0 = vld [vmem:[#allocation26_spill] sm:$0xff]  ;;  %v6839_v20 = vpop.eup %6838 }
0x1005   :  { %4999 = vmatpush.bf16.msra.mxu2 %v4987_v52  ;;  %4889 = vmatpush.msrb.mxu3 %v6833_v18  ;;  %v4937_v8 = vrot.slane %v10825_v0, 3  ;;  %v4924_v2 = vpop.trf.xlu2 }
0x1007   :  { %4890 = vmatpush.msrb.mxu3 %v6835_v22  ;;  %v4990_v60 = vsel %vm179_vm1, %v4937_v8, 0 }
0x1009   :  { %4891 = vmatpush.msrb.mxu3 %v6837_v44 }
0x100b   :  { %4892 = vmatpush.msrb.mxu3 %v6839_v20 }
0x100c   :  { %4873 = vmatmul.f32.gmra.mxu2 %v10821_v36  ;;  %4893 = vmatmul.f32.vlgmr.msrb.gmra.mxu3 %v9954_v37 }
0x100d   :  { %5088 = vmatpush.bf16.msra.mxu3 %v4990_v60  ;;  %v4925_v34 = vpop.trf.xlu2 }
0x1014   :  { %5874 = vmatmul.msk.bf16.vlgmr.msra.gmra.mxu2 %vm130_vm2, %v9974_v42  ;;  %4896 = vmatmul.f32.gmra.mxu3 %v10821_v36 }
0x1015   :  { %v4926_v43 = vpop.trf.xlu2 }
0x101c   :  { %5890 = vmatmul.msk.bf16.vlgmr.msra.gmra.mxu3 %vm130_vm2, %v9974_v42 }
0x101d   :  { %v4927_v37 = vpop.trf.xlu2 }
0x1024   :  { %5875 = vmatmul.msk.bf16.gmra.mxu2 %vm130_vm2, %v4922_v16 }
0x1025   :  { %v4928_v1 = vpop.trf.xlu2 }
0x102c   :  { %5891 = vmatmul.msk.bf16.gmra.mxu3 %vm130_vm2, %v4922_v16 }
0x102d   :  { %v10003_v11 = vpop.trf.xlu2 }
0x1034   :  { %5876 = vmatmul.msk.bf16.gmra.mxu2 %vm130_vm2, %v4924_v2 }
0x1035   :  { %v4930_v24 = vpop.trf.xlu2 }
0x103c   :  { %5892 = vmatmul.msk.bf16.gmra.mxu3 %vm130_vm2, %v4924_v2 }
0x103d   :  { %v10008_v47 = vpop.trf.xlu2 }
0x1044   :  { %5877 = vmatmul.msk.bf16.gmra.mxu2 %vm130_vm2, %v4926_v43 }
0x1045   :  { %v4932_v51 = vpop.trf.xlu2 }
0x104c   :  { %5893 = vmatmul.msk.bf16.gmra.mxu3 %vm130_vm2, %v4926_v43 }
0x104d   :  { %v10013_v46 = vpop.trf.xlu2 }
0x1054   :  { %5878 = vmatmul.msk.bf16.gmra.mxu2 %vm130_vm2, %v4928_v1 }
0x1055   :  { %v4934_v40 = vpop.trf.xlu2 }
0x105c   :  { %5894 = vmatmul.msk.bf16.gmra.mxu3 %vm130_vm2, %v4928_v1 }
0x105d   :  { %v4935_v8 = vpop.trf.xlu2 }
0x1064   :  { %5879 = vmatmul.msk.bf16.gmra.mxu2 %vm130_vm2, %v4930_v24 }
0x1067   :  { %v4825_v23 = vpop.f32.mrf.mxu2 }
0x106c   :  { %5895 = vmatmul.msk.bf16.gmra.mxu3 %vm130_vm2, %v4930_v24 }
0x106f   :  { %v4848_v27 = vpop.f32.mrf.mxu3  ;;  %v4828_v7 = vpop.f32.mrf.mxu2 }
0x1070   :  { %v4849_v54 = vadd.f32 %v4848_v27, %v4825_v23 }
0x1074   :  { %5880 = vmatmul.msk.bf16.gmra.mxu2 %vm130_vm2, %v4932_v51 }
0x1077   :  { %v4851_v15 = vpop.f32.mrf.mxu3 }
0x1078   :  { %v4852_v41 = vadd.f32 %v4851_v15, %v4828_v7 }
0x107a   :  { %6840 = vrcp.f32 %v4852_v41 }
0x107c   :  { %5896 = vmatmul.msk.bf16.gmra.mxu3 %vm130_vm2, %v4932_v51 }
0x1080   :  { %v6841_v35 = vpop.eup %6840 }
0x1081   :  { %v4902_v17 = vperm.slane %v6841_v35, 0 }
0x1083   :  { %v4904_v14 = vmul.f32 %v4902_v17, %v4849_v54 }
0x1084   :  { %5881 = vmatmul.msk.bf16.gmra.mxu2 %vm130_vm2, %v4934_v40 }
0x1085   :  { %v10018_v28 = vadd.f32 %v4904_v14, %v10826_v31 }
0x1087   :  { %v4871_v38 = vpop.f32.mrf.mxu2  ;;  %10827 = vst [vmem:[#allocation41_spill] sm:$0xff] %v10018_v28 }
0x108c   :  { %5897 = vmatmul.msk.bf16.gmra.mxu3 %vm130_vm2, %v4934_v40 }
0x108f   :  { %v4874_v48 = vpop.f32.mrf.mxu2  ;;  %v4894_v55 = vpop.f32.mrf.mxu3 }
0x1090   :  { %v4895_v42 = vadd.f32 %v4894_v55, %v4871_v38 }
0x1094   :  { %5882 = vmatmul.msk.bf16.gmra.mxu2 %vm130_vm2, %v9985_v3 }
0x1097   :  { %v10023_v58 = vpop.f32.mrf.mxu2  ;;  %v4897_v6 = vpop.f32.mrf.mxu3 }
0x1098   :  { %10828 = vst [vmem:[#allocation42_spill] sm:$0xff] %v10023_v58  ;;  %v4898_v4 = vadd.f32 %v4897_v6, %v4874_v48 }
0x109a   :  { %6842 = vrcp.f32 %v4898_v4 }
0x109c   :  { %5898 = vmatmul.msk.bf16.gmra.mxu3 %vm130_vm2, %v9985_v3 }
0x109f   :  { %v10025_v62 = vpop.f32.mrf.mxu2  ;;  %v10029_v53 = vpop.f32.mrf.mxu3 }
0x10a0   :  { %10829 = vst [vmem:[#allocation13_spill] sm:$0xff] %v10025_v62  ;;  %v6843_v32 = vpop.eup %6842 }
0x10a1   :  { %10830 = vst [vmem:[#allocation28_spill] sm:$0xff] %v10029_v53  ;;  %v4903_v33 = vperm.slane %v6843_v32, 0 }
0x10a3   :  { %v4905_v13 = vmul.f32 %v4903_v33, %v4895_v42 }
0x10a4   :  { %5883 = vmatmul.msk.bf16.gmra.mxu2 %vm130_vm2, %v4923_v30 }
0x10a5   :  { %v10035_v59 = vadd.f32 %v4905_v13, %v10831_v26 }
0x10a7   :  { %v10032_v19 = vpop.f32.mrf.mxu2  ;;  %10832 = vst [vmem:[#allocation30_spill] sm:$0xff] %v10035_v59  ;;  %v10037_v21 = vpop.f32.mrf.mxu3 }
0x10a8   :  { %v5170_v48 = vmax.f32 %v10023_v58, %v10032_v19 }
0x10ac   :  { %5899 = vmatmul.msk.bf16.gmra.mxu3 %vm130_vm2, %v4923_v30 }
0x10af   :  { %v10039_v9 = vpop.f32.mrf.mxu2  ;;  %v10042_v61 = vpop.f32.mrf.mxu3 }
0x10b0   :  { %v5171_v55 = vmax.f32 %v10025_v62, %v10039_v9 }
0x10b4   :  { %5884 = vmatmul.msk.bf16.gmra.mxu2 %vm130_vm2, %v4925_v34 }
0x10b7   :  { %v10045_v50 = vpop.f32.mrf.mxu2  ;;  %v10047_v12 = vpop.f32.mrf.mxu3 }
0x10b8   :  { %v5172_v42 = vmax.f32 %v5170_v48, %v10045_v50 }
0x10bc   :  { %5900 = vmatmul.msk.bf16.gmra.mxu3 %vm130_vm2, %v4925_v34 }
0x10bf   :  { %v10049_v45 = vpop.f32.mrf.mxu2  ;;  %v10052_v29 = vpop.f32.mrf.mxu3 }
0x10c0   :  { %v5173_v6 = vmax.f32 %v5171_v55, %v10049_v45 }
0x10c4   :  { %5885 = vmatmul.msk.bf16.gmra.mxu2 %vm130_vm2, %v4927_v37 }
0x10c7   :  { %v10055_v57 = vpop.f32.mrf.mxu2  ;;  %v10057_v25 = vpop.f32.mrf.mxu3 }
0x10c8   :  { %v5174_v32 = vmax.f32 %v5172_v42, %v10055_v57 }
0x10cc   :  { %5901 = vmatmul.msk.bf16.gmra.mxu3 %vm130_vm2, %v4927_v37 }
0x10cf   :  { %v10059_v3 = vpop.f32.mrf.mxu2  ;;  %v10062_v39 = vpop.f32.mrf.mxu3 }
0x10d0   :  { %v5175_v33 = vmax.f32 %v5173_v6, %v10059_v3 }
0x10d4   :  { %5886 = vmatmul.msk.bf16.gmra.mxu2 %vm130_vm2, %v10003_v11 }
0x10d7   :  { %v10066_v10 = vpop.f32.mrf.mxu2  ;;  %v10068_v5 = vpop.f32.mrf.mxu3 }
0x10d8   :  { %v5176_v26 = vmax.f32 %v5174_v32, %v10066_v10 }
0x10dc   :  { %5902 = vmatmul.msk.bf16.gmra.mxu3 %vm130_vm2, %v10003_v11 }
0x10df   :  { %v10070_v52 = vpop.f32.mrf.mxu2  ;;  %v10074_v56 = vpop.f32.mrf.mxu3 }
0x10e4   :  { %5887 = vmatmul.msk.bf16.gmra.mxu2 %vm130_vm2, %v10008_v47 }
0x10e7   :  { %v10078_v63 = vpop.f32.mrf.mxu2  ;;  %v10080_v49 = vpop.f32.mrf.mxu3 }
0x10e8   :  { %v5178_v59 = vmax.f32 %v5176_v26, %v10078_v63 }
0x10ec   :  { %5903 = vmatmul.msk.bf16.gmra.mxu3 %vm130_vm2, %v10008_v47 }
0x10ef   :  { %v10082_v18 = vpop.f32.mrf.mxu2  ;;  %v10088_v16 = vpop.f32.mrf.mxu3 }
0x10f4   :  { %5888 = vmatmul.msk.bf16.gmra.mxu2 %vm130_vm2, %v10013_v46 }
0x10f7   :  { %v10090_v22 = vpop.f32.mrf.mxu2  ;;  %v10094_v0 = vpop.f32.mrf.mxu3 }
0x10f8   :  { %v5180_v48 = vmax.f32 %v5178_v59, %v10090_v22 }
0x10fc   :  { %5904 = vmatmul.msk.bf16.gmra.mxu3 %vm130_vm2, %v10013_v46 }
0x10ff   :  { %v10092_v44 = vpop.f32.mrf.mxu2  ;;  %v10101_v60 = vpop.f32.mrf.mxu3 }
0x1104   :  { %5889 = vmatmul.msk.bf16.gmra.mxu2 %vm130_vm2, %v4935_v8 }
0x1107   :  { %v10099_v20 = vpop.f32.mrf.mxu2  ;;  %v10106_v2 = vpop.f32.mrf.mxu3 }
0x1108   :  { %v5182_v42 = vmax.f32 %v5180_v48, %v10099_v20 }
0x110c   :  { %5905 = vmatmul.msk.bf16.gmra.mxu3 %vm130_vm2, %v4935_v8  ;;  %v5177_v8 = vmax.f32 %v5175_v33, %v10070_v52 }
0x110e   :  { %v5179_v28 = vmax.f32 %v5177_v8, %v10082_v18 }
0x110f   :  { %v10103_v30 = vpop.f32.mrf.mxu2  ;;  %v10110_v43 = vpop.f32.mrf.mxu3 }
0x1110   :  { %v5181_v55 = vmax.f32 %v5179_v28, %v10092_v44 }
0x1112   :  { %v5183_v6 = vmax.f32 %v5181_v55, %v10103_v30 }
0x1117   :  { %v10108_v34 = vpop.f32.mrf.mxu2  ;;  %v10116_v11 = vpop.f32.mrf.mxu3 }
0x1118   :  { %10833 = vst [vmem:[#allocation25_spill] sm:$0xff] %v10108_v34  ;;  %v5184_v58 = vmax.f32 %v5182_v42, %v10108_v34 }
0x111f   :  { %v10112_v37 = vpop.f32.mrf.mxu2  ;;  %v10120_v47 = vpop.f32.mrf.mxu3 }
0x1120   :  { %10834 = vst [vmem:[#allocation10_spill] sm:$0xff] %v10112_v37  ;;  %v5185_v32 = vmax.f32 %v5183_v6, %v10112_v37 }
0x1121   :  { %10837 = vst [vmem:[#allocation38_spill] sm:$0xff] %v10120_v47 }
0x1127   :  { %v10114_v1 = vpop.f32.mrf.mxu2  ;;  %v10124_v23 = vpop.f32.mrf.mxu3 }
0x1128   :  { %10835 = vst [vmem:[#allocation37_spill] sm:$0xff] %v10114_v1  ;;  %v5186_v33 = vmax.f32 %v5184_v58, %v10114_v1 }
0x1129   :  { %10839 = vst [vmem:[#allocation39_spill] sm:$0xff] %v10124_v23 }
0x112f   :  { %v10118_v24 = vpop.f32.mrf.mxu2  ;;  %v10128_v54 = vpop.f32.mrf.mxu3 }
0x1130   :  { %10836 = vst [vmem:[#allocation36_spill] sm:$0xff] %v10118_v24  ;;  %v5187_v26 = vmax.f32 %v5185_v32, %v10118_v24 }
0x1137   :  { %v10122_v51 = vpop.f32.mrf.mxu2  ;;  %v10134_v15 = vpop.f32.mrf.mxu3 }
0x1138   :  { %10838 = vst [vmem:[#allocation40_spill] sm:$0xff] %v10122_v51  ;;  %v5188_v59 = vmax.f32 %v5186_v33, %v10122_v51 }
0x113f   :  { %v10126_v27 = vpop.f32.mrf.mxu2  ;;  %v10138_v40 = vpop.f32.mrf.mxu3 }
0x1140   :  { %10840 = vst [vmem:[#allocation14_spill] sm:$0xff] %v10126_v27  ;;  %v5189_v28 = vmax.f32 %v5187_v26, %v10126_v27 }
0x1147   :  { %v10130_v46 = vpop.f32.mrf.mxu2  ;;  %v10142_v17 = vpop.f32.mrf.mxu3 }
0x1148   :  { %10841 = vst [vmem:[#allocation34_spill] sm:$0xff] %v10130_v46  ;;  %v5190_v48 = vmax.f32 %v5188_v59, %v10130_v46 }
0x114f   :  { %v10132_v7 = vpop.f32.mrf.mxu2  ;;  %v10146_v14 = vpop.f32.mrf.mxu3 }
0x1150   :  { %10842 = vst [vmem:[#allocation35_spill] sm:$0xff] %v10132_v7  ;;  %v5191_v55 = vmax.f32 %v5189_v28, %v10132_v7 }
0x1157   :  { %v10136_v41 = vpop.f32.mrf.mxu2  ;;  %v10160_v13 = vpop.f32.mrf.mxu3 }
0x1158   :  { %v5192_v42 = vmax.f32 %v5190_v48, %v10136_v41 }
0x115f   :  { %v10140_v35 = vpop.f32.mrf.mxu2  ;;  %v10174_v62 = vpop.f32.mrf.mxu3 }
0x1160   :  { %v5193_v6 = vmax.f32 %v5191_v55, %v10140_v35 }
0x1167   :  { %v10144_v38 = vpop.f32.mrf.mxu2  ;;  %v10186_v34 = vpop.f32.mrf.mxu3 }
0x1168   :  { %v5194_v58 = vmax.f32 %v5192_v42, %v10144_v38 }
0x116f   :  { %v10148_v31 = vpop.f32.mrf.mxu2  ;;  %v10193_v51 = vpop.f32.mrf.mxu3 }
0x1170   :  { %v5195_v32 = vmax.f32 %v5193_v6, %v10148_v31 }
0x1177   :  { %v10156_v4 = vpop.f32.mrf.mxu2  ;;  %v10197_v42 = vpop.f32.mrf.mxu3 }
0x1178   :  { %v5196_v33 = vmax.f32 %v5194_v58, %v10156_v4 }
0x117f   :  { %v10168_v36 = vpop.f32.mrf.mxu2 }
0x1180   :  { %v5197_v26 = vmax.f32 %v5195_v32, %v10168_v36 }
0x1187   :  { %v10180_v8 = vpop.f32.mrf.mxu2 }
0x1188   :  { %v5198_v1 = vmax.f32 %v5196_v33, %v10180_v8 }
0x118f   :  { %v5078_v37 = vpop.f32.mrf.mxu2 }
0x1190   :  { %v5199_v59 = vmax.f32 %v5197_v26, %v5078_v37  ;;  %v10210_v26 = vpop.f32.mrf.mxu3 }
0x1192   :  { %v5200_v24 = vmax.f32 %v5198_v1, %v5199_v59  ;;  %v5207_v59 = vmax.f32 %v10029_v53, %v10042_v61 }
0x1194   :  { %v5201_v28 = vrot.slane %v5200_v24, 4 }
0x1196   :  { %v5202_v48 = vmax.f32 %v5200_v24, %v5201_v28 }
0x1198   :  { %v5203_v55 = vrot.slane %v5202_v48, 2 }
0x119a   :  { %v5204_v27 = vmax.f32 %v5202_v48, %v5203_v55  ;;  %v5209_v48 = vmax.f32 %v5207_v59, %v10052_v29 }
0x119c   :  { %v5205_v46 = vrot.slane %v5204_v27, 1 }
0x119e   :  { %v10195_v7 = vmax.f32 %v5204_v27, %v5205_v46 }
0x11a0   :  { %v5306_v6 = vsub.f32 %v5078_v37, %v10195_v7  ;;  %v5208_v37 = vmax.f32 %v10037_v21, %v10047_v12 }
0x11a2   :  { %v5432_v58 = vmul.f32 1.442695, %v5306_v6  ;;  %v5210_v28 = vmax.f32 %v5208_v37, %v10057_v25  ;;  %v10219_v6 = vpop.f32.mrf.mxu3 }
0x11a4   :  { %6844 = vpow2.f32 %v5432_v58  ;;  %v5212_v55 = vmax.f32 %v5210_v28, %v10068_v5  ;;  %v5211_v58 = vmax.f32 %v5209_v48, %v10062_v39 }
0x11a6   :  { %v5214_v32 = vmax.f32 %v5212_v55, %v10080_v49 }
0x11a8   :  { %v5216_v1 = vmax.f32 %v5214_v32, %v10094_v0 }
0x11aa   :  { %v6845_v46 = vpop.eup %6844  ;;  %v5218_v33 = vmax.f32 %v5216_v1, %v10106_v2  ;;  %v10231_v53 = vpop.f32.mrf.mxu3 }
0x11ab   :  { %5505 = vmatpush.msrb.mxu1 %v6845_v46  ;;  %v5213_v46 = vmax.f32 %v5211_v58, %v10074_v56 }
0x11ac   :  { %v5220_v59 = vmax.f32 %v5218_v33, %v10116_v11 }
0x11ad   :  { %v5215_v24 = vmax.f32 %v5213_v46, %v10088_v16 }
0x11ae   :  { %v5222_v27 = vmax.f32 %v5220_v59, %v10124_v23 }
0x11af   :  { %v5217_v37 = vmax.f32 %v5215_v24, %v10101_v60 }
0x11b0   :  { %v5224_v55 = vmax.f32 %v5222_v27, %v10134_v15 }
0x11b1   :  { %v5219_v28 = vmax.f32 %v5217_v37, %v10110_v43 }
0x11b2   :  { %v5226_v58 = vmax.f32 %v5224_v55, %v10142_v17  ;;  %v10243_v23 = vpop.f32.mrf.mxu3 }
0x11b3   :  { %v5221_v48 = vmax.f32 %v5219_v28, %v10120_v47 }
0x11b4   :  { %v5228_v24 = vmax.f32 %v5226_v58, %v10160_v13 }
0x11b5   :  { %v5223_v32 = vmax.f32 %v5221_v48, %v10128_v54 }
0x11b6   :  { %v5230_v46 = vmax.f32 %v5228_v24, %v10186_v34 }
0x11b7   :  { %v5225_v1 = vmax.f32 %v5223_v32, %v10138_v40  ;;  %v5274_v32 = vsub.f32 %v10103_v30, %v10195_v7  ;;  %v5264_v30 = vsub.f32 %v10078_v63, %v10195_v7  ;;  %v5258_v63 = vsub.f32 %v10059_v3, %v10195_v7 }
0x11b8   :  { %v5232_v59 = vmax.f32 %v5230_v46, %v10197_v42  ;;  %v5252_v3 = vsub.f32 %v10045_v50, %v10195_v7 }
0x11b9   :  { %v5227_v33 = vmax.f32 %v5225_v1, %v10146_v14  ;;  %v5272_v1 = vsub.f32 %v10099_v20, %v10195_v7  ;;  %v5368_v46 = vmul.f32 1.442695, %v5274_v32 }
0x11ba   :  { %v5234_v28 = vmax.f32 %v5232_v59, %v10219_v6 }
0x11bb   :  { %v5229_v37 = vmax.f32 %v5227_v33, %v10174_v62  ;;  %v5270_v33 = vsub.f32 %v10092_v44, %v10195_v7  ;;  %v5364_v59 = vmul.f32 1.442695, %v5272_v1  ;;  %6846 = vpow2.f32 %v5368_v46 }
0x11bc   :  { %v5236_v55 = vmax.f32 %v5234_v28, %v10243_v23  ;;  %v5266_v28 = vsub.f32 %v10082_v18, %v10195_v7  ;;  %v5262_v44 = vsub.f32 %v10070_v52, %v10195_v7  ;;  %v5256_v52 = vsub.f32 %v10055_v57, %v10195_v7 }
0x11bd   :  { %v5231_v27 = vmax.f32 %v5229_v37, %v10193_v51  ;;  %v5268_v37 = vsub.f32 %v10090_v22, %v10195_v7  ;;  %v5360_v47 = vmul.f32 1.442695, %v5270_v33  ;;  %6848 = vpow2.f32 %v5364_v59 }
0x11be   :  { %v5260_v22 = vsub.f32 %v10066_v10, %v10195_v7  ;;  %v5344_v33 = vmul.f32 1.442695, %v5262_v44  ;;  %v5336_v59 = vmul.f32 1.442695, %v5258_v63 }
0x11bf   :  { %v5233_v48 = vmax.f32 %v5231_v27, %v10210_v26  ;;  %6850 = vpow2.f32 %v5360_v47 }
0x11c0   :  { %v5340_v47 = vmul.f32 1.442695, %v5260_v22  ;;  %v10843_v22 = vld [vmem:[#allocation13_spill] sm:$0xff] }
0x11c1   :  { %v5235_v58 = vmax.f32 %v5233_v48, %v10231_v53  ;;  %v5356_v48 = vmul.f32 1.442695, %v5268_v37  ;;  %v6847_v32 = vpop.eup %6846  ;;  %v5254_v37 = vsub.f32 %v10049_v45, %v10195_v7  ;;  %v5248_v45 = vsub.f32 %v10032_v19, %v10195_v7 }
0x11c2   :  { %5482 = vmatpush.msrb.mxu0 %v6847_v32 }
0x11c3   :  { %v5237_v24 = vmax.f32 %v5235_v58, %v5236_v55  ;;  %v5352_v55 = vmul.f32 1.442695, %v5266_v28  ;;  %v5348_v58 = vmul.f32 1.442695, %v5264_v30  ;;  %6852 = vpow2.f32 %v5356_v48  ;;  %v6849_v1 = vpop.eup %6848 }
0x11c4   :  { %5483 = vmatpush.msrb.mxu0 %v6849_v1  ;;  %v5332_v28 = vmul.f32 1.442695, %v5256_v52  ;;  %v5250_v48 = vsub.f32 %v10039_v9, %v10195_v7  ;;  %v10844_v9 = vld [vmem:[#allocation42_spill] sm:$0xff] }
0x11c5   :  { %v5238_v27 = vrot.slane %v5237_v24, 4  ;;  %6854 = vpow2.f32 %v5352_v55  ;;  %v5324_v55 = vmul.f32 1.442695, %v5252_v3  ;;  %v5244_v1 = vsub.f32 %v10844_v9, %v10195_v7 }
0x11c6   :  { %6856 = vpow2.f32 %v5348_v58  ;;  %v5246_v58 = vsub.f32 %v10843_v22, %v10195_v7 }
0x11c7   :  { %v5239_v20 = vmax.f32 %v5237_v24, %v5238_v27  ;;  %v6851_v24 = vpop.eup %6850  ;;  %6858 = vpow2.f32 %v5344_v33  ;;  %v5316_v33 = vmul.f32 1.442695, %v5248_v45  ;;  %v5294_v45 = vsub.f32 %v10140_v35, %v10195_v7 }
0x11c8   :  { %5484 = vmatpush.msrb.mxu0 %v6851_v24  ;;  %6860 = vpow2.f32 %v5340_v47  ;;  %v5312_v52 = vmul.f32 1.442695, %v5246_v58  ;;  %v10849_v58 = vsub.f32 %v10144_v38, %v10195_v7 }
0x11c9   :  { %v5240_v18 = vrot.slane %v5239_v20, 2  ;;  %v6853_v10 = vpop.eup %6852  ;;  %6862 = vpow2.f32 %v5336_v59 }
0x11ca   :  { %5485 = vmatpush.msrb.mxu0 %v6853_v10  ;;  %6864 = vpow2.f32 %v5332_v28  ;;  %v10846_v28 = vsub.f32 %v10168_v36, %v10195_v7 }
0x11cb   :  { %v5241_v46 = vmax.f32 %v5239_v20, %v5240_v18  ;;  %v6855_v27 = vpop.eup %6854  ;;  %v5328_v20 = vmul.f32 1.442695, %v5254_v37  ;;  %v5320_v18 = vmul.f32 1.442695, %v5250_v48  ;;  %v10845_v37 = vsub.f32 %v10180_v8, %v10195_v7 }
0x11cc   :  { %5486 = vmatpush.msrb.mxu0 %v6855_v27  ;;  %v6857_v57 = vpop.eup %6856  ;;  %v10847_v48 = vsub.f32 %v10156_v4, %v10195_v7 }
0x11cd   :  { %v5242_v30 = vrot.slane %v5241_v46, 1  ;;  %v6859_v44 = vpop.eup %6858  ;;  %6866 = vpow2.f32 %v5328_v20  ;;  %v5428_v59 = vmul.f32 1.442695, %v10845_v37 }
0x11ce   :  { %5487 = vmatpush.msrb.mxu0 %v6857_v57  ;;  %v6861_v50 = vpop.eup %6860  ;;  %6868 = vpow2.f32 %v5324_v55  ;;  %v5420_v20 = vmul.f32 1.442695, %v10847_v48 }
0x11cf   :  { %v10278_v32 = vmax.f32 %v5241_v46, %v5242_v30  ;;  %v6863_v63 = vpop.eup %6862  ;;  %6870 = vpow2.f32 %v5320_v18  ;;  %v5308_v46 = vmul.f32 1.442695, %v5244_v1  ;;  %v5424_v30 = vmul.f32 1.442695, %v10846_v28  ;;  %v10850_v1 = vld [vmem:[#allocation35_spill] sm:$0xff] }
0x11d0   :  { %5488 = vmatpush.msrb.mxu0 %v6859_v44  ;;  %v6865_v24 = vpop.eup %6864  ;;  %6872 = vpow2.f32 %v5316_v33  ;;  %v5412_v18 = vmul.f32 1.442695, %v10849_v58  ;;  %v5408_v33 = vmul.f32 1.442695, %v5294_v45 }
0x11d1   :  { %v5275_v19 = vsub.f32 %v10116_v11, %v10278_v32  ;;  %v5273_v47 = vsub.f32 %v10110_v43, %v10278_v32  ;;  %v5271_v27 = vsub.f32 %v10106_v2, %v10278_v32  ;;  %6874 = vpow2.f32 %v5312_v52  ;;  %v10851_v52 = vld [vmem:[#allocation34_spill] sm:$0xff] }
0x11d2   :  { %5489 = vmatpush.msrb.mxu0 %v6861_v50  ;;  %v5269_v43 = vsub.f32 %v10101_v60, %v10278_v32  ;;  %6876 = vpow2.f32 %v5308_v46  ;;  %v5267_v2 = vsub.f32 %v10094_v0, %v10278_v32  ;;  %v10848_v60 = vsub.f32 %v10148_v31, %v10195_v7 }
0x11d3   :  { %v6867_v10 = vpop.eup %6866  ;;  %v5370_v3 = vmul.f32 1.442695, %v5275_v19  ;;  %v5366_v57 = vmul.f32 1.442695, %v5273_v47  ;;  %6878 = vpow2.f32 %v5428_v59  ;;  %v5362_v44 = vmul.f32 1.442695, %v5271_v27 }
0x11d4   :  { %5490 = vmatpush.msrb.mxu0 %v6863_v63  ;;  %v6869_v11 = vpop.eup %6868  ;;  %v5416_v55 = vmul.f32 1.442695, %v10848_v60  ;;  %v5265_v4 = vsub.f32 %v10088_v16, %v10278_v32  ;;  %v5358_v50 = vmul.f32 1.442695, %v5269_v43  ;;  %v5292_v0 = vsub.f32 %v10136_v41, %v10195_v7  ;;  %v10319_v41 = vpop.f32.mrf.mxu0  ;;  %v10852_v27 = vld [vmem:[#allocation14_spill] sm:$0xff] }
0x11d5   :  { %v6871_v8 = vpop.eup %6870  ;;  %6880 = vpow2.f32 %v5370_v3  ;;  %v5263_v31 = vsub.f32 %v10080_v49, %v10278_v32  ;;  %v5354_v9 = vmul.f32 1.442695, %v5267_v2  ;;  %v5290_v63 = vsub.f32 %v10850_v1, %v10195_v7 }
0x11d6   :  { %5491 = vmatpush.msrb.mxu0 %v6865_v24  ;;  %v6873_v36 = vpop.eup %6872  ;;  %6882 = vpow2.f32 %v5424_v30  ;;  %v5261_v38 = vsub.f32 %v10074_v56, %v10278_v32  ;;  %v5350_v24 = vmul.f32 1.442695, %v5265_v4  ;;  %v5288_v47 = vsub.f32 %v10851_v52, %v10195_v7 }
0x11d7   :  { %6884 = vpow2.f32 %v5366_v57  ;;  %v6875_v22 = vpop.eup %6874  ;;  %v5404_v46 = vmul.f32 1.442695, %v5292_v0  ;;  %v5259_v37 = vsub.f32 %v10068_v5, %v10278_v32  ;;  %v5346_v59 = vmul.f32 1.442695, %v5263_v31  ;;  %v10853_v5 = vld [vmem:[#allocation40_spill] sm:$0xff] }
0x11d8   :  { %5492 = vmatpush.msrb.mxu0 %v6867_v10  ;;  %6886 = vpow2.f32 %v5420_v20  ;;  %v6877_v35 = vpop.eup %6876  ;;  %v5286_v3 = vsub.f32 %v10852_v27, %v10195_v7  ;;  %v5257_v30 = vsub.f32 %v10062_v39, %v10278_v32  ;;  %v5342_v43 = vmul.f32 1.442695, %v5261_v38  ;;  %v10854_v39 = vld [vmem:[#allocation36_spill] sm:$0xff] }
0x11d9   :  { %6888 = vpow2.f32 %v5362_v44  ;;  %v6879_v16 = vpop.eup %6878  ;;  %v5396_v48 = vmul.f32 1.442695, %v5288_v47  ;;  %v5255_v2 = vsub.f32 %v10057_v25, %v10278_v32  ;;  %v5338_v44 = vmul.f32 1.442695, %v5259_v37  ;;  %v10855_v25 = vld [vmem:[#allocation37_spill] sm:$0xff]  ;;  %v10859_v27 = vld [vmem:[#allocation28_spill] sm:$0xff] }
0x11da   :  { %5493 = vmatpush.msrb.mxu0 %v6869_v11  ;;  %6890 = vpow2.f32 %v5416_v55  ;;  %5506 = vmatpush.msrb.mxu1 %v6879_v16  ;;  %v5400_v11 = vmul.f32 1.442695, %v5290_v63  ;;  %v5282_v45 = vsub.f32 %v10854_v39, %v10195_v7  ;;  %v5392_v60 = vmul.f32 1.442695, %v5286_v3  ;;  %v10857_v16 = vld [vmem:[#allocation10_spill] sm:$0xff] }
0x11db   :  { %v6881_v19 = vpop.eup %6880  ;;  %6892 = vpow2.f32 %v5358_v50  ;;  %v5253_v4 = vsub.f32 %v10052_v29, %v10278_v32  ;;  %v5334_v50 = vmul.f32 1.442695, %v5257_v30  ;;  %v5280_v0 = vsub.f32 %v10855_v25, %v10195_v7 }
0x11dc   :  { %5494 = vmatpush.msrb.mxu0 %v6871_v8  ;;  %v6883_v49 = vpop.eup %6882  ;;  %6894 = vpow2.f32 %v5412_v18  ;;  %v5284_v8 = vsub.f32 %v10853_v5, %v10195_v7  ;;  %v10856_v18 = vmov 1.0   ;;  %v5251_v31 = vsub.f32 %v10047_v12, %v10278_v32  ;;  %v10858_v12 = vld [vmem:[#allocation25_spill] sm:$0xff] }
0x11dd   :  { %v6885_v10 = vpop.eup %6884  ;;  %6896 = vpow2.f32 %v5354_v9  ;;  %5507 = vmatpush.msrb.mxu1 %v6883_v49  ;;  %v5330_v9 = vmul.f32 1.442695, %v5255_v2  ;;  %v5278_v1 = vsub.f32 %v10857_v16, %v10195_v7  ;;  %v5384_v63 = vmul.f32 1.442695, %v5282_v45 }
0x11de   :  { %5495 = vmatpush.msrb.mxu0 %v6873_v36  ;;  %v6887_v56 = vpop.eup %6886  ;;  %6898 = vpow2.f32 %v5408_v33  ;;  %v5388_v58 = vmul.f32 1.442695, %v5284_v8  ;;  %v5326_v38 = vmul.f32 1.442695, %v5253_v4  ;;  %v5276_v49 = vsub.f32 %v10858_v12, %v10195_v7 }
0x11df   :  { %v6889_v28 = vpop.eup %6888  ;;  %6900 = vpow2.f32 %v5350_v24  ;;  %5508 = vmatpush.msrb.mxu1 %v6887_v56  ;;  %v5380_v52 = vmul.f32 1.442695, %v5280_v0  ;;  %v5245_v7 = vsub.f32 %v10859_v27, %v10278_v32  ;;  %v10369_v0 = vpop.f32.mrf.mxu1 }
0x11e0   :  { %5496 = vmatpush.msrb.mxu0 %v6875_v22  ;;  %v6891_v57 = vpop.eup %6890  ;;  %6902 = vpow2.f32 %v5404_v46  ;;  %v5307_v46 = vsub.f32 %v10243_v23, %v10278_v32  ;;  %v5305_v23 = vsub.f32 %v10231_v53, %v10278_v32  ;;  %v5301_v53 = vsub.f32 %v10210_v26, %v10278_v32 }
0x11e1   :  { %v6893_v20 = vpop.eup %6892  ;;  %6904 = vpow2.f32 %v5346_v59  ;;  %5509 = vmatpush.msrb.mxu1 %v6891_v57  ;;  %v5376_v59 = vmul.f32 1.442695, %v5278_v1  ;;  %v5303_v57 = vsub.f32 %v10219_v6, %v10278_v32  ;;  %v5299_v6 = vsub.f32 %v10197_v42, %v10278_v32 }
0x11e2   :  { %5497 = vmatpush.msrb.mxu0 %v6877_v35  ;;  %v6895_v36 = vpop.eup %6894  ;;  %6906 = vpow2.f32 %v5400_v11  ;;  %v5430_v2 = vmul.f32 1.442695, %v5305_v23  ;;  %v5297_v26 = vsub.f32 %v10193_v51, %v10278_v32  ;;  %v5293_v51 = vsub.f32 %v10174_v62, %v10278_v32 }
0x11e3   :  { %5498 = vmatmul.f32.vlgmr.msrb.gmra.mxu0 %v10319_v41  ;;  %v6897_v55 = vpop.eup %6896  ;;  %6908 = vpow2.f32 %v5342_v43  ;;  %5510 = vmatpush.msrb.mxu1 %v6895_v36  ;;  %v5434_v43 = vmul.f32 1.442695, %v5307_v46  ;;  %v5426_v39 = vmul.f32 1.442695, %v5303_v57  ;;  %v5418_v42 = vmul.f32 1.442695, %v5299_v6 }
0x11e4   :  { %5528 = vmatpush.msra.mxu0 %v6881_v19  ;;  %v6899_v22 = vpop.eup %6898  ;;  %6910 = vpow2.f32 %v5396_v48  ;;  %v5249_v19 = vsub.f32 %v10042_v61, %v10278_v32  ;;  %v5247_v61 = vsub.f32 %v10037_v21, %v10278_v32  ;;  %v5310_v48 = vmul.f32 1.442695, %v5245_v7 }
0x11e5   :  { %v6901_v35 = vpop.eup %6900  ;;  %6912 = vpow2.f32 %v5338_v44  ;;  %5511 = vmatpush.msrb.mxu1 %v6899_v22  ;;  %v5295_v22 = vsub.f32 %v10186_v34, %v10278_v32  ;;  %v5291_v34 = vsub.f32 %v10160_v13, %v10278_v32  ;;  %v5289_v1 = vsub.f32 %v10146_v14, %v10278_v32 }
0x11e6   :  { %5529 = vmatpush.msra.mxu0 %v6885_v10  ;;  %v6903_v29 = vpop.eup %6902  ;;  %6914 = vpow2.f32 %v5392_v60  ;;  %v5322_v10 = vmul.f32 1.442695, %v5251_v31  ;;  %v5318_v3 = vmul.f32 1.442695, %v5249_v19  ;;  %v5314_v5 = vmul.f32 1.442695, %v5247_v61 }
0x11e7   :  { %v6905_v33 = vpop.eup %6904  ;;  %6916 = vpow2.f32 %v5334_v50  ;;  %5512 = vmatpush.msrb.mxu1 %v6903_v29  ;;  %v5410_v29 = vmul.f32 1.442695, %v5295_v22  ;;  %v5406_v62 = vmul.f32 1.442695, %v5293_v51  ;;  %v5402_v19 = vmul.f32 1.442695, %v5291_v34 }
0x11e8   :  { %5530 = vmatpush.msra.mxu0 %v6889_v28  ;;  %v6907_v24 = vpop.eup %6906  ;;  %6918 = vpow2.f32 %v5388_v58  ;;  %v5372_v28 = vmul.f32 1.442695, %v5276_v49  ;;  %v5281_v49 = vsub.f32 %v10128_v54, %v10278_v32 }
0x11e9   :  { %v6909_v47 = vpop.eup %6908  ;;  %6920 = vpow2.f32 %v5330_v9  ;;  %5513 = vmatpush.msrb.mxu1 %v6907_v24  ;;  %v5398_v24 = vmul.f32 1.442695, %v5289_v1 }
0x11ea   :  { %5531 = vmatpush.msra.mxu0 %v6893_v20  ;;  %v6911_v37 = vpop.eup %6910  ;;  %6922 = vpow2.f32 %v5384_v63 }
0x11eb   :  { %5501 = vmatmul.f32.gmra.mxu0 %v10856_v18  ;;  %v6913_v56 = vpop.eup %6912  ;;  %6924 = vpow2.f32 %v5326_v38  ;;  %5514 = vmatpush.msrb.mxu1 %v6911_v37  ;;  %v5285_v38 = vsub.f32 %v10138_v40, %v10278_v32  ;;  %v10861_v37 = vld [vmem:[#allocation38_spill] sm:$0xff] }
0x11ec   :  { %5532 = vmatpush.msra.mxu0 %v6897_v55  ;;  %v6915_v11 = vpop.eup %6914  ;;  %6926 = vpow2.f32 %v5380_v52  ;;  %v5422_v55 = vmul.f32 1.442695, %v5301_v53  ;;  %v5277_v61 = vsub.f32 %v10861_v37, %v10278_v32 }
0x11ed   :  { %v6917_v30 = vpop.eup %6916  ;;  %6928 = vpow2.f32 %v5322_v10  ;;  %5515 = vmatpush.msrb.mxu1 %v6915_v11  ;;  %v5390_v52 = vmul.f32 1.442695, %v5285_v38 }
0x11ee   :  { %5533 = vmatpush.msra.mxu0 %v6901_v35  ;;  %v6919_v21 = vpop.eup %6918  ;;  %6930 = vpow2.f32 %v5376_v59  ;;  %v5414_v35 = vmul.f32 1.442695, %v5297_v26  ;;  %v5382_v59 = vmul.f32 1.442695, %v5281_v49  ;;  %v5374_v7 = vmul.f32 1.442695, %v5277_v61 }
0x11ef   :  { %v6921_v8 = vpop.eup %6920  ;;  %6932 = vpow2.f32 %v5318_v3  ;;  %5516 = vmatpush.msrb.mxu1 %v6919_v21 }
0x11f0   :  { %5534 = vmatpush.msra.mxu0 %v6905_v33  ;;  %v6923_v20 = vpop.eup %6922  ;;  %6934 = vpow2.f32 %v5372_v28  ;;  %v5287_v33 = vsub.f32 %v10142_v17, %v10278_v32 }
0x11f1   :  { %v6925_v44 = vpop.eup %6924  ;;  %6936 = vpow2.f32 %v5434_v43  ;;  %5517 = vmatpush.msrb.mxu1 %v6923_v20 }
0x11f2   :  { %5535 = vmatpush.msra.mxu0 %v6909_v47  ;;  %v6927_v36 = vpop.eup %6926  ;;  %6938 = vpow2.f32 %v5314_v5  ;;  %v5394_v12 = vmul.f32 1.442695, %v5287_v33  ;;  %v10860_v47 = vld [vmem:[#allocation39_spill] sm:$0xff] }
0x11f3   :  { %v6929_v45 = vpop.eup %6928  ;;  %6940 = vpow2.f32 %v5310_v48  ;;  %5518 = vmatpush.msrb.mxu1 %v6927_v36  ;;  %v5279_v46 = vsub.f32 %v10860_v47, %v10278_v32  ;;  %v10863_v36 = vld [vmem:[#allocation33_spill] sm:$0xff] }
0x11f4   :  { %5536 = vmatpush.msra.mxu0 %v6913_v56  ;;  %v6931_v60 = vpop.eup %6930  ;;  %6942 = vpow2.f32 %v5430_v2  ;;  %v10862_v2 = vld [vmem:[#allocation41_spill] sm:$0xff] }
0x11f5   :  { %v6933_v4 = vpop.eup %6932  ;;  %5519 = vmatpush.msrb.mxu1 %v6931_v60  ;;  %6944 = vpow2.f32 %v5426_v39  ;;  %v5378_v56 = vmul.f32 1.442695, %v5279_v46  ;;  %v6983_v39 = vld [vmem:[%s10408_s0 + $0x10] sm:$0xff] }
0x11f6   :  { %5537 = vmatpush.msra.mxu0 %v6917_v30  ;;  %v6935_v50 = vpop.eup %6934  ;;  %6946 = vpow2.f32 %v5422_v55 }
0x11f7   :  { %v6937_v25 = vpop.eup %6936  ;;  %5520 = vmatpush.msrb.mxu1 %v6935_v50  ;;  %6948 = vpow2.f32 %v5418_v42 }
0x11f8   :  { %5538 = vmatpush.msra.mxu0 %v6921_v8  ;;  %v6939_v58 = vpop.eup %6938  ;;  %5521 = vmatmul.f32.vlgmr.msrb.gmra.mxu1 %v10369_v0  ;;  %6950 = vpow2.f32 %v5414_v35  ;;  %v6984_v35 = vld [vmem:[%s10408_s0 + $0x18] sm:$0xff] }
0x11f9   :  { %v6941_v31 = vpop.eup %6940  ;;  %5551 = vmatpush.msra.mxu1 %v6937_v25  ;;  %6952 = vpow2.f32 %v5410_v29 }
0x11fa   :  { %5539 = vmatpush.msra.mxu0 %v6925_v44  ;;  %v6943_v9 = vpop.eup %6942  ;;  %6954 = vpow2.f32 %v5406_v62 }
0x11fb   :  { %5552 = vmatpush.msra.mxu1 %v6943_v9  ;;  %v6945_v16 = vpop.eup %6944  ;;  %6956 = vpow2.f32 %v5402_v19 }
0x11fc   :  { %5540 = vmatpush.msra.mxu0 %v6929_v45  ;;  %v6947_v63 = vpop.eup %6946  ;;  %6958 = vpow2.f32 %v5398_v24 }
0x11fd   :  { %5553 = vmatpush.msra.mxu1 %v6945_v16  ;;  %v6949_v13 = vpop.eup %6948  ;;  %6960 = vpow2.f32 %v5394_v12 }
0x11fe   :  { %5541 = vmatpush.msra.mxu0 %v6933_v4  ;;  %v6951_v14 = vpop.eup %6950  ;;  %6962 = vpow2.f32 %v5390_v52 }
0x11ff   :  { %5554 = vmatpush.msra.mxu1 %v6947_v63  ;;  %v6953_v17 = vpop.eup %6952 }
0x1200   :  { %5542 = vmatpush.msra.mxu0 %v6939_v58  ;;  %5524 = vmatmul.f32.gmra.mxu1 %v10856_v18  ;;  %v6955_v40 = vpop.eup %6954 }
0x1201   :  { %5555 = vmatpush.msra.mxu1 %v6949_v13 }
0x1202   :  { %5543 = vmatpush.msra.mxu0 %v6941_v31 }
0x1203   :  { %5544 = vmatmul.f32.vlgmr.msra.gmra.mxu0 %v10319_v41  ;;  %v5283_v41 = vsub.f32 %v10134_v15, %v10278_v32  ;;  %5556 = vmatpush.msra.mxu1 %v6951_v14  ;;  %v6957_v15 = vpop.eup %6956 }
0x1204   :  { %v6959_v54 = vpop.eup %6958 }
0x1205   :  { %5557 = vmatpush.msra.mxu1 %v6953_v17  ;;  %v5386_v10 = vmul.f32 1.442695, %v5283_v41  ;;  %v6961_v27 = vpop.eup %6960 }
0x1206   :  { %v6963_v3 = vpop.eup %6962 }
0x1207   :  { %5558 = vmatpush.msra.mxu1 %v6955_v40  ;;  %6964 = vpow2.f32 %v5386_v10 }
0x1208   :  { %6966 = vpow2.f32 %v5382_v59 }
0x1209   :  { %5559 = vmatpush.msra.mxu1 %v6957_v15  ;;  %6968 = vpow2.f32 %v5378_v56 }
0x120a   :  { %6970 = vpow2.f32 %v5374_v7 }
0x120b   :  { %5547 = vmatmul.f32.gmra.mxu0 %v10856_v18  ;;  %5560 = vmatpush.msra.mxu1 %v6959_v54 }
0x120d   :  { %5561 = vmatpush.msra.mxu1 %v6961_v27  ;;  %v6965_v11 = vpop.eup %6964 }
0x120e   :  { %v6967_v23 = vpop.eup %6966 }
0x120f   :  { %5562 = vmatpush.msra.mxu1 %v6963_v3  ;;  %v6969_v32 = vpop.eup %6968 }
0x1210   :  { %v6971_v28 = vpop.eup %6970 }
0x1211   :  { %5563 = vmatpush.msra.mxu1 %v6965_v11 }
0x1213   :  { %5564 = vmatpush.msra.mxu1 %v6967_v23 }
0x1215   :  { %5565 = vmatpush.msra.mxu1 %v6969_v32 }
0x1217   :  { %5566 = vmatpush.msra.mxu1 %v6971_v28 }
0x1218   :  { %5567 = vmatmul.f32.vlgmr.msra.gmra.mxu1 %v10369_v0  ;;  %v10864_v0 = vld [vmem:[#allocation30_spill] sm:$0xff] }
0x1220   :  { %5570 = vmatmul.f32.gmra.mxu1 %v10856_v18 }
0x1260   :  { %v5499_v30 = vpop.f32.mrf.mxu0 }
0x1268   :  { %v5502_v21 = vpop.f32.mrf.mxu0 }
0x1275   :  { %v5522_v43 = vpop.f32.mrf.mxu1 }
0x1276   :  { %v5523_v48 = vadd.f32 %v5522_v43, %v5499_v30 }
0x127d   :  { %v5525_v57 = vpop.f32.mrf.mxu1 }
0x127e   :  { %v5526_v5 = vadd.f32 %v5525_v57, %v5502_v21 }
0x1280   :  { %6972 = vrcp.f32 %v5526_v5  ;;  %v5545_v18 = vpop.f32.mrf.mxu0 }
0x1286   :  { %v6973_v8 = vpop.eup %6972 }
0x1287   :  { %v5576_v20 = vperm.slane %v6973_v8, 0 }
0x1288   :  { %v5548_v26 = vpop.f32.mrf.mxu0 }
0x1289   :  { %v5578_v53 = vmul.f32 %v5576_v20, %v5523_v48 }
0x128b   :  { %v5580_v44 = vadd.f32 %v5578_v53, %v10862_v2 }
0x128d   :  { %v5582_v6 = vadd.f32 %v5580_v44, %v10863_v36 }
0x128f   :  { %v5584_v45 = vadd.f32 %v6983_v39, %v5582_v6 }
0x1291   :  { %5587 = vst [vmem:[#allocation5 + $0x10] sm:$0xff] %v5584_v45 }
0x1295   :  { %v5568_v60 = vpop.f32.mrf.mxu1 }
0x1296   :  { %v5569_v22 = vadd.f32 %v5568_v60, %v5545_v18 }
0x129d   :  { %v5571_v55 = vpop.f32.mrf.mxu1 }
0x129e   :  { %v5572_v4 = vadd.f32 %v5571_v55, %v5548_v26 }
0x12a0   :  { %6974 = vrcp.f32 %v5572_v4 }
0x12a6   :  { %v6975_v50 = vpop.eup %6974 }
0x12a7   :  { %v5577_v42 = vperm.slane %v6975_v50, 0 }
0x12a9   :  { %v5579_v25 = vmul.f32 %v5577_v42, %v5569_v22 }
0x12ab   :  { %v5581_v58 = vadd.f32 %v5579_v25, %v10864_v0 }
0x12ad   :  { %v5583_v51 = vadd.f32 %v5581_v58, %v10863_v36 }
0x12af   :  { %v5585_v31 = vadd.f32 %v6984_v35, %v5583_v51 }
0x12b1   :  { %5588 = vst [vmem:[#allocation5 + $0x18] sm:$0xff] %v5585_v31 }
0x12b2   :  { %5601 = dma.vmem_to_hbm [thread:$0]  %s5594_s23, 512, %s5596_s2, [#allocation4], %s7044_s28, %s7044_s28, %s7045_s29  }
0x12b3   :  { %7035 = dma.done.wait [#allocation4], 512  }
0x12b4   :  { %7036 = vsyncadd [#allocation4], 4294966784 }
0x12b5   :  { %5606 = vsyncpa [#allocation3], 1 }
0x12b6   :  { %5607 = vsyncpa [#allocation4], 1 }

</bundles_post_ra>
